<compile_context>
chip_gen: v6e
topology: v6e:2x2x1
jax: 0.10.0
libtpu: 0.0.40
codegen_flags: <defaults>
</compile_context>

<pallas_src>
import jax
import jax.numpy as jnp
from jax import lax
from jax.experimental import pallas as pl
from jax.experimental.pallas import tpu as pltpu

# ----------------------------- model config (toy, lane-dense) ----------------
VOCAB = 128              # multiple of 128 -> lane-dense LM head
D_MODEL = 128            # multiple of 128 -> lane-dense activations
N_HEADS = 4
D_HEAD = D_MODEL // N_HEADS
D_FF = 256
NUM_SAMPLES = 5          # num_return_sequences
TEMPERATURE = 0.95
MAX_NEW_TOKENS = 8       # stands in for max_length=512 at toy scale
MAX_DEC_LEN = 16         # KV-cache length (>= 1+MAX_NEW_TOKENS, multiple of 8)
DECODER_START_ID = 0     # T5 uses pad token as decoder start
EOS_ID = 1
NEWLINE_ID = 3           # token id standing in for '\n' (stop_strings)
REL_POS_MAX = 8


# ----------------------------- small helpers ---------------------------------
def _fb(shape):
    """Full-array block (last two block dims == full array dims -> always legal)."""
    nd = len(shape)
    return pl.BlockSpec(shape, lambda *_: (0,) * nd)


def _rms(x, scale):
    """T5 LayerNorm (RMSNorm, no mean subtraction, no bias), f32 elementwise."""
    var = jnp.mean(x * x, axis=-1, keepdims=True)
    return x * lax.rsqrt(var + 1e-6) * scale


# ----------------------------- Pallas kernels --------------------------------
def _ln_matmul_kernel(x_ref, s_ref, w_ref, o_ref):
    # fused RMSNorm + (packed) projection; bf16 MXU inputs, f32 accumulation.
    h = _rms(x_ref[...], s_ref[...])
    o_ref[...] = jnp.dot(h.astype(jnp.bfloat16), w_ref[...],
                         preferred_element_type=jnp.float32)


def _attn_bias_kernel(q_ref, k_ref, v_ref, b_ref, o_ref):
    # Generic bias attention (encoder self-attn, decoder cross-attn).
    # T5 attention: no 1/sqrt(d) scaling; additive bias carries mask/rel-pos.
    q = q_ref[...].astype(jnp.bfloat16)
    k = k_ref[...].astype(jnp.bfloat16)
    v = v_ref[...].astype(jnp.bfloat16)
    s = jnp.einsum('gqd,gkd->gqk', q, k,
                   preferred_element_type=jnp.float32) + b_ref[...]
    s = s - jnp.max(s, axis=-1, keepdims=True)
    p = jnp.exp(s)
    p = p * pl.reciprocal(jnp.sum(p, axis=-1, keepdims=True), approx=True)
    o_ref[...] = jnp.einsum('gqk,gkd->gqd', p.astype(jnp.bfloat16), v,
                            preferred_element_type=jnp.float32)


def _decode_self_attn_kernel(step_ref, q_ref, k_ref, v_ref, rel_ref, o_ref):
    # Single-query decode attention over the KV cache.
    # Causal/validity mask generated in-kernel from iota + scalar-prefetched t;
    # only the rel-pos-bias row for query position t is DMA'd (see BlockSpec).
    t = step_ref[0]
    q = q_ref[...].astype(jnp.bfloat16)            # [G, 1, Dh]
    k = k_ref[...]                                 # [G, T, Dh] bf16 cache
    v = v_ref[...]
    s = jnp.einsum('gqd,gkd->gqk', q, k,
                   preferred_element_type=jnp.float32) + rel_ref[0]
    pos = lax.broadcasted_iota(jnp.int32, s.shape, 2)
    s = jnp.where(pos <= t, s, -1e9)
    s = s - jnp.max(s, axis=-1, keepdims=True)
    p = jnp.exp(s)
    p = p * pl.reciprocal(jnp.sum(p, axis=-1, keepdims=True), approx=True)
    o_ref[...] = jnp.einsum('gqk,gkd->gqd', p.astype(jnp.bfloat16), v,
                            preferred_element_type=jnp.float32)


def _dec_mid_kernel(x_ref, a_ref, wo_ref, ln2_ref, wq_ref, x2_ref, qc_ref):
    # self-attn out-proj + residual + RMSNorm + cross-attn Q projection.
    x2 = x_ref[...] + jnp.dot(a_ref[...].astype(jnp.bfloat16), wo_ref[...],
                              preferred_element_type=jnp.float32)
    x2_ref[...] = x2
    h = _rms(x2, ln2_ref[...])
    qc_ref[...] = jnp.dot(h.astype(jnp.bfloat16), wq_ref[...],
                          preferred_element_type=jnp.float32)


def _dec_tail_kernel(x2_ref, c_ref, woc_ref, ln3_ref, wi_ref, wof_ref,
                     lnf_ref, lm_ref, logit_ref):
    # cross-attn out-proj + residual + RMSNorm + ReLU-FFN + residual +
    # final RMSNorm + (pre-scaled, pre-transposed) LM head, last token only.
    x3 = x2_ref[...] + jnp.dot(c_ref[...].astype(jnp.bfloat16), woc_ref[...],
                               preferred_element_type=jnp.float32)
    h = _rms(x3, ln3_ref[...])
    ff = jnp.dot(h.astype(jnp.bfloat16), wi_ref[...],
                 preferred_element_type=jnp.float32)
    ff = jnp.maximum(ff, 0.0)
    x4 = x3 + jnp.dot(ff.astype(jnp.bfloat16), wof_ref[...],
                      preferred_element_type=jnp.float32)
    hf = _rms(x4, lnf_ref[...])
    logit_ref[...] = jnp.dot(hf.astype(jnp.bfloat16), lm_ref[...],
                             preferred_element_type=jnp.float32)


def _enc_tail_kernel(x_ref, a_ref, wo_ref, ln2_ref, wi_ref, wof_ref,
                     lnf_ref, wkv_ref, h_ref, kv_ref):
    # encoder: attn out-proj + residual + RMSNorm + ReLU-FFN + residual +
    # final RMSNorm, plus the (one-time) cross-attention K/V projection.
    x2 = x_ref[...] + jnp.dot(a_ref[...].astype(jnp.bfloat16), wo_ref[...],
                              preferred_element_type=jnp.float32)
    h = _rms(x2, ln2_ref[...])
    ff = jnp.maximum(jnp.dot(h.astype(jnp.bfloat16), wi_ref[...],
                             preferred_element_type=jnp.float32), 0.0)
    x3 = x2 + jnp.dot(ff.astype(jnp.bfloat16), wof_ref[...],
                      preferred_element_type=jnp.float32)
    hf = _rms(x3, lnf_ref[...])
    h_ref[...] = hf
    kv_ref[...] = jnp.dot(hf.astype(jnp.bfloat16), wkv_ref[...],
                          preferred_element_type=jnp.float32)


# ----------------------------- kernel wrappers --------------------------------
def fused_ln_matmul(x, scale, w):
    M, D = x.shape
    N = w.shape[1]
    return pl.pallas_call(
        _ln_matmul_kernel,
        out_shape=jax.ShapeDtypeStruct((M, N), jnp.float32),
        in_specs=[_fb((M, D)), _fb((1, D)), _fb((D, N))],
        out_specs=_fb((M, N)),
    )(x, scale.reshape(1, D), w)


def attn_with_bias(q, k, v, bias):
    G, Q, Dh = q.shape
    K = k.shape[1]
    return pl.pallas_call(
        _attn_bias_kernel,
        out_shape=jax.ShapeDtypeStruct((G, Q, Dh), jnp.float32),
        in_specs=[_fb((G, Q, Dh)), _fb((G, K, Dh)), _fb((G, K, Dh)),
                  _fb((G, Q, K))],
        out_specs=_fb((G, Q, Dh)),
    )(q, k, v, bias)


def decode_self_attention(step, q, k_cache, v_cache, rel_all):
    G, Q, Dh = q.shape
    T = k_cache.shape[1]
    grid_spec = pltpu.PrefetchScalarGridSpec(
        num_scalar_prefetch=1,
        grid=(1,),
        in_specs=[
            pl.BlockSpec((G, Q, Dh), lambda i, s: (0, 0, 0)),
            pl.BlockSpec((G, T, Dh), lambda i, s: (0, 0, 0)),
            pl.BlockSpec((G, T, Dh), lambda i, s: (0, 0, 0)),
            # only the rel-pos-bias row for the current query position is DMA'd
            pl.BlockSpec((1, G, Q, T), lambda i, s: (s[0], 0, 0, 0)),
        ],
        out_specs=pl.BlockSpec((G, Q, Dh), lambda i, s: (0, 0, 0)),
    )
    return pl.pallas_call(
        _decode_self_attn_kernel,
        out_shape=jax.ShapeDtypeStruct((G, Q, Dh), jnp.float32),
        grid_spec=grid_spec,
        compiler_params=pltpu.CompilerParams(
            dimension_semantics=("arbitrary",)),
    )(step, q, k_cache, v_cache, rel_all)


def dec_mid(x, attn, wo, ln2, wq):
    M, D = x.shape
    return pl.pallas_call(
        _dec_mid_kernel,
        out_shape=(jax.ShapeDtypeStruct((M, D), jnp.float32),
                   jax.ShapeDtypeStruct((M, D), jnp.float32)),
        in_specs=[_fb((M, D)), _fb((M, D)), _fb((D, D)), _fb((1, D)),
                  _fb((D, D))],
        out_specs=(_fb((M, D)), _fb((M, D))),
    )(x, attn, wo, ln2.reshape(1, D), wq)


def dec_tail(x2, cross, woc, ln3, wi, wof, lnf, lm):
    M, D = x2.shape
    F = wi.shape[1]
    V = lm.shape[1]
    return pl.pallas_call(
        _dec_tail_kernel,
        out_shape=jax.ShapeDtypeStruct((M, V), jnp.float32),
        in_specs=[_fb((M, D)), _fb((M, D)), _fb((D, D)), _fb((1, D)),
                  _fb((D, F)), _fb((F, D)), _fb((1, D)), _fb((D, V))],
        out_specs=_fb((M, V)),
    )(x2, cross, woc, ln3.reshape(1, D), wi, wof, lnf.reshape(1, D), lm)


def enc_tail(x, attn, wo, ln2, wi, wof, lnf, wkv):
    M, D = x.shape
    F = wi.shape[1]
    N2 = wkv.shape[1]
    return pl.pallas_call(
        _enc_tail_kernel,
        out_shape=(jax.ShapeDtypeStruct((M, D), jnp.float32),
                   jax.ShapeDtypeStruct((M, N2), jnp.float32)),
        in_specs=[_fb((M, D)), _fb((M, D)), _fb((D, D)), _fb((1, D)),
                  _fb((D, F)), _fb((F, D)), _fb((1, D)), _fb((D, N2))],
        out_specs=(_fb((M, D)), _fb((M, N2))),
    )(x, attn, wo, ln2.reshape(1, D), wi, wof, lnf.reshape(1, D), wkv)


# ----------------------------- parameters ------------------------------------
def init_params(key):
    keys = iter(jax.random.split(key, 24))

    def dense(shape):
        # weights stored in bf16 (MXU-friendly, halves HBM/VMEM footprint)
        return (0.05 * jax.random.normal(next(keys), shape,
                                         jnp.float32)).astype(jnp.bfloat16)

    embed = 0.05 * jax.random.normal(next(keys), (VOCAB, D_MODEL), jnp.float32)
    params = {
        'embed': embed,                                           # f32 for gather
        # tied LM head: pre-transposed and pre-scaled by d_model**-0.5,
        # hoisted out of the decode loop.
        'lm_head': (embed.T * (D_MODEL ** -0.5)).astype(jnp.bfloat16),
        'enc_rel_bias': 0.05 * jax.random.normal(
            next(keys), (2 * REL_POS_MAX + 1, N_HEADS), jnp.float32),
        'dec_rel_bias': 0.05 * jax.random.normal(
            next(keys), (2 * REL_POS_MAX + 1, N_HEADS), jnp.float32),
        'enc': {
            'ln1': jnp.ones((D_MODEL,), jnp.float32),
            'wqkv': dense((D_MODEL, 3 * D_MODEL)),                # packed Q|K|V
            'wo': dense((D_MODEL, D_MODEL)),
            'ln2': jnp.ones((D_MODEL,), jnp.float32),
            'wi': dense((D_MODEL, D_FF)),
            'wo_ff': dense((D_FF, D_MODEL)),
            'ln_f': jnp.ones((D_MODEL,), jnp.float32),
        },
        'dec': {
            'ln1': jnp.ones((D_MODEL,), jnp.float32),
            'wqkv_self': dense((D_MODEL, 3 * D_MODEL)),           # packed Q|K|V
            'wo_self': dense((D_MODEL, D_MODEL)),
            'ln2': jnp.ones((D_MODEL,), jnp.float32),
            'wq_cross': dense((D_MODEL, D_MODEL)),
            'wkv_cross': dense((D_MODEL, 2 * D_MODEL)),           # packed K|V
            'wo_cross': dense((D_MODEL, D_MODEL)),
            'ln3': jnp.ones((D_MODEL,), jnp.float32),
            'wi': dense((D_MODEL, D_FF)),
            'wo_ff': dense((D_FF, D_MODEL)),
            'ln_f': jnp.ones((D_MODEL,), jnp.float32),
        },
    }
    return params


# ----------------------------- glue helpers ----------------------------------
def split_heads_seq(x, b):
    # [b*s, D] -> [b*H, s, Dh]
    s = x.shape[0] // b
    x = x.reshape(b, s, N_HEADS, D_HEAD).transpose(0, 2, 1, 3)
    return x.reshape(b * N_HEADS, s, D_HEAD)


def merge_heads_seq(x, b):
    # [b*H, s, Dh] -> [b*s, D]
    s = x.shape[1]
    x = x.reshape(b, N_HEADS, s, D_HEAD).transpose(0, 2, 1, 3)
    return x.reshape(b * s, D_MODEL)


def rel_pos_bias(table, q_len, k_len):
    # TODO(synk): T5 uses log-spaced relative-position buckets; this uses
    # simple clipped linear buckets at toy scale.
    q_pos = jnp.arange(q_len)[:, None]
    k_pos = jnp.arange(k_len)[None, :]
    rel = jnp.clip(k_pos - q_pos, -REL_POS_MAX, REL_POS_MAX) + REL_POS_MAX
    bias = table[rel]                       # [q, k, H]
    return jnp.transpose(bias, (2, 0, 1))   # [H, q, k]


# ----------------------------- T5 encoder (runs once) -------------------------
def encode(params, input_ids, attention_mask):
    b, s = input_ids.shape
    E = params['enc']
    x = params['embed'][input_ids].reshape(b * s, D_MODEL)
    # encoder bias is tiny and built once ([b*H, S, S]); fine at this scale.
    mask_bias = jnp.where(attention_mask[:, None, None, :] > 0, 0.0, -1e9)
    rel = rel_pos_bias(params['enc_rel_bias'], s, s)[None]          # [1,H,s,s]
    bias = jnp.broadcast_to(mask_bias + rel,
                            (b, N_HEADS, s, s)).reshape(b * N_HEADS, s, s)

    qkv = fused_ln_matmul(x, E['ln1'], E['wqkv'])                   # [b*s, 3D]
    q, k, v = (qkv[:, :D_MODEL], qkv[:, D_MODEL:2 * D_MODEL],
               qkv[:, 2 * D_MODEL:])
    o = attn_with_bias(split_heads_seq(q, b), split_heads_seq(k, b),
                       split_heads_seq(v, b), bias)
    attn = merge_heads_seq(o, b)
    hidden, kv_cross = enc_tail(x, attn, E['wo'], E['ln2'], E['wi'],
                                E['wo_ff'], E['ln_f'],
                                params['dec']['wkv_cross'])
    return hidden.reshape(b, s, D_MODEL), kv_cross                  # kv:[b*s,2D]


# ----------------------------- generate (KV-cached) ---------------------------
def generate(params, input_ids, attention_mask, rng):
    b, s_enc = input_ids.shape
    bn = b * NUM_SAMPLES
    BH = bn * N_HEADS
    dec = params['dec']

    _, kv_cross = encode(params, input_ids, attention_mask)

    # cross-attn K/V computed ONCE from encoder output at batch b, expanded to
    # bn ONCE before the loop (not per decode step), stored bf16.
    ck = split_heads_seq(kv_cross[:, :D_MODEL], b)                   # [b*H,Se,Dh]
    cv = split_heads_seq(kv_cross[:, D_MODEL:], b)

    def expand_samples(x):  # [b*H, Se, Dh] -> [bn*H, Se, Dh]
        x = x.reshape(b, 1, N_HEADS, s_enc, D_HEAD)
        x = jnp.broadcast_to(x, (b, NUM_SAMPLES, N_HEADS, s_enc, D_HEAD))
        return x.reshape(BH, s_enc, D_HEAD)

    ck = expand_samples(ck).astype(jnp.bfloat16)
    cv = expand_samples(cv).astype(jnp.bfloat16)

    cross_bias = jnp.where(attention_mask > 0, 0.0, -1e9)            # [b, Se]
    cross_bias = jnp.broadcast_to(
        cross_bias[:, None, None, None, :],
        (b, NUM_SAMPLES, N_HEADS, 1, s_enc)).reshape(BH, 1, s_enc)

    # decoder self-attn rel-pos bias, one row per query position, pre-expanded
    # so the scalar-prefetch-driven BlockSpec only DMAs the current row.
    rel = rel_pos_bias(params['dec_rel_bias'], MAX_DEC_LEN, MAX_DEC_LEN)
    rel = jnp.transpose(rel, (1, 0, 2))                               # [T,H,T]
    rel_all = jnp.broadcast_to(
        rel[:, None, :, None, :],
        (MAX_DEC_LEN, bn, N_HEADS, 1, MAX_DEC_LEN)
    ).reshape(MAX_DEC_LEN, BH, 1, MAX_DEC_LEN)

    seqs = jnp.zeros((bn, 1 + MAX_NEW_TOKENS), jnp.int32)
    seqs = seqs.at[:, 0].set(DECODER_START_ID)
    k_cache = jnp.zeros((BH, MAX_DEC_LEN, D_HEAD), jnp.bfloat16)
    v_cache = jnp.zeros((BH, MAX_DEC_LEN, D_HEAD), jnp.bfloat16)
    finished = jnp.zeros((bn,), jnp.bool_)

    def body(t, carry):
        seqs, k_cache, v_cache, finished, rng = carry
        cur = lax.dynamic_slice_in_dim(seqs, t, 1, axis=1)[:, 0]      # [bn]
        x = params['embed'][cur]                                      # [bn, D]
        step = jnp.full((1,), t, jnp.int32)

        # 1) fused RMSNorm + packed QKV projection (last token only)
        qkv = fused_ln_matmul(x, dec['ln1'], dec['wqkv_self'])        # [bn, 3D]
        q = split_heads_seq(qkv[:, :D_MODEL], bn)                     # [BH,1,Dh]
        k_new = split_heads_seq(qkv[:, D_MODEL:2 * D_MODEL],
                                bn).astype(jnp.bfloat16)
        v_new = split_heads_seq(qkv[:, 2 * D_MODEL:],
                                bn).astype(jnp.bfloat16)
        # KV-cache update (in place on the fori_loop carry)
        k_cache = lax.dynamic_update_slice(k_cache, k_new, (0, t, 0))
        v_cache = lax.dynamic_update_slice(v_cache, v_new, (0, t, 0))

        # 2) fused single-query self-attention over the cache
        o = decode_self_attention(step, q, k_cache, v_cache, rel_all)
        attn = merge_heads_seq(o, bn)                                 # [bn, D]

        # 3) out-proj + residual + RMSNorm + cross-Q projection
        x2, q_cross = dec_mid(x, attn, dec['wo_self'], dec['ln2'],
                              dec['wq_cross'])

        # 4) fused cross-attention against precomputed encoder K/V
        oc = attn_with_bias(split_heads_seq(q_cross, bn), ck, cv, cross_bias)
        cross = merge_heads_seq(oc, bn)

        # 5) out-proj + residual + RMSNorm + FFN + residual + final RMSNorm +
        #    last-token-only LM head
        logits = dec_tail(x2, cross, dec['wo_cross'], dec['ln3'], dec['wi'],
                          dec['wo_ff'], dec['ln_f'], params['lm_head'])

        rng, sub = jax.random.split(rng)
        nxt = jax.random.categorical(sub, logits / TEMPERATURE,
                                     axis=-1).astype(jnp.int32)
        # stop_strings='\n' approximated at token level (NEWLINE_ID); EOS stops.
        nxt = jnp.where(finished, DECODER_START_ID, nxt)
        finished = finished | (nxt == NEWLINE_ID) | (nxt == EOS_ID)
        seqs = lax.dynamic_update_slice(seqs, nxt[:, None], (0, t + 1))
        return (seqs, k_cache, v_cache, finished, rng)

    carry = (seqs, k_cache, v_cache, finished, rng)
    seqs, _, _, _, _ = lax.fori_loop(0, MAX_NEW_TOKENS, body, carry)
    return seqs


@jax.jit
def policy_value_forward(params, input_ids, attention_mask, rng):
    outputs = generate(params, input_ids, attention_mask, rng)        # int32
    values = jnp.ones(outputs.shape, jnp.float32)   # torch.ones(outputs.shape)
    return outputs, values


# ----------------------------- main -------------------------------------------
if __name__ == "__main__":
    key = jax.random.PRNGKey(0)
    k_ids, k_gen, k_par = jax.random.split(key, 3)

    B, S = 2, 8
    input_ids = jax.random.randint(k_ids, (B, S), 4, VOCAB, dtype=jnp.int32)
    attention_mask = jnp.array([[1] * S, [1] * (S - 2) + [0, 0]], jnp.int32)

    params = init_params(k_par)
    outputs, values = policy_value_forward(params, input_ids,
                                           attention_mask, k_gen)
    jax.block_until_ready(outputs)
    jax.block_until_ready(values)

    assert outputs.shape == (B * NUM_SAMPLES, 1 + MAX_NEW_TOKENS)
    assert values.shape == outputs.shape
    assert bool(jnp.all(values == 1.0))
    print("KERNEL_OK")
</pallas_src>

<mosaic_0001>
module attributes {stable_mosaic.version = 11 : i64} {
  func.func @_ln_matmul_kernel(%arg0: memref<16x128xf32, #tpu.memory_space<vmem>>, %arg1: memref<1x128xf32, #tpu.memory_space<vmem>>, %arg2: memref<128x384xbf16, #tpu.memory_space<vmem>>, %arg3: memref<16x384xf32, #tpu.memory_space<vmem>>) attributes {dimension_semantics = [], scalar_prefetch = 0 : i64, scratch_operands = 0 : i64, tpu.core_type = #tpu.core_type<tc>} {
    %c0 = arith.constant 0 : index
    %c0_0 = arith.constant 0 : index
    %0 = vector.load %arg0[%c0, %c0_0] : memref<16x128xf32, #tpu.memory_space<vmem>>, vector<16x128xf32>
    %c0_1 = arith.constant 0 : index
    %c0_2 = arith.constant 0 : index
    %1 = vector.load %arg1[%c0_1, %c0_2] : memref<1x128xf32, #tpu.memory_space<vmem>>, vector<1x128xf32>
    %2 = arith.mulf %0, %0 : vector<16x128xf32>
    %cst = arith.constant dense<0.000000e+00> : vector<16xf32>
    %3 = vector.multi_reduction <add>, %2, %cst [1] : vector<16x128xf32> to vector<16xf32>
    %4 = vector.shape_cast %3 : vector<16xf32> to vector<16x1xf32>
    %cst_3 = arith.constant 1.280000e+02 : f32
    %5 = vector.broadcast %cst_3 : f32 to vector<16x1xf32>
    %6 = arith.divf %4, %5 : vector<16x1xf32>
    %cst_4 = arith.constant 9.99999997E-7 : f32
    %7 = vector.broadcast %cst_4 : f32 to vector<16x1xf32>
    %8 = arith.addf %6, %7 : vector<16x1xf32>
    %9 = math.rsqrt %8 : vector<16x1xf32>
    %10 = vector.broadcast %9 : vector<16x1xf32> to vector<16x128xf32>
    %11 = arith.mulf %0, %10 : vector<16x128xf32>
    %12 = vector.broadcast %1 : vector<1x128xf32> to vector<16x128xf32>
    %13 = arith.mulf %11, %12 : vector<16x128xf32>
    %14 = arith.truncf %13 : vector<16x128xf32> to vector<16x128xbf16>
    %c0_5 = arith.constant 0 : index
    %c0_6 = arith.constant 0 : index
    %15 = vector.load %arg2[%c0_5, %c0_6] : memref<128x384xbf16, #tpu.memory_space<vmem>>, vector<128x384xbf16>
    %cst_7 = arith.constant dense<0.000000e+00> : vector<16x384xf32>
    %16 = tpu.matmul %14, %15, %cst_7 {dimension_numbers = #tpu.dot_dimension_numbers<[1], [0], [0], [1], [0, 0, 1, 1], [], []>} : vector<16x128xbf16>, vector<128x384xbf16>, vector<16x384xf32> -> vector<16x384xf32>
    %c0_8 = arith.constant 0 : index
    %c0_9 = arith.constant 0 : index
    %17 = vector.load %arg3[%c0_8, %c0_9] : memref<16x384xf32, #tpu.memory_space<vmem>>, vector<16x384xf32>
    tpu.vector_store %arg3[%c0_8, %c0_9], %16 {strides = array<i32>} : memref<16x384xf32, #tpu.memory_space<vmem>>, vector<16x384xf32>,
    return
  }
}

module attributes {stable_mosaic.version = 11 : i64} {
  func.func @_attn_bias_kernel(%arg0: memref<8x8x32xf32, #tpu.memory_space<vmem>>, %arg1: memref<8x8x32xf32, #tpu.memory_space<vmem>>, %arg2: memref<8x8x32xf32, #tpu.memory_space<vmem>>, %arg3: memref<8x8x8xf32, #tpu.memory_space<vmem>>, %arg4: memref<8x8x32xf32, #tpu.memory_space<vmem>>) attributes {dimension_semantics = [], scalar_prefetch = 0 : i64, scratch_operands = 0 : i64, tpu.core_type = #tpu.core_type<tc>} {
    %c0 = arith.constant 0 : index
    %c0_0 = arith.constant 0 : index
    %c0_1 = arith.constant 0 : index
    %0 = vector.load %arg0[%c0, %c0_0, %c0_1] : memref<8x8x32xf32, #tpu.memory_space<vmem>>, vector<8x8x32xf32>
    %1 = arith.truncf %0 : vector<8x8x32xf32> to vector<8x8x32xbf16>
    %c0_2 = arith.constant 0 : index
    %c0_3 = arith.constant 0 : index
    %c0_4 = arith.constant 0 : index
    %2 = vector.load %arg1[%c0_2, %c0_3, %c0_4] : memref<8x8x32xf32, #tpu.memory_space<vmem>>, vector<8x8x32xf32>
    %3 = arith.truncf %2 : vector<8x8x32xf32> to vector<8x8x32xbf16>
    %c0_5 = arith.constant 0 : index
    %c0_6 = arith.constant 0 : index
    %c0_7 = arith.constant 0 : index
    %4 = vector.load %arg2[%c0_5, %c0_6, %c0_7] : memref<8x8x32xf32, #tpu.memory_space<vmem>>, vector<8x8x32xf32>
    %5 = arith.truncf %4 : vector<8x8x32xf32> to vector<8x8x32xbf16>
    "tpu.trace_start"() <{level = 10 : i32, message = "gqd,gkd->gqk"}> : () -> ()
    %cst = arith.constant dense<0.000000e+00> : vector<8x8x8xf32>
    %6 = tpu.matmul %1, %3, %cst {dimension_numbers = #tpu.dot_dimension_numbers<[2], [2], [1], [1], [0, 0, 0, 1, 1, 1], [0], [0]>} : vector<8x8x32xbf16>, vector<8x8x32xbf16>, vector<8x8x8xf32> -> vector<8x8x8xf32>
    "tpu.trace_stop"() : () -> ()
    %c0_8 = arith.constant 0 : index
    %c0_9 = arith.constant 0 : index
    %c0_10 = arith.constant 0 : index
    %7 = vector.load %arg3[%c0_8, %c0_9, %c0_10] : memref<8x8x8xf32, #tpu.memory_space<vmem>>, vector<8x8x8xf32>
    %8 = arith.addf %6, %7 : vector<8x8x8xf32>
    %cst_11 = arith.constant dense<0xFF800000> : vector<8x8xf32>
    %9 = vector.multi_reduction <maximumf>, %8, %cst_11 [2] : vector<8x8x8xf32> to vector<8x8xf32>
    %10 = vector.shape_cast %9 : vector<8x8xf32> to vector<8x8x1xf32>
    %11 = vector.broadcast %10 : vector<8x8x1xf32> to vector<8x8x8xf32>
    %12 = arith.subf %8, %11 : vector<8x8x8xf32>
    %13 = math.exp %12 : vector<8x8x8xf32>
    %cst_12 = arith.constant dense<0.000000e+00> : vector<8x8xf32>
    %14 = vector.multi_reduction <add>, %13, %cst_12 [2] : vector<8x8x8xf32> to vector<8x8xf32>
    %15 = vector.shape_cast %14 : vector<8x8xf32> to vector<8x8x1xf32>
    %16 = tpu.reciprocal %15 {approx = true} : vector<8x8x1xf32> -> vector<8x8x1xf32>
    %17 = vector.broadcast %16 : vector<8x8x1xf32> to vector<8x8x8xf32>
    %18 = arith.mulf %13, %17 : vector<8x8x8xf32>
    %19 = arith.truncf %18 : vector<8x8x8xf32> to vector<8x8x8xbf16>
    "tpu.trace_start"() <{level = 10 : i32, message = "gqk,gkd->gqd"}> : () -> ()
    %cst_13 = arith.constant dense<0.000000e+00> : vector<8x8x32xf32>
    %20 = tpu.matmul %19, %5, %cst_13 {dimension_numbers = #tpu.dot_dimension_numbers<[2], [1], [1], [2], [0, 0, 0, 1, 1, 2], [0], [0]>} : vector<8x8x8xbf16>, vector<8x8x32xbf16>, vector<8x8x32xf32> -> vector<8x8x32xf32>
    "tpu.trace_stop"() : () -> ()
    %c0_14 = arith.constant 0 : index
    %c0_15 = arith.constant 0 : index
    %c0_16 = arith.constant 0 : index
    %21 = vector.load %arg4[%c0_14, %c0_15, %c0_16] : memref<8x8x32xf32, #tpu.memory_space<vmem>>, vector<8x8x32xf32>
    tpu.vector_store %arg4[%c0_14, %c0_15, %c0_16], %20 {strides = array<i32>} : memref<8x8x32xf32, #tpu.memory_space<vmem>>, vector<8x8x32xf32>,
    return
  }
}

module attributes {stable_mosaic.version = 11 : i64} {
  func.func @_enc_tail_kernel(%arg0: memref<16x128xf32, #tpu.memory_space<vmem>>, %arg1: memref<16x128xf32, #tpu.memory_space<vmem>>, %arg2: memref<128x128xbf16, #tpu.memory_space<vmem>>, %arg3: memref<1x128xf32, #tpu.memory_space<vmem>>, %arg4: memref<128x256xbf16, #tpu.memory_space<vmem>>, %arg5: memref<256x128xbf16, #tpu.memory_space<vmem>>, %arg6: memref<1x128xf32, #tpu.memory_space<vmem>>, %arg7: memref<128x256xbf16, #tpu.memory_space<vmem>>, %arg8: memref<16x128xf32, #tpu.memory_space<vmem>>, %arg9: memref<16x256xf32, #tpu.memory_space<vmem>>) attributes {dimension_semantics = [], scalar_prefetch = 0 : i64, scratch_operands = 0 : i64, tpu.core_type = #tpu.core_type<tc>} {
    %c0 = arith.constant 0 : index
    %c0_0 = arith.constant 0 : index
    %0 = vector.load %arg0[%c0, %c0_0] : memref<16x128xf32, #tpu.memory_space<vmem>>, vector<16x128xf32>
    %c0_1 = arith.constant 0 : index
    %c0_2 = arith.constant 0 : index
    %1 = vector.load %arg1[%c0_1, %c0_2] : memref<16x128xf32, #tpu.memory_space<vmem>>, vector<16x128xf32>
    %2 = arith.truncf %1 : vector<16x128xf32> to vector<16x128xbf16>
    %c0_3 = arith.constant 0 : index
    %c0_4 = arith.constant 0 : index
    %3 = vector.load %arg2[%c0_3, %c0_4] : memref<128x128xbf16, #tpu.memory_space<vmem>>, vector<128x128xbf16>
    %cst = arith.constant dense<0.000000e+00> : vector<16x128xf32>
    %4 = tpu.matmul %2, %3, %cst {dimension_numbers = #tpu.dot_dimension_numbers<[1], [0], [0], [1], [0, 0, 1, 1], [], []>} : vector<16x128xbf16>, vector<128x128xbf16>, vector<16x128xf32> -> vector<16x128xf32>
    %5 = arith.addf %0, %4 : vector<16x128xf32>
    %c0_5 = arith.constant 0 : index
    %c0_6 = arith.constant 0 : index
    %6 = vector.load %arg3[%c0_5, %c0_6] : memref<1x128xf32, #tpu.memory_space<vmem>>, vector<1x128xf32>
    %7 = arith.mulf %5, %5 : vector<16x128xf32>
    %cst_7 = arith.constant dense<0.000000e+00> : vector<16xf32>
    %8 = vector.multi_reduction <add>, %7, %cst_7 [1] : vector<16x128xf32> to vector<16xf32>
    %9 = vector.shape_cast %8 : vector<16xf32> to vector<16x1xf32>
    %cst_8 = arith.constant 1.280000e+02 : f32
    %10 = vector.broadcast %cst_8 : f32 to vector<16x1xf32>
    %11 = arith.divf %9, %10 : vector<16x1xf32>
    %cst_9 = arith.constant 9.99999997E-7 : f32
    %12 = vector.broadcast %cst_9 : f32 to vector<16x1xf32>
    %13 = arith.addf %11, %12 : vector<16x1xf32>
    %14 = math.rsqrt %13 : vector<16x1xf32>
    %15 = vector.broadcast %14 : vector<16x1xf32> to vector<16x128xf32>
    %16 = arith.mulf %5, %15 : vector<16x128xf32>
    %17 = vector.broadcast %6 : vector<1x128xf32> to vector<16x128xf32>
    %18 = arith.mulf %16, %17 : vector<16x128xf32>
    %19 = arith.truncf %18 : vector<16x128xf32> to vector<16x128xbf16>
    %c0_10 = arith.constant 0 : index
    %c0_11 = arith.constant 0 : index
    %20 = vector.load %arg4[%c0_10, %c0_11] : memref<128x256xbf16, #tpu.memory_space<vmem>>, vector<128x256xbf16>
    %cst_12 = arith.constant dense<0.000000e+00> : vector<16x256xf32>
    %21 = tpu.matmul %19, %20, %cst_12 {dimension_numbers = #tpu.dot_dimension_numbers<[1], [0], [0], [1], [0, 0, 1, 1], [], []>} : vector<16x128xbf16>, vector<128x256xbf16>, vector<16x256xf32> -> vector<16x256xf32>
    %cst_13 = arith.constant 0.000000e+00 : f32
    %22 = vector.broadcast %cst_13 : f32 to vector<16x256xf32>
    %23 = arith.maximumf %21, %22 : vector<16x256xf32>
    %24 = arith.truncf %23 : vector<16x256xf32> to vector<16x256xbf16>
    %c0_14 = arith.constant 0 : index
    %c0_15 = arith.constant 0 : index
    %25 = vector.load %arg5[%c0_14, %c0_15] : memref<256x128xbf16, #tpu.memory_space<vmem>>, vector<256x128xbf16>
    %cst_16 = arith.constant dense<0.000000e+00> : vector<16x128xf32>
    %26 = tpu.matmul %24, %25, %cst_16 {dimension_numbers = #tpu.dot_dimension_numbers<[1], [0], [0], [1], [0, 0, 1, 1], [], []>} : vector<16x256xbf16>, vector<256x128xbf16>, vector<16x128xf32> -> vector<16x128xf32>
    %27 = arith.addf %5, %26 : vector<16x128xf32>
    %c0_17 = arith.constant 0 : index
    %c0_18 = arith.constant 0 : index
    %28 = vector.load %arg6[%c0_17, %c0_18] : memref<1x128xf32, #tpu.memory_space<vmem>>, vector<1x128xf32>
    %29 = arith.mulf %27, %27 : vector<16x128xf32>
    %cst_19 = arith.constant dense<0.000000e+00> : vector<16xf32>
    %30 = vector.multi_reduction <add>, %29, %cst_19 [1] : vector<16x128xf32> to vector<16xf32>
    %31 = vector.shape_cast %30 : vector<16xf32> to vector<16x1xf32>
    %cst_20 = arith.constant 1.280000e+02 : f32
    %32 = vector.broadcast %cst_20 : f32 to vector<16x1xf32>
    %33 = arith.divf %31, %32 : vector<16x1xf32>
    %cst_21 = arith.constant 9.99999997E-7 : f32
    %34 = vector.broadcast %cst_21 : f32 to vector<16x1xf32>
    %35 = arith.addf %33, %34 : vector<16x1xf32>
    %36 = math.rsqrt %35 : vector<16x1xf32>
    %37 = vector.broadcast %36 : vector<16x1xf32> to vector<16x128xf32>
    %38 = arith.mulf %27, %37 : vector<16x128xf32>
    %39 = vector.broadcast %28 : vector<1x128xf32> to vector<16x128xf32>
    %40 = arith.mulf %38, %39 : vector<16x128xf32>
    %c0_22 = arith.constant 0 : index
    %c0_23 = arith.constant 0 : index
    %41 = vector.load %arg8[%c0_22, %c0_23] : memref<16x128xf32, #tpu.memory_space<vmem>>, vector<16x128xf32>
    tpu.vector_store %arg8[%c0_22, %c0_23], %40 {strides = array<i32>} : memref<16x128xf32, #tpu.memory_space<vmem>>, vector<16x128xf32>,
    %42 = arith.truncf %40 : vector<16x128xf32> to vector<16x128xbf16>
    %c0_24 = arith.constant 0 : index
    %c0_25 = arith.constant 0 : index
    %43 = vector.load %arg7[%c0_24, %c0_25] : memref<128x256xbf16, #tpu.memory_space<vmem>>, vector<128x256xbf16>
    %cst_26 = arith.constant dense<0.000000e+00> : vector<16x256xf32>
    %44 = tpu.matmul %42, %43, %cst_26 {dimension_numbers = #tpu.dot_dimension_numbers<[1], [0], [0], [1], [0, 0, 1, 1], [], []>} : vector<16x128xbf16>, vector<128x256xbf16>, vector<16x256xf32> -> vector<16x256xf32>
    %c0_27 = arith.constant 0 : index
    %c0_28 = arith.constant 0 : index
    %45 = vector.load %arg9[%c0_27, %c0_28] : memref<16x256xf32, #tpu.memory_space<vmem>>, vector<16x256xf32>
    tpu.vector_store %arg9[%c0_27, %c0_28], %44 {strides = array<i32>} : memref<16x256xf32, #tpu.memory_space<vmem>>, vector<16x256xf32>,
    return
  }
}

module attributes {stable_mosaic.version = 11 : i64} {
  func.func @_ln_matmul_kernel(%arg0: memref<10x128xf32, #tpu.memory_space<vmem>>, %arg1: memref<1x128xf32, #tpu.memory_space<vmem>>, %arg2: memref<128x384xbf16, #tpu.memory_space<vmem>>, %arg3: memref<10x384xf32, #tpu.memory_space<vmem>>) attributes {dimension_semantics = [], scalar_prefetch = 0 : i64, scratch_operands = 0 : i64, tpu.core_type = #tpu.core_type<tc>} {
    %c0 = arith.constant 0 : index
    %c0_0 = arith.constant 0 : index
    %0 = vector.load %arg0[%c0, %c0_0] : memref<10x128xf32, #tpu.memory_space<vmem>>, vector<10x128xf32>
    %c0_1 = arith.constant 0 : index
    %c0_2 = arith.constant 0 : index
    %1 = vector.load %arg1[%c0_1, %c0_2] : memref<1x128xf32, #tpu.memory_space<vmem>>, vector<1x128xf32>
    %2 = arith.mulf %0, %0 : vector<10x128xf32>
    %cst = arith.constant dense<0.000000e+00> : vector<10xf32>
    %3 = vector.multi_reduction <add>, %2, %cst [1] : vector<10x128xf32> to vector<10xf32>
    %4 = vector.shape_cast %3 : vector<10xf32> to vector<10x1xf32>
    %cst_3 = arith.constant 1.280000e+02 : f32
    %5 = vector.broadcast %cst_3 : f32 to vector<10x1xf32>
    %6 = arith.divf %4, %5 : vector<10x1xf32>
    %cst_4 = arith.constant 9.99999997E-7 : f32
    %7 = vector.broadcast %cst_4 : f32 to vector<10x1xf32>
    %8 = arith.addf %6, %7 : vector<10x1xf32>
    %9 = math.rsqrt %8 : vector<10x1xf32>
    %10 = vector.broadcast %9 : vector<10x1xf32> to vector<10x128xf32>
    %11 = arith.mulf %0, %10 : vector<10x128xf32>
    %12 = vector.broadcast %1 : vector<1x128xf32> to vector<10x128xf32>
    %13 = arith.mulf %11, %12 : vector<10x128xf32>
    %14 = arith.truncf %13 : vector<10x128xf32> to vector<10x128xbf16>
    %c0_5 = arith.constant 0 : index
    %c0_6 = arith.constant 0 : index
    %15 = vector.load %arg2[%c0_5, %c0_6] : memref<128x384xbf16, #tpu.memory_space<vmem>>, vector<128x384xbf16>
    %cst_7 = arith.constant dense<0.000000e+00> : vector<10x384xf32>
    %16 = tpu.matmul %14, %15, %cst_7 {dimension_numbers = #tpu.dot_dimension_numbers<[1], [0], [0], [1], [0, 0, 1, 1], [], []>} : vector<10x128xbf16>, vector<128x384xbf16>, vector<10x384xf32> -> vector<10x384xf32>
    %c0_8 = arith.constant 0 : index
    %c0_9 = arith.constant 0 : index
    %17 = vector.load %arg3[%c0_8, %c0_9] : memref<10x384xf32, #tpu.memory_space<vmem>>, vector<10x384xf32>
    tpu.vector_store %arg3[%c0_8, %c0_9], %16 {strides = array<i32>} : memref<10x384xf32, #tpu.memory_space<vmem>>, vector<10x384xf32>,
    return
  }
}

module attributes {stable_mosaic.version = 11 : i64} {
  func.func @_decode_self_attn_kernel(%arg0: i32, %arg1: memref<1xi32, #tpu.memory_space<smem>>, %arg2: memref<40x1x32xf32, #tpu.memory_space<vmem>>, %arg3: memref<40x16x32xbf16, #tpu.memory_space<vmem>>, %arg4: memref<40x16x32xbf16, #tpu.memory_space<vmem>>, %arg5: memref<1x40x1x16xf32, #tpu.memory_space<vmem>>, %arg6: memref<40x1x32xf32, #tpu.memory_space<vmem>>) attributes {dimension_semantics = [#tpu.dimension_semantics<arbitrary>], iteration_bounds = array<i64: 1>, scalar_prefetch = 1 : i64, scratch_operands = 0 : i64, tpu.core_type = #tpu.core_type<tc>, window_params = [{pipeline_mode = #tpu.pipeline_mode<synchronous>, transform_indices = @transform_0, window_bounds = array<i64: 40, 1, 32>}, {pipeline_mode = #tpu.pipeline_mode<synchronous>, transform_indices = @transform_1, window_bounds = array<i64: 40, 16, 32>}, {pipeline_mode = #tpu.pipeline_mode<synchronous>, transform_indices = @transform_2, window_bounds = array<i64: 40, 16, 32>}, {transform_indices = @transform_3, window_bounds = array<i64: 1, 40, 1, 16>}, {pipeline_mode = #tpu.pipeline_mode<synchronous>, transform_indices = @transform_4, window_bounds = array<i64: 40, 1, 32>}]} {
    %c0 = arith.constant 0 : index
    %0 = memref.load %arg1[%c0] : memref<1xi32, #tpu.memory_space<smem>>
    %c0_0 = arith.constant 0 : index
    %c0_1 = arith.constant 0 : index
    %c0_2 = arith.constant 0 : index
    %1 = vector.load %arg2[%c0_0, %c0_1, %c0_2] : memref<40x1x32xf32, #tpu.memory_space<vmem>>, vector<40x1x32xf32>
    %2 = arith.truncf %1 : vector<40x1x32xf32> to vector<40x1x32xbf16>
    %c0_3 = arith.constant 0 : index
    %c0_4 = arith.constant 0 : index
    %c0_5 = arith.constant 0 : index
    %3 = vector.load %arg3[%c0_3, %c0_4, %c0_5] : memref<40x16x32xbf16, #tpu.memory_space<vmem>>, vector<40x16x32xbf16>
    %c0_6 = arith.constant 0 : index
    %c0_7 = arith.constant 0 : index
    %c0_8 = arith.constant 0 : index
    %4 = vector.load %arg4[%c0_6, %c0_7, %c0_8] : memref<40x16x32xbf16, #tpu.memory_space<vmem>>, vector<40x16x32xbf16>
    "tpu.trace_start"() <{level = 10 : i32, message = "gqd,gkd->gqk"}> : () -> ()
    %cst = arith.constant dense<0.000000e+00> : vector<40x1x16xf32>
    %5 = tpu.matmul %2, %3, %cst {dimension_numbers = #tpu.dot_dimension_numbers<[2], [2], [1], [1], [0, 0, 0, 1, 1, 1], [0], [0]>} : vector<40x1x32xbf16>, vector<40x16x32xbf16>, vector<40x1x16xf32> -> vector<40x1x16xf32>
    "tpu.trace_stop"() : () -> ()
    %c0_9 = arith.constant 0 : index
    %c0_10 = arith.constant 0 : index
    %c0_11 = arith.constant 0 : index
    %c0_12 = arith.constant 0 : index
    %6 = vector.load %arg5[%c0_9, %c0_10, %c0_11, %c0_12] : memref<1x40x1x16xf32, #tpu.memory_space<vmem>>, vector<1x40x1x16xf32>
    %7 = vector.shape_cast %6 : vector<1x40x1x16xf32> to vector<40x1x16xf32>
    %8 = arith.addf %5, %7 : vector<40x1x16xf32>
    %9 = tpu.iota {dimensions = array<i32: 2>} : vector<40x1x16xi32>
    %10 = vector.broadcast %0 : i32 to vector<40x1x16xi32>
    %11 = arith.cmpi sle, %9, %10 : vector<40x1x16xi32>
    %cst_13 = arith.constant -1.000000e+09 : f32
    %12 = vector.broadcast %cst_13 : f32 to vector<40x1x16xf32>
    %13 = arith.select %11, %8, %12 : vector<40x1x16xi1>, vector<40x1x16xf32>
    %cst_14 = arith.constant dense<0xFF800000> : vector<40x1xf32>
    %14 = vector.multi_reduction <maximumf>, %13, %cst_14 [2] : vector<40x1x16xf32> to vector<40x1xf32>
    %15 = vector.shape_cast %14 : vector<40x1xf32> to vector<40x1x1xf32>
    %16 = vector.broadcast %15 : vector<40x1x1xf32> to vector<40x1x16xf32>
    %17 = arith.subf %13, %16 : vector<40x1x16xf32>
    %18 = math.exp %17 : vector<40x1x16xf32>
    %cst_15 = arith.constant dense<0.000000e+00> : vector<40x1xf32>
    %19 = vector.multi_reduction <add>, %18, %cst_15 [2] : vector<40x1x16xf32> to vector<40x1xf32>
    %20 = vector.shape_cast %19 : vector<40x1xf32> to vector<40x1x1xf32>
    %21 = tpu.reciprocal %20 {approx = true} : vector<40x1x1xf32> -> vector<40x1x1xf32>
    %22 = vector.broadcast %21 : vector<40x1x1xf32> to vector<40x1x16xf32>
    %23 = arith.mulf %18, %22 : vector<40x1x16xf32>
    %24 = arith.truncf %23 : vector<40x1x16xf32> to vector<40x1x16xbf16>
    "tpu.trace_start"() <{level = 10 : i32, message = "gqk,gkd->gqd"}> : () -> ()
    %cst_16 = arith.constant dense<0.000000e+00> : vector<40x1x32xf32>
    %25 = tpu.matmul %24, %4, %cst_16 {dimension_numbers = #tpu.dot_dimension_numbers<[2], [1], [1], [2], [0, 0, 0, 1, 1, 2], [0], [0]>} : vector<40x1x16xbf16>, vector<40x16x32xbf16>, vector<40x1x32xf32> -> vector<40x1x32xf32>
    "tpu.trace_stop"() : () -> ()
    %c0_17 = arith.constant 0 : index
    %c0_18 = arith.constant 0 : index
    %c0_19 = arith.constant 0 : index
    %26 = vector.load %arg6[%c0_17, %c0_18, %c0_19] : memref<40x1x32xf32, #tpu.memory_space<vmem>>, vector<40x1x32xf32>
    tpu.vector_store %arg6[%c0_17, %c0_18, %c0_19], %25 {strides = array<i32>} : memref<40x1x32xf32, #tpu.memory_space<vmem>>, vector<40x1x32xf32>,
    return
  }
  func.func @transform_0(%arg0: i32, %arg1: memref<1xi32, #tpu.memory_space<smem>>) -> (i32, i32, i32) {
    %c0_i32 = arith.constant 0 : i32
    %c0_i32_0 = arith.constant 0 : i32
    %c0_i32_1 = arith.constant 0 : i32
    %c0_i32_2 = arith.constant 0 : i32
    return %c0_i32, %c0_i32_0, %c0_i32_1 : i32, i32, i32
  }
  func.func @transform_1(%arg0: i32, %arg1: memref<1xi32, #tpu.memory_space<smem>>) -> (i32, i32, i32) {
    %c0_i32 = arith.constant 0 : i32
    %c0_i32_0 = arith.constant 0 : i32
    %c0_i32_1 = arith.constant 0 : i32
    %c0_i32_2 = arith.constant 0 : i32
    return %c0_i32, %c0_i32_0, %c0_i32_1 : i32, i32, i32
  }
  func.func @transform_2(%arg0: i32, %arg1: memref<1xi32, #tpu.memory_space<smem>>) -> (i32, i32, i32) {
    %c0_i32 = arith.constant 0 : i32
    %c0_i32_0 = arith.constant 0 : i32
    %c0_i32_1 = arith.constant 0 : i32
    %c0_i32_2 = arith.constant 0 : i32
    return %c0_i32, %c0_i32_0, %c0_i32_1 : i32, i32, i32
  }
  func.func @transform_3(%arg0: i32, %arg1: memref<1xi32, #tpu.memory_space<smem>>) -> (i32, i32, i32, i32) {
    %c0 = arith.constant 0 : index
    %0 = memref.load %arg1[%c0] : memref<1xi32, #tpu.memory_space<smem>>
    %c0_i32 = arith.constant 0 : i32
    %c0_i32_0 = arith.constant 0 : i32
    %c0_i32_1 = arith.constant 0 : i32
    %c0_i32_2 = arith.constant 0 : i32
    return %0, %c0_i32, %c0_i32_0, %c0_i32_1 : i32, i32, i32, i32
  }
  func.func @transform_4(%arg0: i32, %arg1: memref<1xi32, #tpu.memory_space<smem>>) -> (i32, i32, i32) {
    %c0_i32 = arith.constant 0 : i32
    %c0_i32_0 = arith.constant 0 : i32
    %c0_i32_1 = arith.constant 0 : i32
    %c0_i32_2 = arith.constant 0 : i32
    return %c0_i32, %c0_i32_0, %c0_i32_1 : i32, i32, i32
  }
}

module attributes {stable_mosaic.version = 11 : i64} {
  func.func @_dec_mid_kernel(%arg0: memref<10x128xf32, #tpu.memory_space<vmem>>, %arg1: memref<10x128xf32, #tpu.memory_space<vmem>>, %arg2: memref<128x128xbf16, #tpu.memory_space<vmem>>, %arg3: memref<1x128xf32, #tpu.memory_space<vmem>>, %arg4: memref<128x128xbf16, #tpu.memory_space<vmem>>, %arg5: memref<10x128xf32, #tpu.memory_space<vmem>>, %arg6: memref<10x128xf32, #tpu.memory_space<vmem>>) attributes {dimension_semantics = [], scalar_prefetch = 0 : i64, scratch_operands = 0 : i64, tpu.core_type = #tpu.core_type<tc>} {
    %c0 = arith.constant 0 : index
    %c0_0 = arith.constant 0 : index
    %0 = vector.load %arg0[%c0, %c0_0] : memref<10x128xf32, #tpu.memory_space<vmem>>, vector<10x128xf32>
    %c0_1 = arith.constant 0 : index
    %c0_2 = arith.constant 0 : index
    %1 = vector.load %arg1[%c0_1, %c0_2] : memref<10x128xf32, #tpu.memory_space<vmem>>, vector<10x128xf32>
    %2 = arith.truncf %1 : vector<10x128xf32> to vector<10x128xbf16>
    %c0_3 = arith.constant 0 : index
    %c0_4 = arith.constant 0 : index
    %3 = vector.load %arg2[%c0_3, %c0_4] : memref<128x128xbf16, #tpu.memory_space<vmem>>, vector<128x128xbf16>
    %cst = arith.constant dense<0.000000e+00> : vector<10x128xf32>
    %4 = tpu.matmul %2, %3, %cst {dimension_numbers = #tpu.dot_dimension_numbers<[1], [0], [0], [1], [0, 0, 1, 1], [], []>} : vector<10x128xbf16>, vector<128x128xbf16>, vector<10x128xf32> -> vector<10x128xf32>
    %5 = arith.addf %0, %4 : vector<10x128xf32>
    %c0_5 = arith.constant 0 : index
    %c0_6 = arith.constant 0 : index
    %6 = vector.load %arg5[%c0_5, %c0_6] : memref<10x128xf32, #tpu.memory_space<vmem>>, vector<10x128xf32>
    tpu.vector_store %arg5[%c0_5, %c0_6], %5 {strides = array<i32>} : memref<10x128xf32, #tpu.memory_space<vmem>>, vector<10x128xf32>,
    %c0_7 = arith.constant 0 : index
    %c0_8 = arith.constant 0 : index
    %7 = vector.load %arg3[%c0_7, %c0_8] : memref<1x128xf32, #tpu.memory_space<vmem>>, vector<1x128xf32>
    %8 = arith.mulf %5, %5 : vector<10x128xf32>
    %cst_9 = arith.constant dense<0.000000e+00> : vector<10xf32>
    %9 = vector.multi_reduction <add>, %8, %cst_9 [1] : vector<10x128xf32> to vector<10xf32>
    %10 = vector.shape_cast %9 : vector<10xf32> to vector<10x1xf32>
    %cst_10 = arith.constant 1.280000e+02 : f32
    %11 = vector.broadcast %cst_10 : f32 to vector<10x1xf32>
    %12 = arith.divf %10, %11 : vector<10x1xf32>
    %cst_11 = arith.constant 9.99999997E-7 : f32
    %13 = vector.broadcast %cst_11 : f32 to vector<10x1xf32>
    %14 = arith.addf %12, %13 : vector<10x1xf32>
    %15 = math.rsqrt %14 : vector<10x1xf32>
    %16 = vector.broadcast %15 : vector<10x1xf32> to vector<10x128xf32>
    %17 = arith.mulf %5, %16 : vector<10x128xf32>
    %18 = vector.broadcast %7 : vector<1x128xf32> to vector<10x128xf32>
    %19 = arith.mulf %17, %18 : vector<10x128xf32>
    %20 = arith.truncf %19 : vector<10x128xf32> to vector<10x128xbf16>
    %c0_12 = arith.constant 0 : index
    %c0_13 = arith.constant 0 : index
    %21 = vector.load %arg4[%c0_12, %c0_13] : memref<128x128xbf16, #tpu.memory_space<vmem>>, vector<128x128xbf16>
    %cst_14 = arith.constant dense<0.000000e+00> : vector<10x128xf32>
    %22 = tpu.matmul %20, %21, %cst_14 {dimension_numbers = #tpu.dot_dimension_numbers<[1], [0], [0], [1], [0, 0, 1, 1], [], []>} : vector<10x128xbf16>, vector<128x128xbf16>, vector<10x128xf32> -> vector<10x128xf32>
    %c0_15 = arith.constant 0 : index
    %c0_16 = arith.constant 0 : index
    %23 = vector.load %arg6[%c0_15, %c0_16] : memref<10x128xf32, #tpu.memory_space<vmem>>, vector<10x128xf32>
    tpu.vector_store %arg6[%c0_15, %c0_16], %22 {strides = array<i32>} : memref<10x128xf32, #tpu.memory_space<vmem>>, vector<10x128xf32>,
    return
  }
}

module attributes {stable_mosaic.version = 11 : i64} {
  func.func @_attn_bias_kernel(%arg0: memref<40x1x32xf32, #tpu.memory_space<vmem>>, %arg1: memref<40x8x32xbf16, #tpu.memory_space<vmem>>, %arg2: memref<40x8x32xbf16, #tpu.memory_space<vmem>>, %arg3: memref<40x1x8xf32, #tpu.memory_space<vmem>>, %arg4: memref<40x1x32xf32, #tpu.memory_space<vmem>>) attributes {dimension_semantics = [], scalar_prefetch = 0 : i64, scratch_operands = 0 : i64, tpu.core_type = #tpu.core_type<tc>} {
    %c0 = arith.constant 0 : index
    %c0_0 = arith.constant 0 : index
    %c0_1 = arith.constant 0 : index
    %0 = vector.load %arg0[%c0, %c0_0, %c0_1] : memref<40x1x32xf32, #tpu.memory_space<vmem>>, vector<40x1x32xf32>
    %1 = arith.truncf %0 : vector<40x1x32xf32> to vector<40x1x32xbf16>
    %c0_2 = arith.constant 0 : index
    %c0_3 = arith.constant 0 : index
    %c0_4 = arith.constant 0 : index
    %2 = vector.load %arg1[%c0_2, %c0_3, %c0_4] : memref<40x8x32xbf16, #tpu.memory_space<vmem>>, vector<40x8x32xbf16>
    %c0_5 = arith.constant 0 : index
    %c0_6 = arith.constant 0 : index
    %c0_7 = arith.constant 0 : index
    %3 = vector.load %arg2[%c0_5, %c0_6, %c0_7] : memref<40x8x32xbf16, #tpu.memory_space<vmem>>, vector<40x8x32xbf16>
    "tpu.trace_start"() <{level = 10 : i32, message = "gqd,gkd->gqk"}> : () -> ()
    %cst = arith.constant dense<0.000000e+00> : vector<40x1x8xf32>
    %4 = tpu.matmul %1, %2, %cst {dimension_numbers = #tpu.dot_dimension_numbers<[2], [2], [1], [1], [0, 0, 0, 1, 1, 1], [0], [0]>} : vector<40x1x32xbf16>, vector<40x8x32xbf16>, vector<40x1x8xf32> -> vector<40x1x8xf32>
    "tpu.trace_stop"() : () -> ()
    %c0_8 = arith.constant 0 : index
    %c0_9 = arith.constant 0 : index
    %c0_10 = arith.constant 0 : index
    %5 = vector.load %arg3[%c0_8, %c0_9, %c0_10] : memref<40x1x8xf32, #tpu.memory_space<vmem>>, vector<40x1x8xf32>
    %6 = vector.shape_cast %5 : vector<40x1x8xf32> to vector<40x1x8xf32>
    %7 = arith.addf %4, %6 : vector<40x1x8xf32>
    %cst_11 = arith.constant dense<0xFF800000> : vector<40x1xf32>
    %8 = vector.multi_reduction <maximumf>, %7, %cst_11 [2] : vector<40x1x8xf32> to vector<40x1xf32>
    %9 = vector.shape_cast %8 : vector<40x1xf32> to vector<40x1x1xf32>
    %10 = vector.broadcast %9 : vector<40x1x1xf32> to vector<40x1x8xf32>
    %11 = arith.subf %7, %10 : vector<40x1x8xf32>
    %12 = math.exp %11 : vector<40x1x8xf32>
    %cst_12 = arith.constant dense<0.000000e+00> : vector<40x1xf32>
    %13 = vector.multi_reduction <add>, %12, %cst_12 [2] : vector<40x1x8xf32> to vector<40x1xf32>
    %14 = vector.shape_cast %13 : vector<40x1xf32> to vector<40x1x1xf32>
    %15 = tpu.reciprocal %14 {approx = true} : vector<40x1x1xf32> -> vector<40x1x1xf32>
    %16 = vector.broadcast %15 : vector<40x1x1xf32> to vector<40x1x8xf32>
    %17 = arith.mulf %12, %16 : vector<40x1x8xf32>
    %18 = arith.truncf %17 : vector<40x1x8xf32> to vector<40x1x8xbf16>
    "tpu.trace_start"() <{level = 10 : i32, message = "gqk,gkd->gqd"}> : () -> ()
    %cst_13 = arith.constant dense<0.000000e+00> : vector<40x1x32xf32>
    %19 = tpu.matmul %18, %3, %cst_13 {dimension_numbers = #tpu.dot_dimension_numbers<[2], [1], [1], [2], [0, 0, 0, 1, 1, 2], [0], [0]>} : vector<40x1x8xbf16>, vector<40x8x32xbf16>, vector<40x1x32xf32> -> vector<40x1x32xf32>
    "tpu.trace_stop"() : () -> ()
    %c0_14 = arith.constant 0 : index
    %c0_15 = arith.constant 0 : index
    %c0_16 = arith.constant 0 : index
    %20 = vector.load %arg4[%c0_14, %c0_15, %c0_16] : memref<40x1x32xf32, #tpu.memory_space<vmem>>, vector<40x1x32xf32>
    tpu.vector_store %arg4[%c0_14, %c0_15, %c0_16], %19 {strides = array<i32>} : memref<40x1x32xf32, #tpu.memory_space<vmem>>, vector<40x1x32xf32>,
    return
  }
}

module attributes {stable_mosaic.version = 11 : i64} {
  func.func @_dec_tail_kernel(%arg0: memref<10x128xf32, #tpu.memory_space<vmem>>, %arg1: memref<10x128xf32, #tpu.memory_space<vmem>>, %arg2: memref<128x128xbf16, #tpu.memory_space<vmem>>, %arg3: memref<1x128xf32, #tpu.memory_space<vmem>>, %arg4: memref<128x256xbf16, #tpu.memory_space<vmem>>, %arg5: memref<256x128xbf16, #tpu.memory_space<vmem>>, %arg6: memref<1x128xf32, #tpu.memory_space<vmem>>, %arg7: memref<128x128xbf16, #tpu.memory_space<vmem>>, %arg8: memref<10x128xf32, #tpu.memory_space<vmem>>) attributes {dimension_semantics = [], scalar_prefetch = 0 : i64, scratch_operands = 0 : i64, tpu.core_type = #tpu.core_type<tc>} {
    %c0 = arith.constant 0 : index
    %c0_0 = arith.constant 0 : index
    %0 = vector.load %arg0[%c0, %c0_0] : memref<10x128xf32, #tpu.memory_space<vmem>>, vector<10x128xf32>
    %c0_1 = arith.constant 0 : index
    %c0_2 = arith.constant 0 : index
    %1 = vector.load %arg1[%c0_1, %c0_2] : memref<10x128xf32, #tpu.memory_space<vmem>>, vector<10x128xf32>
    %2 = arith.truncf %1 : vector<10x128xf32> to vector<10x128xbf16>
    %c0_3 = arith.constant 0 : index
    %c0_4 = arith.constant 0 : index
    %3 = vector.load %arg2[%c0_3, %c0_4] : memref<128x128xbf16, #tpu.memory_space<vmem>>, vector<128x128xbf16>
    %cst = arith.constant dense<0.000000e+00> : vector<10x128xf32>
    %4 = tpu.matmul %2, %3, %cst {dimension_numbers = #tpu.dot_dimension_numbers<[1], [0], [0], [1], [0, 0, 1, 1], [], []>} : vector<10x128xbf16>, vector<128x128xbf16>, vector<10x128xf32> -> vector<10x128xf32>
    %5 = arith.addf %0, %4 : vector<10x128xf32>
    %c0_5 = arith.constant 0 : index
    %c0_6 = arith.constant 0 : index
    %6 = vector.load %arg3[%c0_5, %c0_6] : memref<1x128xf32, #tpu.memory_space<vmem>>, vector<1x128xf32>
    %7 = arith.mulf %5, %5 : vector<10x128xf32>
    %cst_7 = arith.constant dense<0.000000e+00> : vector<10xf32>
    %8 = vector.multi_reduction <add>, %7, %cst_7 [1] : vector<10x128xf32> to vector<10xf32>
    %9 = vector.shape_cast %8 : vector<10xf32> to vector<10x1xf32>
    %cst_8 = arith.constant 1.280000e+02 : f32
    %10 = vector.broadcast %cst_8 : f32 to vector<10x1xf32>
    %11 = arith.divf %9, %10 : vector<10x1xf32>
    %cst_9 = arith.constant 9.99999997E-7 : f32
    %12 = vector.broadcast %cst_9 : f32 to vector<10x1xf32>
    %13 = arith.addf %11, %12 : vector<10x1xf32>
    %14 = math.rsqrt %13 : vector<10x1xf32>
    %15 = vector.broadcast %14 : vector<10x1xf32> to vector<10x128xf32>
    %16 = arith.mulf %5, %15 : vector<10x128xf32>
    %17 = vector.broadcast %6 : vector<1x128xf32> to vector<10x128xf32>
    %18 = arith.mulf %16, %17 : vector<10x128xf32>
    %19 = arith.truncf %18 : vector<10x128xf32> to vector<10x128xbf16>
    %c0_10 = arith.constant 0 : index
    %c0_11 = arith.constant 0 : index
    %20 = vector.load %arg4[%c0_10, %c0_11] : memref<128x256xbf16, #tpu.memory_space<vmem>>, vector<128x256xbf16>
    %cst_12 = arith.constant dense<0.000000e+00> : vector<10x256xf32>
    %21 = tpu.matmul %19, %20, %cst_12 {dimension_numbers = #tpu.dot_dimension_numbers<[1], [0], [0], [1], [0, 0, 1, 1], [], []>} : vector<10x128xbf16>, vector<128x256xbf16>, vector<10x256xf32> -> vector<10x256xf32>
    %cst_13 = arith.constant 0.000000e+00 : f32
    %22 = vector.broadcast %cst_13 : f32 to vector<10x256xf32>
    %23 = arith.maximumf %21, %22 : vector<10x256xf32>
    %24 = arith.truncf %23 : vector<10x256xf32> to vector<10x256xbf16>
    %c0_14 = arith.constant 0 : index
    %c0_15 = arith.constant 0 : index
    %25 = vector.load %arg5[%c0_14, %c0_15] : memref<256x128xbf16, #tpu.memory_space<vmem>>, vector<256x128xbf16>
    %cst_16 = arith.constant dense<0.000000e+00> : vector<10x128xf32>
    %26 = tpu.matmul %24, %25, %cst_16 {dimension_numbers = #tpu.dot_dimension_numbers<[1], [0], [0], [1], [0, 0, 1, 1], [], []>} : vector<10x256xbf16>, vector<256x128xbf16>, vector<10x128xf32> -> vector<10x128xf32>
    %27 = arith.addf %5, %26 : vector<10x128xf32>
    %c0_17 = arith.constant 0 : index
    %c0_18 = arith.constant 0 : index
    %28 = vector.load %arg6[%c0_17, %c0_18] : memref<1x128xf32, #tpu.memory_space<vmem>>, vector<1x128xf32>
    %29 = arith.mulf %27, %27 : vector<10x128xf32>
    %cst_19 = arith.constant dense<0.000000e+00> : vector<10xf32>
    %30 = vector.multi_reduction <add>, %29, %cst_19 [1] : vector<10x128xf32> to vector<10xf32>
    %31 = vector.shape_cast %30 : vector<10xf32> to vector<10x1xf32>
    %cst_20 = arith.constant 1.280000e+02 : f32
    %32 = vector.broadcast %cst_20 : f32 to vector<10x1xf32>
    %33 = arith.divf %31, %32 : vector<10x1xf32>
    %cst_21 = arith.constant 9.99999997E-7 : f32
    %34 = vector.broadcast %cst_21 : f32 to vector<10x1xf32>
    %35 = arith.addf %33, %34 : vector<10x1xf32>
    %36 = math.rsqrt %35 : vector<10x1xf32>
    %37 = vector.broadcast %36 : vector<10x1xf32> to vector<10x128xf32>
    %38 = arith.mulf %27, %37 : vector<10x128xf32>
    %39 = vector.broadcast %28 : vector<1x128xf32> to vector<10x128xf32>
    %40 = arith.mulf %38, %39 : vector<10x128xf32>
    %41 = arith.truncf %40 : vector<10x128xf32> to vector<10x128xbf16>
    %c0_22 = arith.constant 0 : index
    %c0_23 = arith.constant 0 : index
    %42 = vector.load %arg7[%c0_22, %c0_23] : memref<128x128xbf16, #tpu.memory_space<vmem>>, vector<128x128xbf16>
    %cst_24 = arith.constant dense<0.000000e+00> : vector<10x128xf32>
    %43 = tpu.matmul %41, %42, %cst_24 {dimension_numbers = #tpu.dot_dimension_numbers<[1], [0], [0], [1], [0, 0, 1, 1], [], []>} : vector<10x128xbf16>, vector<128x128xbf16>, vector<10x128xf32> -> vector<10x128xf32>
    %c0_25 = arith.constant 0 : index
    %c0_26 = arith.constant 0 : index
    %44 = vector.load %arg8[%c0_25, %c0_26] : memref<10x128xf32, #tpu.memory_space<vmem>>, vector<10x128xf32>
    tpu.vector_store %arg8[%c0_25, %c0_26], %43 {strides = array<i32>} : memref<10x128xf32, #tpu.memory_space<vmem>>, vector<10x128xf32>,
    return
  }
}

</mosaic_0001>

<bundles_post_ra>
// kernel: policy_value_forward.3
= control target key start
LH: loop header
LB: loop body
LE: loop exit
PB: predicated region body
PF: predicated region fallthrough
CT: control target
= control target key end

     0   :  { %8 = vsyncpa [#allocation3], 0  ;;  %s429_s12 = smov [#allocation2]   ;;  %s504_s0 = inlined_call_operand.vmem [shape: f32[16,128], index: 0, kind: input, shape index: {}]   ;;  %s505_s1 = inlined_call_operand.vmem [shape: f32[1,128], index: 1, kind: input, shape index: {}]   ;;  %s506_s2 = inlined_call_operand.hbm [shape: bf16[128,384], index: 2, kind: input, shape index: {}]   ;;  %s507_s3 = inlined_call_operand.vmem [shape: f32[16,384], index: 3, kind: output, shape index: {}]  }
   0x1   :  { %s18_s13 = sshll.u32 %s429_s12, 4  ;;  %s19_s13 = int_to_ptr.vmem [resolvable:$true] %s18_s13 }
   0x2   :  { %s415_s14 = scalar_lea.vmem %s19_s13, 3072  ;;  %p420_p1 = scmp.lt.s32.totalorder %s19_s13, %s19_s13 }
   0x3   :  { %p416_p0 = scmp.ne.s32.totalorder %s19_s13, %s415_s14  ;;  %p421_p2 = scmp.lt.s32.totalorder %s415_s14, %s415_s14 }
   0x5   :  { %p422_p3 = por %p421_p2, %p420_p1 }
   0x7   :  { %p423_p4 = pnand %p422_p3, %p416_p0 }
   0x9   :  { %426 = shalt.err (!%p423_p4)
}
   0xa   :  { %s430_s15 = smov 192   ;;  %s431_s16 = smov 12  }
   0xb   :  { %24 = dma.hbm_to_vmem [thread:$0]  %s506_s2, 3072, %s19_s13, [#allocation3], %s430_s15, %s430_s15, %s431_s16  }
   0xc   :  { %427 = dma.done.wait [#allocation3], 3072  }
   0xd   :  { %428 = vsyncadd [#allocation3], 4294964224  ;;  %v432_v0 = vmov 0.0   ;;  %v462_v1 = vld [vmem:[%s504_s0] sm:$0xff]  ;;  %v467_v2 = vld [vmem:[%s504_s0 + $0x8] sm:$0xff]  ;;  %v433_v24 = vmov 0  }
   0xe   :  { %345 = vmatprep.subr.bf16.mxu1 %v432_v0  ;;  %v32_v3 = vmul.f32 %v462_v1, %v462_v1  ;;  %v371_v4 = vld [vmem:[#allocation2 + $0xac] ss:$12 sps:$4 sm:$0xff]   ;;  %v373_v5 = vld [vmem:[#allocation2 + $0xa8] ss:$12 sps:$4 sm:$0xff]   ;;  %v374_v6 = vld [vmem:[#allocation2 + $0xb0] ss:$12 sps:$4 sm:$0xff]   ;;  %v33_v7 = vmul.f32 %v467_v2, %v467_v2  ;;  %248 = vmatprep.mubr.bf16.mxu0 %v433_v24 }
   0xf   :  { %216 = vmatprep.subr.bf16.mxu0 %v371_v4  ;;  %346 = vmatpush3.bf16.msra.mxu1 %v374_v6  ;;  %v375_v8 = vld [vmem:[#allocation2 + $0x94] ss:$12 sps:$4 sm:$0xff]   ;;  %v377_v9 = vld [vmem:[#allocation2 + $0x90] ss:$12 sps:$4 sm:$0xff]   ;;  %v378_v10 = vld [vmem:[#allocation2 + $0x98] ss:$12 sps:$4 sm:$0xff]  }
  0x10   :  { %34 = vadd.xlane.f32.xlu0 %v32_v3  ;;  %217 = vmatpush1.bf16.msra.mxu0 %v373_v5  ;;  %v379_v11 = vld [vmem:[#allocation2 + $0x7c] ss:$12 sps:$4 sm:$0xff]   ;;  %v381_v12 = vld [vmem:[#allocation2 + $0x78] ss:$12 sps:$4 sm:$0xff]   ;;  %v382_v13 = vld [vmem:[#allocation2 + $0x80] ss:$12 sps:$4 sm:$0xff]  }
  0x11   :  { %347 = vmatprep.subr.bf16.mxu1 %v432_v0  ;;  %218 = vmatprep.subr.bf16.mxu0 %v375_v8  ;;  %v383_v14 = vld [vmem:[#allocation2 + $0x64] ss:$12 sps:$4 sm:$0xff]   ;;  %v385_v15 = vld [vmem:[#allocation2 + $0x60] ss:$12 sps:$4 sm:$0xff]   ;;  %v386_v16 = vld [vmem:[#allocation2 + $0x68] ss:$12 sps:$4 sm:$0xff]  }
  0x12   :  { %v387_v17 = vld [vmem:[#allocation2 + $0x4c] ss:$12 sps:$4 sm:$0xff]   ;;  %v389_v18 = vld [vmem:[#allocation2 + $0x48] ss:$12 sps:$4 sm:$0xff]   ;;  %v390_v19 = vld [vmem:[#allocation2 + $0x50] ss:$12 sps:$4 sm:$0xff]  }
  0x13   :  { %348 = vmatpush3.bf16.msra.mxu1 %v378_v10  ;;  %v391_v20 = vld [vmem:[#allocation2 + $0x34] ss:$12 sps:$4 sm:$0xff]   ;;  %v393_v21 = vld [vmem:[#allocation2 + $0x30] ss:$12 sps:$4 sm:$0xff]   ;;  %v394_v22 = vld [vmem:[#allocation2 + $0x38] ss:$12 sps:$4 sm:$0xff]  }
  0x14   :  { %36 = vadd.xlane.f32.xlu0 %v33_v7  ;;  %219 = vmatpush1.bf16.msra.mxu0 %v377_v9  ;;  %v395_v23 = vld [vmem:[#allocation2 + $0x1c] ss:$12 sps:$4 sm:$0xff]   ;;  %vm434_vm0 = vmmov 0   ;;  %v397_v25 = vld [vmem:[#allocation2 + $0x18] ss:$12 sps:$4 sm:$0xff]  }
  0x15   :  { %349 = vmatprep.subr.bf16.mxu1 %v432_v0  ;;  %220 = vmatprep.subr.bf16.mxu0 %v379_v11  ;;  %v398_v26 = vld [vmem:[#allocation2 + $0x20] ss:$12 sps:$4 sm:$0xff]   ;;  %v399_v27 = vld [vmem:[#allocation2 + $0x4] ss:$12 sps:$4 sm:$0xff]   ;;  %v402_v29 = vld [vmem:[#allocation2 + $0x8] ss:$12 sps:$4 sm:$0xff]  }
  0x16   :  { %361 = vmatprep.mubr.msk.bf16.mxu1 %vm434_vm0, %v432_v0  ;;  %v401_v28 = vld [vmem:[#allocation2] ss:$12 sps:$4 sm:$0xff]  }
  0x17   :  { %350 = vmatpush3.bf16.msra.mxu1 %v382_v13  ;;  %v311_v39 = vld [vmem:[%s505_s1] ss:$0 sm:$0xff] }
  0x18   :  { %221 = vmatpush1.bf16.msra.mxu0 %v381_v12  ;;  %351 = vmatprep.subr.bf16.mxu1 %v432_v0 }
  0x19   :  { %222 = vmatprep.subr.bf16.mxu0 %v383_v14 }
  0x1b   :  { %352 = vmatpush3.bf16.msra.mxu1 %v386_v16 }
  0x1c   :  { %223 = vmatpush1.bf16.msra.mxu0 %v385_v15  ;;  %353 = vmatprep.subr.bf16.mxu1 %v432_v0 }
  0x1d   :  { %224 = vmatprep.subr.bf16.mxu0 %v387_v17 }
  0x1f   :  { %354 = vmatpush3.bf16.msra.mxu1 %v390_v19 }
  0x20   :  { %225 = vmatpush1.bf16.msra.mxu0 %v389_v18  ;;  %355 = vmatprep.subr.bf16.mxu1 %v432_v0 }
  0x21   :  { %226 = vmatprep.subr.bf16.mxu0 %v391_v20 }
  0x23   :  { %356 = vmatpush3.bf16.msra.mxu1 %v394_v22 }
  0x24   :  { %227 = vmatpush1.bf16.msra.mxu0 %v393_v21  ;;  %357 = vmatprep.subr.bf16.mxu1 %v432_v0 }
  0x25   :  { %228 = vmatprep.subr.bf16.mxu0 %v395_v23 }
  0x27   :  { %358 = vmatpush3.bf16.msra.mxu1 %v398_v26 }
  0x28   :  { %229 = vmatpush1.bf16.msra.mxu0 %v397_v25  ;;  %359 = vmatprep.subr.bf16.mxu1 %v432_v0 }
  0x29   :  { %230 = vmatprep.subr.bf16.mxu0 %v399_v27 }
  0x2b   :  { %360 = vmatpush3.bf16.msra.mxu1 %v402_v29 }
  0x2c   :  { %231 = vmatpush1.bf16.msra.mxu0 %v401_v28 }
  0x99   :  { %v35_v30 = vpop.xlane.xlu0 %34 }
  0x9a   :  { %v39_v31 = vmul.f32 0.0078125, %v35_v30 }
  0x9c   :  { %v41_v32 = vadd.f32 1e-06, %v39_v31 }
  0x9d   :  { %v37_v33 = vpop.xlane.xlu0 %36 }
  0x9e   :  { %403 = vrsqrt.f32 %v41_v32  ;;  %v40_v34 = vmul.f32 0.0078125, %v37_v33 }
  0xa0   :  { %v42_v35 = vadd.f32 1e-06, %v40_v34 }
  0xa2   :  { %405 = vrsqrt.f32 %v42_v35 }
  0xab   :  { %v404_v36 = vpop.eup %403 }
  0xac   :  { %v45_v37 = vmul.f32 %v404_v36, %v462_v1 }
  0xae   :  { %v53_v41 = vmul.f32 %v311_v39, %v45_v37 }
  0xaf   :  { %v406_v38 = vpop.eup %405 }
  0xb0   :  { %v46_v40 = vmul.f32 %v406_v38, %v467_v2 }
  0xb2   :  { %v54_v42 = vmul.f32 %v311_v39, %v46_v40 }
  0xb4   :  { %v55_v43 = vpack.c.bf16 %v54_v42, %v53_v41 }
  0xb6   :  { %249 = vmatmul.mubr.bf16.vlgmr.msra.gmra.mxu0 %v55_v43  ;;  %362 = vmatmul.mubr.bf16.vlgmr.msra.gmra.mxu1 %v55_v43 }
 0x176   :  { %v250_v44 = vpop.f32.mrf.mxu0  ;;  %v293_v45 = vpop.f32.mrf.mxu1 }
 0x177   :  { %300 = vst [vmem:[%s507_s3] sm:$0xff] %v250_v44  ;;  %302 = vst [vmem:[%s507_s3 + $0x10] sm:$0xff] %v293_v45 }
 0x178   :  { %v252_v46 = vpop.f32.mrf.mxu0  ;;  %v363_v47 = vpop.f32.mrf.mxu1 }
 0x179   :  { %301 = vst [vmem:[%s507_s3 + $0x8] sm:$0xff] %v252_v46 }
 0x17a   :  { %v254_v48 = vpop.f32.mrf.mxu0  ;;  %v296_v49 = vpop.f32.mrf.mxu1 }
 0x17b   :  { %303 = vst [vmem:[%s507_s3 + $0x18] sm:$0xff] %v254_v48  ;;  %305 = vst [vmem:[%s507_s3 + $0x28] sm:$0xff] %v296_v49 }
 0x17c   :  { %v256_v50 = vpop.f32.mrf.mxu0  ;;  %v364_v51 = vpop.f32.mrf.mxu1 }
 0x17d   :  { %304 = vst [vmem:[%s507_s3 + $0x20] sm:$0xff] %v256_v50 }
 0x17e   :  { %310 = vsyncpa [#allocation3], 1 }

// kernel: custom-call
= control target key start
LH: loop header
LB: loop body
LE: loop exit
PB: predicated region body
PF: predicated region fallthrough
CT: control target
= control target key end

     0   :  { %s6_s0 = inlined_call_operand.vmem [shape: pred[10], index: 0, kind: output, shape index: {}]  }

// kernel: policy_value_forward.4
= control target key start
LH: loop header
LB: loop body
LE: loop exit
PB: predicated region body
PF: predicated region fallthrough
CT: control target
= control target key end

     0   :  { %v1099_v0 = vmov 0.0   ;;  %vm74_vm0 = vcmask 261120   ;;  %vm1100_vm1 = vmmov 0   ;;  %vm443_vm2 = vcmask 64512   ;;  %s1386_s1 = inlined_call_operand.vmem [shape: f32[8,8,32], index: 1, kind: input, shape index: {}]   ;;  %s1387_s0 = inlined_call_operand.vmem [shape: f32[8,8,32], index: 0, kind: input, shape index: {}]   ;;  %s1388_s3 = inlined_call_operand.vmem [shape: f32[8,8,8], index: 3, kind: input, shape index: {}]   ;;  %s1389_s2 = inlined_call_operand.vmem [shape: f32[8,8,32], index: 2, kind: input, shape index: {}]   ;;  %s1390_s4 = inlined_call_operand.vmem [shape: f32[8,8,32], index: 4, kind: output, shape index: {}]  }
   0x1   :  { %969 = vmatprep.subr.bf16.mxu0 %v1099_v0  ;;  %975 = vmatprep.subr.bf16.mxu1 %v1099_v0  ;;  %v34_v1 = vld [vmem:[%s1386_s1] sm:$0xff]  ;;  %v35_v2 = vld [vmem:[%s1386_s1 + $0x8] sm:$0xff]  ;;  %v36_v5 = vld [vmem:[%s1386_s1 + $0x10] sm:$0xff]  ;;  %vm543_vm3 = vcmask 1043456  }
   0x2   :  { %v42_v3 = vpack.c.bf16 %v34_v1, %v34_v1  ;;  %v43_v4 = vpack.c.bf16 %v35_v2, %v35_v2  ;;  %971 = vmatprep.mubr.msk.bf16.mxu0 %vm1100_vm1, %v1099_v0  ;;  %977 = vmatprep.mubr.msk.bf16.mxu1 %vm1100_vm1, %v1099_v0  ;;  %v37_v6 = vld [vmem:[%s1386_s1 + $0x18] sm:$0xff]  ;;  %v18_v9 = vld [vmem:[%s1387_s0] sm:$0xff]  ;;  %v19_v10 = vld [vmem:[%s1387_s0 + $0x8] sm:$0xff]  ;;  %v44_v11 = vpack.c.bf16 %v36_v5, %v36_v5 }
   0x3   :  { %v45_v12 = vpack.c.bf16 %v37_v6, %v37_v6  ;;  %v26_v13 = vpack.c.bf16 %v18_v9, %v18_v9  ;;  %v27_v14 = vpack.c.bf16 %v19_v10, %v19_v10  ;;  %v38_v17 = vld [vmem:[%s1386_s1 + $0x20] sm:$0xff]  ;;  %v39_v18 = vld [vmem:[%s1386_s1 + $0x28] sm:$0xff]  ;;  %v20_v19 = vld [vmem:[%s1387_s0 + $0x10] sm:$0xff] }
   0x4   :  { %v79_v7 = vsel %vm74_vm0, %v42_v3, 0  ;;  %v125_v8 = vsel %vm74_vm0, %v43_v4, 0  ;;  %v171_v15 = vsel %vm74_vm0, %v44_v11, 0  ;;  %v21_v20 = vld [vmem:[%s1387_s0 + $0x18] sm:$0xff]  ;;  %v46_v21 = vpack.c.bf16 %v38_v17, %v38_v17  ;;  %v40_v27 = vld [vmem:[%s1386_s1 + $0x30] sm:$0xff]  ;;  %v22_v29 = vld [vmem:[%s1387_s0 + $0x20] sm:$0xff] }
   0x5   :  { %970 = vmatpush3.bf16.xpose.msra.mxu0 %v79_v7  ;;  %976 = vmatpush3.bf16.xpose.msra.mxu1 %v125_v8  ;;  %v217_v16 = vsel %vm74_vm0, %v45_v12, 0  ;;  %v47_v22 = vpack.c.bf16 %v39_v18, %v39_v18  ;;  %v28_v23 = vpack.c.bf16 %v20_v19, %v20_v19  ;;  %v29_v24 = vpack.c.bf16 %v21_v20, %v21_v20  ;;  %v41_v28 = vld [vmem:[%s1386_s1 + $0x38] sm:$0xff]  ;;  %v23_v30 = vld [vmem:[%s1387_s0 + $0x28] sm:$0xff]  ;;  %v24_v37 = vld [vmem:[%s1387_s0 + $0x30] sm:$0xff] }
   0x6   :  { %981 = vmatprep.subr.bf16.mxu0 %v1099_v0  ;;  %987 = vmatprep.subr.bf16.mxu1 %v1099_v0  ;;  %v263_v25 = vsel %vm74_vm0, %v46_v21, 0  ;;  %v48_v31 = vpack.c.bf16 %v40_v27, %v40_v27  ;;  %v49_v32 = vpack.c.bf16 %v41_v28, %v41_v28  ;;  %v30_v33 = vpack.c.bf16 %v22_v29, %v22_v29  ;;  %v25_v38 = vld [vmem:[%s1387_s0 + $0x38] sm:$0xff]  ;;  %v66_v41 = vld [vmem:[%s1388_s3] sm:$0xff]  ;;  %v67_v42 = vld [vmem:[%s1388_s3 + $0x8] sm:$0xff] }
   0x7   :  { %v309_v26 = vsel %vm74_vm0, %v47_v22, 0  ;;  %v31_v34 = vpack.c.bf16 %v23_v30, %v23_v30  ;;  %v32_v39 = vpack.c.bf16 %v24_v37, %v24_v37  ;;  %v33_v40 = vpack.c.bf16 %v25_v38, %v25_v38  ;;  %v69_v55 = vld [vmem:[%s1388_s3 + $0x18] sm:$0xff]  ;;  %v68_v56 = vld [vmem:[%s1388_s3 + $0x10] sm:$0xff]  ;;  %v71_v6 = vld [vmem:[%s1388_s3 + $0x28] sm:$0xff] }
   0x8   :  { %v355_v35 = vsel %vm74_vm0, %v48_v31, 0  ;;  %v401_v36 = vsel %vm74_vm0, %v49_v32, 0  ;;  %v70_v7 = vld [vmem:[%s1388_s3 + $0x20] sm:$0xff]  ;;  %v72_v20 = vld [vmem:[%s1388_s3 + $0x30] sm:$0xff]  ;;  %v73_v21 = vld [vmem:[%s1388_s3 + $0x38] sm:$0xff] }
   0xc   :  { %972 = vmatmul.mubr.msk.bf16.vlgmr.msra.gmra.mxu0 %vm74_vm0, %v26_v13  ;;  %978 = vmatmul.mubr.msk.bf16.vlgmr.msra.gmra.mxu1 %vm74_vm0, %v27_v14 }
   0xd   :  { %982 = vmatpush3.bf16.xpose.msra.mxu0 %v171_v15  ;;  %988 = vmatpush3.bf16.xpose.msra.mxu1 %v217_v16 }
   0xe   :  { %983 = vmatprep.mubr.msk.bf16.mxu0 %vm1100_vm1, %v1099_v0  ;;  %989 = vmatprep.mubr.msk.bf16.mxu1 %vm1100_vm1, %v1099_v0 }
   0xf   :  { %993 = vmatprep.subr.bf16.mxu0 %v1099_v0  ;;  %999 = vmatprep.subr.bf16.mxu1 %v1099_v0 }
  0x14   :  { %984 = vmatmul.mubr.msk.bf16.vlgmr.msra.gmra.mxu0 %vm74_vm0, %v28_v23  ;;  %990 = vmatmul.mubr.msk.bf16.vlgmr.msra.gmra.mxu1 %vm74_vm0, %v29_v24 }
  0x15   :  { %994 = vmatpush3.bf16.xpose.msra.mxu0 %v263_v25  ;;  %1000 = vmatpush3.bf16.xpose.msra.mxu1 %v309_v26 }
  0x16   :  { %995 = vmatprep.mubr.msk.bf16.mxu0 %vm1100_vm1, %v1099_v0  ;;  %1001 = vmatprep.mubr.msk.bf16.mxu1 %vm1100_vm1, %v1099_v0 }
  0x17   :  { %1005 = vmatprep.subr.bf16.mxu0 %v1099_v0  ;;  %1011 = vmatprep.subr.bf16.mxu1 %v1099_v0 }
  0x1c   :  { %996 = vmatmul.mubr.msk.bf16.vlgmr.msra.gmra.mxu0 %vm74_vm0, %v30_v33  ;;  %1002 = vmatmul.mubr.msk.bf16.vlgmr.msra.gmra.mxu1 %vm74_vm0, %v31_v34 }
  0x1d   :  { %1006 = vmatpush3.bf16.xpose.msra.mxu0 %v355_v35  ;;  %1012 = vmatpush3.bf16.xpose.msra.mxu1 %v401_v36 }
  0x1e   :  { %1007 = vmatprep.mubr.msk.bf16.mxu0 %vm1100_vm1, %v1099_v0  ;;  %1013 = vmatprep.mubr.msk.bf16.mxu1 %vm1100_vm1, %v1099_v0 }
  0x1f   :  { %1017 = vmatprep.subr.bf16.mxu0 %v1099_v0  ;;  %1023 = vmatprep.subr.bf16.mxu1 %v1099_v0 }
  0x24   :  { %1008 = vmatmul.mubr.msk.bf16.vlgmr.msra.gmra.mxu0 %vm74_vm0, %v32_v39  ;;  %1014 = vmatmul.mubr.msk.bf16.vlgmr.msra.gmra.mxu1 %vm74_vm0, %v33_v40 }
  0x25   :  { %1019 = vmatprep.mubr.msk.bf16.mxu0 %vm1100_vm1, %v1099_v0  ;;  %1025 = vmatprep.mubr.msk.bf16.mxu1 %vm1100_vm1, %v1099_v0 }
  0xcc   :  { %v115_v43 = vpop.f32.mrf.mxu0  ;;  %v161_v44 = vpop.f32.mrf.mxu1 }
  0xcd   :  { %v116_v45 = vadd.f32 %v115_v43, %v66_v41  ;;  %v1226_v46 = vadd.f32 %v161_v44, %v67_v42 }
  0xce   :  { %v973_v47 = vpop.f32.mrf.mxu0  ;;  %v979_v48 = vpop.f32.mrf.mxu1 }
  0xcf   :  { %v444_v49 = vsel %vm443_vm2, %v116_v45, -inf  ;;  %v447_v52 = vsel %vm443_vm2, %v1226_v46, -inf }
  0xd0   :  { %v164_v50 = vpop.f32.mrf.mxu1  ;;  %445 = vmax.xlane.f32.xlu0 %v444_v49  ;;  %v118_v51 = vpop.f32.mrf.mxu0 }
  0xd2   :  { %v974_v53 = vpop.f32.mrf.mxu0  ;;  %v980_v54 = vpop.f32.mrf.mxu1 }
  0xd4   :  { %v253_v57 = vpop.f32.mrf.mxu1  ;;  %448 = vmax.xlane.f32.xlu0 %v447_v52  ;;  %v207_v58 = vpop.f32.mrf.mxu0 }
  0xd5   :  { %v254_v59 = vadd.f32 %v253_v57, %v69_v55  ;;  %v208_v60 = vadd.f32 %v207_v58, %v68_v56 }
  0xd6   :  { %v985_v61 = vpop.f32.mrf.mxu0  ;;  %v991_v62 = vpop.f32.mrf.mxu1 }
  0xd7   :  { %v450_v63 = vsel %vm443_vm2, %v208_v60, -inf  ;;  %v453_v3 = vsel %vm443_vm2, %v254_v59, -inf }
  0xd8   :  { %v256_v1 = vpop.f32.mrf.mxu1  ;;  %451 = vmax.xlane.f32.xlu1 %v450_v63  ;;  %v210_v2 = vpop.f32.mrf.mxu0 }
  0xda   :  { %v986_v4 = vpop.f32.mrf.mxu0  ;;  %v992_v5 = vpop.f32.mrf.mxu1 }
  0xdc   :  { %v345_v8 = vpop.f32.mrf.mxu1  ;;  %454 = vmax.xlane.f32.xlu1 %v453_v3  ;;  %v299_v9 = vpop.f32.mrf.mxu0 }
  0xdd   :  { %v346_v10 = vadd.f32 %v345_v8, %v71_v6  ;;  %v300_v11 = vadd.f32 %v299_v9, %v70_v7  ;;  %v50_v8 = vld [vmem:[%s1389_s2] sm:$0xff]  ;;  %v51_v9 = vld [vmem:[%s1389_s2 + $0x8] sm:$0xff] }
  0xde   :  { %v997_v12 = vpop.f32.mrf.mxu0  ;;  %v1003_v13 = vpop.f32.mrf.mxu1 }
  0xdf   :  { %v459_v14 = vsel %vm443_vm2, %v346_v10, -inf  ;;  %v456_v15 = vsel %vm443_vm2, %v300_v11, -inf  ;;  %v58_v12 = vpack.c.bf16 %v50_v8, %v50_v8  ;;  %v59_v13 = vpack.c.bf16 %v51_v9, %v51_v9 }
  0xe0   :  { %v348_v16 = vpop.f32.mrf.mxu1  ;;  %460 = vmax.xlane.f32.xlu1 %v459_v14  ;;  %457 = vmax.xlane.f32.xlu0 %v456_v15  ;;  %v302_v17 = vpop.f32.mrf.mxu0 }
  0xe1   :  { %v545_v15 = vsel %vm543_vm3, %v58_v12, 0  ;;  %v591_v16 = vsel %vm543_vm3, %v59_v13, 0  ;;  %v52_v17 = vld [vmem:[%s1389_s2 + $0x10] sm:$0xff] }
  0xe2   :  { %v998_v18 = vpop.f32.mrf.mxu0  ;;  %v1004_v19 = vpop.f32.mrf.mxu1  ;;  %1018 = vmatpush3.bf16.msra.mxu0 %v545_v15  ;;  %1024 = vmatpush3.bf16.msra.mxu1 %v591_v16 }
  0xe3   :  { %1029 = vmatprep.subr.bf16.mxu0 %v1099_v0  ;;  %1035 = vmatprep.subr.bf16.mxu1 %v1099_v0  ;;  %v60_v18 = vpack.c.bf16 %v52_v17, %v52_v17  ;;  %v53_v19 = vld [vmem:[%s1389_s2 + $0x18] sm:$0xff] }
  0xe4   :  { %v391_v22 = vpop.f32.mrf.mxu0  ;;  %v437_v23 = vpop.f32.mrf.mxu1 }
  0xe5   :  { %v392_v24 = vadd.f32 %v391_v22, %v72_v20  ;;  %v438_v25 = vadd.f32 %v437_v23, %v73_v21  ;;  %v61_v20 = vpack.c.bf16 %v53_v19, %v53_v19  ;;  %v637_v21 = vsel %vm543_vm3, %v60_v18, 0  ;;  %v54_v23 = vld [vmem:[%s1389_s2 + $0x20] sm:$0xff] }
  0xe6   :  { %v1009_v26 = vpop.f32.mrf.mxu0  ;;  %v1015_v27 = vpop.f32.mrf.mxu1 }
  0xe7   :  { %v465_v28 = vsel %vm443_vm2, %v438_v25, -inf  ;;  %v462_v29 = vsel %vm443_vm2, %v392_v24, -inf  ;;  %v683_v22 = vsel %vm543_vm3, %v61_v20, 0 }
  0xe8   :  { %v440_v30 = vpop.f32.mrf.mxu1  ;;  %466 = vmax.xlane.f32.xlu1 %v465_v28  ;;  %463 = vmax.xlane.f32.xlu0 %v462_v29  ;;  %v394_v31 = vpop.f32.mrf.mxu0  ;;  %v56_v29 = vld [vmem:[%s1389_s2 + $0x30] sm:$0xff] }
  0xe9   :  { %v64_v30 = vpack.c.bf16 %v56_v29, %v56_v29  ;;  %v57_v31 = vld [vmem:[%s1389_s2 + $0x38] sm:$0xff] }
  0xea   :  { %v1010_v32 = vpop.f32.mrf.mxu0  ;;  %v1016_v33 = vpop.f32.mrf.mxu1 }
  0xeb   :  { %v821_v32 = vsel %vm543_vm3, %v64_v30, 0  ;;  %v65_v33 = vpack.c.bf16 %v57_v31, %v57_v31 }
 0x159   :  { %v446_v34 = vpop.xlane.xlu0 %445 }
 0x15a   :  { %v468_v35 = vsub.f32 %v116_v45, %v446_v34  ;;  %v867_v34 = vsel %vm543_vm3, %v65_v33, 0 }
 0x15c   :  { %v476_v36 = vmul.f32 1.442695, %v468_v35 }
 0x15d   :  { %v449_v37 = vpop.xlane.xlu0 %448 }
 0x15e   :  { %1067 = vpow2.f32 %v476_v36  ;;  %v469_v38 = vsub.f32 %v1226_v46, %v449_v37 }
 0x160   :  { %v478_v39 = vmul.f32 1.442695, %v469_v38 }
 0x161   :  { %v452_v40 = vpop.xlane.xlu1 %451 }
 0x162   :  { %1069 = vpow2.f32 %v478_v39  ;;  %v470_v41 = vsub.f32 %v208_v60, %v452_v40 }
 0x164   :  { %v480_v42 = vmul.f32 1.442695, %v470_v41 }
 0x165   :  { %v455_v43 = vpop.xlane.xlu1 %454 }
 0x166   :  { %1071 = vpow2.f32 %v480_v42  ;;  %v471_v44 = vsub.f32 %v254_v59, %v455_v43 }
 0x168   :  { %v482_v47 = vmul.f32 1.442695, %v471_v44 }
 0x169   :  { %v461_v48 = vpop.xlane.xlu1 %460  ;;  %v458_v49 = vpop.xlane.xlu0 %457 }
 0x16a   :  { %1073 = vpow2.f32 %v482_v47  ;;  %v473_v50 = vsub.f32 %v346_v10, %v461_v48  ;;  %v472_v51 = vsub.f32 %v300_v11, %v458_v49 }
 0x16b   :  { %v1256_v45 = vpop.eup %1067 }
 0x16c   :  { %v486_v52 = vmul.f32 1.442695, %v473_v50  ;;  %v484_v53 = vmul.f32 1.442695, %v472_v51  ;;  %v492_v46 = vsel %vm443_vm2, %v1256_v45, 0.0 }
 0x16d   :  { %493 = vadd.xlane.f32.xlu0 %v492_v46 }
 0x16e   :  { %1075 = vpow2.f32 %v486_v52 }
 0x16f   :  { %v1260_v54 = vpop.eup %1069  ;;  %1077 = vpow2.f32 %v484_v53 }
 0x170   :  { %v495_v55 = vsel %vm443_vm2, %v1260_v54, 0.0 }
 0x171   :  { %496 = vadd.xlane.f32.xlu1 %v495_v55  ;;  %v467_v56 = vpop.xlane.xlu1 %466  ;;  %v464_v57 = vpop.xlane.xlu0 %463 }
 0x172   :  { %v475_v58 = vsub.f32 %v438_v25, %v467_v56  ;;  %v474_v59 = vsub.f32 %v392_v24, %v464_v57  ;;  %v62_v24 = vpack.c.bf16 %v54_v23, %v54_v23  ;;  %v55_v25 = vld [vmem:[%s1389_s2 + $0x28] sm:$0xff] }
 0x173   :  { %v1264_v60 = vpop.eup %1071  ;;  %v63_v27 = vpack.c.bf16 %v55_v25, %v55_v25 }
 0x174   :  { %v490_v61 = vmul.f32 1.442695, %v475_v58  ;;  %v488_v62 = vmul.f32 1.442695, %v474_v59  ;;  %v498_v63 = vsel %vm443_vm2, %v1264_v60, 0.0  ;;  %v729_v26 = vsel %vm543_vm3, %v62_v24, 0 }
 0x175   :  { %499 = vadd.xlane.f32.xlu0 %v498_v63  ;;  %v775_v28 = vsel %vm543_vm3, %v63_v27, 0 }
 0x176   :  { %1079 = vpow2.f32 %v490_v61 }
 0x177   :  { %v1268_v1 = vpop.eup %1073  ;;  %1081 = vpow2.f32 %v488_v62 }
 0x178   :  { %v501_v2 = vsel %vm443_vm2, %v1268_v1, 0.0 }
 0x179   :  { %502 = vadd.xlane.f32.xlu1 %v501_v2 }
 0x17b   :  { %v1272_v3 = vpop.eup %1075 }
 0x17c   :  { %v1274_v4 = vpop.eup %1077  ;;  %v507_v5 = vsel %vm443_vm2, %v1272_v3, 0.0 }
 0x17d   :  { %508 = vadd.xlane.f32.xlu1 %v507_v5  ;;  %v504_v6 = vsel %vm443_vm2, %v1274_v4, 0.0 }
 0x17e   :  { %505 = vadd.xlane.f32.xlu0 %v504_v6 }
 0x183   :  { %v1280_v7 = vpop.eup %1079 }
 0x184   :  { %v1288_v10 = vpop.eup %1081  ;;  %v513_v11 = vsel %vm443_vm2, %v1280_v7, 0.0 }
 0x185   :  { %514 = vadd.xlane.f32.xlu1 %v513_v11  ;;  %v510_v14 = vsel %vm443_vm2, %v1288_v10, 0.0 }
 0x186   :  { %511 = vadd.xlane.f32.xlu0 %v510_v14 }
 0x1f6   :  { %v494_v35 = vpop.xlane.xlu0 %493 }
 0x1f7   :  { %1083 = vrcp.f32 %v494_v35 }
 0x1fa   :  { %v497_v36 = vpop.xlane.xlu1 %496 }
 0x1fb   :  { %1085 = vrcp.f32 %v497_v36 }
 0x1fe   :  { %v500_v37 = vpop.xlane.xlu0 %499 }
 0x1ff   :  { %1087 = vrcp.f32 %v500_v37 }
 0x202   :  { %v503_v38 = vpop.xlane.xlu1 %502 }
 0x203   :  { %1089 = vrcp.f32 %v503_v38 }
 0x204   :  { %v1084_v39 = vpop.eup %1083 }
 0x205   :  { %v524_v40 = vmul.f32 %v1084_v39, %v1256_v45 }
 0x206   :  { %v509_v41 = vpop.xlane.xlu1 %508 }
 0x207   :  { %1091 = vrcp.f32 %v509_v41  ;;  %v506_v42 = vpop.xlane.xlu0 %505  ;;  %v532_v43 = vpack.c.bf16 %v524_v40, %v524_v40 }
 0x208   :  { %v1086_v44 = vpop.eup %1085  ;;  %1093 = vrcp.f32 %v506_v42 }
 0x209   :  { %1020 = vmatmul.mubr.msk.bf16.vlgmr.msra.gmra.mxu0 %vm443_vm2, %v532_v43  ;;  %v525_v47 = vmul.f32 %v1086_v44, %v1260_v54 }
 0x20a   :  { %1030 = vmatpush3.bf16.msra.mxu0 %v637_v21  ;;  %1031 = vmatprep.mubr.msk.bf16.mxu0 %vm1100_vm1, %v1099_v0 }
 0x20b   :  { %v533_v48 = vpack.c.bf16 %v525_v47, %v525_v47  ;;  %1041 = vmatprep.subr.bf16.mxu0 %v1099_v0 }
 0x20c   :  { %v1088_v49 = vpop.eup %1087 }
 0x20d   :  { %1026 = vmatmul.mubr.msk.bf16.vlgmr.msra.gmra.mxu1 %vm443_vm2, %v533_v48  ;;  %v526_v50 = vmul.f32 %v1088_v49, %v1264_v60 }
 0x20e   :  { %1036 = vmatpush3.bf16.msra.mxu1 %v683_v22  ;;  %v515_v51 = vpop.xlane.xlu1 %514  ;;  %1037 = vmatprep.mubr.msk.bf16.mxu1 %vm1100_vm1, %v1099_v0 }
 0x20f   :  { %1095 = vrcp.f32 %v515_v51  ;;  %v512_v45 = vpop.xlane.xlu0 %511  ;;  %v534_v52 = vpack.c.bf16 %v526_v50, %v526_v50  ;;  %1047 = vmatprep.subr.bf16.mxu1 %v1099_v0 }
 0x210   :  { %v1090_v53 = vpop.eup %1089  ;;  %1097 = vrcp.f32 %v512_v45 }
 0x211   :  { %1032 = vmatmul.mubr.msk.bf16.vlgmr.msra.gmra.mxu0 %vm443_vm2, %v534_v52  ;;  %v527_v46 = vmul.f32 %v1090_v53, %v1268_v1 }
 0x212   :  { %1042 = vmatpush3.bf16.msra.mxu0 %v729_v26  ;;  %1043 = vmatprep.mubr.msk.bf16.mxu0 %vm1100_vm1, %v1099_v0 }
 0x213   :  { %v535_v54 = vpack.c.bf16 %v527_v46, %v527_v46  ;;  %1053 = vmatprep.subr.bf16.mxu0 %v1099_v0 }
 0x214   :  { %v1092_v55 = vpop.eup %1091 }
 0x215   :  { %v1094_v56 = vpop.eup %1093  ;;  %1038 = vmatmul.mubr.msk.bf16.vlgmr.msra.gmra.mxu1 %vm443_vm2, %v535_v54  ;;  %v529_v58 = vmul.f32 %v1092_v55, %v1272_v3 }
 0x216   :  { %1048 = vmatpush3.bf16.msra.mxu1 %v775_v28  ;;  %v528_v57 = vmul.f32 %v1094_v56, %v1274_v4  ;;  %1049 = vmatprep.mubr.msk.bf16.mxu1 %vm1100_vm1, %v1099_v0 }
 0x217   :  { %1059 = vmatprep.subr.bf16.mxu1 %v1099_v0  ;;  %v537_v60 = vpack.c.bf16 %v529_v58, %v529_v58 }
 0x218   :  { %v536_v59 = vpack.c.bf16 %v528_v57, %v528_v57 }
 0x21a   :  { %1044 = vmatmul.mubr.msk.bf16.vlgmr.msra.gmra.mxu0 %vm443_vm2, %v536_v59 }
 0x21b   :  { %1054 = vmatpush3.bf16.msra.mxu0 %v821_v32  ;;  %1055 = vmatprep.mubr.msk.bf16.mxu0 %vm1100_vm1, %v1099_v0 }
 0x21c   :  { %v1096_v61 = vpop.eup %1095 }
 0x21d   :  { %v1098_v62 = vpop.eup %1097  ;;  %1050 = vmatmul.mubr.msk.bf16.vlgmr.msra.gmra.mxu1 %vm443_vm2, %v537_v60  ;;  %v531_v1 = vmul.f32 %v1096_v61, %v1280_v7 }
 0x21e   :  { %1060 = vmatpush3.bf16.msra.mxu1 %v867_v34  ;;  %v530_v63 = vmul.f32 %v1098_v62, %v1288_v10  ;;  %1061 = vmatprep.mubr.msk.bf16.mxu1 %vm1100_vm1, %v1099_v0 }
 0x21f   :  { %v539_v3 = vpack.c.bf16 %v531_v1, %v531_v1 }
 0x220   :  { %v538_v2 = vpack.c.bf16 %v530_v63, %v530_v63 }
 0x222   :  { %1056 = vmatmul.mubr.msk.bf16.vlgmr.msra.gmra.mxu0 %vm443_vm2, %v538_v2 }
 0x225   :  { %1062 = vmatmul.mubr.msk.bf16.vlgmr.msra.gmra.mxu1 %vm443_vm2, %v539_v3 }
 0x2c9   :  { %v581_v4 = vpop.f32.mrf.mxu0 }
 0x2ca   :  { %909 = vst.msk [vmem:[%s1390_s4] sm:$0xff] %vm74_vm0, %v581_v4 }
 0x2cb   :  { %v1021_v5 = vpop.f32.mrf.mxu0 }
 0x2cd   :  { %v584_v6 = vpop.f32.mrf.mxu0  ;;  %v627_v8 = vpop.f32.mrf.mxu1 }
 0x2ce   :  { %910 = vst.msk [vmem:[%s1390_s4 + $0x8] sm:$0xff] %vm74_vm0, %v627_v8 }
 0x2cf   :  { %v1022_v0 = vpop.f32.mrf.mxu0  ;;  %v1027_v7 = vpop.f32.mrf.mxu1 }
 0x2d1   :  { %v630_v9 = vpop.f32.mrf.mxu1  ;;  %v673_v10 = vpop.f32.mrf.mxu0 }
 0x2d2   :  { %911 = vst.msk [vmem:[%s1390_s4 + $0x10] sm:$0xff] %vm74_vm0, %v673_v10 }
 0x2d3   :  { %v1028_v11 = vpop.f32.mrf.mxu1  ;;  %v1033_v12 = vpop.f32.mrf.mxu0 }
 0x2d5   :  { %v676_v13 = vpop.f32.mrf.mxu0  ;;  %v719_v14 = vpop.f32.mrf.mxu1 }
 0x2d6   :  { %912 = vst.msk [vmem:[%s1390_s4 + $0x18] sm:$0xff] %vm74_vm0, %v719_v14 }
 0x2d7   :  { %v1034_v15 = vpop.f32.mrf.mxu0  ;;  %v1039_v16 = vpop.f32.mrf.mxu1 }
 0x2d9   :  { %v722_v17 = vpop.f32.mrf.mxu1 }
 0x2da   :  { %v765_v18 = vpop.f32.mrf.mxu0 }
 0x2db   :  { %913 = vst.msk [vmem:[%s1390_s4 + $0x20] sm:$0xff] %vm74_vm0, %v765_v18  ;;  %v1040_v19 = vpop.f32.mrf.mxu1 }
 0x2dc   :  { %v1045_v20 = vpop.f32.mrf.mxu0 }
 0x2dd   :  { %v811_v21 = vpop.f32.mrf.mxu1 }
 0x2de   :  { %v768_v22 = vpop.f32.mrf.mxu0  ;;  %914 = vst.msk [vmem:[%s1390_s4 + $0x28] sm:$0xff] %vm74_vm0, %v811_v21 }
 0x2df   :  { %v1051_v23 = vpop.f32.mrf.mxu1 }
 0x2e0   :  { %v1046_v24 = vpop.f32.mrf.mxu0 }
 0x2e1   :  { %v814_v25 = vpop.f32.mrf.mxu1 }
 0x2e2   :  { %v857_v26 = vpop.f32.mrf.mxu0 }
 0x2e3   :  { %915 = vst.msk [vmem:[%s1390_s4 + $0x30] sm:$0xff] %vm74_vm0, %v857_v26  ;;  %v1052_v27 = vpop.f32.mrf.mxu1 }
 0x2e4   :  { %v1057_v28 = vpop.f32.mrf.mxu0 }
 0x2e5   :  { %v903_v29 = vpop.f32.mrf.mxu1 }
 0x2e6   :  { %v860_v30 = vpop.f32.mrf.mxu0  ;;  %916 = vst.msk [vmem:[%s1390_s4 + $0x38] sm:$0xff] %vm74_vm0, %v903_v29 }
 0x2e7   :  { %v1063_v31 = vpop.f32.mrf.mxu1 }
 0x2e8   :  { %v1058_v32 = vpop.f32.mrf.mxu0 }
 0x2e9   :  { %v906_v33 = vpop.f32.mrf.mxu1 }
 0x2eb   :  { %v1064_v34 = vpop.f32.mrf.mxu1 }

// kernel: policy_value_forward.5
= control target key start
LH: loop header
LB: loop body
LE: loop exit
PB: predicated region body
PF: predicated region fallthrough
CT: control target
= control target key end

     0   :  { %v892_v1 = vmov 0.0   ;;  %vm893_vm0 = vmmov 0   ;;  %s1161_s0 = inlined_call_operand.vmem [shape: f32[16,128], index: 0, kind: input, shape index: {}]   ;;  %s1162_s1 = inlined_call_operand.vmem [shape: f32[16,128], index: 1, kind: input, shape index: {}]   ;;  %s1163_s2 = inlined_call_operand.vmem [shape: bf16[128,128], index: 2, kind: input, shape index: {}]   ;;  %s1164_s3 = inlined_call_operand.vmem [shape: f32[1,128], index: 3, kind: input, shape index: {}]   ;;  %s1165_s4 = inlined_call_operand.vmem [shape: bf16[128,256], index: 4, kind: input, shape index: {}]   ;;  %s1166_s5 = inlined_call_operand.vmem [shape: bf16[256,128], index: 5, kind: input, shape index: {}]   ;;  %s1167_s6 = inlined_call_operand.vmem [shape: f32[1,128], index: 6, kind: input, shape index: {}]   ;;  %s1168_s7 = inlined_call_operand.vmem [shape: bf16[128,256], index: 7, kind: input, shape index: {}]   ;;  %s1169_s8 = inlined_call_operand.hbm [shape: f32[16,128], index: 8, kind: output, shape index: {0}]   ;;  %s1170_s9 = inlined_call_operand.vmem [shape: f32[16,256], index: 9, kind: output, shape index: {1}]  }
   0x1   :  { %v790_v0 = vld [vmem:[%s1163_s2 + $0x38] sm:$0xff]   ;;  %764 = vmatprep.subr.bf16.mxu0 %v892_v1  ;;  %v791_v2 = vld [vmem:[%s1163_s2 + $0x30] sm:$0xff]   ;;  %780 = vmatprep.mubr.msk.bf16.mxu0 %vm893_vm0, %v892_v1  ;;  %v792_v3 = vld [vmem:[%s1163_s2 + $0x28] sm:$0xff]  }
   0x2   :  { %765 = vmatpush3.bf16.msra.mxu0 %v790_v0  ;;  %v793_v4 = vld [vmem:[%s1163_s2 + $0x20] sm:$0xff]   ;;  %v794_v5 = vld [vmem:[%s1163_s2 + $0x18] sm:$0xff]   ;;  %v795_v6 = vld [vmem:[%s1163_s2 + $0x10] sm:$0xff]  }
   0x3   :  { %766 = vmatprep.subr.bf16.mxu0 %v892_v1  ;;  %v796_v7 = vld [vmem:[%s1163_s2 + $0x8] sm:$0xff]   ;;  %v797_v8 = vld [vmem:[%s1163_s2] sm:$0xff]  }
   0x4   :  { %v35_v9 = vld [vmem:[%s1162_s1] sm:$0xff]  ;;  %v36_v10 = vld [vmem:[%s1162_s1 + $0x8] sm:$0xff] }
   0x5   :  { %v37_v11 = vpack.c.bf16 %v36_v10, %v35_v9 }
   0x6   :  { %767 = vmatpush3.bf16.msra.mxu0 %v791_v2 }
   0x7   :  { %768 = vmatprep.subr.bf16.mxu0 %v892_v1 }
   0xa   :  { %769 = vmatpush3.bf16.msra.mxu0 %v792_v3 }
   0xb   :  { %770 = vmatprep.subr.bf16.mxu0 %v892_v1 }
   0xe   :  { %771 = vmatpush3.bf16.msra.mxu0 %v793_v4 }
   0xf   :  { %772 = vmatprep.subr.bf16.mxu0 %v892_v1 }
  0x12   :  { %773 = vmatpush3.bf16.msra.mxu0 %v794_v5 }
  0x13   :  { %774 = vmatprep.subr.bf16.mxu0 %v892_v1 }
  0x16   :  { %775 = vmatpush3.bf16.msra.mxu0 %v795_v6 }
  0x17   :  { %776 = vmatprep.subr.bf16.mxu0 %v892_v1 }
  0x1a   :  { %777 = vmatpush3.bf16.msra.mxu0 %v796_v7 }
  0x1b   :  { %778 = vmatprep.subr.bf16.mxu0 %v892_v1 }
  0x1e   :  { %779 = vmatpush3.bf16.msra.mxu0 %v797_v8 }
  0x1f   :  { %15 = vsyncpa [#allocation3], 0  ;;  %v798_v12 = vld [vmem:[%s1165_s4 + $0x74] ss:$8 sps:$4 sm:$0xff]   ;;  %v800_v13 = vld [vmem:[%s1165_s4 + $0x70] ss:$8 sps:$4 sm:$0xff]  }
  0x20   :  { %266 = vmatprep.subr.bf16.mxu1 %v798_v12  ;;  %v33_v14 = vld [vmem:[%s1161_s0] sm:$0xff]  ;;  %v34_v18 = vld [vmem:[%s1161_s0 + $0x8] sm:$0xff]  ;;  %v804_v26 = vld [vmem:[%s1165_s4 + $0x54] ss:$8 sps:$4 sm:$0xff]   ;;  %v894_v33 = vmov 0  }
  0x21   :  { %781 = vmatmul.mubr.bf16.vlgmr.msra.gmra.mxu0 %v37_v11  ;;  %267 = vmatpush1.bf16.msra.mxu1 %v800_v13  ;;  %v801_v24 = vld [vmem:[%s1165_s4 + $0x64] ss:$8 sps:$4 sm:$0xff]   ;;  %v803_v25 = vld [vmem:[%s1165_s4 + $0x60] ss:$8 sps:$4 sm:$0xff]   ;;  %v806_v27 = vld [vmem:[%s1165_s4 + $0x50] ss:$8 sps:$4 sm:$0xff]  }
  0x22   :  { %268 = vmatprep.subr.bf16.mxu1 %v801_v24  ;;  %v807_v28 = vld [vmem:[%s1165_s4 + $0x44] ss:$8 sps:$4 sm:$0xff]   ;;  %v809_v29 = vld [vmem:[%s1165_s4 + $0x40] ss:$8 sps:$4 sm:$0xff]   ;;  %v810_v30 = vld [vmem:[%s1165_s4 + $0x34] ss:$8 sps:$4 sm:$0xff]   ;;  %298 = vmatprep.mubr.bf16.mxu1 %v894_v33 }
  0x23   :  { %v812_v31 = vld [vmem:[%s1165_s4 + $0x30] ss:$8 sps:$4 sm:$0xff]   ;;  %v813_v32 = vld [vmem:[%s1165_s4 + $0x24] ss:$8 sps:$4 sm:$0xff]   ;;  %v815_v34 = vld [vmem:[%s1165_s4 + $0x20] ss:$8 sps:$4 sm:$0xff]  }
  0x24   :  { %v816_v35 = vld [vmem:[%s1165_s4 + $0x14] ss:$8 sps:$4 sm:$0xff]   ;;  %v818_v36 = vld [vmem:[%s1165_s4 + $0x10] ss:$8 sps:$4 sm:$0xff]   ;;  %v819_v37 = vld [vmem:[%s1165_s4 + $0x4] ss:$8 sps:$4 sm:$0xff]  }
  0x25   :  { %269 = vmatpush1.bf16.msra.mxu1 %v803_v25  ;;  %v821_v38 = vld [vmem:[%s1165_s4] ss:$8 sps:$4 sm:$0xff]   ;;  %v822_v39 = vld [vmem:[%s1166_s5 + $0x78] sm:$0xff]   ;;  %v824_v41 = vld [vmem:[%s1166_s5 + $0x70] sm:$0xff]  }
  0x26   :  { %270 = vmatprep.subr.bf16.mxu1 %v804_v26  ;;  %v823_v40 = vld [vmem:[%s1166_s5 + $0x38] sm:$0xff]   ;;  %742 = vmatprep.subr.bf16.mxu0 %v822_v39  ;;  %v825_v42 = vld [vmem:[%s1166_s5 + $0x30] sm:$0xff]   ;;  %v826_v43 = vld [vmem:[%s1166_s5 + $0x68] sm:$0xff]  }
  0x27   :  { %743 = vmatpush3.bf16.msra.mxu0 %v823_v40  ;;  %v827_v44 = vld [vmem:[%s1166_s5 + $0x28] sm:$0xff]   ;;  %v828_v45 = vld [vmem:[%s1166_s5 + $0x60] sm:$0xff]   ;;  %v830_v47 = vld [vmem:[%s1166_s5 + $0x58] sm:$0xff]  }
  0x28   :  { %744 = vmatprep.subr.bf16.mxu0 %v824_v41  ;;  %v829_v46 = vld [vmem:[%s1166_s5 + $0x20] sm:$0xff]   ;;  %v831_v48 = vld [vmem:[%s1166_s5 + $0x18] sm:$0xff]   ;;  %v832_v63 = vld [vmem:[%s1166_s5 + $0x50] sm:$0xff]  }
  0x29   :  { %271 = vmatpush1.bf16.msra.mxu1 %v806_v27  ;;  %v683_v58 = vld [vmem:[%s1164_s3] ss:$0 sm:$0xff]  ;;  %v833_v0 = vld [vmem:[%s1166_s5 + $0x10] sm:$0xff]   ;;  %v834_v1 = vld [vmem:[%s1166_s5 + $0x48] sm:$0xff]  }
  0x2a   :  { %272 = vmatprep.subr.bf16.mxu1 %v807_v28  ;;  %v835_v2 = vld [vmem:[%s1166_s5 + $0x8] sm:$0xff]   ;;  %v836_v3 = vld [vmem:[%s1166_s5 + $0x40] sm:$0xff]  }
  0x2b   :  { %745 = vmatpush3.bf16.msra.mxu0 %v825_v42  ;;  %v837_v4 = vld [vmem:[%s1166_s5] sm:$0xff]  }
  0x2c   :  { %746 = vmatprep.subr.bf16.mxu0 %v826_v43  ;;  %v861_v39 = vld [vmem:[%s1168_s7 + $0x4] ss:$8 sps:$4 sm:$0xff]   ;;  %v859_v40 = vld [vmem:[%s1168_s7] ss:$8 sps:$4 sm:$0xff]  }
  0x2d   :  { %273 = vmatpush1.bf16.msra.mxu1 %v809_v29  ;;  %v843_v29 = vld [vmem:[%s1168_s7 + $0x64] ss:$8 sps:$4 sm:$0xff]  }
  0x2e   :  { %274 = vmatprep.subr.bf16.mxu1 %v810_v30  ;;  %v841_v30 = vld [vmem:[%s1168_s7 + $0x60] ss:$8 sps:$4 sm:$0xff]  }
  0x2f   :  { %747 = vmatpush3.bf16.msra.mxu0 %v827_v44 }
  0x30   :  { %748 = vmatprep.subr.bf16.mxu0 %v828_v45 }
  0x31   :  { %275 = vmatpush1.bf16.msra.mxu1 %v812_v31  ;;  %v849_v31 = vld [vmem:[%s1168_s7 + $0x44] ss:$8 sps:$4 sm:$0xff]  }
  0x32   :  { %276 = vmatprep.subr.bf16.mxu1 %v813_v32  ;;  %v847_v32 = vld [vmem:[%s1168_s7 + $0x40] ss:$8 sps:$4 sm:$0xff]  }
  0x33   :  { %749 = vmatpush3.bf16.msra.mxu0 %v829_v46 }
  0x34   :  { %750 = vmatprep.subr.bf16.mxu0 %v830_v47 }
  0x35   :  { %277 = vmatpush1.bf16.msra.mxu1 %v815_v34  ;;  %v850_v34 = vld [vmem:[%s1168_s7 + $0x30] ss:$8 sps:$4 sm:$0xff]  }
  0x36   :  { %278 = vmatprep.subr.bf16.mxu1 %v816_v35  ;;  %v855_v35 = vld [vmem:[%s1168_s7 + $0x24] ss:$8 sps:$4 sm:$0xff]  }
  0x37   :  { %751 = vmatpush3.bf16.msra.mxu0 %v831_v48  ;;  %v716_v48 = vld [vmem:[%s1167_s6] ss:$0 sm:$0xff] }
  0x38   :  { %752 = vmatprep.subr.bf16.mxu0 %v832_v63 }
  0x39   :  { %279 = vmatpush1.bf16.msra.mxu1 %v818_v36  ;;  %v853_v36 = vld [vmem:[%s1168_s7 + $0x20] ss:$8 sps:$4 sm:$0xff]  }
  0x3a   :  { %280 = vmatprep.subr.bf16.mxu1 %v819_v37  ;;  %v858_v37 = vld [vmem:[%s1168_s7 + $0x14] ss:$8 sps:$4 sm:$0xff]  }
  0x3b   :  { %753 = vmatpush3.bf16.msra.mxu0 %v833_v0 }
  0x3c   :  { %754 = vmatprep.subr.bf16.mxu0 %v834_v1 }
  0x3d   :  { %281 = vmatpush1.bf16.msra.mxu1 %v821_v38  ;;  %v856_v38 = vld [vmem:[%s1168_s7 + $0x10] ss:$8 sps:$4 sm:$0xff]  }
  0x3f   :  { %755 = vmatpush3.bf16.msra.mxu0 %v835_v2 }
  0x40   :  { %756 = vmatprep.subr.bf16.mxu0 %v836_v3 }
  0x43   :  { %757 = vmatpush3.bf16.msra.mxu0 %v837_v4 }
  0xe1   :  { %v136_v15 = vpop.f32.mrf.mxu0 }
  0xe2   :  { %v987_v16 = vadd.f32 %v136_v15, %v33_v14  ;;  %v838_v15 = vld [vmem:[%s1168_s7 + $0x70] ss:$8 sps:$4 sm:$0xff]  }
  0xe3   :  { %v782_v17 = vpop.f32.mrf.mxu0 }
  0xe4   :  { %v146_v19 = vmul.f32 %v987_v16, %v987_v16  ;;  %v840_v17 = vld [vmem:[%s1168_s7 + $0x74] ss:$8 sps:$4 sm:$0xff]  }
  0xe5   :  { %v139_v20 = vpop.f32.mrf.mxu0  ;;  %608 = vmatprep.subr.bf16.mxu1 %v840_v17 }
  0xe6   :  { %v994_v21 = vadd.f32 %v139_v20, %v34_v18  ;;  %148 = vadd.xlane.f32.xlu0 %v146_v19 }
  0xe7   :  { %v783_v22 = vpop.f32.mrf.mxu0 }
  0xe8   :  { %v147_v23 = vmul.f32 %v994_v21, %v994_v21 }
  0xea   :  { %150 = vadd.xlane.f32.xlu0 %v147_v23 }
 0x16f   :  { %v149_v49 = vpop.xlane.xlu0 %148 }
 0x170   :  { %v153_v50 = vmul.f32 0.0078125, %v149_v49 }
 0x172   :  { %v155_v51 = vadd.f32 1e-06, %v153_v50 }
 0x173   :  { %v151_v52 = vpop.xlane.xlu0 %150 }
 0x174   :  { %862 = vrsqrt.f32 %v155_v51  ;;  %v154_v53 = vmul.f32 0.0078125, %v151_v52 }
 0x176   :  { %v156_v54 = vadd.f32 1e-06, %v154_v53 }
 0x178   :  { %864 = vrsqrt.f32 %v156_v54 }
 0x181   :  { %v863_v55 = vpop.eup %862 }
 0x182   :  { %v159_v56 = vmul.f32 %v863_v55, %v987_v16 }
 0x184   :  { %v167_v60 = vmul.f32 %v683_v58, %v159_v56 }
 0x185   :  { %v865_v57 = vpop.eup %864 }
 0x186   :  { %v160_v59 = vmul.f32 %v865_v57, %v994_v21 }
 0x188   :  { %v168_v61 = vmul.f32 %v683_v58, %v160_v59 }
 0x18a   :  { %v169_v62 = vpack.c.bf16 %v168_v61, %v167_v60 }
 0x18c   :  { %299 = vmatmul.mubr.bf16.vlgmr.msra.gmra.mxu1 %v169_v62 }
 0x18d   :  { %640 = vmatprep.mubr.bf16.mxu1 %v894_v33  ;;  %609 = vmatpush1.bf16.msra.mxu1 %v838_v15  ;;  %v852_v33 = vld [vmem:[%s1168_s7 + $0x34] ss:$8 sps:$4 sm:$0xff]  }
 0x18e   :  { %610 = vmatprep.subr.bf16.mxu1 %v843_v29 }
 0x191   :  { %611 = vmatpush1.bf16.msra.mxu1 %v841_v30 }
 0x24c   :  { %v300_v5 = vpop.f32.mrf.mxu1 }
 0x24d   :  { %v309_v12 = vmax.f32 %v300_v5, 0.0 }
 0x24e   :  { %v302_v6 = vpop.f32.mrf.mxu1 }
 0x24f   :  { %v310_v10 = vmax.f32 %v302_v6, 0.0 }
 0x250   :  { %v304_v7 = vpop.f32.mrf.mxu1 }
 0x251   :  { %v311_v8 = vmax.f32 %v304_v7, 0.0 }
 0x252   :  { %v306_v9 = vpop.f32.mrf.mxu1 }
 0x253   :  { %v312_v11 = vmax.f32 %v306_v9, 0.0  ;;  %v313_v14 = vpack.c.bf16 %v311_v8, %v309_v12 }
 0x255   :  { %v314_v13 = vpack.c.bf16 %v312_v11, %v310_v10 }
 0x257   :  { %475 = vmatprep.mubr.bf16.mxu0 %v314_v13 }
 0x258   :  { %476 = vmatmul.mubr.bf16.vlgmr.msra.gmra.mxu0 %v313_v14 }
 0x318   :  { %v758_v18 = vpop.f32.mrf.mxu0 }
 0x31a   :  { %v759_v19 = vpop.f32.mrf.mxu0 }
 0x31b   :  { %v760_v20 = vadd.f32 %v759_v19, %v758_v18 }
 0x31c   :  { %v761_v22 = vpop.f32.mrf.mxu0 }
 0x31d   :  { %v484_v23 = vadd.f32 %v760_v20, %v987_v16  ;;  %v846_v16 = vld [vmem:[%s1168_s7 + $0x54] ss:$8 sps:$4 sm:$0xff]  }
 0x31e   :  { %v762_v24 = vpop.f32.mrf.mxu0  ;;  %612 = vmatprep.subr.bf16.mxu1 %v846_v16 }
 0x31f   :  { %v763_v25 = vadd.f32 %v762_v24, %v761_v22  ;;  %v487_v26 = vmul.f32 %v484_v23, %v484_v23 }
 0x321   :  { %v485_v27 = vadd.f32 %v763_v25, %v994_v21  ;;  %489 = vadd.xlane.f32.xlu1 %v487_v26  ;;  %v844_v21 = vld [vmem:[%s1168_s7 + $0x50] ss:$8 sps:$4 sm:$0xff]   ;;  %s895_s7 = smov [#allocation2]  }
 0x322   :  { %613 = vmatpush1.bf16.msra.mxu1 %v844_v21  ;;  %s660_s30 = sshll.u32 %s895_s7, 4  ;;  %s661_s30 = int_to_ptr.vmem [resolvable:$true] %s660_s30 }
 0x323   :  { %v488_v28 = vmul.f32 %v485_v27, %v485_v27  ;;  %614 = vmatprep.subr.bf16.mxu1 %v849_v31  ;;  %s870_s10 = scalar_lea.vmem %s661_s30, 256  ;;  %p875_p1 = scmp.lt.s32.totalorder %s661_s30, %s661_s30 }
 0x324   :  { %p871_p0 = scmp.ne.s32.totalorder %s661_s30, %s870_s10  ;;  %p876_p2 = scmp.lt.s32.totalorder %s870_s10, %s870_s10 }
 0x325   :  { %491 = vadd.xlane.f32.xlu1 %v488_v28 }
 0x326   :  { %615 = vmatpush1.bf16.msra.mxu1 %v847_v32  ;;  %p877_p3 = por %p876_p2, %p875_p1 }
 0x327   :  { %616 = vmatprep.subr.bf16.mxu1 %v852_v33 }
 0x328   :  { %p878_p4 = pnand %p877_p3, %p871_p0 }
 0x32a   :  { %617 = vmatpush1.bf16.msra.mxu1 %v850_v34 }
 0x32b   :  { %618 = vmatprep.subr.bf16.mxu1 %v855_v35 }
 0x32e   :  { %619 = vmatpush1.bf16.msra.mxu1 %v853_v36 }
 0x32f   :  { %620 = vmatprep.subr.bf16.mxu1 %v858_v37 }
 0x332   :  { %621 = vmatpush1.bf16.msra.mxu1 %v856_v38 }
 0x333   :  { %622 = vmatprep.subr.bf16.mxu1 %v861_v39 }
 0x336   :  { %623 = vmatpush1.bf16.msra.mxu1 %v859_v40 }
 0x3aa   :  { %v490_v41 = vpop.xlane.xlu1 %489 }
 0x3ab   :  { %v493_v42 = vmul.f32 0.0078125, %v490_v41 }
 0x3ad   :  { %v495_v43 = vadd.f32 1e-06, %v493_v42 }
 0x3ae   :  { %v492_v44 = vpop.xlane.xlu1 %491 }
 0x3af   :  { %866 = vrsqrt.f32 %v495_v43  ;;  %v494_v45 = vmul.f32 0.0078125, %v492_v44 }
 0x3b1   :  { %v496_v46 = vadd.f32 1e-06, %v494_v45 }
 0x3b3   :  { %868 = vrsqrt.f32 %v496_v46 }
 0x3bc   :  { %v867_v47 = vpop.eup %866 }
 0x3bd   :  { %v499_v49 = vmul.f32 %v867_v47, %v484_v23 }
 0x3bf   :  { %v507_v50 = vmul.f32 %v716_v48, %v499_v49 }
 0x3c0   :  { %v869_v51 = vpop.eup %868 }
 0x3c1   :  { %v500_v52 = vmul.f32 %v869_v51, %v485_v27  ;;  %509 = vst [vmem:[#allocation2] sm:$0xff] %v507_v50 }
 0x3c3   :  { %v508_v53 = vmul.f32 %v716_v48, %v500_v52 }
 0x3c5   :  { %v511_v54 = vpack.c.bf16 %v508_v53, %v507_v50  ;;  %510 = vst [vmem:[#allocation2 + $0x8] sm:$0xff] %v508_v53 }
 0x3c7   :  { %641 = vmatmul.mubr.bf16.vlgmr.msra.gmra.mxu1 %v511_v54 }
 0x3c8   :  { %881 = shalt.err (!%p878_p4)
}
 0x3c9   :  { %s896_s6 = smov 128   ;;  %s897_s2 = smov 8  }
 0x3ca   :  { %666 = dma.vmem_to_hbm [thread:$0]  %s661_s30, 256, %s1169_s8, [#allocation3], %s896_s6, %s896_s6, %s897_s2  }
 0x487   :  { %v642_v55 = vpop.f32.mrf.mxu1 }
 0x488   :  { %651 = vst [vmem:[%s1170_s9] sm:$0xff] %v642_v55 }
 0x489   :  { %v644_v56 = vpop.f32.mrf.mxu1 }
 0x48a   :  { %652 = vst [vmem:[%s1170_s9 + $0x8] sm:$0xff] %v644_v56 }
 0x48b   :  { %v646_v57 = vpop.f32.mrf.mxu1 }
 0x48c   :  { %653 = vst [vmem:[%s1170_s9 + $0x10] sm:$0xff] %v646_v57 }
 0x48d   :  { %v648_v58 = vpop.f32.mrf.mxu1 }
 0x48e   :  { %654 = vst [vmem:[%s1170_s9 + $0x18] sm:$0xff] %v648_v58 }
 0x48f   :  { %890 = dma.done.wait [#allocation3], 256  }
 0x490   :  { %891 = vsyncadd [#allocation3], 4294967040 }
 0x491   :  { %674 = vsyncpa [#allocation3], 1 }

// kernel: closed_call.81
= control target key start
LH: loop header
LB: loop body
LE: loop exit
PB: predicated region body
PF: predicated region fallthrough
CT: control target
= control target key end

     0   :  { %v391_v2 = vmov 0.0   ;;  %vm22_vm0 = vcmask 1041408   ;;  %v392_v25 = vmov 0   ;;  %vm393_vm1 = vmmov 0   ;;  %s532_s0 = inlined_call_operand.vmem [shape: f32[10,128], index: 0, kind: input, shape index: {}]   ;;  %s533_s2 = inlined_call_operand.vmem [shape: bf16[128,384], index: 2, kind: input, shape index: {}]   ;;  %s534_s1 = inlined_call_operand.vmem [shape: f32[1,128], index: 1, kind: input, shape index: {}]   ;;  %s535_s3 = inlined_call_operand.vmem [shape: f32[10,384], index: 3, kind: output, shape index: {}]  }
   0x1   :  { %v417_v0 = vld [vmem:[%s532_s0] sm:$0xff]  ;;  %v422_v1 = vld [vmem:[%s532_s0 + $0x8] sm:$0x3]  ;;  %332 = vmatprep.subr.bf16.mxu1 %v391_v2  ;;  %v355_v5 = vld [vmem:[%s533_s2 + $0xac] ss:$12 sps:$4 sm:$0xff]   ;;  %236 = vmatprep.mubr.bf16.mxu0 %v392_v25 }
   0x2   :  { %v18_v3 = vmul.f32 %v417_v0, %v417_v0  ;;  %v19_v4 = vmul.f32 %v422_v1, %v422_v1  ;;  %v357_v6 = vld [vmem:[%s533_s2 + $0xa8] ss:$12 sps:$4 sm:$0xff]   ;;  %v358_v7 = vld [vmem:[%s533_s2 + $0xb0] ss:$12 sps:$4 sm:$0xff]   ;;  %204 = vmatprep.subr.bf16.mxu0 %v355_v5  ;;  %v362_v11 = vld [vmem:[%s533_s2 + $0x98] ss:$12 sps:$4 sm:$0xff]   ;;  %348 = vmatprep.mubr.msk.bf16.mxu1 %vm393_vm1, %v391_v2 }
   0x3   :  { %205 = vmatpush1.bf16.msra.mxu0 %v357_v6  ;;  %333 = vmatpush3.bf16.msra.mxu1 %v358_v7  ;;  %v359_v9 = vld [vmem:[%s533_s2 + $0x94] ss:$12 sps:$4 sm:$0xff]   ;;  %v361_v10 = vld [vmem:[%s533_s2 + $0x90] ss:$12 sps:$4 sm:$0xff]   ;;  %v365_v13 = vld [vmem:[%s533_s2 + $0x78] ss:$12 sps:$4 sm:$0xff]  }
   0x4   :  { %20 = vadd.xlane.f32.xlu0 %v18_v3  ;;  %v23_v8 = vsel %vm22_vm0, %v19_v4, 0.0  ;;  %334 = vmatprep.subr.bf16.mxu1 %v391_v2  ;;  %v363_v12 = vld [vmem:[%s533_s2 + $0x7c] ss:$12 sps:$4 sm:$0xff]   ;;  %v366_v14 = vld [vmem:[%s533_s2 + $0x80] ss:$12 sps:$4 sm:$0xff]  }
   0x5   :  { %206 = vmatprep.subr.bf16.mxu0 %v359_v9  ;;  %v367_v15 = vld [vmem:[%s533_s2 + $0x64] ss:$12 sps:$4 sm:$0xff]   ;;  %v369_v16 = vld [vmem:[%s533_s2 + $0x60] ss:$12 sps:$4 sm:$0xff]   ;;  %v370_v17 = vld [vmem:[%s533_s2 + $0x68] ss:$12 sps:$4 sm:$0xff]  }
   0x6   :  { %v371_v18 = vld [vmem:[%s533_s2 + $0x4c] ss:$12 sps:$4 sm:$0xff]   ;;  %v373_v19 = vld [vmem:[%s533_s2 + $0x48] ss:$12 sps:$4 sm:$0xff]   ;;  %v374_v20 = vld [vmem:[%s533_s2 + $0x50] ss:$12 sps:$4 sm:$0xff]  }
   0x7   :  { %207 = vmatpush1.bf16.msra.mxu0 %v361_v10  ;;  %335 = vmatpush3.bf16.msra.mxu1 %v362_v11  ;;  %v375_v21 = vld [vmem:[%s533_s2 + $0x34] ss:$12 sps:$4 sm:$0xff]   ;;  %v377_v22 = vld [vmem:[%s533_s2 + $0x30] ss:$12 sps:$4 sm:$0xff]   ;;  %v378_v23 = vld [vmem:[%s533_s2 + $0x38] ss:$12 sps:$4 sm:$0xff]  }
   0x8   :  { %24 = vadd.xlane.f32.xlu0 %v23_v8  ;;  %336 = vmatprep.subr.bf16.mxu1 %v391_v2  ;;  %v379_v24 = vld [vmem:[%s533_s2 + $0x1c] ss:$12 sps:$4 sm:$0xff]   ;;  %v381_v26 = vld [vmem:[%s533_s2 + $0x18] ss:$12 sps:$4 sm:$0xff]   ;;  %v382_v27 = vld [vmem:[%s533_s2 + $0x20] ss:$12 sps:$4 sm:$0xff]  }
   0x9   :  { %208 = vmatprep.subr.bf16.mxu0 %v363_v12  ;;  %v383_v28 = vld [vmem:[%s533_s2 + $0x4] ss:$12 sps:$4 sm:$0xff]   ;;  %v385_v29 = vld [vmem:[%s533_s2] ss:$12 sps:$4 sm:$0xff]   ;;  %v386_v30 = vld [vmem:[%s533_s2 + $0x8] ss:$12 sps:$4 sm:$0xff]  }
   0xa   :  { %v298_v40 = vld [vmem:[%s534_s1] ss:$0 sm:$0xff] }
   0xb   :  { %209 = vmatpush1.bf16.msra.mxu0 %v365_v13  ;;  %337 = vmatpush3.bf16.msra.mxu1 %v366_v14 }
   0xc   :  { %338 = vmatprep.subr.bf16.mxu1 %v391_v2  ;;  %210 = vmatprep.subr.bf16.mxu0 %v367_v15 }
   0xf   :  { %211 = vmatpush1.bf16.msra.mxu0 %v369_v16  ;;  %339 = vmatpush3.bf16.msra.mxu1 %v370_v17 }
  0x10   :  { %212 = vmatprep.subr.bf16.mxu0 %v371_v18  ;;  %340 = vmatprep.subr.bf16.mxu1 %v391_v2 }
  0x13   :  { %213 = vmatpush1.bf16.msra.mxu0 %v373_v19  ;;  %341 = vmatpush3.bf16.msra.mxu1 %v374_v20 }
  0x14   :  { %214 = vmatprep.subr.bf16.mxu0 %v375_v21  ;;  %342 = vmatprep.subr.bf16.mxu1 %v391_v2 }
  0x17   :  { %215 = vmatpush1.bf16.msra.mxu0 %v377_v22  ;;  %343 = vmatpush3.bf16.msra.mxu1 %v378_v23 }
  0x18   :  { %216 = vmatprep.subr.bf16.mxu0 %v379_v24  ;;  %344 = vmatprep.subr.bf16.mxu1 %v391_v2 }
  0x1b   :  { %217 = vmatpush1.bf16.msra.mxu0 %v381_v26  ;;  %345 = vmatpush3.bf16.msra.mxu1 %v382_v27 }
  0x1c   :  { %218 = vmatprep.subr.bf16.mxu0 %v383_v28  ;;  %346 = vmatprep.subr.bf16.mxu1 %v391_v2 }
  0x1f   :  { %219 = vmatpush1.bf16.msra.mxu0 %v385_v29  ;;  %347 = vmatpush3.bf16.msra.mxu1 %v386_v30 }
  0x8d   :  { %v21_v31 = vpop.xlane.xlu0 %20 }
  0x8e   :  { %v27_v32 = vmul.f32 0.0078125, %v21_v31 }
  0x90   :  { %v29_v33 = vadd.f32 1e-06, %v27_v32 }
  0x91   :  { %v25_v34 = vpop.xlane.xlu0 %24 }
  0x92   :  { %387 = vrsqrt.f32 %v29_v33  ;;  %v28_v35 = vmul.f32 0.0078125, %v25_v34 }
  0x94   :  { %v30_v36 = vadd.f32 1e-06, %v28_v35 }
  0x96   :  { %389 = vrsqrt.f32 %v30_v36 }
  0x9f   :  { %v388_v37 = vpop.eup %387 }
  0xa0   :  { %v33_v38 = vmul.f32 %v388_v37, %v417_v0 }
  0xa2   :  { %v41_v42 = vmul.f32 %v298_v40, %v33_v38 }
  0xa3   :  { %v390_v39 = vpop.eup %389 }
  0xa4   :  { %v34_v41 = vmul.f32 %v390_v39, %v422_v1 }
  0xa6   :  { %v42_v43 = vmul.f32 %v298_v40, %v34_v41 }
  0xa8   :  { %v43_v44 = vpack.c.bf16 %v42_v43, %v41_v42 }
  0xaa   :  { %237 = vmatmul.mubr.bf16.vlgmr.msra.gmra.mxu0 %v43_v44  ;;  %349 = vmatmul.mubr.bf16.vlgmr.msra.gmra.mxu1 %v43_v44 }
 0x16a   :  { %v238_v45 = vpop.f32.mrf.mxu0  ;;  %v281_v46 = vpop.f32.mrf.mxu1 }
 0x16b   :  { %288 = vst [vmem:[%s535_s3] sm:$0xff] %v238_v45  ;;  %290 = vst [vmem:[%s535_s3 + $0x10] sm:$0xff] %v281_v46 }
 0x16c   :  { %v240_v47 = vpop.f32.mrf.mxu0  ;;  %v350_v48 = vpop.f32.mrf.mxu1 }
 0x16d   :  { %289 = vst [vmem:[%s535_s3 + $0x8] sm:$0xff] %v240_v47 }
 0x16e   :  { %v242_v49 = vpop.f32.mrf.mxu0  ;;  %v284_v50 = vpop.f32.mrf.mxu1 }
 0x16f   :  { %291 = vst [vmem:[%s535_s3 + $0x18] sm:$0x3] %v242_v49  ;;  %293 = vst [vmem:[%s535_s3 + $0x28] sm:$0x3] %v284_v50 }
 0x170   :  { %v244_v51 = vpop.f32.mrf.mxu0  ;;  %v351_v52 = vpop.f32.mrf.mxu1 }
 0x171   :  { %292 = vst [vmem:[%s535_s3 + $0x20] sm:$0x3] %v244_v51 }

// kernel: closed_call.83
= control target key start
LH: loop header
LB: loop body
LE: loop exit
PB: predicated region body
PF: predicated region fallthrough
CT: control target
= control target key end

     0   :  { %v376_v0 = vmov 0.0   ;;  %vm377_vm0 = vmmov 0   ;;  %vm142_vm1 = vcmask 1041408   ;;  %s506_s2 = inlined_call_operand.vmem [shape: bf16[128,128], index: 2, kind: input, shape index: {}]   ;;  %s507_s1 = inlined_call_operand.vmem [shape: f32[10,128], index: 1, kind: input, shape index: {}]   ;;  %s508_s4 = inlined_call_operand.vmem [shape: bf16[128,128], index: 4, kind: input, shape index: {}]   ;;  %s509_s0 = inlined_call_operand.vmem [shape: f32[10,128], index: 0, kind: input, shape index: {}]   ;;  %s510_s5 = inlined_call_operand.vmem [shape: f32[10,128], index: 5, kind: output, shape index: {0}]   ;;  %s511_s3 = inlined_call_operand.vmem [shape: f32[1,128], index: 3, kind: input, shape index: {}]   ;;  %s512_s6 = inlined_call_operand.vmem [shape: f32[10,128], index: 6, kind: output, shape index: {1}]  }
   0x1   :  { %314 = vmatprep.subr.bf16.mxu0 %v376_v0  ;;  %v356_v1 = vld [vmem:[%s506_s2 + $0x38] sm:$0xff]   ;;  %330 = vmatprep.mubr.msk.bf16.mxu0 %vm377_vm0, %v376_v0  ;;  %v357_v2 = vld [vmem:[%s506_s2 + $0x30] sm:$0xff]   ;;  %v358_v3 = vld [vmem:[%s506_s2 + $0x28] sm:$0xff]  }
   0x2   :  { %334 = vmatprep.subr.bf16.mxu1 %v376_v0  ;;  %350 = vmatprep.mubr.msk.bf16.mxu1 %vm377_vm0, %v376_v0  ;;  %v359_v4 = vld [vmem:[%s506_s2 + $0x20] sm:$0xff]   ;;  %v360_v5 = vld [vmem:[%s506_s2 + $0x18] sm:$0xff]   ;;  %v361_v6 = vld [vmem:[%s506_s2 + $0x10] sm:$0xff]  }
   0x3   :  { %315 = vmatpush3.bf16.msra.mxu0 %v356_v1  ;;  %v362_v7 = vld [vmem:[%s506_s2 + $0x8] sm:$0xff]   ;;  %v363_v8 = vld [vmem:[%s506_s2] sm:$0xff]   ;;  %v364_v12 = vld [vmem:[%s508_s4 + $0x38] sm:$0xff]  }
   0x4   :  { %316 = vmatprep.subr.bf16.mxu0 %v376_v0  ;;  %v25_v9 = vld [vmem:[%s507_s1] sm:$0xff]  ;;  %v26_v10 = vld [vmem:[%s507_s1 + $0x8] sm:$0x3]  ;;  %335 = vmatpush3.bf16.msra.mxu1 %v364_v12  ;;  %v365_v24 = vld [vmem:[%s508_s4 + $0x30] sm:$0xff]  }
   0x5   :  { %v27_v11 = vpack.c.bf16 %v26_v10, %v25_v9  ;;  %336 = vmatprep.subr.bf16.mxu1 %v376_v0  ;;  %v23_v13 = vld [vmem:[%s509_s0] sm:$0xff]  ;;  %v24_v17 = vld [vmem:[%s509_s0 + $0x8] sm:$0x3]  ;;  %v368_v27 = vld [vmem:[%s508_s4 + $0x18] sm:$0xff]  }
   0x6   :  { %v366_v25 = vld [vmem:[%s508_s4 + $0x28] sm:$0xff]   ;;  %v367_v26 = vld [vmem:[%s508_s4 + $0x20] sm:$0xff]   ;;  %v369_v28 = vld [vmem:[%s508_s4 + $0x10] sm:$0xff]  }
   0x7   :  { %317 = vmatpush3.bf16.msra.mxu0 %v357_v2  ;;  %v370_v29 = vld [vmem:[%s508_s4 + $0x8] sm:$0xff]   ;;  %v371_v30 = vld [vmem:[%s508_s4] sm:$0xff]  }
   0x8   :  { %318 = vmatprep.subr.bf16.mxu0 %v376_v0  ;;  %337 = vmatpush3.bf16.msra.mxu1 %v365_v24  ;;  %v287_v40 = vld [vmem:[%s511_s3] ss:$0 sm:$0xff] }
   0x9   :  { %338 = vmatprep.subr.bf16.mxu1 %v376_v0 }
   0xb   :  { %319 = vmatpush3.bf16.msra.mxu0 %v358_v3 }
   0xc   :  { %320 = vmatprep.subr.bf16.mxu0 %v376_v0  ;;  %339 = vmatpush3.bf16.msra.mxu1 %v366_v25 }
   0xd   :  { %340 = vmatprep.subr.bf16.mxu1 %v376_v0 }
   0xf   :  { %321 = vmatpush3.bf16.msra.mxu0 %v359_v4 }
  0x10   :  { %322 = vmatprep.subr.bf16.mxu0 %v376_v0  ;;  %341 = vmatpush3.bf16.msra.mxu1 %v367_v26 }
  0x11   :  { %342 = vmatprep.subr.bf16.mxu1 %v376_v0 }
  0x13   :  { %323 = vmatpush3.bf16.msra.mxu0 %v360_v5 }
  0x14   :  { %324 = vmatprep.subr.bf16.mxu0 %v376_v0  ;;  %343 = vmatpush3.bf16.msra.mxu1 %v368_v27 }
  0x15   :  { %344 = vmatprep.subr.bf16.mxu1 %v376_v0 }
  0x17   :  { %325 = vmatpush3.bf16.msra.mxu0 %v361_v6 }
  0x18   :  { %326 = vmatprep.subr.bf16.mxu0 %v376_v0  ;;  %345 = vmatpush3.bf16.msra.mxu1 %v369_v28 }
  0x19   :  { %346 = vmatprep.subr.bf16.mxu1 %v376_v0 }
  0x1b   :  { %327 = vmatpush3.bf16.msra.mxu0 %v362_v7 }
  0x1c   :  { %328 = vmatprep.subr.bf16.mxu0 %v376_v0  ;;  %347 = vmatpush3.bf16.msra.mxu1 %v370_v29 }
  0x1d   :  { %348 = vmatprep.subr.bf16.mxu1 %v376_v0 }
  0x1f   :  { %329 = vmatpush3.bf16.msra.mxu0 %v363_v8 }
  0x20   :  { %349 = vmatpush3.bf16.msra.mxu1 %v371_v30 }
  0x22   :  { %331 = vmatmul.mubr.bf16.vlgmr.msra.gmra.mxu0 %v27_v11 }
  0xe2   :  { %v126_v14 = vpop.f32.mrf.mxu0 }
  0xe3   :  { %v133_v15 = vadd.f32 %v126_v14, %v23_v13 }
  0xe4   :  { %v332_v16 = vpop.f32.mrf.mxu0 }
  0xe5   :  { %135 = vst [vmem:[%s510_s5] sm:$0xff] %v133_v15  ;;  %v138_v18 = vmul.f32 %v133_v15, %v133_v15 }
  0xe6   :  { %v129_v19 = vpop.f32.mrf.mxu0 }
  0xe7   :  { %v134_v20 = vadd.f32 %v129_v19, %v24_v17  ;;  %140 = vadd.xlane.f32.xlu0 %v138_v18 }
  0xe8   :  { %v333_v21 = vpop.f32.mrf.mxu0 }
  0xe9   :  { %136 = vst [vmem:[%s510_s5 + $0x8] sm:$0x3] %v134_v20  ;;  %v139_v22 = vmul.f32 %v134_v20, %v134_v20 }
  0xeb   :  { %v143_v23 = vsel %vm142_vm1, %v139_v22, 0.0 }
  0xec   :  { %144 = vadd.xlane.f32.xlu0 %v143_v23 }
 0x170   :  { %v141_v31 = vpop.xlane.xlu0 %140 }
 0x171   :  { %v147_v32 = vmul.f32 0.0078125, %v141_v31 }
 0x173   :  { %v149_v33 = vadd.f32 1e-06, %v147_v32 }
 0x175   :  { %v145_v34 = vpop.xlane.xlu0 %144  ;;  %372 = vrsqrt.f32 %v149_v33 }
 0x176   :  { %v148_v35 = vmul.f32 0.0078125, %v145_v34 }
 0x178   :  { %v150_v36 = vadd.f32 1e-06, %v148_v35 }
 0x17a   :  { %374 = vrsqrt.f32 %v150_v36 }
 0x182   :  { %v373_v37 = vpop.eup %372 }
 0x183   :  { %v153_v38 = vmul.f32 %v373_v37, %v133_v15 }
 0x185   :  { %v161_v42 = vmul.f32 %v287_v40, %v153_v38 }
 0x187   :  { %v375_v39 = vpop.eup %374 }
 0x188   :  { %v154_v41 = vmul.f32 %v375_v39, %v134_v20 }
 0x18a   :  { %v162_v43 = vmul.f32 %v287_v40, %v154_v41 }
 0x18c   :  { %v163_v44 = vpack.c.bf16 %v162_v43, %v161_v42 }
 0x18e   :  { %351 = vmatmul.mubr.bf16.vlgmr.msra.gmra.mxu1 %v163_v44 }
 0x24e   :  { %v262_v45 = vpop.f32.mrf.mxu1 }
 0x24f   :  { %269 = vst [vmem:[%s512_s6] sm:$0xff] %v262_v45 }
 0x250   :  { %v352_v46 = vpop.f32.mrf.mxu1 }
 0x252   :  { %v265_v47 = vpop.f32.mrf.mxu1 }
 0x253   :  { %270 = vst [vmem:[%s512_s6 + $0x8] sm:$0x3] %v265_v47 }
 0x254   :  { %v353_v48 = vpop.f32.mrf.mxu1 }

// kernel: closed_call.85
= control target key start
LH: loop header
LB: loop body
LE: loop exit
PB: predicated region body
PF: predicated region fallthrough
CT: control target
= control target key end

     0   :  { %v818_v0 = vmov 0.0   ;;  %vm819_vm0 = vmmov 0   ;;  %vm147_vm1 = vcmask 1041408   ;;  %v820_v34 = vmov 0   ;;  %s1068_s2 = inlined_call_operand.vmem [shape: bf16[128,128], index: 2, kind: input, shape index: {}]   ;;  %s1069_s1 = inlined_call_operand.vmem [shape: f32[10,128], index: 1, kind: input, shape index: {}]   ;;  %s1070_s4 = inlined_call_operand.vmem [shape: bf16[128,256], index: 4, kind: input, shape index: {}]   ;;  %s1071_s0 = inlined_call_operand.vmem [shape: f32[10,128], index: 0, kind: input, shape index: {}]   ;;  %s1072_s5 = inlined_call_operand.vmem [shape: bf16[256,128], index: 5, kind: input, shape index: {}]   ;;  %s1073_s3 = inlined_call_operand.vmem [shape: f32[1,128], index: 3, kind: input, shape index: {}]   ;;  %s1074_s7 = inlined_call_operand.vmem [shape: bf16[128,128], index: 7, kind: input, shape index: {}]   ;;  %s1075_s6 = inlined_call_operand.vmem [shape: f32[1,128], index: 6, kind: input, shape index: {}]   ;;  %s1076_s8 = inlined_call_operand.vmem [shape: f32[10,128], index: 8, kind: output, shape index: {}]  }
   0x1   :  { %711 = vmatprep.subr.bf16.mxu0 %v818_v0  ;;  %v754_v1 = vld [vmem:[%s1068_s2 + $0x38] sm:$0xff]   ;;  %727 = vmatprep.mubr.msk.bf16.mxu0 %vm819_vm0, %v818_v0  ;;  %v755_v2 = vld [vmem:[%s1068_s2 + $0x30] sm:$0xff]   ;;  %v756_v3 = vld [vmem:[%s1068_s2 + $0x28] sm:$0xff]  }
   0x2   :  { %712 = vmatpush3.bf16.msra.mxu0 %v754_v1  ;;  %v757_v4 = vld [vmem:[%s1068_s2 + $0x20] sm:$0xff]   ;;  %v758_v5 = vld [vmem:[%s1068_s2 + $0x18] sm:$0xff]   ;;  %v759_v6 = vld [vmem:[%s1068_s2 + $0x10] sm:$0xff]   ;;  %297 = vmatprep.mubr.bf16.mxu1 %v820_v34 }
   0x3   :  { %713 = vmatprep.subr.bf16.mxu0 %v818_v0  ;;  %v760_v7 = vld [vmem:[%s1068_s2 + $0x8] sm:$0xff]   ;;  %v761_v8 = vld [vmem:[%s1068_s2] sm:$0xff]   ;;  %v762_v12 = vld [vmem:[%s1070_s4 + $0x74] ss:$8 sps:$4 sm:$0xff]  }
   0x4   :  { %v32_v9 = vld [vmem:[%s1069_s1] sm:$0xff]  ;;  %v33_v10 = vld [vmem:[%s1069_s1 + $0x8] sm:$0x3]  ;;  %v764_v13 = vld [vmem:[%s1070_s4 + $0x70] ss:$8 sps:$4 sm:$0xff]   ;;  %265 = vmatprep.subr.bf16.mxu1 %v762_v12 }
   0x5   :  { %v34_v11 = vpack.c.bf16 %v33_v10, %v32_v9  ;;  %266 = vmatpush1.bf16.msra.mxu1 %v764_v13  ;;  %v30_v14 = vld [vmem:[%s1071_s0] sm:$0xff]  ;;  %v31_v18 = vld [vmem:[%s1071_s0 + $0x8] sm:$0x3]  ;;  %v768_v27 = vld [vmem:[%s1070_s4 + $0x54] ss:$8 sps:$4 sm:$0xff]  }
   0x6   :  { %714 = vmatpush3.bf16.msra.mxu0 %v755_v2  ;;  %v765_v25 = vld [vmem:[%s1070_s4 + $0x64] ss:$8 sps:$4 sm:$0xff]   ;;  %v767_v26 = vld [vmem:[%s1070_s4 + $0x60] ss:$8 sps:$4 sm:$0xff]   ;;  %v770_v28 = vld [vmem:[%s1070_s4 + $0x50] ss:$8 sps:$4 sm:$0xff]  }
   0x7   :  { %715 = vmatprep.subr.bf16.mxu0 %v818_v0  ;;  %267 = vmatprep.subr.bf16.mxu1 %v765_v25  ;;  %v771_v29 = vld [vmem:[%s1070_s4 + $0x44] ss:$8 sps:$4 sm:$0xff]   ;;  %v773_v30 = vld [vmem:[%s1070_s4 + $0x40] ss:$8 sps:$4 sm:$0xff]   ;;  %v774_v31 = vld [vmem:[%s1070_s4 + $0x34] ss:$8 sps:$4 sm:$0xff]  }
   0x8   :  { %v776_v32 = vld [vmem:[%s1070_s4 + $0x30] ss:$8 sps:$4 sm:$0xff]   ;;  %v777_v33 = vld [vmem:[%s1070_s4 + $0x24] ss:$8 sps:$4 sm:$0xff]   ;;  %v779_v35 = vld [vmem:[%s1070_s4 + $0x20] ss:$8 sps:$4 sm:$0xff]  }
   0x9   :  { %268 = vmatpush1.bf16.msra.mxu1 %v767_v26  ;;  %v780_v36 = vld [vmem:[%s1070_s4 + $0x14] ss:$8 sps:$4 sm:$0xff]   ;;  %v782_v37 = vld [vmem:[%s1070_s4 + $0x10] ss:$8 sps:$4 sm:$0xff]   ;;  %v783_v38 = vld [vmem:[%s1070_s4 + $0x4] ss:$8 sps:$4 sm:$0xff]  }
   0xa   :  { %716 = vmatpush3.bf16.msra.mxu0 %v756_v3  ;;  %269 = vmatprep.subr.bf16.mxu1 %v768_v27  ;;  %v785_v39 = vld [vmem:[%s1070_s4] ss:$8 sps:$4 sm:$0xff]   ;;  %v786_v40 = vld [vmem:[%s1072_s5 + $0x78] sm:$0xff]   ;;  %v788_v42 = vld [vmem:[%s1072_s5 + $0x70] sm:$0xff]  }
   0xb   :  { %717 = vmatprep.subr.bf16.mxu0 %v818_v0  ;;  %v787_v41 = vld [vmem:[%s1072_s5 + $0x38] sm:$0xff]   ;;  %v789_v43 = vld [vmem:[%s1072_s5 + $0x30] sm:$0xff]   ;;  %v790_v44 = vld [vmem:[%s1072_s5 + $0x68] sm:$0xff]  }
   0xc   :  { %v791_v45 = vld [vmem:[%s1072_s5 + $0x28] sm:$0xff]   ;;  %v792_v46 = vld [vmem:[%s1072_s5 + $0x60] sm:$0xff]   ;;  %v794_v48 = vld [vmem:[%s1072_s5 + $0x58] sm:$0xff]  }
   0xd   :  { %270 = vmatpush1.bf16.msra.mxu1 %v770_v28  ;;  %v793_v47 = vld [vmem:[%s1072_s5 + $0x20] sm:$0xff]   ;;  %v795_v49 = vld [vmem:[%s1072_s5 + $0x18] sm:$0xff]   ;;  %v796_v1 = vld [vmem:[%s1072_s5 + $0x50] sm:$0xff]  }
   0xe   :  { %718 = vmatpush3.bf16.msra.mxu0 %v757_v4  ;;  %271 = vmatprep.subr.bf16.mxu1 %v771_v29  ;;  %v629_v59 = vld [vmem:[%s1073_s3] ss:$0 sm:$0xff]  ;;  %v797_v2 = vld [vmem:[%s1072_s5 + $0x10] sm:$0xff]   ;;  %v798_v3 = vld [vmem:[%s1072_s5 + $0x48] sm:$0xff]  }
   0xf   :  { %719 = vmatprep.subr.bf16.mxu0 %v818_v0  ;;  %v799_v4 = vld [vmem:[%s1072_s5 + $0x8] sm:$0xff]  }
  0x10   :  { %v808_v34 = vld [vmem:[%s1074_s7 + $0x8] sm:$0xff]  }
  0x11   :  { %272 = vmatpush1.bf16.msra.mxu1 %v773_v30 }
  0x12   :  { %720 = vmatpush3.bf16.msra.mxu0 %v758_v5  ;;  %273 = vmatprep.subr.bf16.mxu1 %v774_v31  ;;  %v800_v5 = vld [vmem:[%s1072_s5 + $0x40] sm:$0xff]   ;;  %v803_v31 = vld [vmem:[%s1074_s7 + $0x30] sm:$0xff]  }
  0x13   :  { %721 = vmatprep.subr.bf16.mxu0 %v818_v0 }
  0x15   :  { %274 = vmatpush1.bf16.msra.mxu1 %v776_v32  ;;  %v806_v32 = vld [vmem:[%s1074_s7 + $0x18] sm:$0xff]  }
  0x16   :  { %722 = vmatpush3.bf16.msra.mxu0 %v759_v6  ;;  %275 = vmatprep.subr.bf16.mxu1 %v777_v33  ;;  %v801_v6 = vld [vmem:[%s1072_s5] sm:$0xff]   ;;  %v807_v33 = vld [vmem:[%s1074_s7 + $0x10] sm:$0xff]  }
  0x17   :  { %723 = vmatprep.subr.bf16.mxu0 %v818_v0 }
  0x19   :  { %276 = vmatpush1.bf16.msra.mxu1 %v779_v35  ;;  %v809_v35 = vld [vmem:[%s1074_s7] sm:$0xff]  }
  0x1a   :  { %724 = vmatpush3.bf16.msra.mxu0 %v760_v7  ;;  %277 = vmatprep.subr.bf16.mxu1 %v780_v36 }
  0x1b   :  { %725 = vmatprep.subr.bf16.mxu0 %v818_v0 }
  0x1d   :  { %278 = vmatpush1.bf16.msra.mxu1 %v782_v37 }
  0x1e   :  { %726 = vmatpush3.bf16.msra.mxu0 %v761_v8  ;;  %279 = vmatprep.subr.bf16.mxu1 %v783_v38 }
  0x1f   :  { %680 = vmatprep.subr.bf16.mxu0 %v786_v40 }
  0x21   :  { %728 = vmatmul.mubr.bf16.vlgmr.msra.gmra.mxu0 %v34_v11  ;;  %280 = vmatpush1.bf16.msra.mxu1 %v785_v39 }
  0x22   :  { %731 = vmatprep.subr.bf16.mxu1 %v818_v0  ;;  %681 = vmatpush3.bf16.msra.mxu0 %v787_v41 }
  0x23   :  { %682 = vmatprep.subr.bf16.mxu0 %v788_v42 }
  0x26   :  { %683 = vmatpush3.bf16.msra.mxu0 %v789_v43 }
  0x27   :  { %684 = vmatprep.subr.bf16.mxu0 %v790_v44 }
  0x2a   :  { %685 = vmatpush3.bf16.msra.mxu0 %v791_v45  ;;  %v662_v45 = vld [vmem:[%s1075_s6] ss:$0 sm:$0xff] }
  0x2b   :  { %686 = vmatprep.subr.bf16.mxu0 %v792_v46 }
  0x2e   :  { %687 = vmatpush3.bf16.msra.mxu0 %v793_v47 }
  0x2f   :  { %688 = vmatprep.subr.bf16.mxu0 %v794_v48 }
  0x32   :  { %689 = vmatpush3.bf16.msra.mxu0 %v795_v49 }
  0x33   :  { %690 = vmatprep.subr.bf16.mxu0 %v796_v1 }
  0x36   :  { %691 = vmatpush3.bf16.msra.mxu0 %v797_v2 }
  0x37   :  { %692 = vmatprep.subr.bf16.mxu0 %v798_v3 }
  0x3a   :  { %693 = vmatpush3.bf16.msra.mxu0 %v799_v4 }
  0x3b   :  { %694 = vmatprep.subr.bf16.mxu0 %v800_v5 }
  0x3e   :  { %695 = vmatpush3.bf16.msra.mxu0 %v801_v6 }
  0xe1   :  { %v133_v15 = vpop.f32.mrf.mxu0 }
  0xe2   :  { %v915_v16 = vadd.f32 %v133_v15, %v30_v14 }
  0xe3   :  { %v729_v17 = vpop.f32.mrf.mxu0 }
  0xe4   :  { %v143_v19 = vmul.f32 %v915_v16, %v915_v16 }
  0xe5   :  { %v136_v20 = vpop.f32.mrf.mxu0 }
  0xe6   :  { %v922_v21 = vadd.f32 %v136_v20, %v31_v18  ;;  %145 = vadd.xlane.f32.xlu0 %v143_v19  ;;  %v802_v18 = vld [vmem:[%s1074_s7 + $0x38] sm:$0xff]  }
  0xe7   :  { %v730_v22 = vpop.f32.mrf.mxu0 }
  0xe8   :  { %v144_v23 = vmul.f32 %v922_v21, %v922_v21 }
  0xea   :  { %v148_v24 = vsel %vm147_vm1, %v144_v23, 0.0 }
  0xeb   :  { %149 = vadd.xlane.f32.xlu0 %v148_v24 }
 0x16f   :  { %v146_v50 = vpop.xlane.xlu0 %145 }
 0x170   :  { %v152_v51 = vmul.f32 0.0078125, %v146_v50 }
 0x172   :  { %v154_v52 = vadd.f32 1e-06, %v152_v51 }
 0x174   :  { %v150_v53 = vpop.xlane.xlu0 %149  ;;  %810 = vrsqrt.f32 %v154_v52 }
 0x175   :  { %v153_v54 = vmul.f32 0.0078125, %v150_v53 }
 0x177   :  { %v155_v55 = vadd.f32 1e-06, %v153_v54 }
 0x179   :  { %812 = vrsqrt.f32 %v155_v55 }
 0x181   :  { %v811_v56 = vpop.eup %810 }
 0x182   :  { %v158_v57 = vmul.f32 %v811_v56, %v915_v16 }
 0x184   :  { %v166_v61 = vmul.f32 %v629_v59, %v158_v57 }
 0x186   :  { %v813_v58 = vpop.eup %812 }
 0x187   :  { %v159_v60 = vmul.f32 %v813_v58, %v922_v21 }
 0x189   :  { %v167_v62 = vmul.f32 %v629_v59, %v159_v60 }
 0x18b   :  { %v168_v63 = vpack.c.bf16 %v167_v62, %v166_v61 }
 0x18d   :  { %298 = vmatmul.mubr.bf16.vlgmr.msra.gmra.mxu1 %v168_v63 }
 0x18e   :  { %747 = vmatprep.mubr.msk.bf16.mxu1 %vm819_vm0, %v818_v0  ;;  %732 = vmatpush3.bf16.msra.mxu1 %v802_v18 }
 0x18f   :  { %733 = vmatprep.subr.bf16.mxu1 %v818_v0 }
 0x192   :  { %734 = vmatpush3.bf16.msra.mxu1 %v803_v31 }
 0x193   :  { %735 = vmatprep.subr.bf16.mxu1 %v818_v0 }
 0x24d   :  { %v299_v7 = vpop.f32.mrf.mxu1 }
 0x24e   :  { %v308_v14 = vmax.f32 %v299_v7, 0.0 }
 0x24f   :  { %v301_v8 = vpop.f32.mrf.mxu1 }
 0x250   :  { %v309_v12 = vmax.f32 %v301_v8, 0.0 }
 0x251   :  { %v303_v9 = vpop.f32.mrf.mxu1 }
 0x252   :  { %v310_v10 = vmax.f32 %v303_v9, 0.0 }
 0x253   :  { %v305_v11 = vpop.f32.mrf.mxu1 }
 0x254   :  { %v311_v13 = vmax.f32 %v305_v11, 0.0  ;;  %v312_v17 = vpack.c.bf16 %v310_v10, %v308_v14 }
 0x256   :  { %v313_v15 = vpack.c.bf16 %v311_v13, %v309_v12 }
 0x258   :  { %474 = vmatprep.mubr.bf16.mxu0 %v313_v15 }
 0x259   :  { %475 = vmatmul.mubr.bf16.vlgmr.msra.gmra.mxu0 %v312_v17 }
 0x319   :  { %v696_v19 = vpop.f32.mrf.mxu0 }
 0x31b   :  { %v697_v20 = vpop.f32.mrf.mxu0 }
 0x31c   :  { %v698_v22 = vadd.f32 %v697_v20, %v696_v19 }
 0x31d   :  { %v699_v23 = vpop.f32.mrf.mxu0 }
 0x31e   :  { %v483_v24 = vadd.f32 %v698_v22, %v915_v16  ;;  %v804_v16 = vld [vmem:[%s1074_s7 + $0x28] sm:$0xff]  }
 0x31f   :  { %v700_v25 = vpop.f32.mrf.mxu0  ;;  %736 = vmatpush3.bf16.msra.mxu1 %v804_v16 }
 0x320   :  { %v701_v26 = vadd.f32 %v700_v25, %v699_v23  ;;  %v486_v27 = vmul.f32 %v483_v24, %v483_v24  ;;  %737 = vmatprep.subr.bf16.mxu1 %v818_v0 }
 0x322   :  { %v484_v28 = vadd.f32 %v701_v26, %v922_v21  ;;  %488 = vadd.xlane.f32.xlu1 %v486_v27  ;;  %v805_v21 = vld [vmem:[%s1074_s7 + $0x20] sm:$0xff]  }
 0x323   :  { %738 = vmatpush3.bf16.msra.mxu1 %v805_v21 }
 0x324   :  { %v487_v29 = vmul.f32 %v484_v28, %v484_v28  ;;  %739 = vmatprep.subr.bf16.mxu1 %v818_v0 }
 0x326   :  { %v490_v30 = vsel %vm147_vm1, %v487_v29, 0.0 }
 0x327   :  { %491 = vadd.xlane.f32.xlu1 %v490_v30  ;;  %740 = vmatpush3.bf16.msra.mxu1 %v806_v32 }
 0x328   :  { %741 = vmatprep.subr.bf16.mxu1 %v818_v0 }
 0x32b   :  { %742 = vmatpush3.bf16.msra.mxu1 %v807_v33 }
 0x32c   :  { %743 = vmatprep.subr.bf16.mxu1 %v818_v0 }
 0x32f   :  { %744 = vmatpush3.bf16.msra.mxu1 %v808_v34 }
 0x330   :  { %745 = vmatprep.subr.bf16.mxu1 %v818_v0 }
 0x333   :  { %746 = vmatpush3.bf16.msra.mxu1 %v809_v35 }
 0x3ab   :  { %v489_v36 = vpop.xlane.xlu1 %488 }
 0x3ac   :  { %v493_v37 = vmul.f32 0.0078125, %v489_v36 }
 0x3ae   :  { %v495_v38 = vadd.f32 1e-06, %v493_v37 }
 0x3b0   :  { %v492_v39 = vpop.xlane.xlu1 %491  ;;  %814 = vrsqrt.f32 %v495_v38 }
 0x3b1   :  { %v494_v40 = vmul.f32 0.0078125, %v492_v39 }
 0x3b3   :  { %v496_v41 = vadd.f32 1e-06, %v494_v40 }
 0x3b5   :  { %816 = vrsqrt.f32 %v496_v41 }
 0x3bd   :  { %v815_v42 = vpop.eup %814 }
 0x3be   :  { %v499_v43 = vmul.f32 %v815_v42, %v483_v24 }
 0x3c0   :  { %v507_v47 = vmul.f32 %v662_v45, %v499_v43 }
 0x3c2   :  { %v817_v44 = vpop.eup %816 }
 0x3c3   :  { %v500_v46 = vmul.f32 %v817_v44, %v484_v28 }
 0x3c5   :  { %v508_v48 = vmul.f32 %v662_v45, %v500_v46 }
 0x3c7   :  { %v509_v0 = vpack.c.bf16 %v508_v48, %v507_v47 }
 0x3c9   :  { %748 = vmatmul.mubr.bf16.vlgmr.msra.gmra.mxu1 %v509_v0 }
 0x489   :  { %v608_v49 = vpop.f32.mrf.mxu1 }
 0x48a   :  { %615 = vst [vmem:[%s1076_s8] sm:$0xff] %v608_v49 }
 0x48b   :  { %v749_v50 = vpop.f32.mrf.mxu1 }
 0x48d   :  { %v611_v51 = vpop.f32.mrf.mxu1 }
 0x48e   :  { %616 = vst [vmem:[%s1076_s8 + $0x8] sm:$0x3] %v611_v51 }
 0x48f   :  { %v750_v52 = vpop.f32.mrf.mxu1 }

// kernel: closed_call.84
= control target key start
LH: loop header
LB: loop body
LE: loop exit
PB: predicated region body
PF: predicated region fallthrough
CT: control target
= control target key end

     0   :  { %vm218_vm0 = vcmask 261120   ;;  %v5309_v0 = vmov 0.0   ;;  %vm5310_vm1 = vmmov 0   ;;  %vm2059_vm2 = vcmask 57344   ;;  %s6824_s1 = inlined_call_operand.vmem [shape: bf16[40,8,32], index: 1, kind: input, shape index: {}]   ;;  %s6825_s0 = inlined_call_operand.vmem [shape: f32[40,1,32], index: 0, kind: input, shape index: {}]   ;;  %s6826_s3 = inlined_call_operand.vmem [shape: f32[40,1,8], index: 3, kind: input, shape index: {}]   ;;  %s6827_s2 = inlined_call_operand.vmem [shape: bf16[40,8,32], index: 2, kind: input, shape index: {}]   ;;  %s6828_s4 = inlined_call_operand.vmem [shape: f32[40,1,32], index: 4, kind: output, shape index: {}]  }
   0x1   :  { %4667 = vmatprep.subr.bf16.mxu0 %v5309_v0  ;;  %4673 = vmatprep.subr.bf16.mxu1 %v5309_v0  ;;  %v98_v1 = vld [vmem:[%s6824_s1] sm:$0xf]  ;;  %v99_v2 = vld [vmem:[%s6824_s1 + $0x4] sm:$0xf]  ;;  %v100_v7 = vld [vmem:[%s6824_s1 + $0x8] sm:$0xf] }
   0x2   :  { %v223_v3 = vsel %vm218_vm0, %v98_v1, 0  ;;  %v269_v4 = vsel %vm218_vm0, %v99_v2, 0  ;;  %4669 = vmatprep.mubr.msk.bf16.mxu0 %vm5310_vm1, %v5309_v0  ;;  %4675 = vmatprep.mubr.msk.bf16.mxu1 %vm5310_vm1, %v5309_v0  ;;  %v18_v5 = vld [vmem:[%s6825_s0] sm:$0x1]  ;;  %v19_v6 = vld [vmem:[%s6825_s0 + $0x1] sm:$0x1] }
   0x3   :  { %4668 = vmatpush3.bf16.xpose.msra.mxu0 %v223_v3  ;;  %4674 = vmatpush3.bf16.xpose.msra.mxu1 %v269_v4  ;;  %v101_v8 = vld [vmem:[%s6824_s1 + $0xc] sm:$0xf]  ;;  %v58_v9 = vpack.c.bf16 %v18_v5, %v18_v5  ;;  %v59_v10 = vpack.c.bf16 %v19_v6, %v19_v6  ;;  %v315_v11 = vsel %vm218_vm0, %v100_v7, 0  ;;  %v20_v13 = vld [vmem:[%s6825_s0 + $0x2] sm:$0x1]  ;;  %vm2544_vm3 = vcmask 1043456  }
   0x4   :  { %4679 = vmatprep.subr.bf16.mxu0 %v5309_v0  ;;  %4685 = vmatprep.subr.bf16.mxu1 %v5309_v0  ;;  %v361_v12 = vsel %vm218_vm0, %v101_v8, 0  ;;  %v21_v14 = vld [vmem:[%s6825_s0 + $0x3] sm:$0x1]  ;;  %v102_v15 = vld [vmem:[%s6824_s1 + $0x10] sm:$0xf]  ;;  %v60_v17 = vpack.c.bf16 %v20_v13, %v20_v13  ;;  %vm2540_vm4 = vcmask 64512  }
   0x5   :  { %v103_v16 = vld [vmem:[%s6824_s1 + $0x14] sm:$0xf]  ;;  %v61_v18 = vpack.c.bf16 %v21_v14, %v21_v14  ;;  %v407_v19 = vsel %vm218_vm0, %v102_v15, 0  ;;  %v22_v21 = vld [vmem:[%s6825_s0 + $0x4] sm:$0x1]  ;;  %vm4382_vm5 = vcmask 253952  }
   0x6   :  { %v453_v20 = vsel %vm218_vm0, %v103_v16, 0  ;;  %v23_v22 = vld [vmem:[%s6825_s0 + $0x5] sm:$0x1]  ;;  %v104_v23 = vld [vmem:[%s6824_s1 + $0x18] sm:$0xf]  ;;  %v62_v25 = vpack.c.bf16 %v22_v21, %v22_v21 }
   0x7   :  { %v105_v24 = vld [vmem:[%s6824_s1 + $0x1c] sm:$0xf]  ;;  %v63_v26 = vpack.c.bf16 %v23_v22, %v23_v22  ;;  %v499_v27 = vsel %vm218_vm0, %v104_v23, 0  ;;  %v24_v29 = vld [vmem:[%s6825_s0 + $0x6] sm:$0x1] }
   0x8   :  { %v545_v28 = vsel %vm218_vm0, %v105_v24, 0  ;;  %v25_v30 = vld [vmem:[%s6825_s0 + $0x7] sm:$0x1]  ;;  %v106_v31 = vld [vmem:[%s6824_s1 + $0x20] sm:$0xf]  ;;  %v64_v33 = vpack.c.bf16 %v24_v29, %v24_v29 }
   0x9   :  { %v107_v32 = vld [vmem:[%s6824_s1 + $0x24] sm:$0xf]  ;;  %v65_v34 = vpack.c.bf16 %v25_v30, %v25_v30  ;;  %v591_v35 = vsel %vm218_vm0, %v106_v31, 0  ;;  %v26_v37 = vld [vmem:[%s6825_s0 + $0x8] sm:$0x1] }
   0xa   :  { %4670 = vmatmul.mubr.msk.bf16.vlgmr.msra.gmra.mxu0 %vm218_vm0, %v58_v9  ;;  %4676 = vmatmul.mubr.msk.bf16.vlgmr.msra.gmra.mxu1 %vm218_vm0, %v59_v10  ;;  %v637_v36 = vsel %vm218_vm0, %v107_v32, 0  ;;  %v27_v38 = vld [vmem:[%s6825_s0 + $0x9] sm:$0x1]  ;;  %v109_v40 = vld [vmem:[%s6824_s1 + $0x2c] sm:$0xf]  ;;  %v66_v41 = vpack.c.bf16 %v26_v37, %v26_v37 }
   0xb   :  { %4680 = vmatpush3.bf16.xpose.msra.mxu0 %v315_v11  ;;  %4686 = vmatpush3.bf16.xpose.msra.mxu1 %v361_v12  ;;  %v108_v39 = vld [vmem:[%s6824_s1 + $0x28] sm:$0xf]  ;;  %v67_v42 = vpack.c.bf16 %v27_v38, %v27_v38  ;;  %v729_v44 = vsel %vm218_vm0, %v109_v40, 0  ;;  %v110_v47 = vld [vmem:[%s6824_s1 + $0x30] sm:$0xf] }
   0xc   :  { %4681 = vmatprep.mubr.msk.bf16.mxu0 %vm5310_vm1, %v5309_v0  ;;  %4687 = vmatprep.mubr.msk.bf16.mxu1 %vm5310_vm1, %v5309_v0  ;;  %v683_v43 = vsel %vm218_vm0, %v108_v39, 0  ;;  %v28_v45 = vld [vmem:[%s6825_s0 + $0xa] sm:$0x1]  ;;  %v29_v46 = vld [vmem:[%s6825_s0 + $0xb] sm:$0x1]  ;;  %v775_v51 = vsel %vm218_vm0, %v110_v47, 0 }
   0xd   :  { %4691 = vmatprep.subr.bf16.mxu0 %v5309_v0  ;;  %4697 = vmatprep.subr.bf16.mxu1 %v5309_v0  ;;  %v111_v48 = vld [vmem:[%s6824_s1 + $0x34] sm:$0xf]  ;;  %v68_v49 = vpack.c.bf16 %v28_v45, %v28_v45  ;;  %v69_v50 = vpack.c.bf16 %v29_v46, %v29_v46  ;;  %v30_v53 = vld [vmem:[%s6825_s0 + $0xc] sm:$0x1]  ;;  %v31_v54 = vld [vmem:[%s6825_s0 + $0xd] sm:$0x1] }
   0xe   :  { %v821_v52 = vsel %vm218_vm0, %v111_v48, 0  ;;  %v112_v55 = vld [vmem:[%s6824_s1 + $0x38] sm:$0xf]  ;;  %v113_v56 = vld [vmem:[%s6824_s1 + $0x3c] sm:$0xf]  ;;  %v70_v57 = vpack.c.bf16 %v30_v53, %v30_v53  ;;  %v71_v58 = vpack.c.bf16 %v31_v54, %v31_v54 }
   0xf   :  { %v867_v59 = vsel %vm218_vm0, %v112_v55, 0  ;;  %v913_v60 = vsel %vm218_vm0, %v113_v56, 0  ;;  %v32_v61 = vld [vmem:[%s6825_s0 + $0xe] sm:$0x1]  ;;  %v33_v62 = vld [vmem:[%s6825_s0 + $0xf] sm:$0x1] }
  0x10   :  { %v114_v63 = vld [vmem:[%s6824_s1 + $0x40] sm:$0xf]  ;;  %v115_v1 = vld [vmem:[%s6824_s1 + $0x44] sm:$0xf]  ;;  %v72_v2 = vpack.c.bf16 %v32_v61, %v32_v61  ;;  %v73_v3 = vpack.c.bf16 %v33_v62, %v33_v62  ;;  %v34_v6 = vld [vmem:[%s6825_s0 + $0x10] sm:$0x1] }
  0x11   :  { %v959_v4 = vsel %vm218_vm0, %v114_v63, 0  ;;  %v1005_v5 = vsel %vm218_vm0, %v115_v1, 0  ;;  %v35_v7 = vld [vmem:[%s6825_s0 + $0x11] sm:$0x1]  ;;  %v116_v8 = vld [vmem:[%s6824_s1 + $0x48] sm:$0xf]  ;;  %v74_v10 = vpack.c.bf16 %v34_v6, %v34_v6 }
  0x12   :  { %4682 = vmatmul.mubr.msk.bf16.vlgmr.msra.gmra.mxu0 %vm218_vm0, %v60_v17  ;;  %4688 = vmatmul.mubr.msk.bf16.vlgmr.msra.gmra.mxu1 %vm218_vm0, %v61_v18  ;;  %v117_v9 = vld [vmem:[%s6824_s1 + $0x4c] sm:$0xf]  ;;  %v75_v11 = vpack.c.bf16 %v35_v7, %v35_v7  ;;  %v1051_v12 = vsel %vm218_vm0, %v116_v8, 0  ;;  %v36_v14 = vld [vmem:[%s6825_s0 + $0x12] sm:$0x1] }
  0x13   :  { %4692 = vmatpush3.bf16.xpose.msra.mxu0 %v407_v19  ;;  %4698 = vmatpush3.bf16.xpose.msra.mxu1 %v453_v20  ;;  %v1097_v13 = vsel %vm218_vm0, %v117_v9, 0  ;;  %v37_v15 = vld [vmem:[%s6825_s0 + $0x13] sm:$0x1]  ;;  %v119_v17 = vld [vmem:[%s6824_s1 + $0x54] sm:$0xf]  ;;  %v76_v18 = vpack.c.bf16 %v36_v14, %v36_v14 }
  0x14   :  { %4693 = vmatprep.mubr.msk.bf16.mxu0 %vm5310_vm1, %v5309_v0  ;;  %4699 = vmatprep.mubr.msk.bf16.mxu1 %vm5310_vm1, %v5309_v0  ;;  %v118_v16 = vld [vmem:[%s6824_s1 + $0x50] sm:$0xf]  ;;  %v77_v19 = vpack.c.bf16 %v37_v15, %v37_v15  ;;  %v1189_v21 = vsel %vm218_vm0, %v119_v17, 0  ;;  %v38_v22 = vld [vmem:[%s6825_s0 + $0x14] sm:$0x1] }
  0x15   :  { %4703 = vmatprep.subr.bf16.mxu0 %v5309_v0  ;;  %4709 = vmatprep.subr.bf16.mxu1 %v5309_v0  ;;  %v1143_v20 = vsel %vm218_vm0, %v118_v16, 0  ;;  %v39_v23 = vld [vmem:[%s6825_s0 + $0x15] sm:$0x1]  ;;  %v120_v24 = vld [vmem:[%s6824_s1 + $0x58] sm:$0xf] }
  0x16   :  { %v40_v30 = vld [vmem:[%s6825_s0 + $0x16] sm:$0x1]  ;;  %v41_v31 = vld [vmem:[%s6825_s0 + $0x17] sm:$0x1]  ;;  %v122_v32 = vld [vmem:[%s6824_s1 + $0x60] sm:$0xf] }
  0x17   :  { %v42_v38 = vld [vmem:[%s6825_s0 + $0x18] sm:$0x1]  ;;  %v43_v39 = vld [vmem:[%s6825_s0 + $0x19] sm:$0x1]  ;;  %v124_v40 = vld [vmem:[%s6824_s1 + $0x68] sm:$0xf] }
  0x18   :  { %v44_v46 = vld [vmem:[%s6825_s0 + $0x1a] sm:$0x1]  ;;  %v45_v47 = vld [vmem:[%s6825_s0 + $0x1b] sm:$0x1]  ;;  %v126_v48 = vld [vmem:[%s6824_s1 + $0x70] sm:$0xf] }
  0x19   :  { %v46_v54 = vld [vmem:[%s6825_s0 + $0x1c] sm:$0x1]  ;;  %v47_v55 = vld [vmem:[%s6825_s0 + $0x1d] sm:$0x1]  ;;  %v128_v56 = vld [vmem:[%s6824_s1 + $0x78] sm:$0xf] }
  0x1a   :  { %4694 = vmatmul.mubr.msk.bf16.vlgmr.msra.gmra.mxu0 %vm218_vm0, %v62_v25  ;;  %4700 = vmatmul.mubr.msk.bf16.vlgmr.msra.gmra.mxu1 %vm218_vm0, %v63_v26  ;;  %v121_v25 = vld [vmem:[%s6824_s1 + $0x5c] sm:$0xf]  ;;  %v78_v26 = vpack.c.bf16 %v38_v22, %v38_v22  ;;  %v130_v1 = vld [vmem:[%s6824_s1 + $0x80] sm:$0xf]  ;;  %v132_v9 = vld [vmem:[%s6824_s1 + $0x88] sm:$0xf] }
  0x1b   :  { %4704 = vmatpush3.bf16.xpose.msra.mxu0 %v499_v27  ;;  %4710 = vmatpush3.bf16.xpose.msra.mxu1 %v545_v28  ;;  %v79_v27 = vpack.c.bf16 %v39_v23, %v39_v23  ;;  %v1235_v28 = vsel %vm218_vm0, %v120_v24, 0  ;;  %v1281_v29 = vsel %vm218_vm0, %v121_v25, 0  ;;  %v48_v62 = vld [vmem:[%s6825_s0 + $0x1e] sm:$0x1]  ;;  %v49_v63 = vld [vmem:[%s6825_s0 + $0x1f] sm:$0x1] }
  0x1c   :  { %4705 = vmatprep.mubr.msk.bf16.mxu0 %vm5310_vm1, %v5309_v0  ;;  %4711 = vmatprep.mubr.msk.bf16.mxu1 %vm5310_vm1, %v5309_v0  ;;  %v50_v7 = vld [vmem:[%s6825_s0 + $0x20] sm:$0x1]  ;;  %v51_v8 = vld [vmem:[%s6825_s0 + $0x21] sm:$0x1]  ;;  %v52_v15 = vld [vmem:[%s6825_s0 + $0x22] sm:$0x1] }
  0x1d   :  { %4715 = vmatprep.subr.bf16.mxu0 %v5309_v0  ;;  %4721 = vmatprep.subr.bf16.mxu1 %v5309_v0  ;;  %v53_v16 = vld [vmem:[%s6825_s0 + $0x23] sm:$0x1]  ;;  %v134_v17 = vld [vmem:[%s6824_s1 + $0x90] sm:$0xf]  ;;  %v54_v23 = vld [vmem:[%s6825_s0 + $0x24] sm:$0x1] }
  0x1e   :  { %v55_v24 = vld [vmem:[%s6825_s0 + $0x25] sm:$0x1]  ;;  %v136_v25 = vld [vmem:[%s6824_s1 + $0x98] sm:$0xf] }
  0x22   :  { %4706 = vmatmul.mubr.msk.bf16.vlgmr.msra.gmra.mxu0 %vm218_vm0, %v64_v33  ;;  %4712 = vmatmul.mubr.msk.bf16.vlgmr.msra.gmra.mxu1 %vm218_vm0, %v65_v34  ;;  %v123_v33 = vld [vmem:[%s6824_s1 + $0x64] sm:$0xf]  ;;  %v80_v34 = vpack.c.bf16 %v40_v30, %v40_v30 }
  0x23   :  { %4716 = vmatpush3.bf16.xpose.msra.mxu0 %v591_v35  ;;  %4722 = vmatpush3.bf16.xpose.msra.mxu1 %v637_v36  ;;  %v81_v35 = vpack.c.bf16 %v41_v31, %v41_v31  ;;  %v1327_v36 = vsel %vm218_vm0, %v122_v32, 0  ;;  %v1373_v37 = vsel %vm218_vm0, %v123_v33, 0  ;;  %v56_v31 = vld [vmem:[%s6825_s0 + $0x26] sm:$0x1]  ;;  %v57_v32 = vld [vmem:[%s6825_s0 + $0x27] sm:$0x1] }
  0x24   :  { %4717 = vmatprep.mubr.msk.bf16.mxu0 %vm5310_vm1, %v5309_v0  ;;  %4723 = vmatprep.mubr.msk.bf16.mxu1 %vm5310_vm1, %v5309_v0  ;;  %v96_v33 = vpack.c.bf16 %v56_v31, %v56_v31 }
  0x25   :  { %4727 = vmatprep.subr.bf16.mxu0 %v5309_v0  ;;  %4733 = vmatprep.subr.bf16.mxu1 %v5309_v0 }
  0x2a   :  { %4718 = vmatmul.mubr.msk.bf16.vlgmr.msra.gmra.mxu0 %vm218_vm0, %v66_v41  ;;  %4724 = vmatmul.mubr.msk.bf16.vlgmr.msra.gmra.mxu1 %vm218_vm0, %v67_v42  ;;  %v125_v41 = vld [vmem:[%s6824_s1 + $0x6c] sm:$0xf]  ;;  %v82_v42 = vpack.c.bf16 %v42_v38, %v42_v38 }
  0x2b   :  { %4728 = vmatpush3.bf16.xpose.msra.mxu0 %v683_v43  ;;  %4734 = vmatpush3.bf16.xpose.msra.mxu1 %v729_v44  ;;  %v83_v43 = vpack.c.bf16 %v43_v39, %v43_v39  ;;  %v1419_v44 = vsel %vm218_vm0, %v124_v40, 0  ;;  %v1465_v45 = vsel %vm218_vm0, %v125_v41, 0 }
  0x2c   :  { %4729 = vmatprep.mubr.msk.bf16.mxu0 %vm5310_vm1, %v5309_v0  ;;  %4735 = vmatprep.mubr.msk.bf16.mxu1 %vm5310_vm1, %v5309_v0 }
  0x2d   :  { %4739 = vmatprep.subr.bf16.mxu0 %v5309_v0  ;;  %4745 = vmatprep.subr.bf16.mxu1 %v5309_v0 }
  0x32   :  { %4730 = vmatmul.mubr.msk.bf16.vlgmr.msra.gmra.mxu0 %vm218_vm0, %v68_v49  ;;  %4736 = vmatmul.mubr.msk.bf16.vlgmr.msra.gmra.mxu1 %vm218_vm0, %v69_v50  ;;  %v127_v49 = vld [vmem:[%s6824_s1 + $0x74] sm:$0xf]  ;;  %v84_v50 = vpack.c.bf16 %v44_v46, %v44_v46 }
  0x33   :  { %4740 = vmatpush3.bf16.xpose.msra.mxu0 %v775_v51  ;;  %4746 = vmatpush3.bf16.xpose.msra.mxu1 %v821_v52  ;;  %v85_v51 = vpack.c.bf16 %v45_v47, %v45_v47  ;;  %v1511_v52 = vsel %vm218_vm0, %v126_v48, 0  ;;  %v1557_v53 = vsel %vm218_vm0, %v127_v49, 0  ;;  %v181_v49 = vld [vmem:[%s6826_s3 + $0x3] sm:$0x1] }
  0x34   :  { %4741 = vmatprep.mubr.msk.bf16.mxu0 %vm5310_vm1, %v5309_v0  ;;  %4747 = vmatprep.mubr.msk.bf16.mxu1 %vm5310_vm1, %v5309_v0 }
  0x35   :  { %4751 = vmatprep.subr.bf16.mxu0 %v5309_v0  ;;  %4757 = vmatprep.subr.bf16.mxu1 %v5309_v0 }
  0x3a   :  { %4742 = vmatmul.mubr.msk.bf16.vlgmr.msra.gmra.mxu0 %vm218_vm0, %v70_v57  ;;  %4748 = vmatmul.mubr.msk.bf16.vlgmr.msra.gmra.mxu1 %vm218_vm0, %v71_v58  ;;  %v129_v57 = vld [vmem:[%s6824_s1 + $0x7c] sm:$0xf]  ;;  %v86_v58 = vpack.c.bf16 %v46_v54, %v46_v54 }
  0x3b   :  { %4752 = vmatpush3.bf16.xpose.msra.mxu0 %v867_v59  ;;  %4758 = vmatpush3.bf16.xpose.msra.mxu1 %v913_v60  ;;  %v87_v59 = vpack.c.bf16 %v47_v55, %v47_v55  ;;  %v1603_v60 = vsel %vm218_vm0, %v128_v56, 0  ;;  %v1649_v61 = vsel %vm218_vm0, %v129_v57, 0 }
  0x3c   :  { %4753 = vmatprep.mubr.msk.bf16.mxu0 %vm5310_vm1, %v5309_v0  ;;  %4759 = vmatprep.mubr.msk.bf16.mxu1 %vm5310_vm1, %v5309_v0 }
  0x3d   :  { %4763 = vmatprep.subr.bf16.mxu0 %v5309_v0  ;;  %4769 = vmatprep.subr.bf16.mxu1 %v5309_v0 }
  0x42   :  { %4754 = vmatmul.mubr.msk.bf16.vlgmr.msra.gmra.mxu0 %vm218_vm0, %v72_v2  ;;  %4760 = vmatmul.mubr.msk.bf16.vlgmr.msra.gmra.mxu1 %vm218_vm0, %v73_v3  ;;  %v131_v2 = vld [vmem:[%s6824_s1 + $0x84] sm:$0xf]  ;;  %v88_v3 = vpack.c.bf16 %v48_v62, %v48_v62 }
  0x43   :  { %4764 = vmatpush3.bf16.xpose.msra.mxu0 %v959_v4  ;;  %4770 = vmatpush3.bf16.xpose.msra.mxu1 %v1005_v5  ;;  %v89_v4 = vpack.c.bf16 %v49_v63, %v49_v63  ;;  %v1695_v5 = vsel %vm218_vm0, %v130_v1, 0  ;;  %v1741_v6 = vsel %vm218_vm0, %v131_v2, 0  ;;  %v183_v63 = vld [vmem:[%s6826_s3 + $0x5] sm:$0x1]  ;;  %v182_v1 = vld [vmem:[%s6826_s3 + $0x4] sm:$0x1] }
  0x44   :  { %4765 = vmatprep.mubr.msk.bf16.mxu0 %vm5310_vm1, %v5309_v0  ;;  %4771 = vmatprep.mubr.msk.bf16.mxu1 %vm5310_vm1, %v5309_v0 }
  0x45   :  { %4775 = vmatprep.subr.bf16.mxu0 %v5309_v0  ;;  %4781 = vmatprep.subr.bf16.mxu1 %v5309_v0 }
  0x4a   :  { %4766 = vmatmul.mubr.msk.bf16.vlgmr.msra.gmra.mxu0 %vm218_vm0, %v74_v10  ;;  %4772 = vmatmul.mubr.msk.bf16.vlgmr.msra.gmra.mxu1 %vm218_vm0, %v75_v11  ;;  %v133_v10 = vld [vmem:[%s6824_s1 + $0x8c] sm:$0xf]  ;;  %v90_v11 = vpack.c.bf16 %v50_v7, %v50_v7 }
  0x4b   :  { %4776 = vmatpush3.bf16.xpose.msra.mxu0 %v1051_v12  ;;  %4782 = vmatpush3.bf16.xpose.msra.mxu1 %v1097_v13  ;;  %v91_v12 = vpack.c.bf16 %v51_v8, %v51_v8  ;;  %v1787_v13 = vsel %vm218_vm0, %v132_v9, 0  ;;  %v1833_v14 = vsel %vm218_vm0, %v133_v10, 0 }
  0x4c   :  { %4777 = vmatprep.mubr.msk.bf16.mxu0 %vm5310_vm1, %v5309_v0  ;;  %4783 = vmatprep.mubr.msk.bf16.mxu1 %vm5310_vm1, %v5309_v0 }
  0x4d   :  { %4787 = vmatprep.subr.bf16.mxu0 %v5309_v0  ;;  %4793 = vmatprep.subr.bf16.mxu1 %v5309_v0 }
  0x52   :  { %4778 = vmatmul.mubr.msk.bf16.vlgmr.msra.gmra.mxu0 %vm218_vm0, %v76_v18  ;;  %4784 = vmatmul.mubr.msk.bf16.vlgmr.msra.gmra.mxu1 %vm218_vm0, %v77_v19  ;;  %v135_v18 = vld [vmem:[%s6824_s1 + $0x94] sm:$0xf]  ;;  %v92_v19 = vpack.c.bf16 %v52_v15, %v52_v15  ;;  %v185_v15 = vld [vmem:[%s6826_s3 + $0x7] sm:$0x1] }
  0x53   :  { %4788 = vmatpush3.bf16.xpose.msra.mxu0 %v1143_v20  ;;  %4794 = vmatpush3.bf16.xpose.msra.mxu1 %v1189_v21  ;;  %v93_v20 = vpack.c.bf16 %v53_v16, %v53_v16  ;;  %v1879_v21 = vsel %vm218_vm0, %v134_v17, 0  ;;  %v1925_v22 = vsel %vm218_vm0, %v135_v18, 0 }
  0x54   :  { %4789 = vmatprep.mubr.msk.bf16.mxu0 %vm5310_vm1, %v5309_v0  ;;  %4795 = vmatprep.mubr.msk.bf16.mxu1 %vm5310_vm1, %v5309_v0 }
  0x55   :  { %4799 = vmatprep.subr.bf16.mxu0 %v5309_v0  ;;  %4805 = vmatprep.subr.bf16.mxu1 %v5309_v0 }
  0x5a   :  { %4790 = vmatmul.mubr.msk.bf16.vlgmr.msra.gmra.mxu0 %vm218_vm0, %v78_v26  ;;  %4796 = vmatmul.mubr.msk.bf16.vlgmr.msra.gmra.mxu1 %vm218_vm0, %v79_v27  ;;  %v137_v26 = vld [vmem:[%s6824_s1 + $0x9c] sm:$0xf]  ;;  %v94_v27 = vpack.c.bf16 %v54_v23, %v54_v23 }
  0x5b   :  { %4800 = vmatpush3.bf16.xpose.msra.mxu0 %v1235_v28  ;;  %4806 = vmatpush3.bf16.xpose.msra.mxu1 %v1281_v29  ;;  %v95_v28 = vpack.c.bf16 %v55_v24, %v55_v24  ;;  %v1971_v29 = vsel %vm218_vm0, %v136_v25, 0  ;;  %v2017_v30 = vsel %vm218_vm0, %v137_v26, 0 }
  0x5c   :  { %4801 = vmatprep.mubr.msk.bf16.mxu0 %vm5310_vm1, %v5309_v0  ;;  %4807 = vmatprep.mubr.msk.bf16.mxu1 %vm5310_vm1, %v5309_v0 }
  0x5d   :  { %4811 = vmatprep.subr.bf16.mxu0 %v5309_v0  ;;  %4817 = vmatprep.subr.bf16.mxu1 %v5309_v0 }
  0x62   :  { %4802 = vmatmul.mubr.msk.bf16.vlgmr.msra.gmra.mxu0 %vm218_vm0, %v80_v34  ;;  %4808 = vmatmul.mubr.msk.bf16.vlgmr.msra.gmra.mxu1 %vm218_vm0, %v81_v35  ;;  %v97_v34 = vpack.c.bf16 %v57_v32, %v57_v32  ;;  %v178_v35 = vld [vmem:[%s6826_s3] sm:$0x1] }
  0x63   :  { %4812 = vmatpush3.bf16.xpose.msra.mxu0 %v1327_v36  ;;  %4818 = vmatpush3.bf16.xpose.msra.mxu1 %v1373_v37  ;;  %v179_v36 = vld [vmem:[%s6826_s3 + $0x1] sm:$0x1] }
  0x64   :  { %4813 = vmatprep.mubr.msk.bf16.mxu0 %vm5310_vm1, %v5309_v0  ;;  %4819 = vmatprep.mubr.msk.bf16.mxu1 %vm5310_vm1, %v5309_v0 }
  0x65   :  { %4823 = vmatprep.subr.bf16.mxu0 %v5309_v0  ;;  %4829 = vmatprep.subr.bf16.mxu1 %v5309_v0 }
  0x6a   :  { %4814 = vmatmul.mubr.msk.bf16.vlgmr.msra.gmra.mxu0 %vm218_vm0, %v82_v42  ;;  %4820 = vmatmul.mubr.msk.bf16.vlgmr.msra.gmra.mxu1 %vm218_vm0, %v83_v43 }
  0x6b   :  { %4824 = vmatpush3.bf16.xpose.msra.mxu0 %v1419_v44  ;;  %4830 = vmatpush3.bf16.xpose.msra.mxu1 %v1465_v45 }
  0x6c   :  { %4825 = vmatprep.mubr.msk.bf16.mxu0 %vm5310_vm1, %v5309_v0  ;;  %4831 = vmatprep.mubr.msk.bf16.mxu1 %vm5310_vm1, %v5309_v0 }
  0x6d   :  { %4835 = vmatprep.subr.bf16.mxu0 %v5309_v0  ;;  %4841 = vmatprep.subr.bf16.mxu1 %v5309_v0 }
  0x72   :  { %4826 = vmatmul.mubr.msk.bf16.vlgmr.msra.gmra.mxu0 %vm218_vm0, %v84_v50  ;;  %4832 = vmatmul.mubr.msk.bf16.vlgmr.msra.gmra.mxu1 %vm218_vm0, %v85_v51  ;;  %v180_v50 = vld [vmem:[%s6826_s3 + $0x2] sm:$0x1] }
  0x73   :  { %4836 = vmatpush3.bf16.xpose.msra.mxu0 %v1511_v52  ;;  %4842 = vmatpush3.bf16.xpose.msra.mxu1 %v1557_v53 }
  0x74   :  { %4837 = vmatprep.mubr.msk.bf16.mxu0 %vm5310_vm1, %v5309_v0  ;;  %4843 = vmatprep.mubr.msk.bf16.mxu1 %vm5310_vm1, %v5309_v0 }
  0x75   :  { %4847 = vmatprep.subr.bf16.mxu0 %v5309_v0  ;;  %4853 = vmatprep.subr.bf16.mxu1 %v5309_v0 }
  0x7a   :  { %4838 = vmatmul.mubr.msk.bf16.vlgmr.msra.gmra.mxu0 %vm218_vm0, %v86_v58  ;;  %4844 = vmatmul.mubr.msk.bf16.vlgmr.msra.gmra.mxu1 %vm218_vm0, %v87_v59 }
  0x7b   :  { %4848 = vmatpush3.bf16.xpose.msra.mxu0 %v1603_v60  ;;  %4854 = vmatpush3.bf16.xpose.msra.mxu1 %v1649_v61 }
  0x7c   :  { %4849 = vmatprep.mubr.msk.bf16.mxu0 %vm5310_vm1, %v5309_v0  ;;  %4855 = vmatprep.mubr.msk.bf16.mxu1 %vm5310_vm1, %v5309_v0 }
  0x7d   :  { %4859 = vmatprep.subr.bf16.mxu0 %v5309_v0  ;;  %4865 = vmatprep.subr.bf16.mxu1 %v5309_v0 }
  0x82   :  { %4850 = vmatmul.mubr.msk.bf16.vlgmr.msra.gmra.mxu0 %vm218_vm0, %v88_v3  ;;  %4856 = vmatmul.mubr.msk.bf16.vlgmr.msra.gmra.mxu1 %vm218_vm0, %v89_v4 }
  0x83   :  { %4860 = vmatpush3.bf16.xpose.msra.mxu0 %v1695_v5  ;;  %4866 = vmatpush3.bf16.xpose.msra.mxu1 %v1741_v6 }
  0x84   :  { %4861 = vmatprep.mubr.msk.bf16.mxu0 %vm5310_vm1, %v5309_v0  ;;  %4867 = vmatprep.mubr.msk.bf16.mxu1 %vm5310_vm1, %v5309_v0 }
  0x85   :  { %4871 = vmatprep.subr.bf16.mxu0 %v5309_v0  ;;  %4877 = vmatprep.subr.bf16.mxu1 %v5309_v0 }
  0x8a   :  { %4862 = vmatmul.mubr.msk.bf16.vlgmr.msra.gmra.mxu0 %vm218_vm0, %v90_v11  ;;  %4868 = vmatmul.mubr.msk.bf16.vlgmr.msra.gmra.mxu1 %vm218_vm0, %v91_v12 }
  0x8b   :  { %4872 = vmatpush3.bf16.xpose.msra.mxu0 %v1787_v13  ;;  %4878 = vmatpush3.bf16.xpose.msra.mxu1 %v1833_v14  ;;  %v184_v14 = vld [vmem:[%s6826_s3 + $0x6] sm:$0x1] }
  0x8c   :  { %4873 = vmatprep.mubr.msk.bf16.mxu0 %vm5310_vm1, %v5309_v0  ;;  %4879 = vmatprep.mubr.msk.bf16.mxu1 %vm5310_vm1, %v5309_v0 }
  0x8d   :  { %4883 = vmatprep.subr.bf16.mxu0 %v5309_v0  ;;  %4889 = vmatprep.subr.bf16.mxu1 %v5309_v0 }
  0x92   :  { %4874 = vmatmul.mubr.msk.bf16.vlgmr.msra.gmra.mxu0 %vm218_vm0, %v92_v19  ;;  %4880 = vmatmul.mubr.msk.bf16.vlgmr.msra.gmra.mxu1 %vm218_vm0, %v93_v20 }
  0x93   :  { %4884 = vmatpush3.bf16.xpose.msra.mxu0 %v1879_v21  ;;  %4890 = vmatpush3.bf16.xpose.msra.mxu1 %v1925_v22 }
  0x94   :  { %4885 = vmatprep.mubr.msk.bf16.mxu0 %vm5310_vm1, %v5309_v0  ;;  %4891 = vmatprep.mubr.msk.bf16.mxu1 %vm5310_vm1, %v5309_v0 }
  0x95   :  { %4895 = vmatprep.subr.bf16.mxu0 %v5309_v0  ;;  %4901 = vmatprep.subr.bf16.mxu1 %v5309_v0 }
  0x9a   :  { %4886 = vmatmul.mubr.msk.bf16.vlgmr.msra.gmra.mxu0 %vm218_vm0, %v94_v27  ;;  %4892 = vmatmul.mubr.msk.bf16.vlgmr.msra.gmra.mxu1 %vm218_vm0, %v95_v28  ;;  %v186_v28 = vld [vmem:[%s6826_s3 + $0x8] sm:$0x1] }
  0x9b   :  { %4896 = vmatpush3.bf16.xpose.msra.mxu0 %v1971_v29  ;;  %4902 = vmatpush3.bf16.xpose.msra.mxu1 %v2017_v30  ;;  %v187_v29 = vld [vmem:[%s6826_s3 + $0x9] sm:$0x1] }
  0x9c   :  { %4897 = vmatprep.mubr.msk.bf16.mxu0 %vm5310_vm1, %v5309_v0  ;;  %4903 = vmatprep.mubr.msk.bf16.mxu1 %vm5310_vm1, %v5309_v0 }
  0x9d   :  { %4907 = vmatprep.subr.bf16.mxu0 %v5309_v0  ;;  %4913 = vmatprep.subr.bf16.mxu1 %v5309_v0 }
  0xa2   :  { %4898 = vmatmul.mubr.msk.bf16.vlgmr.msra.gmra.mxu0 %vm218_vm0, %v96_v33  ;;  %4904 = vmatmul.mubr.msk.bf16.vlgmr.msra.gmra.mxu1 %vm218_vm0, %v97_v34 }
  0xa3   :  { %4909 = vmatprep.mubr.msk.bf16.mxu0 %vm5310_vm1, %v5309_v0  ;;  %4915 = vmatprep.mubr.msk.bf16.mxu1 %vm5310_vm1, %v5309_v0 }
  0xca   :  { %v259_v37 = vpop.f32.mrf.mxu0  ;;  %v305_v38 = vpop.f32.mrf.mxu1 }
  0xcb   :  { %v5788_v39 = vadd.f32 %v259_v37, %v178_v35  ;;  %v5790_v40 = vadd.f32 %v305_v38, %v179_v36 }
  0xcc   :  { %v4671_v41 = vpop.f32.mrf.mxu0  ;;  %v4677_v42 = vpop.f32.mrf.mxu1 }
  0xcd   :  { %v2060_v43 = vsel %vm2059_vm2, %v5788_v39, -inf  ;;  %v2063_v46 = vsel %vm2059_vm2, %v5790_v40, -inf }
  0xce   :  { %v308_v44 = vpop.f32.mrf.mxu1  ;;  %2061 = vmax.xlane.f32.xlu0 %v2060_v43  ;;  %v262_v45 = vpop.f32.mrf.mxu0 }
  0xcf   :  { %v188_v44 = vld [vmem:[%s6826_s3 + $0xa] sm:$0x1]  ;;  %v189_v45 = vld [vmem:[%s6826_s3 + $0xb] sm:$0x1] }
  0xd0   :  { %v4672_v47 = vpop.f32.mrf.mxu0  ;;  %v4678_v48 = vpop.f32.mrf.mxu1 }
  0xd2   :  { %v397_v51 = vpop.f32.mrf.mxu1  ;;  %2064 = vmax.xlane.f32.xlu0 %v2063_v46  ;;  %v351_v52 = vpop.f32.mrf.mxu0 }
  0xd3   :  { %v5802_v53 = vadd.f32 %v397_v51, %v181_v49  ;;  %v5804_v54 = vadd.f32 %v351_v52, %v180_v50 }
  0xd4   :  { %v4683_v55 = vpop.f32.mrf.mxu0  ;;  %v4689_v56 = vpop.f32.mrf.mxu1 }
  0xd5   :  { %v2066_v57 = vsel %vm2059_vm2, %v5804_v54, -inf  ;;  %v2069_v60 = vsel %vm2059_vm2, %v5802_v53, -inf }
  0xd6   :  { %v400_v58 = vpop.f32.mrf.mxu1  ;;  %2067 = vmax.xlane.f32.xlu1 %v2066_v57  ;;  %v354_v59 = vpop.f32.mrf.mxu0 }
  0xd8   :  { %v4684_v61 = vpop.f32.mrf.mxu0  ;;  %v4690_v62 = vpop.f32.mrf.mxu1 }
  0xd9   :  { %v191_v61 = vld [vmem:[%s6826_s3 + $0xd] sm:$0x1] }
  0xda   :  { %v489_v2 = vpop.f32.mrf.mxu1  ;;  %2070 = vmax.xlane.f32.xlu1 %v2069_v60  ;;  %v443_v3 = vpop.f32.mrf.mxu0  ;;  %v190_v60 = vld [vmem:[%s6826_s3 + $0xc] sm:$0x1] }
  0xdb   :  { %v5816_v4 = vadd.f32 %v489_v2, %v183_v63  ;;  %v5818_v5 = vadd.f32 %v443_v3, %v182_v1 }
  0xdc   :  { %v4695_v6 = vpop.f32.mrf.mxu0  ;;  %v4701_v7 = vpop.f32.mrf.mxu1 }
  0xdd   :  { %v2075_v8 = vsel %vm2059_vm2, %v5816_v4, -inf  ;;  %v2072_v9 = vsel %vm2059_vm2, %v5818_v5, -inf }
  0xde   :  { %v492_v10 = vpop.f32.mrf.mxu1  ;;  %2076 = vmax.xlane.f32.xlu1 %v2075_v8  ;;  %2073 = vmax.xlane.f32.xlu0 %v2072_v9  ;;  %v446_v11 = vpop.f32.mrf.mxu0 }
  0xe0   :  { %v4696_v12 = vpop.f32.mrf.mxu0  ;;  %v4702_v13 = vpop.f32.mrf.mxu1 }
  0xe1   :  { %v192_v13 = vld [vmem:[%s6826_s3 + $0xe] sm:$0x1] }
  0xe2   :  { %v535_v16 = vpop.f32.mrf.mxu0  ;;  %v581_v17 = vpop.f32.mrf.mxu1 }
  0xe3   :  { %v5830_v18 = vadd.f32 %v535_v16, %v184_v14  ;;  %v5832_v19 = vadd.f32 %v581_v17, %v185_v15  ;;  %v193_v14 = vld [vmem:[%s6826_s3 + $0xf] sm:$0x1] }
  0xe4   :  { %v4707_v20 = vpop.f32.mrf.mxu0  ;;  %v4713_v21 = vpop.f32.mrf.mxu1 }
  0xe5   :  { %v2081_v22 = vsel %vm2059_vm2, %v5832_v19, -inf  ;;  %v2078_v23 = vsel %vm2059_vm2, %v5830_v18, -inf }
  0xe6   :  { %v584_v24 = vpop.f32.mrf.mxu1  ;;  %2082 = vmax.xlane.f32.xlu1 %v2081_v22  ;;  %2079 = vmax.xlane.f32.xlu0 %v2078_v23  ;;  %v538_v25 = vpop.f32.mrf.mxu0 }
  0xe8   :  { %v4708_v26 = vpop.f32.mrf.mxu0  ;;  %v4714_v27 = vpop.f32.mrf.mxu1 }
  0xea   :  { %v627_v30 = vpop.f32.mrf.mxu0  ;;  %v673_v31 = vpop.f32.mrf.mxu1 }
  0xeb   :  { %v5844_v32 = vadd.f32 %v627_v30, %v186_v28  ;;  %v5846_v33 = vadd.f32 %v673_v31, %v187_v29  ;;  %v194_v29 = vld [vmem:[%s6826_s3 + $0x10] sm:$0x1]  ;;  %v195_v30 = vld [vmem:[%s6826_s3 + $0x11] sm:$0x1] }
  0xec   :  { %v4719_v34 = vpop.f32.mrf.mxu0  ;;  %v4725_v35 = vpop.f32.mrf.mxu1 }
  0xed   :  { %v2087_v36 = vsel %vm2059_vm2, %v5846_v33, -inf  ;;  %v2084_v37 = vsel %vm2059_vm2, %v5844_v32, -inf }
  0xee   :  { %v676_v38 = vpop.f32.mrf.mxu1  ;;  %2088 = vmax.xlane.f32.xlu1 %v2087_v36  ;;  %2085 = vmax.xlane.f32.xlu0 %v2084_v37  ;;  %v630_v41 = vpop.f32.mrf.mxu0 }
  0xf0   :  { %v4720_v42 = vpop.f32.mrf.mxu0  ;;  %v4726_v43 = vpop.f32.mrf.mxu1 }
  0xf2   :  { %v719_v46 = vpop.f32.mrf.mxu0  ;;  %v765_v47 = vpop.f32.mrf.mxu1 }
  0xf3   :  { %v5858_v48 = vadd.f32 %v719_v46, %v188_v44  ;;  %v5860_v49 = vadd.f32 %v765_v47, %v189_v45  ;;  %v196_v47 = vld [vmem:[%s6826_s3 + $0x12] sm:$0x1] }
  0xf4   :  { %v4731_v50 = vpop.f32.mrf.mxu0  ;;  %v4737_v51 = vpop.f32.mrf.mxu1 }
  0xf5   :  { %v2093_v52 = vsel %vm2059_vm2, %v5860_v49, -inf  ;;  %v2090_v55 = vsel %vm2059_vm2, %v5858_v48, -inf  ;;  %v197_v50 = vld [vmem:[%s6826_s3 + $0x13] sm:$0x1] }
  0xf6   :  { %v768_v56 = vpop.f32.mrf.mxu1  ;;  %2094 = vmax.xlane.f32.xlu1 %v2093_v52  ;;  %2091 = vmax.xlane.f32.xlu0 %v2090_v55  ;;  %v722_v57 = vpop.f32.mrf.mxu0 }
  0xf8   :  { %v4732_v58 = vpop.f32.mrf.mxu0  ;;  %v4738_v59 = vpop.f32.mrf.mxu1 }
  0xfa   :  { %v811_v62 = vpop.f32.mrf.mxu0  ;;  %v857_v63 = vpop.f32.mrf.mxu1 }
  0xfb   :  { %v5872_v1 = vadd.f32 %v811_v62, %v190_v60  ;;  %v5874_v2 = vadd.f32 %v857_v63, %v191_v61 }
  0xfc   :  { %v4743_v3 = vpop.f32.mrf.mxu0  ;;  %v4749_v6 = vpop.f32.mrf.mxu1 }
  0xfd   :  { %v2099_v7 = vsel %vm2059_vm2, %v5874_v2, -inf  ;;  %v2096_v8 = vsel %vm2059_vm2, %v5872_v1, -inf  ;;  %v198_v6 = vld [vmem:[%s6826_s3 + $0x14] sm:$0x1] }
  0xfe   :  { %v860_v9 = vpop.f32.mrf.mxu1  ;;  %2100 = vmax.xlane.f32.xlu1 %v2099_v7  ;;  %2097 = vmax.xlane.f32.xlu0 %v2096_v8  ;;  %v814_v10 = vpop.f32.mrf.mxu0  ;;  %v199_v7 = vld [vmem:[%s6826_s3 + $0x15] sm:$0x1] }
 0x100   :  { %v4744_v11 = vpop.f32.mrf.mxu0  ;;  %v4750_v12 = vpop.f32.mrf.mxu1 }
 0x102   :  { %v903_v15 = vpop.f32.mrf.mxu0  ;;  %v949_v16 = vpop.f32.mrf.mxu1 }
 0x103   :  { %v5886_v17 = vadd.f32 %v903_v15, %v192_v13  ;;  %v5888_v20 = vadd.f32 %v949_v16, %v193_v14 }
 0x104   :  { %v4755_v21 = vpop.f32.mrf.mxu0  ;;  %v4761_v22 = vpop.f32.mrf.mxu1 }
 0x105   :  { %v2105_v23 = vsel %vm2059_vm2, %v5888_v20, -inf  ;;  %v2102_v24 = vsel %vm2059_vm2, %v5886_v17, -inf }
 0x106   :  { %v952_v25 = vpop.f32.mrf.mxu1  ;;  %2106 = vmax.xlane.f32.xlu1 %v2105_v23  ;;  %2103 = vmax.xlane.f32.xlu0 %v2102_v24  ;;  %v906_v26 = vpop.f32.mrf.mxu0  ;;  %v200_v24 = vld [vmem:[%s6826_s3 + $0x16] sm:$0x1] }
 0x107   :  { %v201_v25 = vld [vmem:[%s6826_s3 + $0x17] sm:$0x1] }
 0x108   :  { %v4756_v27 = vpop.f32.mrf.mxu0  ;;  %v4762_v28 = vpop.f32.mrf.mxu1 }
 0x10a   :  { %v995_v31 = vpop.f32.mrf.mxu0  ;;  %v1041_v34 = vpop.f32.mrf.mxu1 }
 0x10b   :  { %v5900_v35 = vadd.f32 %v995_v31, %v194_v29  ;;  %v5902_v36 = vadd.f32 %v1041_v34, %v195_v30 }
 0x10c   :  { %v4767_v37 = vpop.f32.mrf.mxu0  ;;  %v4773_v38 = vpop.f32.mrf.mxu1 }
 0x10d   :  { %v2111_v41 = vsel %vm2059_vm2, %v5902_v36, -inf  ;;  %v2108_v42 = vsel %vm2059_vm2, %v5900_v35, -inf }
 0x10e   :  { %v1044_v43 = vpop.f32.mrf.mxu1  ;;  %2112 = vmax.xlane.f32.xlu1 %v2111_v41  ;;  %2109 = vmax.xlane.f32.xlu0 %v2108_v42  ;;  %v998_v44 = vpop.f32.mrf.mxu0 }
 0x110   :  { %v4768_v45 = vpop.f32.mrf.mxu0  ;;  %v4774_v46 = vpop.f32.mrf.mxu1 }
 0x112   :  { %v1087_v51 = vpop.f32.mrf.mxu0  ;;  %v1133_v52 = vpop.f32.mrf.mxu1 }
 0x113   :  { %v5914_v55 = vadd.f32 %v1087_v51, %v196_v47  ;;  %v5916_v56 = vadd.f32 %v1133_v52, %v197_v50 }
 0x114   :  { %v4779_v57 = vpop.f32.mrf.mxu0  ;;  %v4785_v58 = vpop.f32.mrf.mxu1 }
 0x115   :  { %v2117_v59 = vsel %vm2059_vm2, %v5916_v56, -inf  ;;  %v2114_v60 = vsel %vm2059_vm2, %v5914_v55, -inf }
 0x116   :  { %v1136_v61 = vpop.f32.mrf.mxu1  ;;  %2118 = vmax.xlane.f32.xlu1 %v2117_v59  ;;  %2115 = vmax.xlane.f32.xlu0 %v2114_v60  ;;  %v1090_v62 = vpop.f32.mrf.mxu0 }
 0x118   :  { %v4780_v63 = vpop.f32.mrf.mxu0  ;;  %v4786_v3 = vpop.f32.mrf.mxu1 }
 0x11a   :  { %v1179_v8 = vpop.f32.mrf.mxu0  ;;  %v1225_v9 = vpop.f32.mrf.mxu1 }
 0x11b   :  { %v5928_v10 = vadd.f32 %v1179_v8, %v198_v6  ;;  %v5930_v11 = vadd.f32 %v1225_v9, %v199_v7 }
 0x11c   :  { %v4791_v12 = vpop.f32.mrf.mxu0  ;;  %v4797_v13 = vpop.f32.mrf.mxu1 }
 0x11d   :  { %v2123_v14 = vsel %vm2059_vm2, %v5930_v11, -inf  ;;  %v2120_v15 = vsel %vm2059_vm2, %v5928_v10, -inf }
 0x11e   :  { %v1228_v16 = vpop.f32.mrf.mxu1  ;;  %2124 = vmax.xlane.f32.xlu1 %v2123_v14  ;;  %2121 = vmax.xlane.f32.xlu0 %v2120_v15  ;;  %v1182_v21 = vpop.f32.mrf.mxu0 }
 0x120   :  { %v4792_v22 = vpop.f32.mrf.mxu0  ;;  %v4798_v23 = vpop.f32.mrf.mxu1 }
 0x122   :  { %v1271_v26 = vpop.f32.mrf.mxu0  ;;  %v1317_v27 = vpop.f32.mrf.mxu1 }
 0x123   :  { %v5942_v28 = vadd.f32 %v1271_v26, %v200_v24  ;;  %v5944_v29 = vadd.f32 %v1317_v27, %v201_v25 }
 0x124   :  { %v4803_v30 = vpop.f32.mrf.mxu0  ;;  %v4809_v31 = vpop.f32.mrf.mxu1 }
 0x125   :  { %v2129_v34 = vsel %vm2059_vm2, %v5944_v29, -inf  ;;  %v2126_v37 = vsel %vm2059_vm2, %v5942_v28, -inf }
 0x126   :  { %2130 = vmax.xlane.f32.xlu1 %v2129_v34  ;;  %2127 = vmax.xlane.f32.xlu0 %v2126_v37  ;;  %v1274_v38 = vpop.f32.mrf.mxu0  ;;  %v1320_v41 = vpop.f32.mrf.mxu1 }
 0x128   :  { %v4804_v42 = vpop.f32.mrf.mxu0  ;;  %v4810_v43 = vpop.f32.mrf.mxu1 }
 0x12a   :  { %v5950_v44 = vpop.f32.mrf.mxu0  ;;  %v5952_v45 = vpop.f32.mrf.mxu1 }
 0x12c   :  { %v4815_v46 = vpop.f32.mrf.mxu0  ;;  %v4821_v47 = vpop.f32.mrf.mxu1 }
 0x12e   :  { %v1366_v50 = vpop.f32.mrf.mxu0  ;;  %v1412_v51 = vpop.f32.mrf.mxu1 }
 0x130   :  { %v4816_v52 = vpop.f32.mrf.mxu0  ;;  %v4822_v57 = vpop.f32.mrf.mxu1 }
 0x132   :  { %v5954_v58 = vpop.f32.mrf.mxu0  ;;  %v5956_v59 = vpop.f32.mrf.mxu1 }
 0x134   :  { %v4827_v60 = vpop.f32.mrf.mxu0  ;;  %v4833_v61 = vpop.f32.mrf.mxu1 }
 0x136   :  { %v1458_v62 = vpop.f32.mrf.mxu0  ;;  %v1504_v63 = vpop.f32.mrf.mxu1 }
 0x138   :  { %v4828_v3 = vpop.f32.mrf.mxu0  ;;  %v4834_v6 = vpop.f32.mrf.mxu1 }
 0x13a   :  { %v5958_v7 = vpop.f32.mrf.mxu0  ;;  %v5960_v8 = vpop.f32.mrf.mxu1 }
 0x13c   :  { %v4839_v9 = vpop.f32.mrf.mxu0  ;;  %v4845_v12 = vpop.f32.mrf.mxu1 }
 0x13e   :  { %v1550_v13 = vpop.f32.mrf.mxu0  ;;  %v1596_v14 = vpop.f32.mrf.mxu1 }
 0x140   :  { %v4840_v15 = vpop.f32.mrf.mxu0  ;;  %v4846_v16 = vpop.f32.mrf.mxu1 }
 0x142   :  { %v5962_v21 = vpop.f32.mrf.mxu0  ;;  %v5964_v22 = vpop.f32.mrf.mxu1 }
 0x144   :  { %v4851_v23 = vpop.f32.mrf.mxu0  ;;  %v4857_v24 = vpop.f32.mrf.mxu1 }
 0x146   :  { %v1642_v25 = vpop.f32.mrf.mxu0  ;;  %v1688_v26 = vpop.f32.mrf.mxu1 }
 0x148   :  { %v4852_v27 = vpop.f32.mrf.mxu0  ;;  %v4858_v30 = vpop.f32.mrf.mxu1 }
 0x14a   :  { %v5966_v31 = vpop.f32.mrf.mxu0  ;;  %v5968_v34 = vpop.f32.mrf.mxu1 }
 0x14c   :  { %v4863_v37 = vpop.f32.mrf.mxu0  ;;  %v4869_v38 = vpop.f32.mrf.mxu1 }
 0x14e   :  { %v1734_v41 = vpop.f32.mrf.mxu0  ;;  %v1780_v42 = vpop.f32.mrf.mxu1 }
 0x150   :  { %v4864_v43 = vpop.f32.mrf.mxu0  ;;  %v4870_v46 = vpop.f32.mrf.mxu1 }
 0x152   :  { %v5970_v47 = vpop.f32.mrf.mxu0  ;;  %v5972_v50 = vpop.f32.mrf.mxu1 }
 0x154   :  { %v4875_v51 = vpop.f32.mrf.mxu0  ;;  %v4881_v52 = vpop.f32.mrf.mxu1 }
 0x155   :  { %v202_v51 = vld [vmem:[%s6826_s3 + $0x18] sm:$0x1] }
 0x156   :  { %v1826_v57 = vpop.f32.mrf.mxu0  ;;  %v1872_v60 = vpop.f32.mrf.mxu1 }
 0x157   :  { %v2062_v61 = vpop.xlane.xlu0 %2061 }
 0x158   :  { %v2180_v62 = vsub.f32 %v5788_v39, %v2062_v61  ;;  %v4876_v63 = vpop.f32.mrf.mxu0  ;;  %v4882_v3 = vpop.f32.mrf.mxu1 }
 0x159   :  { %v5992_v3 = vadd.f32 %v5950_v44, %v202_v51 }
 0x15a   :  { %v2220_v6 = vmul.f32 1.442695, %v2180_v62  ;;  %v5975_v9 = vpop.f32.mrf.mxu0  ;;  %v5977_v12 = vpop.f32.mrf.mxu1 }
 0x15b   :  { %v2065_v13 = vpop.xlane.xlu0 %2064 }
 0x15c   :  { %5149 = vpow2.f32 %v2220_v6  ;;  %v2181_v14 = vsub.f32 %v5790_v40, %v2065_v13  ;;  %v4887_v15 = vpop.f32.mrf.mxu0  ;;  %v4893_v16 = vpop.f32.mrf.mxu1 }
 0x15e   :  { %v2222_v23 = vmul.f32 1.442695, %v2181_v14  ;;  %v1918_v24 = vpop.f32.mrf.mxu0  ;;  %v1964_v25 = vpop.f32.mrf.mxu1  ;;  %v203_v14 = vld [vmem:[%s6826_s3 + $0x19] sm:$0x1] }
 0x15f   :  { %v2068_v26 = vpop.xlane.xlu1 %2067  ;;  %v204_v24 = vld [vmem:[%s6826_s3 + $0x1a] sm:$0x1] }
 0x160   :  { %5151 = vpow2.f32 %v2222_v23  ;;  %v2182_v39 = vsub.f32 %v5804_v54, %v2068_v26  ;;  %v4888_v27 = vpop.f32.mrf.mxu0  ;;  %v4894_v30 = vpop.f32.mrf.mxu1 }
 0x161   :  { %v6016_v30 = vadd.f32 %v5954_v58, %v204_v24 }
 0x162   :  { %v2224_v37 = vmul.f32 1.442695, %v2182_v39  ;;  %v5981_v38 = vpop.f32.mrf.mxu0  ;;  %v5983_v41 = vpop.f32.mrf.mxu1 }
 0x163   :  { %v2071_v42 = vpop.xlane.xlu1 %2070 }
 0x164   :  { %5153 = vpow2.f32 %v2224_v37  ;;  %v2183_v40 = vsub.f32 %v5802_v53, %v2071_v42  ;;  %v4899_v43 = vpop.f32.mrf.mxu0  ;;  %v4905_v46 = vpop.f32.mrf.mxu1 }
 0x166   :  { %v2226_v52 = vmul.f32 1.442695, %v2183_v40  ;;  %v2010_v57 = vpop.f32.mrf.mxu0  ;;  %v2056_v54 = vpop.f32.mrf.mxu1  ;;  %v205_v40 = vld [vmem:[%s6826_s3 + $0x1b] sm:$0x1] }
 0x167   :  { %v2077_v60 = vpop.xlane.xlu1 %2076  ;;  %v2074_v61 = vpop.xlane.xlu0 %2073  ;;  %v206_v57 = vld [vmem:[%s6826_s3 + $0x1c] sm:$0x1] }
 0x168   :  { %5155 = vpow2.f32 %v2226_v52  ;;  %v2185_v62 = vsub.f32 %v5816_v4, %v2077_v60  ;;  %v2184_v63 = vsub.f32 %v5818_v5, %v2074_v61  ;;  %v4900_v53 = vpop.f32.mrf.mxu0  ;;  %v4906_v6 = vpop.f32.mrf.mxu1  ;;  %v6002_v4 = vadd.f32 %v5952_v45, %v203_v14 }
 0x169   :  { %v5994_v13 = vpop.eup %5149  ;;  %v2132_v5 = vsel %vm2059_vm2, %v5992_v3, -inf  ;;  %v207_v53 = vld [vmem:[%s6826_s3 + $0x1d] sm:$0x1] }
 0x16a   :  { %v2230_v15 = vmul.f32 1.442695, %v2185_v62  ;;  %v2228_v16 = vmul.f32 1.442695, %v2184_v63  ;;  %v2300_v23 = vsel %vm2059_vm2, %v5994_v13, 0.0  ;;  %v2135_v37 = vsel %vm2059_vm2, %v6002_v4, -inf }
 0x16b   :  { %2301 = vadd.xlane.f32.xlu0 %v2300_v23  ;;  %v6044_v63 = vadd.f32 %v5958_v7, %v206_v57  ;;  %v210_v57 = vld [vmem:[%s6826_s3 + $0x20] sm:$0x1] }
 0x16c   :  { %5157 = vpow2.f32 %v2228_v16 }
 0x16d   :  { %v6006_v44 = vpop.eup %5151  ;;  %5159 = vpow2.f32 %v2230_v15  ;;  %v2144_v7 = vsel %vm2059_vm2, %v6044_v63, -inf }
 0x16e   :  { %v2303_v25 = vsel %vm2059_vm2, %v6006_v44, 0.0 }
 0x16f   :  { %2304 = vadd.xlane.f32.xlu1 %v2303_v25  ;;  %v2083_v26 = vpop.xlane.xlu1 %2082  ;;  %v2080_v39 = vpop.xlane.xlu0 %2079  ;;  %2133 = vmax.xlane.f32.xlu0 %v2132_v5  ;;  %v208_v5 = vld [vmem:[%s6826_s3 + $0x1e] sm:$0x1] }
 0x170   :  { %v2187_v45 = vsub.f32 %v5832_v19, %v2083_v26  ;;  %v2186_v27 = vsub.f32 %v5830_v18, %v2080_v39  ;;  %v6028_v18 = vadd.f32 %v5956_v59, %v205_v40  ;;  %v2138_v19 = vsel %vm2059_vm2, %v6016_v30, -inf }
 0x171   :  { %v6020_v42 = vpop.eup %5153 }
 0x172   :  { %v2234_v43 = vmul.f32 1.442695, %v2187_v45  ;;  %v2232_v46 = vmul.f32 1.442695, %v2186_v27  ;;  %v2306_v51 = vsel %vm2059_vm2, %v6020_v42, 0.0  ;;  %v2141_v62 = vsel %vm2059_vm2, %v6028_v18, -inf }
 0x173   :  { %2136 = vmax.xlane.f32.xlu1 %v2135_v37  ;;  %2307 = vadd.xlane.f32.xlu0 %v2306_v51  ;;  %v6070_v45 = vadd.f32 %v5962_v21, %v208_v5  ;;  %v209_v27 = vld [vmem:[%s6826_s3 + $0x1f] sm:$0x1] }
 0x174   :  { %5161 = vpow2.f32 %v2232_v46  ;;  %v6085_v21 = vadd.f32 %v5964_v22, %v209_v27 }
 0x175   :  { %v6032_v58 = vpop.eup %5155  ;;  %5163 = vpow2.f32 %v2234_v43 }
 0x176   :  { %v2309_v52 = vsel %vm2059_vm2, %v6032_v58, 0.0 }
 0x177   :  { %2310 = vadd.xlane.f32.xlu1 %v2309_v52  ;;  %v2089_v54 = vpop.xlane.xlu1 %2088  ;;  %v2086_v60 = vpop.xlane.xlu0 %2085  ;;  %2139 = vmax.xlane.f32.xlu0 %v2138_v19  ;;  %v2150_v19 = vsel %vm2059_vm2, %v6070_v45, -inf }
 0x178   :  { %v2189_v59 = vsub.f32 %v5846_v33, %v2089_v54  ;;  %v2188_v61 = vsub.f32 %v5844_v32, %v2086_v60  ;;  %v6056_v33 = vadd.f32 %v5960_v8, %v207_v53  ;;  %v139_v60 = vld [vmem:[%s6827_s2 + $0x4] sm:$0xf] }
 0x179   :  { %v6049_v6 = vpop.eup %5157  ;;  %v2592_v53 = vsel %vm2544_vm3, %v139_v60, 0 }
 0x17a   :  { %v2238_v14 = vmul.f32 1.442695, %v2189_v59  ;;  %v2236_v15 = vmul.f32 1.442695, %v2188_v61  ;;  %v6051_v16 = vpop.eup %5159  ;;  %v2312_v32 = vsel %vm2059_vm2, %v6049_v6, 0.0  ;;  %v2147_v39 = vsel %vm2059_vm2, %v6056_v33, -inf  ;;  %4914 = vmatpush3.bf16.msra.mxu1 %v2592_v53 }
 0x17b   :  { %2142 = vmax.xlane.f32.xlu1 %v2141_v62  ;;  %2313 = vadd.xlane.f32.xlu0 %v2312_v32  ;;  %v2315_v23 = vsel %vm2059_vm2, %v6051_v16, 0.0  ;;  %v2153_v62 = vsel %vm2059_vm2, %v6085_v21, -inf }
 0x17c   :  { %5165 = vpow2.f32 %v2236_v15  ;;  %v211_v15 = vld [vmem:[%s6826_s3 + $0x21] sm:$0x1]  ;;  %4925 = vmatprep.subr.bf16.mxu1 %v5309_v0 }
 0x17d   :  { %5167 = vpow2.f32 %v2238_v14  ;;  %v6105_v14 = vadd.f32 %v5966_v31, %v210_v57  ;;  %v6118_v31 = vadd.f32 %v5968_v34, %v211_v15  ;;  %v214_v57 = vld [vmem:[%s6826_s3 + $0x24] sm:$0x1] }
 0x17f   :  { %2316 = vadd.xlane.f32.xlu1 %v2315_v23  ;;  %v2095_v24 = vpop.xlane.xlu1 %2094  ;;  %v2092_v25 = vpop.xlane.xlu0 %2091  ;;  %2145 = vmax.xlane.f32.xlu0 %v2144_v7  ;;  %v2156_v5 = vsel %vm2059_vm2, %v6105_v14, -inf  ;;  %v2159_v27 = vsel %vm2059_vm2, %v6118_v31, -inf }
 0x180   :  { %v2191_v26 = vsub.f32 %v5860_v49, %v2095_v24  ;;  %v2190_v8 = vsub.f32 %v5858_v48, %v2092_v25  ;;  %v138_v49 = vld [vmem:[%s6827_s2] sm:$0xf] }
 0x181   :  { %v6075_v37 = vpop.eup %5161  ;;  %v2546_v51 = vsel %vm2544_vm3, %v138_v49, 0  ;;  %v212_v25 = vld [vmem:[%s6826_s3 + $0x22] sm:$0x1] }
 0x182   :  { %v2242_v40 = vmul.f32 1.442695, %v2191_v26  ;;  %v2240_v43 = vmul.f32 1.442695, %v2190_v8  ;;  %v6077_v46 = vpop.eup %5163  ;;  %v2318_v48 = vsel %vm2059_vm2, %v6075_v37, 0.0  ;;  %4908 = vmatpush3.bf16.msra.mxu0 %v2546_v51 }
 0x183   :  { %2148 = vmax.xlane.f32.xlu1 %v2147_v39  ;;  %2319 = vadd.xlane.f32.xlu0 %v2318_v48  ;;  %v2321_v52 = vsel %vm2059_vm2, %v6077_v46, 0.0 }
 0x184   :  { %5169 = vpow2.f32 %v2240_v43  ;;  %4919 = vmatprep.subr.bf16.mxu0 %v5309_v0  ;;  %v213_v43 = vld [vmem:[%s6826_s3 + $0x23] sm:$0x1] }
 0x185   :  { %5171 = vpow2.f32 %v2242_v40  ;;  %v6132_v40 = vadd.f32 %v5970_v47, %v212_v25 }
 0x187   :  { %2322 = vadd.xlane.f32.xlu1 %v2321_v52  ;;  %v2101_v22 = vpop.xlane.xlu1 %2100  ;;  %v2098_v54 = vpop.xlane.xlu0 %2097  ;;  %2151 = vmax.xlane.f32.xlu0 %v2150_v19  ;;  %v2162_v47 = vsel %vm2059_vm2, %v6132_v40, -inf }
 0x188   :  { %v2193_v59 = vsub.f32 %v5874_v2, %v2101_v22  ;;  %v2192_v61 = vsub.f32 %v5872_v1, %v2098_v54 }
 0x189   :  { %v6110_v32 = vpop.eup %5165 }
 0x18a   :  { %v2246_v7 = vmul.f32 1.442695, %v2193_v59  ;;  %v2244_v2 = vmul.f32 1.442695, %v2192_v61  ;;  %v6113_v1 = vpop.eup %5167  ;;  %v2324_v23 = vsel %vm2059_vm2, %v6110_v32, 0.0  ;;  %v6158_v61 = vadd.f32 %v5975_v9, %v214_v57 }
 0x18b   :  { %2154 = vmax.xlane.f32.xlu1 %v2153_v62  ;;  %2325 = vadd.xlane.f32.xlu0 %v2324_v23  ;;  %v2327_v24 = vsel %vm2059_vm2, %v6113_v1, 0.0  ;;  %v215_v62 = vld [vmem:[%s6826_s3 + $0x25] sm:$0x1] }
 0x18c   :  { %5173 = vpow2.f32 %v2244_v2  ;;  %v2168_v9 = vsel %vm2059_vm2, %v6158_v61, -inf }
 0x18d   :  { %5175 = vpow2.f32 %v2246_v7 }
 0x18f   :  { %2328 = vadd.xlane.f32.xlu1 %v2327_v24  ;;  %v2107_v26 = vpop.xlane.xlu1 %2106  ;;  %v2104_v8 = vpop.xlane.xlu0 %2103  ;;  %2157 = vmax.xlane.f32.xlu0 %v2156_v5  ;;  %v216_v5 = vld [vmem:[%s6826_s3 + $0x26] sm:$0x1] }
 0x190   :  { %v2195_v39 = vsub.f32 %v5888_v20, %v2107_v26  ;;  %v2194_v34 = vsub.f32 %v5886_v17, %v2104_v8  ;;  %v6144_v20 = vadd.f32 %v5972_v50, %v213_v43 }
 0x191   :  { %v6137_v48 = vpop.eup %5169 }
 0x192   :  { %v2250_v49 = vmul.f32 1.442695, %v2195_v39  ;;  %v2248_v51 = vmul.f32 1.442695, %v2194_v34  ;;  %v6139_v19 = vpop.eup %5171  ;;  %v2330_v17 = vsel %vm2059_vm2, %v6137_v48, 0.0  ;;  %v2165_v59 = vsel %vm2059_vm2, %v6144_v20, -inf }
 0x193   :  { %2160 = vmax.xlane.f32.xlu1 %v2159_v27  ;;  %2331 = vadd.xlane.f32.xlu0 %v2330_v17  ;;  %v2333_v52 = vsel %vm2059_vm2, %v6139_v19, 0.0  ;;  %v6184_v39 = vadd.f32 %v5981_v38, %v216_v5  ;;  %v217_v34 = vld [vmem:[%s6826_s3 + $0x27] sm:$0x1] }
 0x194   :  { %5177 = vpow2.f32 %v2248_v51 }
 0x195   :  { %5179 = vpow2.f32 %v2250_v49  ;;  %v2174_v38 = vsel %vm2059_vm2, %v6184_v39, -inf }
 0x197   :  { %2334 = vadd.xlane.f32.xlu1 %v2333_v52  ;;  %v2113_v22 = vpop.xlane.xlu1 %2112  ;;  %v2110_v54 = vpop.xlane.xlu0 %2109  ;;  %2163 = vmax.xlane.f32.xlu0 %v2162_v47 }
 0x198   :  { %v2197_v60 = vsub.f32 %v5902_v36, %v2113_v22  ;;  %v2196_v50 = vsub.f32 %v5900_v35, %v2110_v54  ;;  %v6170_v36 = vadd.f32 %v5977_v12, %v215_v62 }
 0x199   :  { %v6163_v53 = vpop.eup %5173 }
 0x19a   :  { %v2254_v15 = vmul.f32 1.442695, %v2197_v60  ;;  %v2252_v7 = vmul.f32 1.442695, %v2196_v50  ;;  %v6165_v2 = vpop.eup %5175  ;;  %v2336_v35 = vsel %vm2059_vm2, %v6163_v53, 0.0  ;;  %v2171_v8 = vsel %vm2059_vm2, %v6170_v36, -inf }
 0x19b   :  { %2166 = vmax.xlane.f32.xlu1 %v2165_v59  ;;  %2337 = vadd.xlane.f32.xlu0 %v2336_v35  ;;  %v2339_v23 = vsel %vm2059_vm2, %v6165_v2, 0.0 }
 0x19c   :  { %5181 = vpow2.f32 %v2252_v7 }
 0x19d   :  { %5183 = vpow2.f32 %v2254_v15 }
 0x19f   :  { %2340 = vadd.xlane.f32.xlu1 %v2339_v23  ;;  %v2119_v24 = vpop.xlane.xlu1 %2118  ;;  %v2116_v25 = vpop.xlane.xlu0 %2115  ;;  %2169 = vmax.xlane.f32.xlu0 %v2168_v9 }
 0x1a0   :  { %v2199_v26 = vsub.f32 %v5916_v56, %v2119_v24  ;;  %v2198_v12 = vsub.f32 %v5914_v55, %v2116_v25  ;;  %v6196_v56 = vadd.f32 %v5983_v41, %v217_v34 }
 0x1a1   :  { %v6189_v27 = vpop.eup %5177 }
 0x1a2   :  { %v2258_v43 = vmul.f32 1.442695, %v2199_v26  ;;  %v2256_v49 = vmul.f32 1.442695, %v2198_v12  ;;  %v6191_v51 = vpop.eup %5179  ;;  %v2342_v55 = vsel %vm2059_vm2, %v6189_v27, 0.0  ;;  %v2177_v41 = vsel %vm2059_vm2, %v6196_v56, -inf }
 0x1a3   :  { %2172 = vmax.xlane.f32.xlu1 %v2171_v8  ;;  %2343 = vadd.xlane.f32.xlu0 %v2342_v55  ;;  %v2345_v17 = vsel %vm2059_vm2, %v6191_v51, 0.0 }
 0x1a4   :  { %5185 = vpow2.f32 %v2258_v43 }
 0x1a5   :  { %5187 = vpow2.f32 %v2256_v49 }
 0x1a7   :  { %2346 = vadd.xlane.f32.xlu1 %v2345_v17  ;;  %v2125_v47 = vpop.xlane.xlu1 %2124  ;;  %v2122_v52 = vpop.xlane.xlu0 %2121  ;;  %2175 = vmax.xlane.f32.xlu0 %v2174_v38 }
 0x1a8   :  { %v2201_v57 = vsub.f32 %v5930_v11, %v2125_v47  ;;  %v2200_v22 = vsub.f32 %v5928_v10, %v2122_v52 }
 0x1a9   :  { %v6206_v54 = vpop.eup %5181 }
 0x1aa   :  { %v2262_v60 = vmul.f32 1.442695, %v2201_v57  ;;  %v2260_v50 = vmul.f32 1.442695, %v2200_v22  ;;  %v6208_v59 = vpop.eup %5183  ;;  %v2348_v62 = vsel %vm2059_vm2, %v6206_v54, 0.0 }
 0x1ab   :  { %2178 = vmax.xlane.f32.xlu1 %v2177_v41  ;;  %2349 = vadd.xlane.f32.xlu0 %v2348_v62  ;;  %v2351_v10 = vsel %vm2059_vm2, %v6208_v59, 0.0 }
 0x1ac   :  { %5189 = vpow2.f32 %v2262_v60 }
 0x1ad   :  { %5191 = vpow2.f32 %v2260_v50 }
 0x1af   :  { %2352 = vadd.xlane.f32.xlu1 %v2351_v10  ;;  %v2131_v11 = vpop.xlane.xlu1 %2130  ;;  %v2128_v15 = vpop.xlane.xlu0 %2127 }
 0x1b0   :  { %v2203_v7 = vsub.f32 %v5944_v29, %v2131_v11  ;;  %v2202_v35 = vsub.f32 %v5942_v28, %v2128_v15 }
 0x1b1   :  { %v6216_v9 = vpop.eup %5185 }
 0x1b2   :  { %v6218_v23 = vpop.eup %5187  ;;  %v2266_v5 = vmul.f32 1.442695, %v2203_v7  ;;  %v2264_v24 = vmul.f32 1.442695, %v2202_v35  ;;  %v2357_v25 = vsel %vm2059_vm2, %v6216_v9, 0.0 }
 0x1b3   :  { %2358 = vadd.xlane.f32.xlu1 %v2357_v25  ;;  %v2354_v26 = vsel %vm2059_vm2, %v6218_v23, 0.0  ;;  %v140_v7 = vld [vmem:[%s6827_s2 + $0x8] sm:$0xf] }
 0x1b4   :  { %5193 = vpow2.f32 %v2266_v5  ;;  %2355 = vadd.xlane.f32.xlu0 %v2354_v26  ;;  %v2638_v26 = vsel %vm2544_vm3, %v140_v7, 0 }
 0x1b5   :  { %5195 = vpow2.f32 %v2264_v24 }
 0x1b9   :  { %v6224_v12 = vpop.eup %5189 }
 0x1ba   :  { %v6226_v29 = vpop.eup %5191  ;;  %v2363_v28 = vsel %vm2059_vm2, %v6224_v12, 0.0 }
 0x1bb   :  { %2364 = vadd.xlane.f32.xlu1 %v2363_v28  ;;  %v2360_v8 = vsel %vm2059_vm2, %v6226_v29, 0.0 }
 0x1bc   :  { %2361 = vadd.xlane.f32.xlu0 %v2360_v8 }
 0x1c1   :  { %v6232_v34 = vpop.eup %5193 }
 0x1c2   :  { %v6234_v43 = vpop.eup %5195  ;;  %v2369_v49 = vsel %vm2059_vm2, %v6232_v34, 0.0 }
 0x1c3   :  { %2370 = vadd.xlane.f32.xlu1 %v2369_v49  ;;  %v2366_v55 = vsel %vm2059_vm2, %v6234_v43, 0.0 }
 0x1c4   :  { %2367 = vadd.xlane.f32.xlu0 %v2366_v55 }
 0x1f4   :  { %v2302_v38 = vpop.xlane.xlu0 %2301 }
 0x1f5   :  { %5197 = vrcp.f32 %v2302_v38 }
 0x1f8   :  { %v2305_v17 = vpop.xlane.xlu1 %2304  ;;  %v2134_v47 = vpop.xlane.xlu0 %2133 }
 0x1f9   :  { %5199 = vrcp.f32 %v2305_v17  ;;  %v2204_v52 = vsub.f32 %v5992_v3, %v2134_v47 }
 0x1fb   :  { %v2268_v57 = vmul.f32 1.442695, %v2204_v52 }
 0x1fc   :  { %v2137_v22 = vpop.xlane.xlu1 %2136  ;;  %v2308_v41 = vpop.xlane.xlu0 %2307 }
 0x1fd   :  { %5201 = vpow2.f32 %v2268_v57  ;;  %v2205_v60 = vsub.f32 %v6002_v4, %v2137_v22  ;;  %v142_v57 = vld [vmem:[%s6827_s2 + $0x10] sm:$0xf] }
 0x1fe   :  { %5203 = vrcp.f32 %v2308_v41 }
 0x1ff   :  { %v2270_v50 = vmul.f32 1.442695, %v2205_v60 }
 0x200   :  { %v2311_v62 = vpop.xlane.xlu1 %2310  ;;  %v2140_v10 = vpop.xlane.xlu0 %2139 }
 0x201   :  { %5205 = vpow2.f32 %v2270_v50  ;;  %v2206_v11 = vsub.f32 %v6016_v30, %v2140_v10  ;;  %v141_v30 = vld [vmem:[%s6827_s2 + $0xc] sm:$0xf] }
 0x202   :  { %v5198_v15 = vpop.eup %5197  ;;  %5207 = vrcp.f32 %v2311_v62  ;;  %v2684_v38 = vsel %vm2544_vm3, %v141_v30, 0  ;;  %v144_v30 = vld [vmem:[%s6827_s2 + $0x18] sm:$0xf] }
 0x203   :  { %v2272_v3 = vmul.f32 1.442695, %v2206_v11  ;;  %v2460_v35 = vmul.f32 %v5198_v15, %v5994_v13  ;;  %v2730_v11 = vsel %vm2544_vm3, %v142_v57, 0 }
 0x204   :  { %v2143_v5 = vpop.xlane.xlu1 %2142  ;;  %v2314_v24 = vpop.xlane.xlu0 %2313 }
 0x205   :  { %5209 = vpow2.f32 %v2272_v3  ;;  %v2207_v4 = vsub.f32 %v6028_v18, %v2143_v5  ;;  %v2500_v25 = vpack.c.bf16 %v2460_v35, %v2460_v35 }
 0x206   :  { %v5200_v28 = vpop.eup %5199  ;;  %5211 = vrcp.f32 %v2314_v24 }
 0x207   :  { %v2274_v8 = vmul.f32 1.442695, %v2207_v4  ;;  %4910 = vmatmul.mubr.msk.bf16.vlgmr.msra.gmra.mxu0 %vm2540_vm4, %v2500_v25  ;;  %v2461_v13 = vmul.f32 %v5200_v28, %v6006_v44 }
 0x208   :  { %v2317_v49 = vpop.xlane.xlu1 %2316  ;;  %4920 = vmatpush3.bf16.msra.mxu0 %v2638_v26  ;;  %4921 = vmatprep.mubr.msk.bf16.mxu0 %vm5310_vm1, %v5309_v0  ;;  %v2146_v18 = vpop.xlane.xlu0 %2145 }
 0x209   :  { %5213 = vpow2.f32 %v2274_v8  ;;  %v2501_v55 = vpack.c.bf16 %v2461_v13, %v2461_v13  ;;  %4931 = vmatprep.subr.bf16.mxu0 %v5309_v0  ;;  %v2208_v47 = vsub.f32 %v6044_v63, %v2146_v18 }
 0x20a   :  { %v6258_v17 = vpop.eup %5201  ;;  %5215 = vrcp.f32 %v2317_v49 }
 0x20b   :  { %v5204_v52 = vpop.eup %5203  ;;  %4916 = vmatmul.mubr.msk.bf16.vlgmr.msra.gmra.mxu1 %vm2540_vm4, %v2501_v55  ;;  %v2372_v44 = vsel %vm2059_vm2, %v6258_v17, 0.0  ;;  %v2276_v22 = vmul.f32 1.442695, %v2208_v47  ;;  %v2822_v47 = vsel %vm2544_vm3, %v144_v30, 0 }
 0x20c   :  { %v2149_v41 = vpop.xlane.xlu1 %2148  ;;  %2373 = vadd.xlane.f32.xlu0 %v2372_v44  ;;  %v2462_v60 = vmul.f32 %v5204_v52, %v6020_v42  ;;  %4926 = vmatpush3.bf16.msra.mxu1 %v2684_v38  ;;  %v2320_v62 = vpop.xlane.xlu0 %2319 }
 0x20d   :  { %v2209_v50 = vsub.f32 %v6056_v33, %v2149_v41  ;;  %4927 = vmatprep.mubr.msk.bf16.mxu1 %vm5310_vm1, %v5309_v0  ;;  %4937 = vmatprep.subr.bf16.mxu1 %v5309_v0  ;;  %5217 = vpow2.f32 %v2276_v22  ;;  %v143_v33 = vld [vmem:[%s6827_s2 + $0x14] sm:$0xf] }
 0x20e   :  { %v6272_v63 = vpop.eup %5205  ;;  %v2502_v10 = vpack.c.bf16 %v2462_v60, %v2462_v60  ;;  %5219 = vrcp.f32 %v2320_v62  ;;  %v2776_v26 = vsel %vm2544_vm3, %v143_v33, 0 }
 0x20f   :  { %v5208_v15 = vpop.eup %5207  ;;  %v2278_v7 = vmul.f32 1.442695, %v2209_v50  ;;  %v2375_v42 = vsel %vm2059_vm2, %v6272_v63, 0.0 }
 0x210   :  { %4922 = vmatmul.mubr.msk.bf16.vlgmr.msra.gmra.mxu0 %vm2540_vm4, %v2502_v10  ;;  %2376 = vadd.xlane.f32.xlu1 %v2375_v42  ;;  %v2323_v3 = vpop.xlane.xlu1 %2322  ;;  %v2463_v35 = vmul.f32 %v5208_v15, %v6032_v58  ;;  %v2152_v5 = vpop.xlane.xlu0 %2151 }
 0x211   :  { %5221 = vpow2.f32 %v2278_v7  ;;  %4932 = vmatpush3.bf16.msra.mxu0 %v2730_v11  ;;  %4933 = vmatprep.mubr.msk.bf16.mxu0 %vm5310_vm1, %v5309_v0  ;;  %v2210_v24 = vsub.f32 %v6070_v45, %v2152_v5 }
 0x212   :  { %v6284_v4 = vpop.eup %5209  ;;  %5223 = vrcp.f32 %v2323_v3  ;;  %v2503_v25 = vpack.c.bf16 %v2463_v35, %v2463_v35  ;;  %4943 = vmatprep.subr.bf16.mxu0 %v5309_v0 }
 0x213   :  { %v5212_v28 = vpop.eup %5211  ;;  %v2378_v58 = vsel %vm2059_vm2, %v6284_v4, 0.0  ;;  %v2280_v8 = vmul.f32 1.442695, %v2210_v24 }
 0x214   :  { %4928 = vmatmul.mubr.msk.bf16.vlgmr.msra.gmra.mxu1 %vm2540_vm4, %v2503_v25  ;;  %v2155_v13 = vpop.xlane.xlu1 %2154  ;;  %2379 = vadd.xlane.f32.xlu0 %v2378_v58  ;;  %v2464_v45 = vmul.f32 %v5212_v28, %v6049_v6  ;;  %v2326_v18 = vpop.xlane.xlu0 %2325 }
 0x215   :  { %v2211_v49 = vsub.f32 %v6085_v21, %v2155_v13  ;;  %4938 = vmatpush3.bf16.msra.mxu1 %v2776_v26  ;;  %4939 = vmatprep.mubr.msk.bf16.mxu1 %vm5310_vm1, %v5309_v0  ;;  %5225 = vpow2.f32 %v2280_v8  ;;  %v145_v21 = vld [vmem:[%s6827_s2 + $0x1c] sm:$0xf] }
 0x216   :  { %v6299_v55 = vpop.eup %5213  ;;  %v2504_v38 = vpack.c.bf16 %v2464_v45, %v2464_v45  ;;  %4949 = vmatprep.subr.bf16.mxu1 %v5309_v0  ;;  %5227 = vrcp.f32 %v2326_v18  ;;  %v2868_v62 = vsel %vm2544_vm3, %v145_v21, 0 }
 0x217   :  { %v5216_v52 = vpop.eup %5215  ;;  %v2282_v44 = vmul.f32 1.442695, %v2211_v49  ;;  %v2381_v6 = vsel %vm2059_vm2, %v6299_v55, 0.0 }
 0x218   :  { %4934 = vmatmul.mubr.msk.bf16.vlgmr.msra.gmra.mxu0 %vm2540_vm4, %v2504_v38  ;;  %2382 = vadd.xlane.f32.xlu1 %v2381_v6  ;;  %v2329_v57 = vpop.xlane.xlu1 %2328  ;;  %v2465_v22 = vmul.f32 %v5216_v52, %v6051_v16  ;;  %v2158_v41 = vpop.xlane.xlu0 %2157  ;;  %v146_v16 = vld [vmem:[%s6827_s2 + $0x20] sm:$0xf] }
 0x219   :  { %5229 = vpow2.f32 %v2282_v44  ;;  %4944 = vmatpush3.bf16.msra.mxu0 %v2822_v47  ;;  %4945 = vmatprep.mubr.msk.bf16.mxu0 %vm5310_vm1, %v5309_v0  ;;  %v2212_v60 = vsub.f32 %v6105_v14, %v2158_v41  ;;  %v2914_v5 = vsel %vm2544_vm3, %v146_v16, 0 }
 0x21a   :  { %5231 = vrcp.f32 %v2329_v57  ;;  %v2505_v50 = vpack.c.bf16 %v2465_v22, %v2465_v22  ;;  %4955 = vmatprep.subr.bf16.mxu0 %v5309_v0  ;;  %v6315_v10 = vpop.eup %5217 }
 0x21b   :  { %v5220_v11 = vpop.eup %5219  ;;  %v2284_v15 = vmul.f32 1.442695, %v2212_v60  ;;  %v2384_v42 = vsel %vm2059_vm2, %v6315_v10, 0.0 }
 0x21c   :  { %4940 = vmatmul.mubr.msk.bf16.vlgmr.msra.gmra.mxu1 %vm2540_vm4, %v2505_v50  ;;  %v2161_v7 = vpop.xlane.xlu1 %2160  ;;  %v2332_v33 = vpop.xlane.xlu0 %2331  ;;  %2385 = vadd.xlane.f32.xlu0 %v2384_v42  ;;  %v2466_v3 = vmul.f32 %v5220_v11, %v6075_v37  ;;  %v147_v37 = vld [vmem:[%s6827_s2 + $0x24] sm:$0xf] }
 0x21d   :  { %v2213_v14 = vsub.f32 %v6118_v31, %v2161_v7  ;;  %4950 = vmatpush3.bf16.msra.mxu1 %v2868_v62  ;;  %5233 = vpow2.f32 %v2284_v15  ;;  %4951 = vmatprep.mubr.msk.bf16.mxu1 %vm5310_vm1, %v5309_v0  ;;  %v2960_v45 = vsel %vm2544_vm3, %v147_v37, 0 }
 0x21e   :  { %v6325_v35 = vpop.eup %5221  ;;  %4961 = vmatprep.subr.bf16.mxu1 %v5309_v0  ;;  %5235 = vrcp.f32 %v2332_v33  ;;  %v2506_v26 = vpack.c.bf16 %v2466_v3, %v2466_v3 }
 0x21f   :  { %v5224_v24 = vpop.eup %5223  ;;  %v2286_v25 = vmul.f32 1.442695, %v2213_v14  ;;  %v2387_v31 = vsel %vm2059_vm2, %v6325_v35, 0.0 }
 0x220   :  { %2388 = vadd.xlane.f32.xlu1 %v2387_v31  ;;  %v2335_v28 = vpop.xlane.xlu1 %2334  ;;  %v2467_v58 = vmul.f32 %v5224_v24, %v6077_v46  ;;  %4946 = vmatmul.mubr.msk.bf16.vlgmr.msra.gmra.mxu0 %vm2540_vm4, %v2506_v26  ;;  %v2164_v30 = vpop.xlane.xlu0 %2163  ;;  %v148_v46 = vld [vmem:[%s6827_s2 + $0x28] sm:$0xf] }
 0x221   :  { %5237 = vpow2.f32 %v2286_v25  ;;  %v2214_v8 = vsub.f32 %v6132_v40, %v2164_v30  ;;  %4956 = vmatpush3.bf16.msra.mxu0 %v2914_v5  ;;  %4957 = vmatprep.mubr.msk.bf16.mxu0 %vm5310_vm1, %v5309_v0  ;;  %v3006_v57 = vsel %vm2544_vm3, %v148_v46, 0 }
 0x222   :  { %5239 = vrcp.f32 %v2335_v28  ;;  %v2507_v13 = vpack.c.bf16 %v2467_v58, %v2467_v58  ;;  %v6342_v49 = vpop.eup %5225  ;;  %4967 = vmatprep.subr.bf16.mxu0 %v5309_v0 }
 0x223   :  { %v5228_v18 = vpop.eup %5227  ;;  %v2288_v38 = vmul.f32 1.442695, %v2214_v8  ;;  %v2390_v47 = vsel %vm2059_vm2, %v6342_v49, 0.0 }
 0x224   :  { %4952 = vmatmul.mubr.msk.bf16.vlgmr.msra.gmra.mxu1 %vm2540_vm4, %v2507_v13  ;;  %v2167_v40 = vpop.xlane.xlu1 %2166  ;;  %v2338_v44 = vpop.xlane.xlu0 %2337  ;;  %2391 = vadd.xlane.f32.xlu0 %v2390_v47  ;;  %v2468_v6 = vmul.f32 %v5228_v18, %v6110_v32  ;;  %v149_v32 = vld [vmem:[%s6827_s2 + $0x2c] sm:$0xf] }
 0x225   :  { %v2215_v52 = vsub.f32 %v6144_v20, %v2167_v40  ;;  %4962 = vmatpush3.bf16.msra.mxu1 %v2960_v45  ;;  %5241 = vpow2.f32 %v2288_v38  ;;  %4963 = vmatprep.mubr.msk.bf16.mxu1 %vm5310_vm1, %v5309_v0  ;;  %v3052_v7 = vsel %vm2544_vm3, %v149_v32, 0 }
 0x226   :  { %v6353_v21 = vpop.eup %5229  ;;  %4973 = vmatprep.subr.bf16.mxu1 %v5309_v0  ;;  %5243 = vrcp.f32 %v2338_v44  ;;  %v2508_v60 = vpack.c.bf16 %v2468_v6, %v2468_v6 }
 0x227   :  { %v5232_v22 = vpop.eup %5231  ;;  %v2290_v41 = vmul.f32 1.442695, %v2215_v52  ;;  %v2393_v20 = vsel %vm2059_vm2, %v6353_v21, 0.0 }
 0x228   :  { %2394 = vadd.xlane.f32.xlu1 %v2393_v20  ;;  %v2341_v50 = vpop.xlane.xlu1 %2340  ;;  %v2469_v62 = vmul.f32 %v5232_v22, %v6113_v1  ;;  %4958 = vmatmul.mubr.msk.bf16.vlgmr.msra.gmra.mxu0 %vm2540_vm4, %v2508_v60  ;;  %v2170_v16 = vpop.xlane.xlu0 %2169  ;;  %v150_v1 = vld [vmem:[%s6827_s2 + $0x30] sm:$0xf] }
 0x229   :  { %5245 = vpow2.f32 %v2290_v41  ;;  %v2216_v11 = vsub.f32 %v6158_v61, %v2170_v16  ;;  %4968 = vmatpush3.bf16.msra.mxu0 %v3006_v57  ;;  %4969 = vmatprep.mubr.msk.bf16.mxu0 %vm5310_vm1, %v5309_v0  ;;  %v3098_v31 = vsel %vm2544_vm3, %v150_v1, 0 }
 0x22a   :  { %5247 = vrcp.f32 %v2341_v50  ;;  %v2509_v15 = vpack.c.bf16 %v2469_v62, %v2469_v62  ;;  %v6370_v42 = vpop.eup %5233  ;;  %4979 = vmatprep.subr.bf16.mxu0 %v5309_v0 }
 0x22b   :  { %v5236_v14 = vpop.eup %5235  ;;  %v2292_v33 = vmul.f32 1.442695, %v2216_v11  ;;  %v2396_v3 = vsel %vm2059_vm2, %v6370_v42, 0.0 }
 0x22c   :  { %4964 = vmatmul.mubr.msk.bf16.vlgmr.msra.gmra.mxu1 %vm2540_vm4, %v2509_v15  ;;  %v2173_v61 = vpop.xlane.xlu1 %2172  ;;  %v2344_v24 = vpop.xlane.xlu0 %2343  ;;  %2397 = vadd.xlane.f32.xlu0 %v2396_v3  ;;  %v2470_v25 = vmul.f32 %v5236_v14, %v6137_v48  ;;  %v151_v48 = vld [vmem:[%s6827_s2 + $0x34] sm:$0xf]  ;;  %v154_v14 = vld [vmem:[%s6827_s2 + $0x40] sm:$0xf] }
 0x22d   :  { %v2217_v5 = vsub.f32 %v6170_v36, %v2173_v61  ;;  %4974 = vmatpush3.bf16.msra.mxu1 %v3052_v7  ;;  %5249 = vpow2.f32 %v2292_v33  ;;  %4975 = vmatprep.mubr.msk.bf16.mxu1 %vm5310_vm1, %v5309_v0  ;;  %v3144_v18 = vsel %vm2544_vm3, %v151_v48, 0 }
 0x22e   :  { %v6381_v26 = vpop.eup %5237  ;;  %4985 = vmatprep.subr.bf16.mxu1 %v5309_v0  ;;  %5251 = vrcp.f32 %v2344_v24  ;;  %v2510_v58 = vpack.c.bf16 %v2470_v25, %v2470_v25 }
 0x22f   :  { %v5240_v37 = vpop.eup %5239  ;;  %v2294_v28 = vmul.f32 1.442695, %v2217_v5  ;;  %v2399_v36 = vsel %vm2059_vm2, %v6381_v26, 0.0 }
 0x230   :  { %2400 = vadd.xlane.f32.xlu1 %v2399_v36  ;;  %v2347_v30 = vpop.xlane.xlu1 %2346  ;;  %v2471_v8 = vmul.f32 %v5240_v37, %v6139_v19  ;;  %4970 = vmatmul.mubr.msk.bf16.vlgmr.msra.gmra.mxu0 %vm2540_vm4, %v2510_v58  ;;  %v2176_v13 = vpop.xlane.xlu0 %2175  ;;  %v152_v19 = vld [vmem:[%s6827_s2 + $0x38] sm:$0xf] }
 0x231   :  { %5253 = vpow2.f32 %v2294_v28  ;;  %v2218_v45 = vsub.f32 %v6184_v39, %v2176_v13  ;;  %4980 = vmatpush3.bf16.msra.mxu0 %v3098_v31  ;;  %4981 = vmatprep.mubr.msk.bf16.mxu0 %vm5310_vm1, %v5309_v0  ;;  %v3190_v41 = vsel %vm2544_vm3, %v152_v19, 0  ;;  %v3282_v31 = vsel %vm2544_vm3, %v154_v14, 0 }
 0x232   :  { %5255 = vrcp.f32 %v2347_v30  ;;  %v2511_v46 = vpack.c.bf16 %v2471_v8, %v2471_v8  ;;  %v6398_v38 = vpop.eup %5241  ;;  %4991 = vmatprep.subr.bf16.mxu0 %v5309_v0  ;;  %v156_v8 = vld [vmem:[%s6827_s2 + $0x48] sm:$0xf] }
 0x233   :  { %v5244_v40 = vpop.eup %5243  ;;  %v2296_v47 = vmul.f32 1.442695, %v2218_v45  ;;  %v2402_v52 = vsel %vm2059_vm2, %v6398_v38, 0.0 }
 0x234   :  { %4976 = vmatmul.mubr.msk.bf16.vlgmr.msra.gmra.mxu1 %vm2540_vm4, %v2511_v46  ;;  %v2179_v39 = vpop.xlane.xlu1 %2178  ;;  %2403 = vadd.xlane.f32.xlu0 %v2402_v52  ;;  %v2350_v6 = vpop.xlane.xlu0 %2349  ;;  %v2472_v57 = vmul.f32 %v5244_v40, %v6163_v53  ;;  %v153_v53 = vld [vmem:[%s6827_s2 + $0x3c] sm:$0xf] }
 0x235   :  { %v2219_v44 = vsub.f32 %v6196_v56, %v2179_v39  ;;  %4986 = vmatpush3.bf16.msra.mxu1 %v3144_v18  ;;  %5257 = vpow2.f32 %v2296_v47  ;;  %4987 = vmatprep.mubr.msk.bf16.mxu1 %vm5310_vm1, %v5309_v0  ;;  %v3236_v11 = vsel %vm2544_vm3, %v153_v53, 0  ;;  %v3374_v47 = vsel %vm2544_vm3, %v156_v8, 0  ;;  %v159_v53 = vld [vmem:[%s6827_s2 + $0x54] sm:$0xf] }
 0x236   :  { %v6409_v22 = vpop.eup %5245  ;;  %4997 = vmatprep.subr.bf16.mxu1 %v5309_v0  ;;  %5259 = vrcp.f32 %v2350_v6  ;;  %v2512_v32 = vpack.c.bf16 %v2472_v57, %v2472_v57 }
 0x237   :  { %v5248_v60 = vpop.eup %5247  ;;  %v2298_v20 = vmul.f32 1.442695, %v2219_v44  ;;  %v2405_v56 = vsel %vm2059_vm2, %v6409_v22, 0.0 }
 0x238   :  { %2406 = vadd.xlane.f32.xlu1 %v2405_v56  ;;  %v2353_v50 = vpop.xlane.xlu1 %2352  ;;  %v2473_v62 = vmul.f32 %v5248_v60, %v6165_v2  ;;  %4982 = vmatmul.mubr.msk.bf16.vlgmr.msra.gmra.mxu0 %vm2540_vm4, %v2512_v32 }
 0x239   :  { %5261 = vpow2.f32 %v2298_v20  ;;  %4992 = vmatpush3.bf16.msra.mxu0 %v3190_v41  ;;  %4993 = vmatprep.mubr.msk.bf16.mxu0 %vm5310_vm1, %v5309_v0 }
 0x23a   :  { %5263 = vrcp.f32 %v2353_v50  ;;  %v2513_v16 = vpack.c.bf16 %v2473_v62, %v2473_v62  ;;  %v6425_v15 = vpop.eup %5249  ;;  %5003 = vmatprep.subr.bf16.mxu0 %v5309_v0 }
 0x23b   :  { %v5252_v7 = vpop.eup %5251  ;;  %v2408_v2 = vsel %vm2059_vm2, %v6425_v15, 0.0 }
 0x23c   :  { %4988 = vmatmul.mubr.msk.bf16.vlgmr.msra.gmra.mxu1 %vm2540_vm4, %v2513_v16  ;;  %v2359_v1 = vpop.xlane.xlu1 %2358  ;;  %2409 = vadd.xlane.f32.xlu0 %v2408_v2  ;;  %v2474_v61 = vmul.f32 %v5252_v7, %v6189_v27  ;;  %v155_v27 = vld [vmem:[%s6827_s2 + $0x44] sm:$0xf]  ;;  %v160_v7 = vld [vmem:[%s6827_s2 + $0x58] sm:$0xf] }
 0x23d   :  { %5265 = vrcp.f32 %v2359_v1  ;;  %v2356_v33 = vpop.xlane.xlu0 %2355  ;;  %4998 = vmatpush3.bf16.msra.mxu1 %v3236_v11  ;;  %4999 = vmatprep.mubr.msk.bf16.mxu1 %vm5310_vm1, %v5309_v0  ;;  %v3328_v58 = vsel %vm2544_vm3, %v155_v27, 0  ;;  %v3558_v14 = vsel %vm2544_vm3, %v160_v7, 0 }
 0x23e   :  { %v6435_v3 = vpop.eup %5253  ;;  %5267 = vrcp.f32 %v2356_v33  ;;  %5009 = vmatprep.subr.bf16.mxu1 %v5309_v0  ;;  %v2514_v24 = vpack.c.bf16 %v2474_v61, %v2474_v61 }
 0x23f   :  { %v5256_v5 = vpop.eup %5255  ;;  %v2411_v25 = vsel %vm2059_vm2, %v6435_v3, 0.0 }
 0x240   :  { %2412 = vadd.xlane.f32.xlu1 %v2411_v25  ;;  %v2475_v37 = vmul.f32 %v5256_v5, %v6191_v51  ;;  %4994 = vmatmul.mubr.msk.bf16.vlgmr.msra.gmra.mxu0 %vm2540_vm4, %v2514_v24  ;;  %v162_v25 = vld [vmem:[%s6827_s2 + $0x60] sm:$0xf] }
 0x241   :  { %5004 = vmatpush3.bf16.msra.mxu0 %v3282_v31  ;;  %5005 = vmatprep.mubr.msk.bf16.mxu0 %vm5310_vm1, %v5309_v0 }
 0x242   :  { %v2515_v28 = vpack.c.bf16 %v2475_v37, %v2475_v37  ;;  %v6451_v36 = vpop.eup %5257  ;;  %5015 = vmatprep.subr.bf16.mxu0 %v5309_v0  ;;  %v3650_v37 = vsel %vm2544_vm3, %v162_v25, 0 }
 0x243   :  { %v5260_v48 = vpop.eup %5259  ;;  %v2414_v51 = vsel %vm2059_vm2, %v6451_v36, 0.0 }
 0x244   :  { %5000 = vmatmul.mubr.msk.bf16.vlgmr.msra.gmra.mxu1 %vm2540_vm4, %v2515_v28  ;;  %v2365_v30 = vpop.xlane.xlu1 %2364  ;;  %v2476_v13 = vmul.f32 %v5260_v48, %v6206_v54  ;;  %2415 = vadd.xlane.f32.xlu0 %v2414_v51  ;;  %v157_v54 = vld [vmem:[%s6827_s2 + $0x4c] sm:$0xf] }
 0x245   :  { %5269 = vrcp.f32 %v2365_v30  ;;  %v2362_v45 = vpop.xlane.xlu0 %2361  ;;  %5010 = vmatpush3.bf16.msra.mxu1 %v3328_v58  ;;  %5011 = vmatprep.mubr.msk.bf16.mxu1 %vm5310_vm1, %v5309_v0  ;;  %v3420_v6 = vsel %vm2544_vm3, %v157_v54, 0  ;;  %v165_v54 = vld [vmem:[%s6827_s2 + $0x6c] sm:$0xf] }
 0x246   :  { %v6461_v46 = vpop.eup %5261  ;;  %5271 = vrcp.f32 %v2362_v45  ;;  %5021 = vmatprep.subr.bf16.mxu1 %v5309_v0  ;;  %v2516_v19 = vpack.c.bf16 %v2476_v13, %v2476_v13  ;;  %v164_v13 = vld [vmem:[%s6827_s2 + $0x68] sm:$0xf] }
 0x247   :  { %v5264_v18 = vpop.eup %5263  ;;  %v2417_v40 = vsel %vm2059_vm2, %v6461_v46, 0.0 }
 0x248   :  { %v2477_v39 = vmul.f32 %v5264_v18, %v6208_v59  ;;  %2418 = vadd.xlane.f32.xlu1 %v2417_v40  ;;  %5006 = vmatmul.mubr.msk.bf16.vlgmr.msra.gmra.mxu0 %vm2540_vm4, %v2516_v19  ;;  %v158_v59 = vld [vmem:[%s6827_s2 + $0x50] sm:$0xf]  ;;  %v3742_v40 = vsel %vm2544_vm3, %v164_v13, 0  ;;  %v173_v13 = vld [vmem:[%s6827_s2 + $0x8c] sm:$0xf] }
 0x249   :  { %5016 = vmatpush3.bf16.msra.mxu0 %v3374_v47  ;;  %5017 = vmatprep.mubr.msk.bf16.mxu0 %vm5310_vm1, %v5309_v0 }
 0x24a   :  { %v5266_v52 = vpop.eup %5265  ;;  %v2517_v44 = vpack.c.bf16 %v2477_v39, %v2477_v39  ;;  %5027 = vmatprep.subr.bf16.mxu0 %v5309_v0 }
 0x24b   :  { %v5268_v57 = vpop.eup %5267  ;;  %v2479_v32 = vmul.f32 %v5266_v52, %v6216_v9  ;;  %v3512_v9 = vsel %vm2544_vm3, %v159_v53, 0 }
 0x24c   :  { %v2478_v41 = vmul.f32 %v5268_v57, %v6218_v23  ;;  %5012 = vmatmul.mubr.msk.bf16.vlgmr.msra.gmra.mxu1 %vm2540_vm4, %v2517_v44  ;;  %v2371_v60 = vpop.xlane.xlu1 %2370  ;;  %v3466_v23 = vsel %vm2544_vm3, %v158_v59, 0  ;;  %v3788_v44 = vsel %vm2544_vm3, %v165_v54, 0  ;;  %v166_v57 = vld [vmem:[%s6827_s2 + $0x70] sm:$0xf] }
 0x24d   :  { %5273 = vrcp.f32 %v2371_v60  ;;  %v2368_v20 = vpop.xlane.xlu0 %2367  ;;  %5022 = vmatpush3.bf16.msra.mxu1 %v3420_v6  ;;  %5023 = vmatprep.mubr.msk.bf16.mxu1 %vm5310_vm1, %v5309_v0  ;;  %v2519_v62 = vpack.c.bf16 %v2479_v32, %v2479_v32  ;;  %v3834_v59 = vsel %vm2544_vm3, %v166_v57, 0  ;;  %v167_v32 = vld [vmem:[%s6827_s2 + $0x74] sm:$0xf] }
 0x24e   :  { %v2518_v56 = vpack.c.bf16 %v2478_v41, %v2478_v41  ;;  %5275 = vrcp.f32 %v2368_v20  ;;  %5033 = vmatprep.subr.bf16.mxu1 %v5309_v0  ;;  %v3880_v53 = vsel %vm2544_vm3, %v167_v32, 0 }
 0x250   :  { %5018 = vmatmul.mubr.msk.bf16.vlgmr.msra.gmra.mxu0 %vm2540_vm4, %v2518_v56 }
 0x251   :  { %5028 = vmatpush3.bf16.msra.mxu0 %v3466_v23  ;;  %5029 = vmatprep.mubr.msk.bf16.mxu0 %vm5310_vm1, %v5309_v0 }
 0x252   :  { %v5270_v50 = vpop.eup %5269  ;;  %5039 = vmatprep.subr.bf16.mxu0 %v5309_v0 }
 0x253   :  { %v5272_v16 = vpop.eup %5271  ;;  %v2481_v1 = vmul.f32 %v5270_v50, %v6224_v12 }
 0x254   :  { %v2480_v11 = vmul.f32 %v5272_v16, %v6226_v29  ;;  %5024 = vmatmul.mubr.msk.bf16.vlgmr.msra.gmra.mxu1 %vm2540_vm4, %v2519_v62  ;;  %v161_v29 = vld [vmem:[%s6827_s2 + $0x5c] sm:$0xf] }
 0x255   :  { %5034 = vmatpush3.bf16.msra.mxu1 %v3512_v9  ;;  %5035 = vmatprep.mubr.msk.bf16.mxu1 %vm5310_vm1, %v5309_v0  ;;  %v2521_v61 = vpack.c.bf16 %v2481_v1, %v2481_v1  ;;  %v3604_v5 = vsel %vm2544_vm3, %v161_v29, 0  ;;  %v169_v1 = vld [vmem:[%s6827_s2 + $0x7c] sm:$0xf] }
 0x256   :  { %v2520_v2 = vpack.c.bf16 %v2480_v11, %v2480_v11  ;;  %5045 = vmatprep.subr.bf16.mxu1 %v5309_v0  ;;  %v3972_v29 = vsel %vm2544_vm3, %v169_v1, 0 }
 0x258   :  { %5030 = vmatmul.mubr.msk.bf16.vlgmr.msra.gmra.mxu0 %vm2540_vm4, %v2520_v2 }
 0x259   :  { %5040 = vmatpush3.bf16.msra.mxu0 %v3558_v14  ;;  %5041 = vmatprep.mubr.msk.bf16.mxu0 %vm5310_vm1, %v5309_v0 }
 0x25a   :  { %v5274_v33 = vpop.eup %5273  ;;  %5051 = vmatprep.subr.bf16.mxu0 %v5309_v0 }
 0x25b   :  { %v5276_v12 = vpop.eup %5275  ;;  %v2483_v31 = vmul.f32 %v5274_v33, %v6232_v34 }
 0x25c   :  { %v2482_v24 = vmul.f32 %v5276_v12, %v6234_v43  ;;  %5036 = vmatmul.mubr.msk.bf16.vlgmr.msra.gmra.mxu1 %vm2540_vm4, %v2521_v61  ;;  %v163_v43 = vld [vmem:[%s6827_s2 + $0x64] sm:$0xf] }
 0x25d   :  { %5046 = vmatpush3.bf16.msra.mxu1 %v3604_v5  ;;  %5047 = vmatprep.mubr.msk.bf16.mxu1 %vm5310_vm1, %v5309_v0  ;;  %v2523_v28 = vpack.c.bf16 %v2483_v31, %v2483_v31  ;;  %v3696_v58 = vsel %vm2544_vm3, %v163_v43, 0  ;;  %v171_v31 = vld [vmem:[%s6827_s2 + $0x84] sm:$0xf] }
 0x25e   :  { %v2522_v27 = vpack.c.bf16 %v2482_v24, %v2482_v24  ;;  %5057 = vmatprep.subr.bf16.mxu1 %v5309_v0  ;;  %v4064_v43 = vsel %vm2544_vm3, %v171_v31, 0 }
 0x260   :  { %5042 = vmatmul.mubr.msk.bf16.vlgmr.msra.gmra.mxu0 %vm2540_vm4, %v2522_v27 }
 0x261   :  { %5052 = vmatpush3.bf16.msra.mxu0 %v3650_v37  ;;  %5053 = vmatprep.mubr.msk.bf16.mxu0 %vm5310_vm1, %v5309_v0 }
 0x262   :  { %5063 = vmatprep.subr.bf16.mxu0 %v5309_v0 }
 0x264   :  { %5048 = vmatmul.mubr.msk.bf16.vlgmr.msra.gmra.mxu1 %vm2540_vm4, %v2523_v28 }
 0x265   :  { %5058 = vmatpush3.bf16.msra.mxu1 %v3696_v58  ;;  %5059 = vmatprep.mubr.msk.bf16.mxu1 %vm5310_vm1, %v5309_v0 }
 0x266   :  { %5069 = vmatprep.subr.bf16.mxu1 %v5309_v0 }
 0x295   :  { %v2374_v34 = vpop.xlane.xlu0 %2373 }
 0x296   :  { %5277 = vrcp.f32 %v2374_v34 }
 0x299   :  { %v2377_v48 = vpop.xlane.xlu1 %2376 }
 0x29a   :  { %5279 = vrcp.f32 %v2377_v48 }
 0x29d   :  { %v2380_v30 = vpop.xlane.xlu0 %2379 }
 0x29e   :  { %5281 = vrcp.f32 %v2380_v30 }
 0x2a1   :  { %v2383_v51 = vpop.xlane.xlu1 %2382 }
 0x2a2   :  { %5283 = vrcp.f32 %v2383_v51 }
 0x2a3   :  { %v5278_v8 = vpop.eup %5277 }
 0x2a4   :  { %v2484_v45 = vmul.f32 %v5278_v8, %v6258_v17 }
 0x2a5   :  { %v2386_v19 = vpop.xlane.xlu0 %2385 }
 0x2a6   :  { %v2524_v18 = vpack.c.bf16 %v2484_v45, %v2484_v45  ;;  %5285 = vrcp.f32 %v2386_v19 }
 0x2a7   :  { %v5280_v47 = vpop.eup %5279 }
 0x2a8   :  { %v2485_v39 = vmul.f32 %v5280_v47, %v6272_v63  ;;  %5054 = vmatmul.mubr.msk.bf16.vlgmr.msra.gmra.mxu0 %vm2540_vm4, %v2524_v18 }
 0x2a9   :  { %v2389_v52 = vpop.xlane.xlu1 %2388  ;;  %5064 = vmatpush3.bf16.msra.mxu0 %v3742_v40  ;;  %5065 = vmatprep.mubr.msk.bf16.mxu0 %vm5310_vm1, %v5309_v0  ;;  %v4156_v40 = vsel %vm2544_vm3, %v173_v13, 0 }
 0x2aa   :  { %v2525_v17 = vpack.c.bf16 %v2485_v39, %v2485_v39  ;;  %5287 = vrcp.f32 %v2389_v52  ;;  %5075 = vmatprep.subr.bf16.mxu0 %v5309_v0  ;;  %v174_v39 = vld [vmem:[%s6827_s2 + $0x90] sm:$0xf] }
 0x2ab   :  { %v5282_v6 = vpop.eup %5281 }
 0x2ac   :  { %v2486_v63 = vmul.f32 %v5282_v6, %v6284_v4  ;;  %5060 = vmatmul.mubr.msk.bf16.vlgmr.msra.gmra.mxu1 %vm2540_vm4, %v2525_v17 }
 0x2ad   :  { %5070 = vmatpush3.bf16.msra.mxu1 %v3788_v44  ;;  %5071 = vmatprep.mubr.msk.bf16.mxu1 %vm5310_vm1, %v5309_v0  ;;  %v2392_v60 = vpop.xlane.xlu0 %2391 }
 0x2ae   :  { %v2526_v41 = vpack.c.bf16 %v2486_v63, %v2486_v63  ;;  %5081 = vmatprep.subr.bf16.mxu1 %v5309_v0  ;;  %5289 = vrcp.f32 %v2392_v60  ;;  %v4202_v60 = vsel %vm2544_vm3, %v174_v39, 0 }
 0x2af   :  { %v5284_v20 = vpop.eup %5283 }
 0x2b0   :  { %v2487_v4 = vmul.f32 %v5284_v20, %v6299_v55  ;;  %5066 = vmatmul.mubr.msk.bf16.vlgmr.msra.gmra.mxu0 %vm2540_vm4, %v2526_v41  ;;  %v168_v55 = vld [vmem:[%s6827_s2 + $0x78] sm:$0xf] }
 0x2b1   :  { %v2395_v56 = vpop.xlane.xlu1 %2394  ;;  %5076 = vmatpush3.bf16.msra.mxu0 %v3834_v59  ;;  %5077 = vmatprep.mubr.msk.bf16.mxu0 %vm5310_vm1, %v5309_v0  ;;  %v3926_v7 = vsel %vm2544_vm3, %v168_v55, 0  ;;  %v175_v59 = vld [vmem:[%s6827_s2 + $0x94] sm:$0xf] }
 0x2b2   :  { %v2527_v23 = vpack.c.bf16 %v2487_v4, %v2487_v4  ;;  %5291 = vrcp.f32 %v2395_v56  ;;  %5087 = vmatprep.subr.bf16.mxu0 %v5309_v0 }
 0x2b3   :  { %v5286_v50 = vpop.eup %5285 }
 0x2b4   :  { %5072 = vmatmul.mubr.msk.bf16.vlgmr.msra.gmra.mxu1 %vm2540_vm4, %v2527_v23  ;;  %v2488_v62 = vmul.f32 %v5286_v50, %v6315_v10 }
 0x2b5   :  { %5082 = vmatpush3.bf16.msra.mxu1 %v3880_v53  ;;  %5083 = vmatprep.mubr.msk.bf16.mxu1 %vm5310_vm1, %v5309_v0  ;;  %v2398_v9 = vpop.xlane.xlu0 %2397  ;;  %v4248_v53 = vsel %vm2544_vm3, %v175_v59, 0 }
 0x2b6   :  { %5093 = vmatprep.subr.bf16.mxu1 %v5309_v0  ;;  %v2528_v11 = vpack.c.bf16 %v2488_v62, %v2488_v62  ;;  %5293 = vrcp.f32 %v2398_v9  ;;  %v176_v62 = vld [vmem:[%s6827_s2 + $0x98] sm:$0xf] }
 0x2b7   :  { %v5288_v16 = vpop.eup %5287 }
 0x2b8   :  { %v2489_v2 = vmul.f32 %v5288_v16, %v6325_v35  ;;  %5078 = vmatmul.mubr.msk.bf16.vlgmr.msra.gmra.mxu0 %vm2540_vm4, %v2528_v11  ;;  %v170_v35 = vld [vmem:[%s6827_s2 + $0x80] sm:$0xf] }
 0x2b9   :  { %v2401_v10 = vpop.xlane.xlu1 %2400  ;;  %5088 = vmatpush3.bf16.msra.mxu0 %v3926_v7  ;;  %5089 = vmatprep.mubr.msk.bf16.mxu0 %vm5310_vm1, %v5309_v0  ;;  %v4018_v25 = vsel %vm2544_vm3, %v170_v35, 0 }
 0x2ba   :  { %v2529_v14 = vpack.c.bf16 %v2489_v2, %v2489_v2  ;;  %5295 = vrcp.f32 %v2401_v10  ;;  %5099 = vmatprep.subr.bf16.mxu0 %v5309_v0  ;;  %v4294_v2 = vsel %vm2544_vm3, %v176_v62, 0 }
 0x2bb   :  { %v5290_v33 = vpop.eup %5289 }
 0x2bc   :  { %5084 = vmatmul.mubr.msk.bf16.vlgmr.msra.gmra.mxu1 %vm2540_vm4, %v2529_v14  ;;  %v2490_v61 = vmul.f32 %v5290_v33, %v6342_v49 }
 0x2bd   :  { %5094 = vmatpush3.bf16.msra.mxu1 %v3972_v29  ;;  %5095 = vmatprep.mubr.msk.bf16.mxu1 %vm5310_vm1, %v5309_v0  ;;  %v2404_v5 = vpop.xlane.xlu0 %2403 }
 0x2be   :  { %5105 = vmatprep.subr.bf16.mxu1 %v5309_v0  ;;  %v2530_v24 = vpack.c.bf16 %v2490_v61, %v2490_v61  ;;  %5297 = vrcp.f32 %v2404_v5 }
 0x2bf   :  { %v5292_v12 = vpop.eup %5291 }
 0x2c0   :  { %v2491_v27 = vmul.f32 %v5292_v12, %v6353_v21  ;;  %5090 = vmatmul.mubr.msk.bf16.vlgmr.msra.gmra.mxu0 %vm2540_vm4, %v2530_v24  ;;  %v172_v21 = vld [vmem:[%s6827_s2 + $0x88] sm:$0xf] }
 0x2c1   :  { %v2407_v49 = vpop.xlane.xlu1 %2406  ;;  %5100 = vmatpush3.bf16.msra.mxu0 %v4018_v25  ;;  %5101 = vmatprep.mubr.msk.bf16.mxu0 %vm5310_vm1, %v5309_v0  ;;  %v4110_v8 = vsel %vm2544_vm3, %v172_v21, 0 }
 0x2c2   :  { %v2531_v37 = vpack.c.bf16 %v2491_v27, %v2491_v27  ;;  %5299 = vrcp.f32 %v2407_v49  ;;  %5111 = vmatprep.subr.bf16.mxu0 %v5309_v0 }
 0x2c3   :  { %v5294_v28 = vpop.eup %5293 }
 0x2c4   :  { %5096 = vmatmul.mubr.msk.bf16.vlgmr.msra.gmra.mxu1 %vm2540_vm4, %v2531_v37  ;;  %v2492_v58 = vmul.f32 %v5294_v28, %v6370_v42 }
 0x2c5   :  { %5106 = vmatpush3.bf16.msra.mxu1 %v4064_v43  ;;  %5107 = vmatprep.mubr.msk.bf16.mxu1 %vm5310_vm1, %v5309_v0  ;;  %v2410_v34 = vpop.xlane.xlu0 %2409 }
 0x2c6   :  { %5117 = vmatprep.subr.bf16.mxu1 %v5309_v0  ;;  %v2532_v30 = vpack.c.bf16 %v2492_v58, %v2492_v58  ;;  %5301 = vrcp.f32 %v2410_v34 }
 0x2c7   :  { %v5296_v48 = vpop.eup %5295  ;;  %v2582_v51 = vpop.f32.mrf.mxu0 }
 0x2c8   :  { %v2493_v42 = vmul.f32 %v5296_v48, %v6381_v26  ;;  %4383 = vst.msk [vmem:[%s6828_s4] sm:$0x1] %vm4382_vm5, %v2582_v51  ;;  %5102 = vmatmul.mubr.msk.bf16.vlgmr.msra.gmra.mxu0 %vm2540_vm4, %v2532_v30 }
 0x2c9   :  { %v2413_v45 = vpop.xlane.xlu1 %2412  ;;  %v4911_v18 = vpop.f32.mrf.mxu0  ;;  %5112 = vmatpush3.bf16.msra.mxu0 %v4110_v8  ;;  %5113 = vmatprep.mubr.msk.bf16.mxu0 %vm5310_vm1, %v5309_v0 }
 0x2ca   :  { %v2533_v19 = vpack.c.bf16 %v2493_v42, %v2493_v42  ;;  %5303 = vrcp.f32 %v2413_v45  ;;  %5123 = vmatprep.subr.bf16.mxu0 %v5309_v0 }
 0x2cb   :  { %v2585_v47 = vpop.f32.mrf.mxu0  ;;  %v2628_v54 = vpop.f32.mrf.mxu1 }
 0x2cc   :  { %v5298_v26 = vpop.eup %5297  ;;  %4384 = vst.msk [vmem:[%s6828_s4 + $0x1] sm:$0x1] %vm4382_vm5, %v2628_v54  ;;  %5108 = vmatmul.mubr.msk.bf16.vlgmr.msra.gmra.mxu1 %vm2540_vm4, %v2533_v19 }
 0x2cd   :  { %v2494_v52 = vmul.f32 %v5298_v26, %v6398_v38  ;;  %v4917_v17 = vpop.f32.mrf.mxu1  ;;  %5118 = vmatpush3.bf16.msra.mxu1 %v4156_v40  ;;  %v4912_v44 = vpop.f32.mrf.mxu0  ;;  %5119 = vmatprep.mubr.msk.bf16.mxu1 %vm5310_vm1, %v5309_v0 }
 0x2ce   :  { %v2416_v6 = vpop.xlane.xlu0 %2415  ;;  %5129 = vmatprep.subr.bf16.mxu1 %v5309_v0 }
 0x2cf   :  { %v5300_v57 = vpop.eup %5299  ;;  %v2534_v63 = vpack.c.bf16 %v2494_v52, %v2494_v52  ;;  %5305 = vrcp.f32 %v2416_v6  ;;  %v2631_v41 = vpop.f32.mrf.mxu1 }
 0x2d0   :  { %v2495_v38 = vmul.f32 %v5300_v57, %v6409_v22  ;;  %v2674_v20 = vpop.f32.mrf.mxu0 }
 0x2d1   :  { %4385 = vst.msk [vmem:[%s6828_s4 + $0x2] sm:$0x1] %vm4382_vm5, %v2674_v20  ;;  %5114 = vmatmul.mubr.msk.bf16.vlgmr.msra.gmra.mxu0 %vm2540_vm4, %v2534_v63  ;;  %v4918_v32 = vpop.f32.mrf.mxu1  ;;  %v2419_v4 = vpop.xlane.xlu1 %2418 }
 0x2d2   :  { %v2535_v56 = vpack.c.bf16 %v2495_v38, %v2495_v38  ;;  %5307 = vrcp.f32 %v2419_v4  ;;  %v4923_v23 = vpop.f32.mrf.mxu0  ;;  %5124 = vmatpush3.bf16.msra.mxu0 %v4202_v60  ;;  %5125 = vmatprep.mubr.msk.bf16.mxu0 %vm5310_vm1, %v5309_v0 }
 0x2d3   :  { %5135 = vmatprep.subr.bf16.mxu0 %v5309_v0  ;;  %v5302_v22 = vpop.eup %5301 }
 0x2d4   :  { %v2677_v50 = vpop.f32.mrf.mxu0  ;;  %v2720_v55 = vpop.f32.mrf.mxu1  ;;  %5120 = vmatmul.mubr.msk.bf16.vlgmr.msra.gmra.mxu1 %vm2540_vm4, %v2535_v56  ;;  %v2496_v9 = vmul.f32 %v5302_v22, %v6425_v15  ;;  %v177_v15 = vld [vmem:[%s6827_s2 + $0x9c] sm:$0xf] }
 0x2d5   :  { %4386 = vst.msk [vmem:[%s6828_s4 + $0x3] sm:$0x1] %vm4382_vm5, %v2720_v55  ;;  %5130 = vmatpush3.bf16.msra.mxu1 %v4248_v53  ;;  %5131 = vmatprep.mubr.msk.bf16.mxu1 %vm5310_vm1, %v5309_v0  ;;  %v4340_v5 = vsel %vm2544_vm3, %v177_v15, 0 }
 0x2d6   :  { %v4924_v16 = vpop.f32.mrf.mxu0  ;;  %v4929_v11 = vpop.f32.mrf.mxu1  ;;  %5141 = vmatprep.subr.bf16.mxu1 %v5309_v0  ;;  %v2536_v1 = vpack.c.bf16 %v2496_v9, %v2496_v9 }
 0x2d7   :  { %v5304_v7 = vpop.eup %5303 }
 0x2d8   :  { %v2497_v10 = vmul.f32 %v5304_v7, %v6435_v3  ;;  %v2723_v14 = vpop.f32.mrf.mxu1  ;;  %v2766_v29 = vpop.f32.mrf.mxu0 }
 0x2d9   :  { %4387 = vst.msk [vmem:[%s6828_s4 + $0x4] sm:$0x1] %vm4382_vm5, %v2766_v29  ;;  %5126 = vmatmul.mubr.msk.bf16.vlgmr.msra.gmra.mxu0 %vm2540_vm4, %v2536_v1 }
 0x2da   :  { %v2537_v33 = vpack.c.bf16 %v2497_v10, %v2497_v10  ;;  %v4930_v35 = vpop.f32.mrf.mxu1  ;;  %v4935_v61 = vpop.f32.mrf.mxu0  ;;  %5136 = vmatpush3.bf16.msra.mxu0 %v4294_v2  ;;  %5137 = vmatprep.mubr.msk.bf16.mxu0 %vm5310_vm1, %v5309_v0 }
 0x2dc   :  { %v5306_v12 = vpop.eup %5305  ;;  %v2769_v3 = vpop.f32.mrf.mxu0  ;;  %5132 = vmatmul.mubr.msk.bf16.vlgmr.msra.gmra.mxu1 %vm2540_vm4, %v2537_v33 }
 0x2dd   :  { %v2812_v24 = vpop.f32.mrf.mxu1  ;;  %v2498_v25 = vmul.f32 %v5306_v12, %v6451_v36  ;;  %5142 = vmatpush3.bf16.msra.mxu1 %v4340_v5  ;;  %5143 = vmatprep.mubr.msk.bf16.mxu1 %vm5310_vm1, %v5309_v0 }
 0x2de   :  { %4388 = vst.msk [vmem:[%s6828_s4 + $0x5] sm:$0x1] %vm4382_vm5, %v2812_v24  ;;  %v4936_v31 = vpop.f32.mrf.mxu0 }
 0x2df   :  { %v4941_v27 = vpop.f32.mrf.mxu1  ;;  %v5308_v49 = vpop.eup %5307  ;;  %v2538_v37 = vpack.c.bf16 %v2498_v25, %v2498_v25 }
 0x2e0   :  { %v2499_v43 = vmul.f32 %v5308_v49, %v6461_v46  ;;  %v2858_v21 = vpop.f32.mrf.mxu0 }
 0x2e1   :  { %v2815_v28 = vpop.f32.mrf.mxu1  ;;  %5138 = vmatmul.mubr.msk.bf16.vlgmr.msra.gmra.mxu0 %vm2540_vm4, %v2538_v37  ;;  %4389 = vst.msk [vmem:[%s6828_s4 + $0x6] sm:$0x1] %vm4382_vm5, %v2858_v21 }
 0x2e2   :  { %v2539_v36 = vpack.c.bf16 %v2499_v43, %v2499_v43  ;;  %v4947_v34 = vpop.f32.mrf.mxu0 }
 0x2e3   :  { %v4942_v58 = vpop.f32.mrf.mxu1 }
 0x2e4   :  { %5144 = vmatmul.mubr.msk.bf16.vlgmr.msra.gmra.mxu1 %vm2540_vm4, %v2539_v36  ;;  %v2861_v0 = vpop.f32.mrf.mxu0 }
 0x2e5   :  { %v2904_v48 = vpop.f32.mrf.mxu1 }
 0x2e6   :  { %4390 = vst.msk [vmem:[%s6828_s4 + $0x7] sm:$0x1] %vm4382_vm5, %v2904_v48  ;;  %v4948_v30 = vpop.f32.mrf.mxu0 }
 0x2e7   :  { %v4953_v46 = vpop.f32.mrf.mxu1 }
 0x2e8   :  { %v2950_v8 = vpop.f32.mrf.mxu0 }
 0x2e9   :  { %v2907_v51 = vpop.f32.mrf.mxu1  ;;  %4391 = vst.msk [vmem:[%s6828_s4 + $0x8] sm:$0x1] %vm4382_vm5, %v2950_v8 }
 0x2ea   :  { %v4959_v42 = vpop.f32.mrf.mxu0 }
 0x2eb   :  { %v4954_v13 = vpop.f32.mrf.mxu1 }
 0x2ec   :  { %v2953_v18 = vpop.f32.mrf.mxu0 }
 0x2ed   :  { %v2996_v45 = vpop.f32.mrf.mxu1 }
 0x2ee   :  { %4392 = vst.msk [vmem:[%s6828_s4 + $0x9] sm:$0x1] %vm4382_vm5, %v2996_v45  ;;  %v4960_v40 = vpop.f32.mrf.mxu0 }
 0x2ef   :  { %v4965_v19 = vpop.f32.mrf.mxu1 }
 0x2f0   :  { %v3042_v54 = vpop.f32.mrf.mxu0 }
 0x2f1   :  { %v2999_v47 = vpop.f32.mrf.mxu1  ;;  %4393 = vst.msk [vmem:[%s6828_s4 + $0xa] sm:$0x1] %vm4382_vm5, %v3042_v54 }
 0x2f2   :  { %v4971_v39 = vpop.f32.mrf.mxu0 }
 0x2f3   :  { %v4966_v26 = vpop.f32.mrf.mxu1 }
 0x2f4   :  { %v3045_v17 = vpop.f32.mrf.mxu0 }
 0x2f5   :  { %v3088_v52 = vpop.f32.mrf.mxu1 }
 0x2f6   :  { %4394 = vst.msk [vmem:[%s6828_s4 + $0xb] sm:$0x1] %vm4382_vm5, %v3088_v52  ;;  %v4972_v6 = vpop.f32.mrf.mxu0 }
 0x2f7   :  { %v4977_v44 = vpop.f32.mrf.mxu1 }
 0x2f8   :  { %v3134_v63 = vpop.f32.mrf.mxu0 }
 0x2f9   :  { %v3091_v57 = vpop.f32.mrf.mxu1  ;;  %4395 = vst.msk [vmem:[%s6828_s4 + $0xc] sm:$0x1] %vm4382_vm5, %v3134_v63 }
 0x2fa   :  { %v4983_v60 = vpop.f32.mrf.mxu0 }
 0x2fb   :  { %v4978_v41 = vpop.f32.mrf.mxu1 }
 0x2fc   :  { %v3137_v38 = vpop.f32.mrf.mxu0 }
 0x2fd   :  { %v3180_v59 = vpop.f32.mrf.mxu1 }
 0x2fe   :  { %4396 = vst.msk [vmem:[%s6828_s4 + $0xd] sm:$0x1] %vm4382_vm5, %v3180_v59  ;;  %v4984_v32 = vpop.f32.mrf.mxu0 }
 0x2ff   :  { %v4989_v20 = vpop.f32.mrf.mxu1 }
 0x300   :  { %v3226_v56 = vpop.f32.mrf.mxu0 }
 0x301   :  { %v3183_v4 = vpop.f32.mrf.mxu1  ;;  %4397 = vst.msk [vmem:[%s6828_s4 + $0xe] sm:$0x1] %vm4382_vm5, %v3226_v56 }
 0x302   :  { %v4995_v53 = vpop.f32.mrf.mxu0 }
 0x303   :  { %v4990_v23 = vpop.f32.mrf.mxu1 }
 0x304   :  { %v3229_v50 = vpop.f32.mrf.mxu0 }
 0x305   :  { %v3272_v22 = vpop.f32.mrf.mxu1 }
 0x306   :  { %4398 = vst.msk [vmem:[%s6828_s4 + $0xf] sm:$0x1] %vm4382_vm5, %v3272_v22  ;;  %v4996_v62 = vpop.f32.mrf.mxu0 }
 0x307   :  { %v5001_v55 = vpop.f32.mrf.mxu1 }
 0x308   :  { %v3318_v16 = vpop.f32.mrf.mxu0 }
 0x309   :  { %v3275_v9 = vpop.f32.mrf.mxu1  ;;  %4399 = vst.msk [vmem:[%s6828_s4 + $0x10] sm:$0x1] %vm4382_vm5, %v3318_v16 }
 0x30a   :  { %v5007_v7 = vpop.f32.mrf.mxu0 }
 0x30b   :  { %v5002_v11 = vpop.f32.mrf.mxu1 }
 0x30c   :  { %v3321_v2 = vpop.f32.mrf.mxu0 }
 0x30d   :  { %v3364_v1 = vpop.f32.mrf.mxu1 }
 0x30e   :  { %4400 = vst.msk [vmem:[%s6828_s4 + $0x11] sm:$0x1] %vm4382_vm5, %v3364_v1  ;;  %v5008_v10 = vpop.f32.mrf.mxu0 }
 0x30f   :  { %v5013_v15 = vpop.f32.mrf.mxu1 }
 0x310   :  { %v3410_v29 = vpop.f32.mrf.mxu0 }
 0x311   :  { %v3367_v14 = vpop.f32.mrf.mxu1  ;;  %4401 = vst.msk [vmem:[%s6828_s4 + $0x12] sm:$0x1] %vm4382_vm5, %v3410_v29 }
 0x312   :  { %v5019_v35 = vpop.f32.mrf.mxu0 }
 0x313   :  { %v5014_v33 = vpop.f32.mrf.mxu1 }
 0x314   :  { %v3413_v5 = vpop.f32.mrf.mxu0 }
 0x315   :  { %v3456_v61 = vpop.f32.mrf.mxu1 }
 0x316   :  { %4402 = vst.msk [vmem:[%s6828_s4 + $0x13] sm:$0x1] %vm4382_vm5, %v3456_v61  ;;  %v5020_v3 = vpop.f32.mrf.mxu0 }
 0x317   :  { %v5025_v12 = vpop.f32.mrf.mxu1 }
 0x318   :  { %v3502_v25 = vpop.f32.mrf.mxu0 }
 0x319   :  { %v3459_v24 = vpop.f32.mrf.mxu1  ;;  %4403 = vst.msk [vmem:[%s6828_s4 + $0x14] sm:$0x1] %vm4382_vm5, %v3502_v25 }
 0x31a   :  { %v5031_v27 = vpop.f32.mrf.mxu0 }
 0x31b   :  { %v5026_v31 = vpop.f32.mrf.mxu1 }
 0x31c   :  { %v3505_v37 = vpop.f32.mrf.mxu0 }
 0x31d   :  { %v3548_v49 = vpop.f32.mrf.mxu1 }
 0x31e   :  { %4404 = vst.msk [vmem:[%s6828_s4 + $0x15] sm:$0x1] %vm4382_vm5, %v3548_v49  ;;  %v5032_v28 = vpop.f32.mrf.mxu0 }
 0x31f   :  { %v5037_v43 = vpop.f32.mrf.mxu1 }
 0x320   :  { %v3594_v36 = vpop.f32.mrf.mxu0 }
 0x321   :  { %v3551_v21 = vpop.f32.mrf.mxu1  ;;  %4405 = vst.msk [vmem:[%s6828_s4 + $0x16] sm:$0x1] %vm4382_vm5, %v3594_v36 }
 0x322   :  { %v5043_v34 = vpop.f32.mrf.mxu0 }
 0x323   :  { %v5038_v58 = vpop.f32.mrf.mxu1 }
 0x324   :  { %v3597_v0 = vpop.f32.mrf.mxu0 }
 0x325   :  { %v3640_v48 = vpop.f32.mrf.mxu1 }
 0x326   :  { %4406 = vst.msk [vmem:[%s6828_s4 + $0x17] sm:$0x1] %vm4382_vm5, %v3640_v48  ;;  %v5044_v30 = vpop.f32.mrf.mxu0 }
 0x327   :  { %v5049_v46 = vpop.f32.mrf.mxu1 }
 0x329   :  { %v3643_v51 = vpop.f32.mrf.mxu1 }
 0x32b   :  { %v5050_v8 = vpop.f32.mrf.mxu1 }
 0x368   :  { %v3686_v13 = vpop.f32.mrf.mxu0 }
 0x369   :  { %4407 = vst.msk [vmem:[%s6828_s4 + $0x18] sm:$0x1] %vm4382_vm5, %v3686_v13 }
 0x36a   :  { %v5055_v42 = vpop.f32.mrf.mxu0 }
 0x36c   :  { %v3689_v45 = vpop.f32.mrf.mxu0  ;;  %v3732_v18 = vpop.f32.mrf.mxu1 }
 0x36d   :  { %4408 = vst.msk [vmem:[%s6828_s4 + $0x19] sm:$0x1] %vm4382_vm5, %v3732_v18 }
 0x36e   :  { %v5056_v19 = vpop.f32.mrf.mxu0  ;;  %v5061_v40 = vpop.f32.mrf.mxu1 }
 0x370   :  { %v3735_v47 = vpop.f32.mrf.mxu1  ;;  %v3778_v54 = vpop.f32.mrf.mxu0 }
 0x371   :  { %4409 = vst.msk [vmem:[%s6828_s4 + $0x1a] sm:$0x1] %vm4382_vm5, %v3778_v54 }
 0x372   :  { %v5062_v26 = vpop.f32.mrf.mxu1  ;;  %v5067_v39 = vpop.f32.mrf.mxu0 }
 0x374   :  { %v3781_v52 = vpop.f32.mrf.mxu0  ;;  %v3824_v17 = vpop.f32.mrf.mxu1 }
 0x375   :  { %4410 = vst.msk [vmem:[%s6828_s4 + $0x1b] sm:$0x1] %vm4382_vm5, %v3824_v17 }
 0x376   :  { %v5068_v44 = vpop.f32.mrf.mxu0  ;;  %v5073_v6 = vpop.f32.mrf.mxu1 }
 0x378   :  { %v3827_v57 = vpop.f32.mrf.mxu1  ;;  %v3870_v63 = vpop.f32.mrf.mxu0 }
 0x379   :  { %4411 = vst.msk [vmem:[%s6828_s4 + $0x1c] sm:$0x1] %vm4382_vm5, %v3870_v63 }
 0x37a   :  { %v5074_v41 = vpop.f32.mrf.mxu1  ;;  %v5079_v60 = vpop.f32.mrf.mxu0 }
 0x37c   :  { %v3916_v59 = vpop.f32.mrf.mxu1  ;;  %v3873_v38 = vpop.f32.mrf.mxu0 }
 0x37d   :  { %4412 = vst.msk [vmem:[%s6828_s4 + $0x1d] sm:$0x1] %vm4382_vm5, %v3916_v59 }
 0x37e   :  { %v5085_v20 = vpop.f32.mrf.mxu1  ;;  %v5080_v32 = vpop.f32.mrf.mxu0 }
 0x380   :  { %v3919_v4 = vpop.f32.mrf.mxu1  ;;  %v3962_v56 = vpop.f32.mrf.mxu0 }
 0x381   :  { %4413 = vst.msk [vmem:[%s6828_s4 + $0x1e] sm:$0x1] %vm4382_vm5, %v3962_v56 }
 0x382   :  { %v5086_v23 = vpop.f32.mrf.mxu1  ;;  %v5091_v53 = vpop.f32.mrf.mxu0 }
 0x384   :  { %v4008_v22 = vpop.f32.mrf.mxu1  ;;  %v3965_v50 = vpop.f32.mrf.mxu0 }
 0x385   :  { %4414 = vst.msk [vmem:[%s6828_s4 + $0x1f] sm:$0x1] %vm4382_vm5, %v4008_v22 }
 0x386   :  { %v5097_v55 = vpop.f32.mrf.mxu1  ;;  %v5092_v62 = vpop.f32.mrf.mxu0 }
 0x388   :  { %v4011_v9 = vpop.f32.mrf.mxu1  ;;  %v4054_v16 = vpop.f32.mrf.mxu0 }
 0x389   :  { %4415 = vst.msk [vmem:[%s6828_s4 + $0x20] sm:$0x1] %vm4382_vm5, %v4054_v16 }
 0x38a   :  { %v5098_v11 = vpop.f32.mrf.mxu1  ;;  %v5103_v7 = vpop.f32.mrf.mxu0 }
 0x38c   :  { %v4100_v1 = vpop.f32.mrf.mxu1  ;;  %v4057_v2 = vpop.f32.mrf.mxu0 }
 0x38d   :  { %4416 = vst.msk [vmem:[%s6828_s4 + $0x21] sm:$0x1] %vm4382_vm5, %v4100_v1 }
 0x38e   :  { %v5109_v15 = vpop.f32.mrf.mxu1  ;;  %v5104_v10 = vpop.f32.mrf.mxu0 }
 0x390   :  { %v4103_v14 = vpop.f32.mrf.mxu1 }
 0x391   :  { %v4146_v29 = vpop.f32.mrf.mxu0 }
 0x392   :  { %4417 = vst.msk [vmem:[%s6828_s4 + $0x22] sm:$0x1] %vm4382_vm5, %v4146_v29  ;;  %v5110_v33 = vpop.f32.mrf.mxu1 }
 0x393   :  { %v5115_v35 = vpop.f32.mrf.mxu0 }
 0x394   :  { %v4192_v61 = vpop.f32.mrf.mxu1 }
 0x395   :  { %v4149_v5 = vpop.f32.mrf.mxu0  ;;  %4418 = vst.msk [vmem:[%s6828_s4 + $0x23] sm:$0x1] %vm4382_vm5, %v4192_v61 }
 0x396   :  { %v5121_v12 = vpop.f32.mrf.mxu1 }
 0x397   :  { %v5116_v3 = vpop.f32.mrf.mxu0 }
 0x398   :  { %v4195_v24 = vpop.f32.mrf.mxu1 }
 0x399   :  { %v4238_v25 = vpop.f32.mrf.mxu0 }
 0x39a   :  { %4419 = vst.msk [vmem:[%s6828_s4 + $0x24] sm:$0x1] %vm4382_vm5, %v4238_v25  ;;  %v5122_v31 = vpop.f32.mrf.mxu1 }
 0x39b   :  { %v5127_v27 = vpop.f32.mrf.mxu0 }
 0x39c   :  { %v4284_v49 = vpop.f32.mrf.mxu1 }
 0x39d   :  { %v4241_v37 = vpop.f32.mrf.mxu0  ;;  %4420 = vst.msk [vmem:[%s6828_s4 + $0x25] sm:$0x1] %vm4382_vm5, %v4284_v49 }
 0x39e   :  { %v5133_v43 = vpop.f32.mrf.mxu1 }
 0x39f   :  { %v5128_v28 = vpop.f32.mrf.mxu0 }
 0x3a0   :  { %v4287_v21 = vpop.f32.mrf.mxu1 }
 0x3a1   :  { %v4330_v36 = vpop.f32.mrf.mxu0 }
 0x3a2   :  { %4421 = vst.msk [vmem:[%s6828_s4 + $0x26] sm:$0x1] %vm4382_vm5, %v4330_v36  ;;  %v5134_v58 = vpop.f32.mrf.mxu1 }
 0x3a3   :  { %v5139_v34 = vpop.f32.mrf.mxu0 }
 0x3a4   :  { %v4376_v48 = vpop.f32.mrf.mxu1 }
 0x3a5   :  { %v4333_v0 = vpop.f32.mrf.mxu0  ;;  %4422 = vst.msk [vmem:[%s6828_s4 + $0x27] sm:$0x1] %vm4382_vm5, %v4376_v48 }
 0x3a6   :  { %v5145_v46 = vpop.f32.mrf.mxu1 }
 0x3a7   :  { %v5140_v30 = vpop.f32.mrf.mxu0 }
 0x3a8   :  { %v4379_v51 = vpop.f32.mrf.mxu1 }
 0x3aa   :  { %v5146_v8 = vpop.f32.mrf.mxu1 }

// kernel: closed_call.82
= control target key start
LH: loop header
LB: loop body
LE: loop exit
PB: predicated region body
PF: predicated region fallthrough
CT: control target
= control target key end

     0   :  { %vm323_vm0 = vcmask 261120   ;;  %v5939_v0 = vmov 0.0   ;;  %vm5940_vm1 = vmmov 0   ;;  %vm2403_vm3 = vcmask 122880   ;;  %s7437_s2 = inlined_call_operand.vmem [shape: bf16[40,16,32], index: 2, kind: input, shape index: {}]   ;;  %s7438_s1 = inlined_call_operand.vmem [shape: f32[40,1,32], index: 1, kind: input, shape index: {}]   ;;  %s7439_s0 = inlined_call_operand.<no memory space> [shape: s32[1], index: 0, kind: input, shape index: {}]   ;;  %s7440_s4 = inlined_call_operand.vmem [shape: f32[16,40,1,16], index: 4, kind: input, shape index: {}]   ;;  %s7441_s3 = inlined_call_operand.vmem [shape: bf16[40,16,32], index: 3, kind: input, shape index: {}]   ;;  %s7442_s5 = inlined_call_operand.vmem [shape: f32[40,1,32], index: 5, kind: output, shape index: {}]  }
   0x1   :  { %5216 = vmatprep.subr.bf16.mxu0 %v5939_v0  ;;  %5222 = vmatprep.subr.bf16.mxu1 %v5939_v0  ;;  %v5699_v1 = vld [vmem:[%s7437_s2] sm:$0xff]   ;;  %v5700_v2 = vld [vmem:[%s7437_s2 + $0x8] sm:$0xff]   ;;  %v5701_v7 = vld [vmem:[%s7437_s2 + $0x10] sm:$0xff]   ;;  %p31_p0 = scmp.lt.s32.totalorder %s7439_s0, 15  ;;  %vm2890_vm4 = vcmask 130048   ;;  %vm4845_vm5 = vcmask 253952  }
   0x2   :  { %5218 = vmatprep.mubr.msk.bf16.mxu0 %vm5940_vm1, %v5939_v0  ;;  %5224 = vmatprep.mubr.msk.bf16.mxu1 %vm5940_vm1, %v5939_v0  ;;  %v328_v3 = vsel %vm323_vm0, %v5699_v1, 0  ;;  %v38_v4 = vld [vmem:[%s7438_s1] sm:$0x1]  ;;  %v39_v5 = vld [vmem:[%s7438_s1 + $0x1] sm:$0x1]  ;;  %v379_v6 = vsel %vm323_vm0, %v5700_v2, 0 }
   0x3   :  { %5217 = vmatpush3.bf16.xpose.msra.mxu0 %v328_v3  ;;  %5223 = vmatpush3.bf16.xpose.msra.mxu1 %v379_v6  ;;  %v5702_v8 = vld [vmem:[%s7437_s2 + $0x18] sm:$0xff]   ;;  %v78_v9 = vpack.c.bf16 %v38_v4, %v38_v4  ;;  %v79_v10 = vpack.c.bf16 %v39_v5, %v39_v5  ;;  %v430_v11 = vsel %vm323_vm0, %v5701_v7, 0  ;;  %v5703_v13 = vld [vmem:[%s7437_s2 + $0x20] sm:$0xff]   ;;  %v5704_v16 = vld [vmem:[%s7437_s2 + $0x28] sm:$0xff]   ;;  %s32_s30 = scalar_select %p31_p0, %s7439_s0, 15 }
   0x4   :  { %5228 = vmatprep.subr.bf16.mxu0 %v5939_v0  ;;  %5234 = vmatprep.subr.bf16.mxu1 %v5939_v0  ;;  %v481_v12 = vsel %vm323_vm0, %v5702_v8, 0  ;;  %v40_v14 = vld [vmem:[%s7438_s1 + $0x2] sm:$0x1]  ;;  %v41_v15 = vld [vmem:[%s7438_s1 + $0x3] sm:$0x1]  ;;  %v532_v19 = vsel %vm323_vm0, %v5703_v13, 0 }
   0x5   :  { %v80_v17 = vpack.c.bf16 %v40_v14, %v40_v14  ;;  %v81_v18 = vpack.c.bf16 %v41_v15, %v41_v15  ;;  %v583_v20 = vsel %vm323_vm0, %v5704_v16, 0  ;;  %v42_v21 = vld [vmem:[%s7438_s1 + $0x4] sm:$0x1]  ;;  %v5705_v22 = vld [vmem:[%s7437_s2 + $0x30] sm:$0xff]   ;;  %v43_v23 = vld [vmem:[%s7438_s1 + $0x5] sm:$0x1] }
   0x6   :  { %v5706_v24 = vld [vmem:[%s7437_s2 + $0x38] sm:$0xff]   ;;  %v82_v25 = vpack.c.bf16 %v42_v21, %v42_v21  ;;  %v83_v26 = vpack.c.bf16 %v43_v23, %v43_v23  ;;  %v634_v27 = vsel %vm323_vm0, %v5705_v22, 0  ;;  %v44_v29 = vld [vmem:[%s7438_s1 + $0x6] sm:$0x1]  ;;  %v45_v30 = vld [vmem:[%s7438_s1 + $0x7] sm:$0x1] }
   0x7   :  { %v685_v28 = vsel %vm323_vm0, %v5706_v24, 0  ;;  %v5707_v31 = vld [vmem:[%s7437_s2 + $0x40] sm:$0xff]   ;;  %v5708_v32 = vld [vmem:[%s7437_s2 + $0x48] sm:$0xff]   ;;  %v84_v33 = vpack.c.bf16 %v44_v29, %v44_v29  ;;  %v85_v34 = vpack.c.bf16 %v45_v30, %v45_v30  ;;  %v5709_v39 = vld [vmem:[%s7437_s2 + $0x50] sm:$0xff]   ;;  %s5696_s6 = smul.u32 40, %s32_s30 }
   0x8   :  { %v736_v35 = vsel %vm323_vm0, %v5707_v31, 0  ;;  %v787_v36 = vsel %vm323_vm0, %v5708_v32, 0  ;;  %v46_v37 = vld [vmem:[%s7438_s1 + $0x8] sm:$0x1]  ;;  %v47_v38 = vld [vmem:[%s7438_s1 + $0x9] sm:$0x1] }
   0x9   :  { %v5710_v40 = vld [vmem:[%s7437_s2 + $0x58] sm:$0xff]   ;;  %v86_v41 = vpack.c.bf16 %v46_v37, %v46_v37  ;;  %v87_v42 = vpack.c.bf16 %v47_v38, %v47_v38  ;;  %v838_v43 = vsel %vm323_vm0, %v5709_v39, 0  ;;  %v5711_v45 = vld [vmem:[%s7437_s2 + $0x60] sm:$0xff]   ;;  %v48_v46 = vld [vmem:[%s7438_s1 + $0xa] sm:$0x1]  ;;  %s6426_s9 = scalar_lea.vmem %s7440_s4, %s5696_s6 }
   0xa   :  { %5219 = vmatmul.mubr.msk.bf16.vlgmr.msra.gmra.mxu0 %vm323_vm0, %v78_v9  ;;  %5225 = vmatmul.mubr.msk.bf16.vlgmr.msra.gmra.mxu1 %vm323_vm0, %v79_v10  ;;  %v889_v44 = vsel %vm323_vm0, %v5710_v40, 0  ;;  %v5712_v47 = vld [vmem:[%s7437_s2 + $0x68] sm:$0xff]   ;;  %v88_v49 = vpack.c.bf16 %v48_v46, %v48_v46  ;;  %v940_v51 = vsel %vm323_vm0, %v5711_v45, 0  ;;  %v5713_v55 = vld [vmem:[%s7437_s2 + $0x70] sm:$0xff]   ;;  %v5714_v56 = vld [vmem:[%s7437_s2 + $0x78] sm:$0xff]  }
   0xb   :  { %5229 = vmatpush3.bf16.xpose.msra.mxu0 %v430_v11  ;;  %5235 = vmatpush3.bf16.xpose.msra.mxu1 %v481_v12  ;;  %v49_v48 = vld [vmem:[%s7438_s1 + $0xb] sm:$0x1]  ;;  %v991_v52 = vsel %vm323_vm0, %v5712_v47, 0  ;;  %v50_v53 = vld [vmem:[%s7438_s1 + $0xc] sm:$0x1]  ;;  %v1042_v59 = vsel %vm323_vm0, %v5713_v55, 0 }
   0xc   :  { %5230 = vmatprep.mubr.msk.bf16.mxu0 %vm5940_vm1, %v5939_v0  ;;  %5236 = vmatprep.mubr.msk.bf16.mxu1 %vm5940_vm1, %v5939_v0  ;;  %v89_v50 = vpack.c.bf16 %v49_v48, %v49_v48  ;;  %v51_v54 = vld [vmem:[%s7438_s1 + $0xd] sm:$0x1]  ;;  %v90_v57 = vpack.c.bf16 %v50_v53, %v50_v53  ;;  %v1093_v60 = vsel %vm323_vm0, %v5714_v56, 0  ;;  %v52_v61 = vld [vmem:[%s7438_s1 + $0xe] sm:$0x1]  ;;  %v5715_v63 = vld [vmem:[%s7437_s2 + $0x80] sm:$0xff]  }
   0xd   :  { %5240 = vmatprep.subr.bf16.mxu0 %v5939_v0  ;;  %5246 = vmatprep.subr.bf16.mxu1 %v5939_v0  ;;  %v91_v58 = vpack.c.bf16 %v51_v54, %v51_v54  ;;  %v53_v62 = vld [vmem:[%s7438_s1 + $0xf] sm:$0x1]  ;;  %v92_v2 = vpack.c.bf16 %v52_v61, %v52_v61  ;;  %v1144_v4 = vsel %vm323_vm0, %v5715_v63, 0  ;;  %v54_v6 = vld [vmem:[%s7438_s1 + $0x10] sm:$0x1]  ;;  %v5718_v9 = vld [vmem:[%s7437_s2 + $0x98] sm:$0xff]  }
   0xe   :  { %v5716_v1 = vld [vmem:[%s7437_s2 + $0x88] sm:$0xff]   ;;  %v93_v3 = vpack.c.bf16 %v53_v62, %v53_v62  ;;  %v55_v7 = vld [vmem:[%s7438_s1 + $0x11] sm:$0x1]  ;;  %v94_v10 = vpack.c.bf16 %v54_v6, %v54_v6  ;;  %v1297_v13 = vsel %vm323_vm0, %v5718_v9, 0  ;;  %v56_v14 = vld [vmem:[%s7438_s1 + $0x12] sm:$0x1] }
   0xf   :  { %v1195_v5 = vsel %vm323_vm0, %v5716_v1, 0  ;;  %v5717_v8 = vld [vmem:[%s7437_s2 + $0x90] sm:$0xff]   ;;  %v95_v11 = vpack.c.bf16 %v55_v7, %v55_v7  ;;  %v5719_v16 = vld [vmem:[%s7437_s2 + $0xa0] sm:$0xff]   ;;  %v62_v38 = vld [vmem:[%s7438_s1 + $0x18] sm:$0x1] }
  0x10   :  { %v1246_v12 = vsel %vm323_vm0, %v5717_v8, 0  ;;  %v57_v15 = vld [vmem:[%s7438_s1 + $0x13] sm:$0x1]  ;;  %v58_v22 = vld [vmem:[%s7438_s1 + $0x14] sm:$0x1]  ;;  %v5723_v32 = vld [vmem:[%s7437_s2 + $0xc0] sm:$0xff]  }
  0x11   :  { %v59_v23 = vld [vmem:[%s7438_s1 + $0x15] sm:$0x1]  ;;  %v60_v30 = vld [vmem:[%s7438_s1 + $0x16] sm:$0x1]  ;;  %v61_v31 = vld [vmem:[%s7438_s1 + $0x17] sm:$0x1] }
  0x12   :  { %5231 = vmatmul.mubr.msk.bf16.vlgmr.msra.gmra.mxu0 %vm323_vm0, %v80_v17  ;;  %5237 = vmatmul.mubr.msk.bf16.vlgmr.msra.gmra.mxu1 %vm323_vm0, %v81_v18  ;;  %v5720_v17 = vld [vmem:[%s7437_s2 + $0xa8] sm:$0xff]   ;;  %v96_v18 = vpack.c.bf16 %v56_v14, %v56_v14  ;;  %v5721_v24 = vld [vmem:[%s7437_s2 + $0xb0] sm:$0xff]   ;;  %v63_v39 = vld [vmem:[%s7438_s1 + $0x19] sm:$0x1] }
  0x13   :  { %5241 = vmatpush3.bf16.xpose.msra.mxu0 %v532_v19  ;;  %5247 = vmatpush3.bf16.xpose.msra.mxu1 %v583_v20  ;;  %v97_v19 = vpack.c.bf16 %v57_v15, %v57_v15  ;;  %v1348_v20 = vsel %vm323_vm0, %v5719_v16, 0  ;;  %v1399_v21 = vsel %vm323_vm0, %v5720_v17, 0  ;;  %v5725_v40 = vld [vmem:[%s7437_s2 + $0xd0] sm:$0xff]   ;;  %v64_v46 = vld [vmem:[%s7438_s1 + $0x1a] sm:$0x1]  ;;  %v5727_v48 = vld [vmem:[%s7437_s2 + $0xe0] sm:$0xff]  }
  0x14   :  { %5242 = vmatprep.mubr.msk.bf16.mxu0 %vm5940_vm1, %v5939_v0  ;;  %5248 = vmatprep.mubr.msk.bf16.mxu1 %vm5940_vm1, %v5939_v0  ;;  %v65_v47 = vld [vmem:[%s7438_s1 + $0x1b] sm:$0x1]  ;;  %v66_v54 = vld [vmem:[%s7438_s1 + $0x1c] sm:$0x1]  ;;  %v67_v55 = vld [vmem:[%s7438_s1 + $0x1d] sm:$0x1] }
  0x15   :  { %5252 = vmatprep.subr.bf16.mxu0 %v5939_v0  ;;  %5258 = vmatprep.subr.bf16.mxu1 %v5939_v0  ;;  %v5729_v56 = vld [vmem:[%s7437_s2 + $0xf0] sm:$0xff]   ;;  %v68_v62 = vld [vmem:[%s7438_s1 + $0x1e] sm:$0x1]  ;;  %v69_v63 = vld [vmem:[%s7438_s1 + $0x1f] sm:$0x1] }
  0x16   :  { %v5731_v1 = vld [vmem:[%s7437_s2 + $0x100] sm:$0xff]   ;;  %v5733_v9 = vld [vmem:[%s7437_s2 + $0x110] sm:$0xff]  }
  0x17   :  { %v70_v7 = vld [vmem:[%s7438_s1 + $0x20] sm:$0x1]  ;;  %v71_v8 = vld [vmem:[%s7438_s1 + $0x21] sm:$0x1]  ;;  %v72_v15 = vld [vmem:[%s7438_s1 + $0x22] sm:$0x1] }
  0x18   :  { %v73_v16 = vld [vmem:[%s7438_s1 + $0x23] sm:$0x1] }
  0x19   :  { %v5735_v17 = vld [vmem:[%s7437_s2 + $0x120] sm:$0xff]  }
  0x1a   :  { %5243 = vmatmul.mubr.msk.bf16.vlgmr.msra.gmra.mxu0 %vm323_vm0, %v82_v25  ;;  %5249 = vmatmul.mubr.msk.bf16.vlgmr.msra.gmra.mxu1 %vm323_vm0, %v83_v26  ;;  %v5722_v25 = vld [vmem:[%s7437_s2 + $0xb8] sm:$0xff]   ;;  %v98_v26 = vpack.c.bf16 %v58_v22, %v58_v22 }
  0x1b   :  { %5253 = vmatpush3.bf16.xpose.msra.mxu0 %v634_v27  ;;  %5259 = vmatpush3.bf16.xpose.msra.mxu1 %v685_v28  ;;  %v99_v27 = vpack.c.bf16 %v59_v23, %v59_v23  ;;  %v1450_v28 = vsel %vm323_vm0, %v5721_v24, 0  ;;  %v1501_v29 = vsel %vm323_vm0, %v5722_v25, 0  ;;  %v74_v23 = vld [vmem:[%s7438_s1 + $0x24] sm:$0x1]  ;;  %v75_v24 = vld [vmem:[%s7438_s1 + $0x25] sm:$0x1] }
  0x1c   :  { %5254 = vmatprep.mubr.msk.bf16.mxu0 %vm5940_vm1, %v5939_v0  ;;  %5260 = vmatprep.mubr.msk.bf16.mxu1 %vm5940_vm1, %v5939_v0  ;;  %v5737_v25 = vld [vmem:[%s7437_s2 + $0x130] sm:$0xff]  }
  0x1d   :  { %5264 = vmatprep.subr.bf16.mxu0 %v5939_v0  ;;  %5270 = vmatprep.subr.bf16.mxu1 %v5939_v0 }
  0x22   :  { %5255 = vmatmul.mubr.msk.bf16.vlgmr.msra.gmra.mxu0 %vm323_vm0, %v84_v33  ;;  %5261 = vmatmul.mubr.msk.bf16.vlgmr.msra.gmra.mxu1 %vm323_vm0, %v85_v34  ;;  %v5724_v33 = vld [vmem:[%s7437_s2 + $0xc8] sm:$0xff]   ;;  %v100_v34 = vpack.c.bf16 %v60_v30, %v60_v30 }
  0x23   :  { %5265 = vmatpush3.bf16.xpose.msra.mxu0 %v736_v35  ;;  %5271 = vmatpush3.bf16.xpose.msra.mxu1 %v787_v36  ;;  %v101_v35 = vpack.c.bf16 %v61_v31, %v61_v31  ;;  %v1552_v36 = vsel %vm323_vm0, %v5723_v32, 0  ;;  %v1603_v37 = vsel %vm323_vm0, %v5724_v33, 0  ;;  %v76_v31 = vld [vmem:[%s7438_s1 + $0x26] sm:$0x1]  ;;  %v77_v32 = vld [vmem:[%s7438_s1 + $0x27] sm:$0x1] }
  0x24   :  { %5266 = vmatprep.mubr.msk.bf16.mxu0 %vm5940_vm1, %v5939_v0  ;;  %5272 = vmatprep.mubr.msk.bf16.mxu1 %vm5940_vm1, %v5939_v0  ;;  %v116_v33 = vpack.c.bf16 %v76_v31, %v76_v31 }
  0x25   :  { %5276 = vmatprep.subr.bf16.mxu0 %v5939_v0  ;;  %5282 = vmatprep.subr.bf16.mxu1 %v5939_v0 }
  0x2a   :  { %5267 = vmatmul.mubr.msk.bf16.vlgmr.msra.gmra.mxu0 %vm323_vm0, %v86_v41  ;;  %5273 = vmatmul.mubr.msk.bf16.vlgmr.msra.gmra.mxu1 %vm323_vm0, %v87_v42  ;;  %v5726_v41 = vld [vmem:[%s7437_s2 + $0xd8] sm:$0xff]   ;;  %v102_v42 = vpack.c.bf16 %v62_v38, %v62_v38  ;;  %v278_v38 = vld [vmem:[%s6426_s9] sm:$0x1] }
  0x2b   :  { %5277 = vmatpush3.bf16.xpose.msra.mxu0 %v838_v43  ;;  %5283 = vmatpush3.bf16.xpose.msra.mxu1 %v889_v44  ;;  %v103_v43 = vpack.c.bf16 %v63_v39, %v63_v39  ;;  %v1654_v44 = vsel %vm323_vm0, %v5725_v40, 0  ;;  %v1705_v45 = vsel %vm323_vm0, %v5726_v41, 0  ;;  %v279_v39 = vld [vmem:[%s6426_s9 + $0x1] sm:$0x1] }
  0x2c   :  { %5278 = vmatprep.mubr.msk.bf16.mxu0 %vm5940_vm1, %v5939_v0  ;;  %5284 = vmatprep.mubr.msk.bf16.mxu1 %vm5940_vm1, %v5939_v0 }
  0x2d   :  { %5288 = vmatprep.subr.bf16.mxu0 %v5939_v0  ;;  %5294 = vmatprep.subr.bf16.mxu1 %v5939_v0 }
  0x32   :  { %5279 = vmatmul.mubr.msk.bf16.vlgmr.msra.gmra.mxu0 %vm323_vm0, %v88_v49  ;;  %5285 = vmatmul.mubr.msk.bf16.vlgmr.msra.gmra.mxu1 %vm323_vm0, %v89_v50  ;;  %v5728_v49 = vld [vmem:[%s7437_s2 + $0xe8] sm:$0xff]   ;;  %v104_v50 = vpack.c.bf16 %v64_v46, %v64_v46 }
  0x33   :  { %5289 = vmatpush3.bf16.xpose.msra.mxu0 %v940_v51  ;;  %5295 = vmatpush3.bf16.xpose.msra.mxu1 %v991_v52  ;;  %v105_v51 = vpack.c.bf16 %v65_v47, %v65_v47  ;;  %v1756_v52 = vsel %vm323_vm0, %v5727_v48, 0  ;;  %v1807_v53 = vsel %vm323_vm0, %v5728_v49, 0 }
  0x34   :  { %5290 = vmatprep.mubr.msk.bf16.mxu0 %vm5940_vm1, %v5939_v0  ;;  %5296 = vmatprep.mubr.msk.bf16.mxu1 %vm5940_vm1, %v5939_v0 }
  0x35   :  { %5300 = vmatprep.subr.bf16.mxu0 %v5939_v0  ;;  %5306 = vmatprep.subr.bf16.mxu1 %v5939_v0 }
  0x3a   :  { %5291 = vmatmul.mubr.msk.bf16.vlgmr.msra.gmra.mxu0 %vm323_vm0, %v90_v57  ;;  %5297 = vmatmul.mubr.msk.bf16.vlgmr.msra.gmra.mxu1 %vm323_vm0, %v91_v58  ;;  %v5730_v57 = vld [vmem:[%s7437_s2 + $0xf8] sm:$0xff]   ;;  %v106_v58 = vpack.c.bf16 %v66_v54, %v66_v54 }
  0x3b   :  { %5301 = vmatpush3.bf16.xpose.msra.mxu0 %v1042_v59  ;;  %5307 = vmatpush3.bf16.xpose.msra.mxu1 %v1093_v60  ;;  %v107_v59 = vpack.c.bf16 %v67_v55, %v67_v55  ;;  %v1858_v60 = vsel %vm323_vm0, %v5729_v56, 0  ;;  %v1909_v61 = vsel %vm323_vm0, %v5730_v57, 0  ;;  %v281_v56 = vld [vmem:[%s6426_s9 + $0x3] sm:$0x1] }
  0x3c   :  { %5302 = vmatprep.mubr.msk.bf16.mxu0 %vm5940_vm1, %v5939_v0  ;;  %5308 = vmatprep.mubr.msk.bf16.mxu1 %vm5940_vm1, %v5939_v0 }
  0x3d   :  { %5312 = vmatprep.subr.bf16.mxu0 %v5939_v0  ;;  %5318 = vmatprep.subr.bf16.mxu1 %v5939_v0 }
  0x42   :  { %5303 = vmatmul.mubr.msk.bf16.vlgmr.msra.gmra.mxu0 %vm323_vm0, %v92_v2  ;;  %5309 = vmatmul.mubr.msk.bf16.vlgmr.msra.gmra.mxu1 %vm323_vm0, %v93_v3  ;;  %v5732_v2 = vld [vmem:[%s7437_s2 + $0x108] sm:$0xff]   ;;  %v108_v3 = vpack.c.bf16 %v68_v62, %v68_v62 }
  0x43   :  { %5313 = vmatpush3.bf16.xpose.msra.mxu0 %v1144_v4  ;;  %5319 = vmatpush3.bf16.xpose.msra.mxu1 %v1195_v5  ;;  %v109_v4 = vpack.c.bf16 %v69_v63, %v69_v63  ;;  %v1960_v5 = vsel %vm323_vm0, %v5731_v1, 0  ;;  %v2011_v6 = vsel %vm323_vm0, %v5732_v2, 0 }
  0x44   :  { %5314 = vmatprep.mubr.msk.bf16.mxu0 %vm5940_vm1, %v5939_v0  ;;  %5320 = vmatprep.mubr.msk.bf16.mxu1 %vm5940_vm1, %v5939_v0 }
  0x45   :  { %5324 = vmatprep.subr.bf16.mxu0 %v5939_v0  ;;  %5330 = vmatprep.subr.bf16.mxu1 %v5939_v0 }
  0x4a   :  { %5315 = vmatmul.mubr.msk.bf16.vlgmr.msra.gmra.mxu0 %vm323_vm0, %v94_v10  ;;  %5321 = vmatmul.mubr.msk.bf16.vlgmr.msra.gmra.mxu1 %vm323_vm0, %v95_v11  ;;  %v5734_v10 = vld [vmem:[%s7437_s2 + $0x118] sm:$0xff]   ;;  %v110_v11 = vpack.c.bf16 %v70_v7, %v70_v7 }
  0x4b   :  { %5325 = vmatpush3.bf16.xpose.msra.mxu0 %v1246_v12  ;;  %5331 = vmatpush3.bf16.xpose.msra.mxu1 %v1297_v13  ;;  %v111_v12 = vpack.c.bf16 %v71_v8, %v71_v8  ;;  %v2062_v13 = vsel %vm323_vm0, %v5733_v9, 0  ;;  %v2113_v14 = vsel %vm323_vm0, %v5734_v10, 0  ;;  %v283_v9 = vld [vmem:[%s6426_s9 + $0x5] sm:$0x1] }
  0x4c   :  { %5326 = vmatprep.mubr.msk.bf16.mxu0 %vm5940_vm1, %v5939_v0  ;;  %5332 = vmatprep.mubr.msk.bf16.mxu1 %vm5940_vm1, %v5939_v0 }
  0x4d   :  { %5336 = vmatprep.subr.bf16.mxu0 %v5939_v0  ;;  %5342 = vmatprep.subr.bf16.mxu1 %v5939_v0 }
  0x52   :  { %5327 = vmatmul.mubr.msk.bf16.vlgmr.msra.gmra.mxu0 %vm323_vm0, %v96_v18  ;;  %5333 = vmatmul.mubr.msk.bf16.vlgmr.msra.gmra.mxu1 %vm323_vm0, %v97_v19  ;;  %v5736_v18 = vld [vmem:[%s7437_s2 + $0x128] sm:$0xff]   ;;  %v112_v19 = vpack.c.bf16 %v72_v15, %v72_v15 }
  0x53   :  { %5337 = vmatpush3.bf16.xpose.msra.mxu0 %v1348_v20  ;;  %5343 = vmatpush3.bf16.xpose.msra.mxu1 %v1399_v21  ;;  %v113_v20 = vpack.c.bf16 %v73_v16, %v73_v16  ;;  %v2164_v21 = vsel %vm323_vm0, %v5735_v17, 0  ;;  %v2215_v22 = vsel %vm323_vm0, %v5736_v18, 0 }
  0x54   :  { %5338 = vmatprep.mubr.msk.bf16.mxu0 %vm5940_vm1, %v5939_v0  ;;  %5344 = vmatprep.mubr.msk.bf16.mxu1 %vm5940_vm1, %v5939_v0 }
  0x55   :  { %5348 = vmatprep.subr.bf16.mxu0 %v5939_v0  ;;  %5354 = vmatprep.subr.bf16.mxu1 %v5939_v0 }
  0x5a   :  { %5339 = vmatmul.mubr.msk.bf16.vlgmr.msra.gmra.mxu0 %vm323_vm0, %v98_v26  ;;  %5345 = vmatmul.mubr.msk.bf16.vlgmr.msra.gmra.mxu1 %vm323_vm0, %v99_v27  ;;  %v5738_v26 = vld [vmem:[%s7437_s2 + $0x138] sm:$0xff]   ;;  %v114_v27 = vpack.c.bf16 %v74_v23, %v74_v23  ;;  %v284_v23 = vld [vmem:[%s6426_s9 + $0x6] sm:$0x1] }
  0x5b   :  { %5349 = vmatpush3.bf16.xpose.msra.mxu0 %v1450_v28  ;;  %5355 = vmatpush3.bf16.xpose.msra.mxu1 %v1501_v29  ;;  %v115_v28 = vpack.c.bf16 %v75_v24, %v75_v24  ;;  %v2266_v29 = vsel %vm323_vm0, %v5737_v25, 0  ;;  %v2317_v30 = vsel %vm323_vm0, %v5738_v26, 0  ;;  %v285_v25 = vld [vmem:[%s6426_s9 + $0x7] sm:$0x1] }
  0x5c   :  { %5350 = vmatprep.mubr.msk.bf16.mxu0 %vm5940_vm1, %v5939_v0  ;;  %5356 = vmatprep.mubr.msk.bf16.mxu1 %vm5940_vm1, %v5939_v0 }
  0x5d   :  { %5360 = vmatprep.subr.bf16.mxu0 %v5939_v0  ;;  %5366 = vmatprep.subr.bf16.mxu1 %v5939_v0 }
  0x62   :  { %5351 = vmatmul.mubr.msk.bf16.vlgmr.msra.gmra.mxu0 %vm323_vm0, %v100_v34  ;;  %5357 = vmatmul.mubr.msk.bf16.vlgmr.msra.gmra.mxu1 %vm323_vm0, %v101_v35  ;;  %v117_v34 = vpack.c.bf16 %v77_v32, %v77_v32  ;;  %v2359_v35 = vlaneseq }
  0x63   :  { %5361 = vmatpush3.bf16.xpose.msra.mxu0 %v1552_v36  ;;  %5367 = vmatpush3.bf16.xpose.msra.mxu1 %v1603_v37  ;;  %v2361_v37 = vstv %s7439_s0 }
  0x64   :  { %5362 = vmatprep.mubr.msk.bf16.mxu0 %vm5940_vm1, %v5939_v0  ;;  %5368 = vmatprep.mubr.msk.bf16.mxu1 %vm5940_vm1, %v5939_v0  ;;  %v2360_v36 = vand.u32 127, %v2359_v35 }
  0x65   :  { %5372 = vmatprep.subr.bf16.mxu0 %v5939_v0  ;;  %5378 = vmatprep.subr.bf16.mxu1 %v5939_v0 }
  0x66   :  { %vm6433_vm2 = vcmp.le.s32.totalorder %v2360_v36, %v2361_v37 }
  0x6a   :  { %5363 = vmatmul.mubr.msk.bf16.vlgmr.msra.gmra.mxu0 %vm323_vm0, %v102_v42  ;;  %5369 = vmatmul.mubr.msk.bf16.vlgmr.msra.gmra.mxu1 %vm323_vm0, %v103_v43 }
  0x6b   :  { %5373 = vmatpush3.bf16.xpose.msra.mxu0 %v1654_v44  ;;  %5379 = vmatpush3.bf16.xpose.msra.mxu1 %v1705_v45 }
  0x6c   :  { %5374 = vmatprep.mubr.msk.bf16.mxu0 %vm5940_vm1, %v5939_v0  ;;  %5380 = vmatprep.mubr.msk.bf16.mxu1 %vm5940_vm1, %v5939_v0 }
  0x6d   :  { %5384 = vmatprep.subr.bf16.mxu0 %v5939_v0  ;;  %5390 = vmatprep.subr.bf16.mxu1 %v5939_v0 }
  0x72   :  { %5375 = vmatmul.mubr.msk.bf16.vlgmr.msra.gmra.mxu0 %vm323_vm0, %v104_v50  ;;  %5381 = vmatmul.mubr.msk.bf16.vlgmr.msra.gmra.mxu1 %vm323_vm0, %v105_v51 }
  0x73   :  { %5385 = vmatpush3.bf16.xpose.msra.mxu0 %v1756_v52  ;;  %5391 = vmatpush3.bf16.xpose.msra.mxu1 %v1807_v53  ;;  %v280_v53 = vld [vmem:[%s6426_s9 + $0x2] sm:$0x1] }
  0x74   :  { %5386 = vmatprep.mubr.msk.bf16.mxu0 %vm5940_vm1, %v5939_v0  ;;  %5392 = vmatprep.mubr.msk.bf16.mxu1 %vm5940_vm1, %v5939_v0 }
  0x75   :  { %5396 = vmatprep.subr.bf16.mxu0 %v5939_v0  ;;  %5402 = vmatprep.subr.bf16.mxu1 %v5939_v0 }
  0x7a   :  { %5387 = vmatmul.mubr.msk.bf16.vlgmr.msra.gmra.mxu0 %vm323_vm0, %v106_v58  ;;  %5393 = vmatmul.mubr.msk.bf16.vlgmr.msra.gmra.mxu1 %vm323_vm0, %v107_v59 }
  0x7b   :  { %5397 = vmatpush3.bf16.xpose.msra.mxu0 %v1858_v60  ;;  %5403 = vmatpush3.bf16.xpose.msra.mxu1 %v1909_v61 }
  0x7c   :  { %5398 = vmatprep.mubr.msk.bf16.mxu0 %vm5940_vm1, %v5939_v0  ;;  %5404 = vmatprep.mubr.msk.bf16.mxu1 %vm5940_vm1, %v5939_v0 }
  0x7d   :  { %5408 = vmatprep.subr.bf16.mxu0 %v5939_v0  ;;  %5414 = vmatprep.subr.bf16.mxu1 %v5939_v0 }
  0x82   :  { %5399 = vmatmul.mubr.msk.bf16.vlgmr.msra.gmra.mxu0 %vm323_vm0, %v108_v3  ;;  %5405 = vmatmul.mubr.msk.bf16.vlgmr.msra.gmra.mxu1 %vm323_vm0, %v109_v4 }
  0x83   :  { %5409 = vmatpush3.bf16.xpose.msra.mxu0 %v1960_v5  ;;  %5415 = vmatpush3.bf16.xpose.msra.mxu1 %v2011_v6  ;;  %v282_v6 = vld [vmem:[%s6426_s9 + $0x4] sm:$0x1] }
  0x84   :  { %5410 = vmatprep.mubr.msk.bf16.mxu0 %vm5940_vm1, %v5939_v0  ;;  %5416 = vmatprep.mubr.msk.bf16.mxu1 %vm5940_vm1, %v5939_v0 }
  0x85   :  { %5420 = vmatprep.subr.bf16.mxu0 %v5939_v0  ;;  %5426 = vmatprep.subr.bf16.mxu1 %v5939_v0 }
  0x8a   :  { %5411 = vmatmul.mubr.msk.bf16.vlgmr.msra.gmra.mxu0 %vm323_vm0, %v110_v11  ;;  %5417 = vmatmul.mubr.msk.bf16.vlgmr.msra.gmra.mxu1 %vm323_vm0, %v111_v12 }
  0x8b   :  { %5421 = vmatpush3.bf16.xpose.msra.mxu0 %v2062_v13  ;;  %5427 = vmatpush3.bf16.xpose.msra.mxu1 %v2113_v14 }
  0x8c   :  { %5422 = vmatprep.mubr.msk.bf16.mxu0 %vm5940_vm1, %v5939_v0  ;;  %5428 = vmatprep.mubr.msk.bf16.mxu1 %vm5940_vm1, %v5939_v0 }
  0x8d   :  { %5432 = vmatprep.subr.bf16.mxu0 %v5939_v0  ;;  %5438 = vmatprep.subr.bf16.mxu1 %v5939_v0 }
  0x92   :  { %5423 = vmatmul.mubr.msk.bf16.vlgmr.msra.gmra.mxu0 %vm323_vm0, %v112_v19  ;;  %5429 = vmatmul.mubr.msk.bf16.vlgmr.msra.gmra.mxu1 %vm323_vm0, %v113_v20 }
  0x93   :  { %5433 = vmatpush3.bf16.xpose.msra.mxu0 %v2164_v21  ;;  %5439 = vmatpush3.bf16.xpose.msra.mxu1 %v2215_v22 }
  0x94   :  { %5434 = vmatprep.mubr.msk.bf16.mxu0 %vm5940_vm1, %v5939_v0  ;;  %5440 = vmatprep.mubr.msk.bf16.mxu1 %vm5940_vm1, %v5939_v0 }
  0x95   :  { %5444 = vmatprep.subr.bf16.mxu0 %v5939_v0  ;;  %5450 = vmatprep.subr.bf16.mxu1 %v5939_v0 }
  0x9a   :  { %5435 = vmatmul.mubr.msk.bf16.vlgmr.msra.gmra.mxu0 %vm323_vm0, %v114_v27  ;;  %5441 = vmatmul.mubr.msk.bf16.vlgmr.msra.gmra.mxu1 %vm323_vm0, %v115_v28 }
  0x9b   :  { %5445 = vmatpush3.bf16.xpose.msra.mxu0 %v2266_v29  ;;  %5451 = vmatpush3.bf16.xpose.msra.mxu1 %v2317_v30 }
  0x9c   :  { %5446 = vmatprep.mubr.msk.bf16.mxu0 %vm5940_vm1, %v5939_v0  ;;  %5452 = vmatprep.mubr.msk.bf16.mxu1 %vm5940_vm1, %v5939_v0 }
  0x9d   :  { %5456 = vmatprep.subr.bf16.mxu0 %v5939_v0  ;;  %5462 = vmatprep.subr.bf16.mxu1 %v5939_v0 }
  0xa2   :  { %5447 = vmatmul.mubr.msk.bf16.vlgmr.msra.gmra.mxu0 %vm323_vm0, %v116_v33  ;;  %5453 = vmatmul.mubr.msk.bf16.vlgmr.msra.gmra.mxu1 %vm323_vm0, %v117_v34 }
  0xa3   :  { %5458 = vmatprep.mubr.msk.bf16.mxu0 %vm5940_vm1, %v5939_v0  ;;  %5464 = vmatprep.mubr.msk.bf16.mxu1 %vm5940_vm1, %v5939_v0 }
  0xca   :  { %v364_v40 = vpop.f32.mrf.mxu0  ;;  %v415_v43 = vpop.f32.mrf.mxu1 }
  0xcb   :  { %v365_v42 = vadd.f32 %v364_v40, %v278_v38  ;;  %v416_v44 = vadd.f32 %v415_v43, %v279_v39  ;;  %v286_v39 = vld [vmem:[%s6426_s9 + $0x8] sm:$0x1] }
  0xcc   :  { %v5220_v45 = vpop.f32.mrf.mxu0  ;;  %v5226_v46 = vpop.f32.mrf.mxu1 }
  0xcd   :  { %v6439_v47 = vsel %vm6433_vm2, %v365_v42, -1e+09  ;;  %v6445_v50 = vsel %vm6433_vm2, %v416_v44, -1e+09  ;;  %v287_v42 = vld [vmem:[%s6426_s9 + $0x9] sm:$0x1] }
  0xce   :  { %v367_v48 = vpop.f32.mrf.mxu0  ;;  %v2404_v49 = vsel %vm2403_vm3, %v6439_v47, -inf  ;;  %v418_v51 = vpop.f32.mrf.mxu1  ;;  %v2407_v54 = vsel %vm2403_vm3, %v6445_v50, -inf }
  0xcf   :  { %2405 = vmax.xlane.f32.xlu0 %v2404_v49 }
  0xd0   :  { %v5221_v52 = vpop.f32.mrf.mxu0  ;;  %v5227_v55 = vpop.f32.mrf.mxu1 }
  0xd2   :  { %v466_v57 = vpop.f32.mrf.mxu0  ;;  %v517_v59 = vpop.f32.mrf.mxu1 }
  0xd3   :  { %v467_v58 = vadd.f32 %v466_v57, %v280_v53  ;;  %2408 = vmax.xlane.f32.xlu0 %v2407_v54  ;;  %v518_v60 = vadd.f32 %v517_v59, %v281_v56 }
  0xd4   :  { %v5232_v61 = vpop.f32.mrf.mxu0  ;;  %v5238_v62 = vpop.f32.mrf.mxu1 }
  0xd5   :  { %v6453_v63 = vsel %vm6433_vm2, %v467_v58, -1e+09  ;;  %v6459_v3 = vsel %vm6433_vm2, %v518_v60, -1e+09  ;;  %v288_v58 = vld [vmem:[%s6426_s9 + $0xa] sm:$0x1] }
  0xd6   :  { %v469_v1 = vpop.f32.mrf.mxu0  ;;  %v2410_v2 = vsel %vm2403_vm3, %v6453_v63, -inf  ;;  %v520_v4 = vpop.f32.mrf.mxu1  ;;  %v2413_v7 = vsel %vm2403_vm3, %v6459_v3, -inf  ;;  %v289_v60 = vld [vmem:[%s6426_s9 + $0xb] sm:$0x1] }
  0xd7   :  { %2411 = vmax.xlane.f32.xlu1 %v2410_v2 }
  0xd8   :  { %v5233_v5 = vpop.f32.mrf.mxu0  ;;  %v5239_v8 = vpop.f32.mrf.mxu1 }
  0xda   :  { %v568_v10 = vpop.f32.mrf.mxu0  ;;  %v619_v12 = vpop.f32.mrf.mxu1 }
  0xdb   :  { %v569_v11 = vadd.f32 %v568_v10, %v282_v6  ;;  %2414 = vmax.xlane.f32.xlu1 %v2413_v7  ;;  %v620_v13 = vadd.f32 %v619_v12, %v283_v9 }
  0xdc   :  { %v5244_v14 = vpop.f32.mrf.mxu0  ;;  %v5250_v15 = vpop.f32.mrf.mxu1 }
  0xdd   :  { %v6467_v16 = vsel %vm6433_vm2, %v569_v11, -1e+09  ;;  %v6471_v18 = vsel %vm6433_vm2, %v620_v13, -1e+09  ;;  %v290_v13 = vld [vmem:[%s6426_s9 + $0xc] sm:$0x1] }
  0xde   :  { %v571_v17 = vpop.f32.mrf.mxu0  ;;  %v2416_v19 = vsel %vm2403_vm3, %v6467_v16, -inf  ;;  %v622_v20 = vpop.f32.mrf.mxu1  ;;  %v2419_v21 = vsel %vm2403_vm3, %v6471_v18, -inf  ;;  %v291_v15 = vld [vmem:[%s6426_s9 + $0xd] sm:$0x1] }
  0xdf   :  { %2417 = vmax.xlane.f32.xlu0 %v2416_v19  ;;  %2420 = vmax.xlane.f32.xlu1 %v2419_v21 }
  0xe0   :  { %v5245_v22 = vpop.f32.mrf.mxu0  ;;  %v5251_v24 = vpop.f32.mrf.mxu1 }
  0xe2   :  { %v670_v26 = vpop.f32.mrf.mxu0  ;;  %v721_v28 = vpop.f32.mrf.mxu1 }
  0xe3   :  { %v671_v27 = vadd.f32 %v670_v26, %v284_v23  ;;  %v722_v29 = vadd.f32 %v721_v28, %v285_v25 }
  0xe4   :  { %v5256_v30 = vpop.f32.mrf.mxu0  ;;  %v5262_v31 = vpop.f32.mrf.mxu1 }
  0xe5   :  { %v6481_v32 = vsel %vm6433_vm2, %v671_v27, -1e+09  ;;  %v6485_v34 = vsel %vm6433_vm2, %v722_v29, -1e+09  ;;  %v292_v31 = vld [vmem:[%s6426_s9 + $0xe] sm:$0x1] }
  0xe6   :  { %v673_v33 = vpop.f32.mrf.mxu0  ;;  %v2422_v35 = vsel %vm2403_vm3, %v6481_v32, -inf  ;;  %v724_v36 = vpop.f32.mrf.mxu1  ;;  %v2425_v37 = vsel %vm2403_vm3, %v6485_v34, -inf }
  0xe7   :  { %2423 = vmax.xlane.f32.xlu0 %v2422_v35  ;;  %2426 = vmax.xlane.f32.xlu1 %v2425_v37  ;;  %v293_v35 = vld [vmem:[%s6426_s9 + $0xf] sm:$0x1] }
  0xe8   :  { %v5257_v38 = vpop.f32.mrf.mxu0  ;;  %v5263_v40 = vpop.f32.mrf.mxu1 }
  0xea   :  { %v772_v43 = vpop.f32.mrf.mxu0  ;;  %v823_v45 = vpop.f32.mrf.mxu1 }
  0xeb   :  { %v773_v44 = vadd.f32 %v772_v43, %v286_v39  ;;  %v824_v46 = vadd.f32 %v823_v45, %v287_v42 }
  0xec   :  { %v5268_v48 = vpop.f32.mrf.mxu0  ;;  %v5274_v49 = vpop.f32.mrf.mxu1 }
  0xed   :  { %v6495_v51 = vsel %vm6433_vm2, %v773_v44, -1e+09  ;;  %v6499_v53 = vsel %vm6433_vm2, %v824_v46, -1e+09 }
  0xee   :  { %v775_v52 = vpop.f32.mrf.mxu0  ;;  %v2428_v54 = vsel %vm2403_vm3, %v6495_v51, -inf  ;;  %v826_v55 = vpop.f32.mrf.mxu1  ;;  %v2431_v56 = vsel %vm2403_vm3, %v6499_v53, -inf }
  0xef   :  { %2429 = vmax.xlane.f32.xlu0 %v2428_v54  ;;  %2432 = vmax.xlane.f32.xlu1 %v2431_v56  ;;  %v294_v54 = vld [vmem:[%s6426_s9 + $0x10] sm:$0x1]  ;;  %v295_v56 = vld [vmem:[%s6426_s9 + $0x11] sm:$0x1] }
  0xf0   :  { %v5269_v57 = vpop.f32.mrf.mxu0  ;;  %v5275_v59 = vpop.f32.mrf.mxu1 }
  0xf2   :  { %v874_v61 = vpop.f32.mrf.mxu0  ;;  %v925_v1 = vpop.f32.mrf.mxu1 }
  0xf3   :  { %v875_v62 = vadd.f32 %v874_v61, %v288_v58  ;;  %v926_v2 = vadd.f32 %v925_v1, %v289_v60 }
  0xf4   :  { %v5280_v4 = vpop.f32.mrf.mxu0  ;;  %v5286_v5 = vpop.f32.mrf.mxu1 }
  0xf5   :  { %v6509_v6 = vsel %vm6433_vm2, %v875_v62, -1e+09  ;;  %v6513_v8 = vsel %vm6433_vm2, %v926_v2, -1e+09 }
  0xf6   :  { %v877_v7 = vpop.f32.mrf.mxu0  ;;  %v2434_v9 = vsel %vm2403_vm3, %v6509_v6, -inf  ;;  %v928_v10 = vpop.f32.mrf.mxu1  ;;  %v2437_v11 = vsel %vm2403_vm3, %v6513_v8, -inf }
  0xf7   :  { %2435 = vmax.xlane.f32.xlu0 %v2434_v9  ;;  %2438 = vmax.xlane.f32.xlu1 %v2437_v11  ;;  %v296_v11 = vld [vmem:[%s6426_s9 + $0x12] sm:$0x1] }
  0xf8   :  { %v5281_v12 = vpop.f32.mrf.mxu0  ;;  %v5287_v14 = vpop.f32.mrf.mxu1 }
  0xfa   :  { %v976_v17 = vpop.f32.mrf.mxu0  ;;  %v1027_v20 = vpop.f32.mrf.mxu1 }
  0xfb   :  { %v977_v19 = vadd.f32 %v976_v17, %v290_v13  ;;  %v1028_v21 = vadd.f32 %v1027_v20, %v291_v15  ;;  %v297_v13 = vld [vmem:[%s6426_s9 + $0x13] sm:$0x1] }
  0xfc   :  { %v5292_v22 = vpop.f32.mrf.mxu0  ;;  %v5298_v23 = vpop.f32.mrf.mxu1 }
  0xfd   :  { %v6523_v24 = vsel %vm6433_vm2, %v977_v19, -1e+09  ;;  %v6527_v26 = vsel %vm6433_vm2, %v1028_v21, -1e+09 }
  0xfe   :  { %v979_v25 = vpop.f32.mrf.mxu0  ;;  %v2440_v27 = vsel %vm2403_vm3, %v6523_v24, -inf  ;;  %v1030_v28 = vpop.f32.mrf.mxu1  ;;  %v2443_v29 = vsel %vm2403_vm3, %v6527_v26, -inf }
  0xff   :  { %2441 = vmax.xlane.f32.xlu0 %v2440_v27  ;;  %2444 = vmax.xlane.f32.xlu1 %v2443_v29 }
 0x100   :  { %v5293_v30 = vpop.f32.mrf.mxu0  ;;  %v5299_v33 = vpop.f32.mrf.mxu1 }
 0x102   :  { %v1078_v36 = vpop.f32.mrf.mxu0  ;;  %v1129_v38 = vpop.f32.mrf.mxu1 }
 0x103   :  { %v1079_v37 = vadd.f32 %v1078_v36, %v292_v31  ;;  %v1130_v39 = vadd.f32 %v1129_v38, %v293_v35  ;;  %v298_v31 = vld [vmem:[%s6426_s9 + $0x14] sm:$0x1]  ;;  %v299_v35 = vld [vmem:[%s6426_s9 + $0x15] sm:$0x1] }
 0x104   :  { %v5304_v40 = vpop.f32.mrf.mxu0  ;;  %v5310_v42 = vpop.f32.mrf.mxu1 }
 0x105   :  { %v6537_v43 = vsel %vm6433_vm2, %v1079_v37, -1e+09  ;;  %v6541_v45 = vsel %vm6433_vm2, %v1130_v39, -1e+09 }
 0x106   :  { %v1081_v44 = vpop.f32.mrf.mxu0  ;;  %v2446_v46 = vsel %vm2403_vm3, %v6537_v43, -inf  ;;  %v1132_v48 = vpop.f32.mrf.mxu1  ;;  %v2449_v49 = vsel %vm2403_vm3, %v6541_v45, -inf }
 0x107   :  { %2447 = vmax.xlane.f32.xlu0 %v2446_v46  ;;  %2450 = vmax.xlane.f32.xlu1 %v2449_v49 }
 0x108   :  { %v5305_v52 = vpop.f32.mrf.mxu0  ;;  %v5311_v55 = vpop.f32.mrf.mxu1 }
 0x10a   :  { %v1180_v57 = vpop.f32.mrf.mxu0  ;;  %v1231_v59 = vpop.f32.mrf.mxu1 }
 0x10b   :  { %v1181_v58 = vadd.f32 %v1180_v57, %v294_v54  ;;  %v1232_v60 = vadd.f32 %v1231_v59, %v295_v56  ;;  %v300_v56 = vld [vmem:[%s6426_s9 + $0x16] sm:$0x1] }
 0x10c   :  { %v5316_v61 = vpop.f32.mrf.mxu0  ;;  %v5322_v62 = vpop.f32.mrf.mxu1 }
 0x10d   :  { %v6551_v1 = vsel %vm6433_vm2, %v1181_v58, -1e+09  ;;  %v6555_v4 = vsel %vm6433_vm2, %v1232_v60, -1e+09  ;;  %v301_v58 = vld [vmem:[%s6426_s9 + $0x17] sm:$0x1] }
 0x10e   :  { %v1183_v2 = vpop.f32.mrf.mxu0  ;;  %v2452_v5 = vsel %vm2403_vm3, %v6551_v1, -inf  ;;  %v1234_v7 = vpop.f32.mrf.mxu1  ;;  %v2455_v9 = vsel %vm2403_vm3, %v6555_v4, -inf }
 0x10f   :  { %2453 = vmax.xlane.f32.xlu0 %v2452_v5  ;;  %2456 = vmax.xlane.f32.xlu1 %v2455_v9 }
 0x110   :  { %v5317_v10 = vpop.f32.mrf.mxu0  ;;  %v5323_v12 = vpop.f32.mrf.mxu1 }
 0x112   :  { %v1282_v14 = vpop.f32.mrf.mxu0  ;;  %v1333_v17 = vpop.f32.mrf.mxu1 }
 0x113   :  { %v1283_v15 = vadd.f32 %v1282_v14, %v296_v11  ;;  %v1334_v19 = vadd.f32 %v1333_v17, %v297_v13 }
 0x114   :  { %v5328_v20 = vpop.f32.mrf.mxu0  ;;  %v5334_v21 = vpop.f32.mrf.mxu1 }
 0x115   :  { %v6565_v22 = vsel %vm6433_vm2, %v1283_v15, -1e+09  ;;  %v6569_v25 = vsel %vm6433_vm2, %v1334_v19, -1e+09 }
 0x116   :  { %v1285_v23 = vpop.f32.mrf.mxu0  ;;  %v2458_v27 = vsel %vm2403_vm3, %v6565_v22, -inf  ;;  %v1336_v28 = vpop.f32.mrf.mxu1  ;;  %v2461_v29 = vsel %vm2403_vm3, %v6569_v25, -inf }
 0x117   :  { %2459 = vmax.xlane.f32.xlu0 %v2458_v27  ;;  %2462 = vmax.xlane.f32.xlu1 %v2461_v29 }
 0x118   :  { %v5329_v30 = vpop.f32.mrf.mxu0  ;;  %v5335_v33 = vpop.f32.mrf.mxu1 }
 0x11a   :  { %v1384_v36 = vpop.f32.mrf.mxu0  ;;  %v1435_v38 = vpop.f32.mrf.mxu1 }
 0x11b   :  { %v1385_v37 = vadd.f32 %v1384_v36, %v298_v31  ;;  %v1436_v39 = vadd.f32 %v1435_v38, %v299_v35 }
 0x11c   :  { %v5340_v40 = vpop.f32.mrf.mxu0  ;;  %v5346_v42 = vpop.f32.mrf.mxu1 }
 0x11d   :  { %v6579_v44 = vsel %vm6433_vm2, %v1385_v37, -1e+09  ;;  %v6583_v48 = vsel %vm6433_vm2, %v1436_v39, -1e+09 }
 0x11e   :  { %v1387_v46 = vpop.f32.mrf.mxu0  ;;  %v2464_v49 = vsel %vm2403_vm3, %v6579_v44, -inf  ;;  %v1438_v52 = vpop.f32.mrf.mxu1  ;;  %v2467_v54 = vsel %vm2403_vm3, %v6583_v48, -inf }
 0x11f   :  { %2465 = vmax.xlane.f32.xlu0 %v2464_v49  ;;  %2468 = vmax.xlane.f32.xlu1 %v2467_v54 }
 0x120   :  { %v5341_v55 = vpop.f32.mrf.mxu0  ;;  %v5347_v57 = vpop.f32.mrf.mxu1 }
 0x122   :  { %v1486_v59 = vpop.f32.mrf.mxu0  ;;  %v1537_v61 = vpop.f32.mrf.mxu1 }
 0x123   :  { %v1487_v60 = vadd.f32 %v1486_v59, %v300_v56  ;;  %v1538_v62 = vadd.f32 %v1537_v61, %v301_v58 }
 0x124   :  { %v5352_v2 = vpop.f32.mrf.mxu0  ;;  %v5358_v7 = vpop.f32.mrf.mxu1 }
 0x125   :  { %v6593_v5 = vsel %vm6433_vm2, %v1487_v60, -1e+09  ;;  %v6597_v9 = vsel %vm6433_vm2, %v1538_v62, -1e+09 }
 0x126   :  { %v2470_v10 = vsel %vm2403_vm3, %v6593_v5, -inf  ;;  %v1489_v11 = vpop.f32.mrf.mxu0  ;;  %v2473_v12 = vsel %vm2403_vm3, %v6597_v9, -inf  ;;  %v1540_v13 = vpop.f32.mrf.mxu1 }
 0x127   :  { %2471 = vmax.xlane.f32.xlu0 %v2470_v10  ;;  %2474 = vmax.xlane.f32.xlu1 %v2473_v12 }
 0x128   :  { %v5353_v14 = vpop.f32.mrf.mxu0  ;;  %v5359_v15 = vpop.f32.mrf.mxu1 }
 0x12a   :  { %v6603_v17 = vpop.f32.mrf.mxu0  ;;  %v6605_v19 = vpop.f32.mrf.mxu1 }
 0x12c   :  { %v5364_v20 = vpop.f32.mrf.mxu0  ;;  %v5370_v21 = vpop.f32.mrf.mxu1 }
 0x12e   :  { %v1591_v23 = vpop.f32.mrf.mxu0  ;;  %v1642_v27 = vpop.f32.mrf.mxu1 }
 0x130   :  { %v5365_v28 = vpop.f32.mrf.mxu0  ;;  %v5371_v29 = vpop.f32.mrf.mxu1 }
 0x132   :  { %v6607_v30 = vpop.f32.mrf.mxu0  ;;  %v6609_v31 = vpop.f32.mrf.mxu1 }
 0x134   :  { %v5376_v33 = vpop.f32.mrf.mxu0  ;;  %v5382_v35 = vpop.f32.mrf.mxu1 }
 0x136   :  { %v1693_v36 = vpop.f32.mrf.mxu0  ;;  %v1744_v37 = vpop.f32.mrf.mxu1 }
 0x138   :  { %v5377_v38 = vpop.f32.mrf.mxu0  ;;  %v5383_v39 = vpop.f32.mrf.mxu1 }
 0x13a   :  { %v6611_v40 = vpop.f32.mrf.mxu0  ;;  %v6613_v42 = vpop.f32.mrf.mxu1 }
 0x13c   :  { %v5388_v46 = vpop.f32.mrf.mxu0  ;;  %v5394_v49 = vpop.f32.mrf.mxu1 }
 0x13e   :  { %v1795_v52 = vpop.f32.mrf.mxu0  ;;  %v1846_v54 = vpop.f32.mrf.mxu1 }
 0x140   :  { %v5389_v55 = vpop.f32.mrf.mxu0  ;;  %v5395_v56 = vpop.f32.mrf.mxu1 }
 0x142   :  { %v6615_v57 = vpop.f32.mrf.mxu0  ;;  %v6617_v58 = vpop.f32.mrf.mxu1 }
 0x144   :  { %v5400_v59 = vpop.f32.mrf.mxu0  ;;  %v5406_v60 = vpop.f32.mrf.mxu1 }
 0x146   :  { %v1897_v61 = vpop.f32.mrf.mxu0  ;;  %v1948_v62 = vpop.f32.mrf.mxu1 }
 0x148   :  { %v5401_v2 = vpop.f32.mrf.mxu0  ;;  %v5407_v7 = vpop.f32.mrf.mxu1 }
 0x14a   :  { %v6619_v10 = vpop.f32.mrf.mxu0  ;;  %v6621_v11 = vpop.f32.mrf.mxu1 }
 0x14c   :  { %v5412_v12 = vpop.f32.mrf.mxu0  ;;  %v5418_v13 = vpop.f32.mrf.mxu1 }
 0x14e   :  { %v1999_v14 = vpop.f32.mrf.mxu0  ;;  %v2050_v15 = vpop.f32.mrf.mxu1 }
 0x14f   :  { %v302_v15 = vld [vmem:[%s6426_s9 + $0x18] sm:$0x1] }
 0x150   :  { %v5413_v20 = vpop.f32.mrf.mxu0  ;;  %v5419_v21 = vpop.f32.mrf.mxu1 }
 0x152   :  { %v6623_v23 = vpop.f32.mrf.mxu0  ;;  %v6625_v27 = vpop.f32.mrf.mxu1 }
 0x154   :  { %v5424_v28 = vpop.f32.mrf.mxu0  ;;  %v5430_v29 = vpop.f32.mrf.mxu1 }
 0x156   :  { %v2101_v33 = vpop.f32.mrf.mxu0  ;;  %v2152_v35 = vpop.f32.mrf.mxu1 }
 0x157   :  { %v1589_v33 = vadd.f32 %v6603_v17, %v302_v15 }
 0x158   :  { %v2406_v36 = vpop.xlane.xlu0 %2405  ;;  %v5425_v37 = vpop.f32.mrf.mxu0 }
 0x159   :  { %v2524_v38 = vsub.f32 %v6439_v47, %v2406_v36  ;;  %v5431_v39 = vpop.f32.mrf.mxu1  ;;  %v303_v37 = vld [vmem:[%s6426_s9 + $0x19] sm:$0x1]  ;;  %v6649_v17 = vsel %vm6433_vm2, %v1589_v33, -1e+09 }
 0x15a   :  { %v6628_v46 = vpop.f32.mrf.mxu0 }
 0x15b   :  { %v2564_v49 = vmul.f32 1.442695, %v2524_v38  ;;  %v6630_v52 = vpop.f32.mrf.mxu1 }
 0x15c   :  { %v2409_v54 = vpop.xlane.xlu0 %2408  ;;  %v5436_v55 = vpop.f32.mrf.mxu0 }
 0x15d   :  { %5779 = vpow2.f32 %v2564_v49  ;;  %v2525_v56 = vsub.f32 %v6445_v50, %v2409_v54  ;;  %v5442_v59 = vpop.f32.mrf.mxu1 }
 0x15e   :  { %v2203_v60 = vpop.f32.mrf.mxu0  ;;  %v1640_v59 = vadd.f32 %v6605_v19, %v303_v37  ;;  %v306_v37 = vld [vmem:[%s6426_s9 + $0x1c] sm:$0x1] }
 0x15f   :  { %v2566_v61 = vmul.f32 1.442695, %v2525_v56  ;;  %v2254_v62 = vpop.f32.mrf.mxu1 }
 0x160   :  { %v2412_v2 = vpop.xlane.xlu1 %2411  ;;  %v5437_v7 = vpop.f32.mrf.mxu0  ;;  %v304_v62 = vld [vmem:[%s6426_s9 + $0x1a] sm:$0x1]  ;;  %v6661_v19 = vsel %vm6433_vm2, %v1640_v59, -1e+09 }
 0x161   :  { %5781 = vpow2.f32 %v2566_v61  ;;  %v2526_v47 = vsub.f32 %v6453_v63, %v2412_v2  ;;  %v5443_v12 = vpop.f32.mrf.mxu1 }
 0x162   :  { %v6634_v13 = vpop.f32.mrf.mxu0  ;;  %v305_v12 = vld [vmem:[%s6426_s9 + $0x1b] sm:$0x1] }
 0x163   :  { %v2568_v14 = vmul.f32 1.442695, %v2526_v47  ;;  %v6637_v20 = vpop.f32.mrf.mxu1 }
 0x164   :  { %v2415_v21 = vpop.xlane.xlu1 %2414  ;;  %v5448_v28 = vpop.f32.mrf.mxu0 }
 0x165   :  { %5783 = vpow2.f32 %v2568_v14  ;;  %v2527_v50 = vsub.f32 %v6459_v3, %v2415_v21  ;;  %v5454_v29 = vpop.f32.mrf.mxu1  ;;  %v2479_v28 = vsel %vm2403_vm3, %v6661_v19, -inf }
 0x166   :  { %v2305_v35 = vpop.f32.mrf.mxu0  ;;  %v1742_v29 = vadd.f32 %v6609_v31, %v305_v12  ;;  %v1793_v31 = vadd.f32 %v6611_v40, %v306_v37 }
 0x167   :  { %v2570_v36 = vmul.f32 1.442695, %v2527_v50  ;;  %v2356_v63 = vpop.f32.mrf.mxu1 }
 0x168   :  { %v2418_v38 = vpop.xlane.xlu0 %2417  ;;  %v5449_v39 = vpop.f32.mrf.mxu0 }
 0x169   :  { %5785 = vpow2.f32 %v2570_v36  ;;  %v2421_v49 = vpop.xlane.xlu1 %2420  ;;  %v2528_v54 = vsub.f32 %v6467_v16, %v2418_v38  ;;  %v5455_v55 = vpop.f32.mrf.mxu1  ;;  %v2476_v16 = vsel %vm2403_vm3, %v6649_v17, -inf  ;;  %v307_v38 = vld [vmem:[%s6426_s9 + $0x1d] sm:$0x1]  ;;  %v6688_v39 = vsel %vm6433_vm2, %v1742_v29, -1e+09 }
 0x16a   :  { %v6643_v56 = vpop.eup %5779  ;;  %v2529_v3 = vsub.f32 %v6471_v18, %v2421_v49  ;;  %v1691_v18 = vadd.f32 %v6607_v30, %v304_v62  ;;  %v1844_v59 = vadd.f32 %v6613_v42, %v307_v38  ;;  %v2485_v40 = vsel %vm2403_vm3, %v6688_v39, -inf  ;;  %v312_v42 = vld [vmem:[%s6426_s9 + $0x22] sm:$0x1] }
 0x16b   :  { %v2572_v60 = vmul.f32 1.442695, %v2528_v54  ;;  %v2644_v61 = vsel %vm2403_vm3, %v6643_v56, 0.0  ;;  %v2099_v37 = vadd.f32 %v6623_v23, %v312_v42 }
 0x16c   :  { %v2574_v2 = vmul.f32 1.442695, %v2529_v3  ;;  %2645 = vadd.xlane.f32.xlu0 %v2644_v61  ;;  %v6675_v33 = vsel %vm6433_vm2, %v1691_v18, -1e+09  ;;  %v309_v61 = vld [vmem:[%s6426_s9 + $0x1f] sm:$0x1] }
 0x16d   :  { %5787 = vpow2.f32 %v2572_v60  ;;  %v308_v60 = vld [vmem:[%s6426_s9 + $0x1e] sm:$0x1]  ;;  %v310_v18 = vld [vmem:[%s6426_s9 + $0x20] sm:$0x1]  ;;  %v6719_v29 = vsel %vm6433_vm2, %v1844_v59, -1e+09 }
 0x16e   :  { %v6656_v7 = vpop.eup %5781  ;;  %5789 = vpow2.f32 %v2574_v2 }
 0x16f   :  { %v2647_v47 = vsel %vm2403_vm3, %v6656_v7, 0.0 }
 0x170   :  { %2477 = vmax.xlane.f32.xlu0 %v2476_v16  ;;  %2648 = vadd.xlane.f32.xlu1 %v2647_v47  ;;  %v2424_v14 = vpop.xlane.xlu0 %2423  ;;  %v2427_v15 = vpop.xlane.xlu1 %2426  ;;  %v6703_v16 = vsel %vm6433_vm2, %v1793_v31, -1e+09  ;;  %v311_v47 = vld [vmem:[%s6426_s9 + $0x21] sm:$0x1] }
 0x171   :  { %v2530_v21 = vsub.f32 %v6481_v32, %v2424_v14  ;;  %v2531_v50 = vsub.f32 %v6485_v34, %v2427_v15  ;;  %v2482_v34 = vsel %vm2403_vm3, %v6675_v33, -inf }
 0x172   :  { %v6669_v30 = vpop.eup %5783 }
 0x173   :  { %v2576_v35 = vmul.f32 1.442695, %v2530_v21  ;;  %v2650_v36 = vsel %vm2403_vm3, %v6669_v30, 0.0  ;;  %v2578_v32 = vmul.f32 1.442695, %v2531_v50  ;;  %v1895_v21 = vadd.f32 %v6615_v57, %v308_v60 }
 0x174   :  { %2651 = vadd.xlane.f32.xlu0 %v2650_v36  ;;  %2480 = vmax.xlane.f32.xlu1 %v2479_v28  ;;  %v313_v28 = vld [vmem:[%s6426_s9 + $0x23] sm:$0x1]  ;;  %v1946_v50 = vadd.f32 %v6617_v58, %v309_v61  ;;  %v2048_v36 = vadd.f32 %v6621_v11, %v311_v47 }
 0x175   :  { %5791 = vpow2.f32 %v2576_v35  ;;  %v1997_v35 = vadd.f32 %v6619_v10, %v310_v18  ;;  %v6729_v58 = vsel %vm6433_vm2, %v1895_v21, -1e+09  ;;  %v2491_v10 = vsel %vm2403_vm3, %v6719_v29, -inf  ;;  %v314_v18 = vld [vmem:[%s6426_s9 + $0x24] sm:$0x1] }
 0x176   :  { %v6682_v63 = vpop.eup %5785  ;;  %5793 = vpow2.f32 %v2578_v32  ;;  %v2150_v32 = vadd.f32 %v6625_v27, %v313_v28  ;;  %v6736_v11 = vsel %vm6433_vm2, %v1946_v50, -1e+09 }
 0x177   :  { %v2653_v49 = vsel %vm2403_vm3, %v6682_v63, 0.0 }
 0x178   :  { %2483 = vmax.xlane.f32.xlu0 %v2482_v34  ;;  %2654 = vadd.xlane.f32.xlu1 %v2653_v49  ;;  %v2430_v54 = vpop.xlane.xlu0 %2429  ;;  %v2433_v55 = vpop.xlane.xlu1 %2432  ;;  %v6743_v49 = vsel %vm6433_vm2, %v1997_v35, -1e+09 }
 0x179   :  { %v2532_v3 = vsub.f32 %v6495_v51, %v2430_v54  ;;  %v2533_v2 = vsub.f32 %v6499_v53, %v2433_v55  ;;  %v2488_v53 = vsel %vm2403_vm3, %v6703_v16, -inf  ;;  %v6747_v54 = vsel %vm6433_vm2, %v2048_v36, -1e+09 }
 0x17a   :  { %v6698_v62 = vpop.eup %5787  ;;  %v2500_v36 = vsel %vm2403_vm3, %v6743_v49, -inf }
 0x17b   :  { %v2580_v12 = vmul.f32 1.442695, %v2532_v3  ;;  %v2656_v51 = vsel %vm2403_vm3, %v6698_v62, 0.0  ;;  %v6710_v14 = vpop.eup %5789  ;;  %v2582_v15 = vmul.f32 1.442695, %v2533_v2  ;;  %v5739_v2 = vld [vmem:[%s7441_s3] sm:$0xff]  }
 0x17c   :  { %2486 = vmax.xlane.f32.xlu1 %v2485_v40  ;;  %2657 = vadd.xlane.f32.xlu0 %v2656_v51  ;;  %v2659_v57 = vsel %vm2403_vm3, %v6710_v14, 0.0  ;;  %v6761_v40 = vsel %vm6433_vm2, %v2150_v32, -1e+09  ;;  %v5740_v51 = vld [vmem:[%s7441_s3 + $0x8] sm:$0xff]   ;;  %v315_v32 = vld [vmem:[%s6426_s9 + $0x25] sm:$0x1] }
 0x17d   :  { %5795 = vpow2.f32 %v2580_v12  ;;  %5457 = vmatpush3.bf16.msra.mxu0 %v5739_v2  ;;  %v2497_v12 = vsel %vm2403_vm3, %v6736_v11, -inf  ;;  %5463 = vmatpush3.bf16.msra.mxu1 %v5740_v51 }
 0x17e   :  { %5797 = vpow2.f32 %v2582_v15  ;;  %5468 = vmatprep.subr.bf16.mxu0 %v5939_v0  ;;  %5474 = vmatprep.subr.bf16.mxu1 %v5939_v0 }
 0x180   :  { %2660 = vadd.xlane.f32.xlu1 %v2659_v57  ;;  %2489 = vmax.xlane.f32.xlu0 %v2488_v53  ;;  %v2436_v34 = vpop.xlane.xlu0 %2435  ;;  %v2439_v31 = vpop.xlane.xlu1 %2438  ;;  %v2201_v57 = vadd.f32 %v6628_v46, %v314_v18  ;;  %v316_v18 = vld [vmem:[%s6426_s9 + $0x26] sm:$0x1] }
 0x181   :  { %v2534_v38 = vsub.f32 %v6509_v6, %v2436_v34  ;;  %v2535_v27 = vsub.f32 %v6513_v8, %v2439_v31  ;;  %v6751_v6 = vsel %vm6433_vm2, %v2099_v37, -1e+09  ;;  %v2494_v8 = vsel %vm2403_vm3, %v6729_v58, -inf }
 0x182   :  { %v6738_v23 = vpop.eup %5791  ;;  %v6794_v31 = vsel %vm6433_vm2, %v2201_v57, -1e+09 }
 0x183   :  { %v6753_v55 = vpop.eup %5793  ;;  %v2584_v3 = vmul.f32 1.442695, %v2534_v38  ;;  %v2662_v59 = vsel %vm2403_vm3, %v6738_v23, 0.0  ;;  %v2586_v60 = vmul.f32 1.442695, %v2535_v27 }
 0x184   :  { %2492 = vmax.xlane.f32.xlu1 %v2491_v10  ;;  %2663 = vadd.xlane.f32.xlu0 %v2662_v59  ;;  %v2665_v61 = vsel %vm2403_vm3, %v6753_v55, 0.0 }
 0x185   :  { %5799 = vpow2.f32 %v2584_v3 }
 0x186   :  { %5801 = vpow2.f32 %v2586_v60  ;;  %v2506_v60 = vsel %vm2403_vm3, %v6751_v6, -inf }
 0x188   :  { %2666 = vadd.xlane.f32.xlu1 %v2665_v61  ;;  %2495 = vmax.xlane.f32.xlu0 %v2494_v8  ;;  %v2442_v47 = vpop.xlane.xlu0 %2441  ;;  %v2445_v42 = vpop.xlane.xlu1 %2444 }
 0x189   :  { %v2536_v15 = vsub.f32 %v6523_v24, %v2442_v47  ;;  %v2537_v28 = vsub.f32 %v6527_v26, %v2445_v42  ;;  %v2503_v26 = vsel %vm2403_vm3, %v6747_v54, -inf }
 0x18a   :  { %v6776_v21 = vpop.eup %5795 }
 0x18b   :  { %v6779_v53 = vpop.eup %5797  ;;  %v2588_v50 = vmul.f32 1.442695, %v2536_v15  ;;  %v2668_v35 = vsel %vm2403_vm3, %v6776_v21, 0.0  ;;  %v2590_v37 = vmul.f32 1.442695, %v2537_v28 }
 0x18c   :  { %2498 = vmax.xlane.f32.xlu1 %v2497_v12  ;;  %2669 = vadd.xlane.f32.xlu0 %v2668_v35  ;;  %v2671_v24 = vsel %vm2403_vm3, %v6779_v53, 0.0 }
 0x18d   :  { %5803 = vpow2.f32 %v2588_v50 }
 0x18e   :  { %5805 = vpow2.f32 %v2590_v37 }
 0x190   :  { %2672 = vadd.xlane.f32.xlu1 %v2671_v24  ;;  %2501 = vmax.xlane.f32.xlu0 %v2500_v36  ;;  %v2448_v34 = vpop.xlane.xlu0 %2447  ;;  %v2451_v38 = vpop.xlane.xlu1 %2450  ;;  %v2512_v36 = vsel %vm2403_vm3, %v6794_v31, -inf }
 0x191   :  { %v2538_v10 = vsub.f32 %v6537_v43, %v2448_v34  ;;  %v2539_v3 = vsub.f32 %v6541_v45, %v2451_v38  ;;  %v2252_v43 = vadd.f32 %v6630_v52, %v315_v32  ;;  %v2509_v45 = vsel %vm2403_vm3, %v6761_v40, -inf }
 0x192   :  { %v6797_v27 = vpop.eup %5799 }
 0x193   :  { %v6800_v59 = vpop.eup %5801  ;;  %v2592_v46 = vmul.f32 1.442695, %v2538_v10  ;;  %v2674_v8 = vsel %vm2403_vm3, %v6797_v27, 0.0  ;;  %v2594_v61 = vmul.f32 1.442695, %v2539_v3 }
 0x194   :  { %2504 = vmax.xlane.f32.xlu1 %v2503_v26  ;;  %2675 = vadd.xlane.f32.xlu0 %v2674_v8  ;;  %v2677_v2 = vsel %vm2403_vm3, %v6800_v59, 0.0  ;;  %v6814_v12 = vsel %vm6433_vm2, %v2252_v43, -1e+09  ;;  %v317_v26 = vld [vmem:[%s6426_s9 + $0x27] sm:$0x1] }
 0x195   :  { %5807 = vpow2.f32 %v2592_v46  ;;  %v2354_v3 = vadd.f32 %v6637_v20, %v317_v26 }
 0x196   :  { %5809 = vpow2.f32 %v2594_v61 }
 0x198   :  { %2678 = vadd.xlane.f32.xlu1 %v2677_v2  ;;  %2507 = vmax.xlane.f32.xlu0 %v2506_v60  ;;  %v2454_v47 = vpop.xlane.xlu0 %2453  ;;  %v2457_v51 = vpop.xlane.xlu1 %2456 }
 0x199   :  { %v2540_v42 = vsub.f32 %v6551_v1, %v2454_v47  ;;  %v2541_v52 = vsub.f32 %v6555_v4, %v2457_v51  ;;  %v2303_v1 = vadd.f32 %v6634_v13, %v316_v18  ;;  %v2515_v4 = vsel %vm2403_vm3, %v6814_v12, -inf }
 0x19a   :  { %v6817_v15 = vpop.eup %5803 }
 0x19b   :  { %v6820_v28 = vpop.eup %5805  ;;  %v2596_v50 = vmul.f32 1.442695, %v2540_v42  ;;  %v2680_v35 = vsel %vm2403_vm3, %v6817_v15, 0.0  ;;  %v2598_v37 = vmul.f32 1.442695, %v2541_v52 }
 0x19c   :  { %2510 = vmax.xlane.f32.xlu1 %v2509_v45  ;;  %2681 = vadd.xlane.f32.xlu0 %v2680_v35  ;;  %v2683_v24 = vsel %vm2403_vm3, %v6820_v28, 0.0  ;;  %v6834_v32 = vsel %vm6433_vm2, %v2303_v1, -1e+09 }
 0x19d   :  { %5811 = vpow2.f32 %v2596_v50  ;;  %v2518_v2 = vsel %vm2403_vm3, %v6834_v32, -inf }
 0x19e   :  { %5813 = vpow2.f32 %v2598_v37 }
 0x1a0   :  { %2684 = vadd.xlane.f32.xlu1 %v2683_v24  ;;  %2513 = vmax.xlane.f32.xlu0 %v2512_v36  ;;  %v2460_v57 = vpop.xlane.xlu0 %2459  ;;  %v2463_v34 = vpop.xlane.xlu1 %2462 }
 0x1a1   :  { %v2542_v38 = vsub.f32 %v6565_v22, %v2460_v57  ;;  %v2543_v13 = vsub.f32 %v6569_v25, %v2463_v34  ;;  %v6849_v22 = vsel %vm6433_vm2, %v2354_v3, -1e+09 }
 0x1a2   :  { %v6837_v10 = vpop.eup %5807  ;;  %v2521_v18 = vsel %vm2403_vm3, %v6849_v22, -inf }
 0x1a3   :  { %v2600_v46 = vmul.f32 1.442695, %v2542_v38  ;;  %v2686_v8 = vsel %vm2403_vm3, %v6837_v10, 0.0  ;;  %v6843_v60 = vpop.eup %5809  ;;  %v2602_v61 = vmul.f32 1.442695, %v2543_v13 }
 0x1a4   :  { %2516 = vmax.xlane.f32.xlu1 %v2515_v4  ;;  %2687 = vadd.xlane.f32.xlu0 %v2686_v8  ;;  %v2689_v25 = vsel %vm2403_vm3, %v6843_v60, 0.0 }
 0x1a5   :  { %5815 = vpow2.f32 %v2600_v46 }
 0x1a6   :  { %5817 = vpow2.f32 %v2602_v61 }
 0x1a8   :  { %2690 = vadd.xlane.f32.xlu1 %v2689_v25  ;;  %2519 = vmax.xlane.f32.xlu0 %v2518_v2  ;;  %v2466_v20 = vpop.xlane.xlu0 %2465  ;;  %v2469_v43 = vpop.xlane.xlu1 %2468 }
 0x1a9   :  { %v2544_v45 = vsub.f32 %v6579_v44, %v2466_v20  ;;  %v2545_v51 = vsub.f32 %v6583_v48, %v2469_v43 }
 0x1aa   :  { %v6856_v47 = vpop.eup %5811 }
 0x1ab   :  { %v2604_v42 = vmul.f32 1.442695, %v2544_v45  ;;  %v2692_v41 = vsel %vm2403_vm3, %v6856_v47, 0.0  ;;  %v6861_v52 = vpop.eup %5813  ;;  %v2606_v50 = vmul.f32 1.442695, %v2545_v51 }
 0x1ac   :  { %2522 = vmax.xlane.f32.xlu1 %v2521_v18  ;;  %2693 = vadd.xlane.f32.xlu0 %v2692_v41  ;;  %v2695_v44 = vsel %vm2403_vm3, %v6861_v52, 0.0 }
 0x1ad   :  { %5819 = vpow2.f32 %v2604_v42 }
 0x1ae   :  { %5821 = vpow2.f32 %v2606_v50 }
 0x1b0   :  { %2696 = vadd.xlane.f32.xlu1 %v2695_v44  ;;  %v2472_v35 = vpop.xlane.xlu0 %2471  ;;  %v2475_v36 = vpop.xlane.xlu1 %2474 }
 0x1b1   :  { %v2546_v37 = vsub.f32 %v6593_v5, %v2472_v35  ;;  %v2547_v24 = vsub.f32 %v6597_v9, %v2475_v36 }
 0x1b2   :  { %v6866_v48 = vpop.eup %5815 }
 0x1b3   :  { %v6869_v1 = vpop.eup %5817  ;;  %v2608_v4 = vmul.f32 1.442695, %v2546_v37  ;;  %v2698_v26 = vsel %vm2403_vm3, %v6866_v48, 0.0  ;;  %v2610_v57 = vmul.f32 1.442695, %v2547_v24 }
 0x1b4   :  { %v2701_v34 = vsel %vm2403_vm3, %v6869_v1, 0.0  ;;  %2699 = vadd.xlane.f32.xlu0 %v2698_v26  ;;  %v5741_v26 = vld [vmem:[%s7441_s3 + $0x10] sm:$0xff]  }
 0x1b5   :  { %5823 = vpow2.f32 %v2608_v4  ;;  %2702 = vadd.xlane.f32.xlu1 %v2701_v34 }
 0x1b6   :  { %5825 = vpow2.f32 %v2610_v57 }
 0x1ba   :  { %v6875_v38 = vpop.eup %5819 }
 0x1bb   :  { %v6877_v5 = vpop.eup %5821  ;;  %v2704_v9 = vsel %vm2403_vm3, %v6875_v38, 0.0 }
 0x1bc   :  { %v2707_v13 = vsel %vm2403_vm3, %v6877_v5, 0.0  ;;  %2705 = vadd.xlane.f32.xlu0 %v2704_v9 }
 0x1bd   :  { %2708 = vadd.xlane.f32.xlu1 %v2707_v13 }
 0x1c2   :  { %v6883_v3 = vpop.eup %5823 }
 0x1c3   :  { %v6885_v46 = vpop.eup %5825  ;;  %v2710_v8 = vsel %vm2403_vm3, %v6883_v3, 0.0 }
 0x1c4   :  { %v2713_v61 = vsel %vm2403_vm3, %v6885_v46, 0.0  ;;  %2711 = vadd.xlane.f32.xlu0 %v2710_v8  ;;  %v5742_v8 = vld [vmem:[%s7441_s3 + $0x18] sm:$0xff]  }
 0x1c5   :  { %2714 = vadd.xlane.f32.xlu1 %v2713_v61 }
 0x1f5   :  { %v2646_v2 = vpop.xlane.xlu0 %2645 }
 0x1f6   :  { %5827 = vrcp.f32 %v2646_v2 }
 0x1f9   :  { %v2649_v25 = vpop.xlane.xlu1 %2648  ;;  %v2478_v20 = vpop.xlane.xlu0 %2477 }
 0x1fa   :  { %5829 = vrcp.f32 %v2649_v25  ;;  %v2548_v43 = vsub.f32 %v6649_v17, %v2478_v20 }
 0x1fc   :  { %v2612_v45 = vmul.f32 1.442695, %v2548_v43 }
 0x1fd   :  { %v2481_v18 = vpop.xlane.xlu1 %2480  ;;  %v2652_v51 = vpop.xlane.xlu0 %2651 }
 0x1fe   :  { %5831 = vpow2.f32 %v2612_v45  ;;  %v2549_v42 = vsub.f32 %v6661_v19, %v2481_v18 }
 0x1ff   :  { %5833 = vrcp.f32 %v2652_v51  ;;  %v5743_v51 = vld [vmem:[%s7441_s3 + $0x20] sm:$0xff]  }
 0x200   :  { %v2614_v41 = vmul.f32 1.442695, %v2549_v42 }
 0x201   :  { %v2655_v50 = vpop.xlane.xlu1 %2654  ;;  %v2484_v44 = vpop.xlane.xlu0 %2483 }
 0x202   :  { %5835 = vpow2.f32 %v2614_v41  ;;  %v2550_v35 = vsub.f32 %v6675_v33, %v2484_v44 }
 0x203   :  { %v5828_v36 = vpop.eup %5827  ;;  %5837 = vrcp.f32 %v2655_v50 }
 0x204   :  { %v2616_v37 = vmul.f32 1.442695, %v2550_v35  ;;  %v2804_v24 = vmul.f32 %v5828_v36, %v6643_v56 }
 0x205   :  { %v2487_v4 = vpop.xlane.xlu1 %2486  ;;  %v2658_v17 = vpop.xlane.xlu0 %2657 }
 0x206   :  { %5839 = vpow2.f32 %v2616_v37  ;;  %v2551_v19 = vsub.f32 %v6688_v39, %v2487_v4  ;;  %v2844_v57 = vpack.c.bf16 %v2804_v24, %v2804_v24  ;;  %v5744_v24 = vld [vmem:[%s7441_s3 + $0x28] sm:$0xff]  }
 0x207   :  { %v5830_v34 = vpop.eup %5829  ;;  %5841 = vrcp.f32 %v2658_v17 }
 0x208   :  { %v2618_v9 = vmul.f32 1.442695, %v2551_v19  ;;  %5459 = vmatmul.mubr.msk.bf16.vlgmr.msra.gmra.mxu0 %vm2890_vm4, %v2844_v57  ;;  %v2805_v33 = vmul.f32 %v5830_v34, %v6656_v7 }
 0x209   :  { %v2661_v13 = vpop.xlane.xlu1 %2660  ;;  %v2490_v56 = vpop.xlane.xlu0 %2489  ;;  %5469 = vmatpush3.bf16.msra.mxu0 %v5741_v26  ;;  %5470 = vmatprep.mubr.msk.bf16.mxu0 %vm5940_vm1, %v5939_v0 }
 0x20a   :  { %5843 = vpow2.f32 %v2618_v9  ;;  %v2552_v39 = vsub.f32 %v6703_v16, %v2490_v56  ;;  %v2845_v61 = vpack.c.bf16 %v2805_v33, %v2805_v33  ;;  %5480 = vmatprep.subr.bf16.mxu0 %v5939_v0  ;;  %v5745_v33 = vld [vmem:[%s7441_s3 + $0x30] sm:$0xff]  }
 0x20b   :  { %v6908_v2 = vpop.eup %5831  ;;  %5845 = vrcp.f32 %v2661_v13 }
 0x20c   :  { %v5834_v7 = vpop.eup %5833  ;;  %v2620_v25 = vmul.f32 1.442695, %v2552_v39  ;;  %5465 = vmatmul.mubr.msk.bf16.vlgmr.msra.gmra.mxu1 %vm2890_vm4, %v2845_v61  ;;  %v2716_v20 = vsel %vm2403_vm3, %v6908_v2, 0.0 }
 0x20d   :  { %v2493_v43 = vpop.xlane.xlu1 %2492  ;;  %2717 = vadd.xlane.f32.xlu0 %v2716_v20  ;;  %v2664_v45 = vpop.xlane.xlu0 %2663  ;;  %v2806_v18 = vmul.f32 %v5834_v7, %v6669_v30  ;;  %5475 = vmatpush3.bf16.msra.mxu1 %v5742_v8  ;;  %v5746_v20 = vld [vmem:[%s7441_s3 + $0x38] sm:$0xff]  }
 0x20e   :  { %5847 = vpow2.f32 %v2620_v25  ;;  %v2553_v16 = vsub.f32 %v6719_v29, %v2493_v43  ;;  %5476 = vmatprep.mubr.msk.bf16.mxu1 %vm5940_vm1, %v5939_v0  ;;  %5486 = vmatprep.subr.bf16.mxu1 %v5939_v0 }
 0x20f   :  { %v6921_v42 = vpop.eup %5835  ;;  %5849 = vrcp.f32 %v2664_v45  ;;  %v2846_v41 = vpack.c.bf16 %v2806_v18, %v2806_v18 }
 0x210   :  { %v5838_v50 = vpop.eup %5837  ;;  %v2622_v44 = vmul.f32 1.442695, %v2553_v16  ;;  %v2719_v30 = vsel %vm2403_vm3, %v6921_v42, 0.0 }
 0x211   :  { %5471 = vmatmul.mubr.msk.bf16.vlgmr.msra.gmra.mxu0 %vm2890_vm4, %v2846_v41  ;;  %2720 = vadd.xlane.f32.xlu1 %v2719_v30  ;;  %v2667_v29 = vpop.xlane.xlu1 %2666  ;;  %v2496_v35 = vpop.xlane.xlu0 %2495  ;;  %v2807_v36 = vmul.f32 %v5838_v50, %v6682_v63 }
 0x212   :  { %5851 = vpow2.f32 %v2622_v44  ;;  %v2554_v37 = vsub.f32 %v6729_v58, %v2496_v35  ;;  %5481 = vmatpush3.bf16.msra.mxu0 %v5743_v51  ;;  %5482 = vmatprep.mubr.msk.bf16.mxu0 %vm5940_vm1, %v5939_v0  ;;  %v5747_v44 = vld [vmem:[%s7441_s3 + $0x40] sm:$0xff]  }
 0x213   :  { %v6933_v4 = vpop.eup %5839  ;;  %5853 = vrcp.f32 %v2667_v29  ;;  %v2847_v17 = vpack.c.bf16 %v2807_v36, %v2807_v36  ;;  %5492 = vmatprep.subr.bf16.mxu0 %v5939_v0 }
 0x214   :  { %v5842_v26 = vpop.eup %5841  ;;  %v2624_v19 = vmul.f32 1.442695, %v2554_v37  ;;  %v2722_v63 = vsel %vm2403_vm3, %v6933_v4, 0.0 }
 0x215   :  { %5477 = vmatmul.mubr.msk.bf16.vlgmr.msra.gmra.mxu1 %vm2890_vm4, %v2847_v17  ;;  %v2499_v58 = vpop.xlane.xlu1 %2498  ;;  %2723 = vadd.xlane.f32.xlu0 %v2722_v63  ;;  %v2670_v57 = vpop.xlane.xlu0 %2669  ;;  %v2808_v34 = vmul.f32 %v5842_v26, %v6698_v62  ;;  %v5748_v26 = vld [vmem:[%s7441_s3 + $0x48] sm:$0xff]  }
 0x216   :  { %5855 = vpow2.f32 %v2624_v19  ;;  %v2555_v9 = vsub.f32 %v6736_v11, %v2499_v58  ;;  %5487 = vmatpush3.bf16.msra.mxu1 %v5744_v24  ;;  %5488 = vmatprep.mubr.msk.bf16.mxu1 %vm5940_vm1, %v5939_v0 }
 0x217   :  { %v6946_v13 = vpop.eup %5843  ;;  %5857 = vrcp.f32 %v2670_v57  ;;  %v2848_v56 = vpack.c.bf16 %v2808_v34, %v2808_v34  ;;  %5498 = vmatprep.subr.bf16.mxu1 %v5939_v0 }
 0x218   :  { %v5846_v8 = vpop.eup %5845  ;;  %v2626_v39 = vmul.f32 1.442695, %v2555_v9  ;;  %v2725_v62 = vsel %vm2403_vm3, %v6946_v13, 0.0 }
 0x219   :  { %5483 = vmatmul.mubr.msk.bf16.vlgmr.msra.gmra.mxu0 %vm2890_vm4, %v2848_v56  ;;  %2726 = vadd.xlane.f32.xlu1 %v2725_v62  ;;  %v2673_v11 = vpop.xlane.xlu1 %2672  ;;  %v2502_v61 = vpop.xlane.xlu0 %2501  ;;  %v2809_v7 = vmul.f32 %v5846_v8, %v6710_v14  ;;  %v5749_v56 = vld [vmem:[%s7441_s3 + $0x50] sm:$0xff]  }
 0x21a   :  { %5859 = vpow2.f32 %v2626_v39  ;;  %v2556_v25 = vsub.f32 %v6743_v49, %v2502_v61  ;;  %5493 = vmatpush3.bf16.msra.mxu0 %v5745_v33  ;;  %5494 = vmatprep.mubr.msk.bf16.mxu0 %vm5940_vm1, %v5939_v0 }
 0x21b   :  { %v6959_v43 = vpop.eup %5847  ;;  %5861 = vrcp.f32 %v2673_v11  ;;  %v2849_v45 = vpack.c.bf16 %v2809_v7, %v2809_v7  ;;  %5504 = vmatprep.subr.bf16.mxu0 %v5939_v0 }
 0x21c   :  { %v5850_v18 = vpop.eup %5849  ;;  %v2628_v16 = vmul.f32 1.442695, %v2556_v25  ;;  %v2728_v14 = vsel %vm2403_vm3, %v6959_v43, 0.0 }
 0x21d   :  { %5489 = vmatmul.mubr.msk.bf16.vlgmr.msra.gmra.mxu1 %vm2890_vm4, %v2849_v45  ;;  %v2505_v49 = vpop.xlane.xlu1 %2504  ;;  %2729 = vadd.xlane.f32.xlu0 %v2728_v14  ;;  %v2676_v51 = vpop.xlane.xlu0 %2675  ;;  %v2810_v41 = vmul.f32 %v5850_v18, %v6738_v23 }
 0x21e   :  { %5863 = vpow2.f32 %v2628_v16  ;;  %v2557_v50 = vsub.f32 %v6747_v54, %v2505_v49  ;;  %5499 = vmatpush3.bf16.msra.mxu1 %v5746_v20  ;;  %5500 = vmatprep.mubr.msk.bf16.mxu1 %vm5940_vm1, %v5939_v0  ;;  %v5750_v20 = vld [vmem:[%s7441_s3 + $0x58] sm:$0xff]  }
 0x21f   :  { %v6972_v30 = vpop.eup %5851  ;;  %5865 = vrcp.f32 %v2676_v51  ;;  %v2850_v29 = vpack.c.bf16 %v2810_v41, %v2810_v41  ;;  %5510 = vmatprep.subr.bf16.mxu1 %v5939_v0 }
 0x220   :  { %v5854_v35 = vpop.eup %5853  ;;  %v2630_v36 = vmul.f32 1.442695, %v2557_v50  ;;  %v2731_v23 = vsel %vm2403_vm3, %v6972_v30, 0.0  ;;  %v5751_v50 = vld [vmem:[%s7441_s3 + $0x60] sm:$0xff]  }
 0x221   :  { %5495 = vmatmul.mubr.msk.bf16.vlgmr.msra.gmra.mxu0 %vm2890_vm4, %v2850_v29  ;;  %2732 = vadd.xlane.f32.xlu1 %v2731_v23  ;;  %v2679_v54 = vpop.xlane.xlu1 %2678  ;;  %v2508_v37 = vpop.xlane.xlu0 %2507  ;;  %v2811_v24 = vmul.f32 %v5854_v35, %v6753_v55 }
 0x222   :  { %5867 = vpow2.f32 %v2630_v36  ;;  %v2558_v17 = vsub.f32 %v6751_v6, %v2508_v37  ;;  %5505 = vmatpush3.bf16.msra.mxu0 %v5747_v44  ;;  %5506 = vmatprep.mubr.msk.bf16.mxu0 %vm5940_vm1, %v5939_v0 }
 0x223   :  { %v6985_v19 = vpop.eup %5855  ;;  %5869 = vrcp.f32 %v2679_v54  ;;  %v2851_v63 = vpack.c.bf16 %v2811_v24, %v2811_v24  ;;  %5516 = vmatprep.subr.bf16.mxu0 %v5939_v0  ;;  %v5752_v24 = vld [vmem:[%s7441_s3 + $0x68] sm:$0xff]  }
 0x224   :  { %v5858_v58 = vpop.eup %5857  ;;  %v2632_v57 = vmul.f32 1.442695, %v2558_v17  ;;  %v2734_v55 = vsel %vm2403_vm3, %v6985_v19, 0.0 }
 0x225   :  { %5501 = vmatmul.mubr.msk.bf16.vlgmr.msra.gmra.mxu1 %vm2890_vm4, %v2851_v63  ;;  %v2511_v6 = vpop.xlane.xlu1 %2510  ;;  %2735 = vadd.xlane.f32.xlu0 %v2734_v55  ;;  %v2682_v34 = vpop.xlane.xlu0 %2681  ;;  %v2812_v9 = vmul.f32 %v5858_v58, %v6776_v21 }
 0x226   :  { %5871 = vpow2.f32 %v2632_v57  ;;  %v2559_v33 = vsub.f32 %v6761_v40, %v2511_v6  ;;  %5511 = vmatpush3.bf16.msra.mxu1 %v5748_v26  ;;  %5512 = vmatprep.mubr.msk.bf16.mxu1 %vm5940_vm1, %v5939_v0 }
 0x227   :  { %v6998_v8 = vpop.eup %5859  ;;  %5873 = vrcp.f32 %v2682_v34  ;;  %v2852_v39 = vpack.c.bf16 %v2812_v9, %v2812_v9  ;;  %5522 = vmatprep.subr.bf16.mxu1 %v5939_v0  ;;  %v5753_v34 = vld [vmem:[%s7441_s3 + $0x70] sm:$0xff]  }
 0x228   :  { %v5862_v62 = vpop.eup %5861  ;;  %v2634_v11 = vmul.f32 1.442695, %v2559_v33  ;;  %v2737_v21 = vsel %vm2403_vm3, %v6998_v8, 0.0 }
 0x229   :  { %5507 = vmatmul.mubr.msk.bf16.vlgmr.msra.gmra.mxu0 %vm2890_vm4, %v2852_v39  ;;  %2738 = vadd.xlane.f32.xlu1 %v2737_v21  ;;  %v2685_v40 = vpop.xlane.xlu1 %2684  ;;  %v2514_v61 = vpop.xlane.xlu0 %2513  ;;  %v2813_v7 = vmul.f32 %v5862_v62, %v6779_v53 }
 0x22a   :  { %5875 = vpow2.f32 %v2634_v11  ;;  %v2560_v25 = vsub.f32 %v6794_v31, %v2514_v61  ;;  %5517 = vmatpush3.bf16.msra.mxu0 %v5749_v56  ;;  %5518 = vmatprep.mubr.msk.bf16.mxu0 %vm5940_vm1, %v5939_v0  ;;  %v5754_v11 = vld [vmem:[%s7441_s3 + $0x78] sm:$0xff]  }
 0x22b   :  { %v7011_v45 = vpop.eup %5863  ;;  %5877 = vrcp.f32 %v2685_v40  ;;  %v2853_v18 = vpack.c.bf16 %v2813_v7, %v2813_v7  ;;  %5528 = vmatprep.subr.bf16.mxu0 %v5939_v0 }
 0x22c   :  { %v5866_v16 = vpop.eup %5865  ;;  %v2636_v14 = vmul.f32 1.442695, %v2560_v25  ;;  %v2740_v53 = vsel %vm2403_vm3, %v7011_v45, 0.0 }
 0x22d   :  { %5513 = vmatmul.mubr.msk.bf16.vlgmr.msra.gmra.mxu1 %vm2890_vm4, %v2853_v18  ;;  %v2517_v31 = vpop.xlane.xlu1 %2516  ;;  %2741 = vadd.xlane.f32.xlu0 %v2740_v53  ;;  %v2688_v49 = vpop.xlane.xlu0 %2687  ;;  %v2814_v51 = vmul.f32 %v5866_v16, %v6797_v27  ;;  %v5755_v18 = vld [vmem:[%s7441_s3 + $0x80] sm:$0xff]  }
 0x22e   :  { %5879 = vpow2.f32 %v2636_v14  ;;  %v2561_v41 = vsub.f32 %v6814_v12, %v2517_v31  ;;  %5523 = vmatpush3.bf16.msra.mxu1 %v5750_v20  ;;  %5524 = vmatprep.mubr.msk.bf16.mxu1 %vm5940_vm1, %v5939_v0 }
 0x22f   :  { %v7024_v44 = vpop.eup %5867  ;;  %5881 = vrcp.f32 %v2688_v49  ;;  %v2854_v29 = vpack.c.bf16 %v2814_v51, %v2814_v51  ;;  %5534 = vmatprep.subr.bf16.mxu1 %v5939_v0  ;;  %v5756_v49 = vld [vmem:[%s7441_s3 + $0x88] sm:$0xff]  }
 0x230   :  { %v5870_v35 = vpop.eup %5869  ;;  %v2638_v36 = vmul.f32 1.442695, %v2561_v41  ;;  %v2743_v27 = vsel %vm2403_vm3, %v7024_v44, 0.0 }
 0x231   :  { %5519 = vmatmul.mubr.msk.bf16.vlgmr.msra.gmra.mxu0 %vm2890_vm4, %v2854_v29  ;;  %2744 = vadd.xlane.f32.xlu1 %v2743_v27  ;;  %v2691_v12 = vpop.xlane.xlu1 %2690  ;;  %v2520_v23 = vpop.xlane.xlu0 %2519  ;;  %v2815_v54 = vmul.f32 %v5870_v35, %v6800_v59  ;;  %v5757_v27 = vld [vmem:[%s7441_s3 + $0x90] sm:$0xff]  }
 0x232   :  { %5883 = vpow2.f32 %v2638_v36  ;;  %v2562_v37 = vsub.f32 %v6834_v32, %v2520_v23  ;;  %5529 = vmatpush3.bf16.msra.mxu0 %v5751_v50  ;;  %5530 = vmatprep.mubr.msk.bf16.mxu0 %vm5940_vm1, %v5939_v0 }
 0x233   :  { %v7037_v17 = vpop.eup %5871  ;;  %5885 = vrcp.f32 %v2691_v12  ;;  %v2855_v26 = vpack.c.bf16 %v2815_v54, %v2815_v54  ;;  %5540 = vmatprep.subr.bf16.mxu0 %v5939_v0 }
 0x234   :  { %v5874_v63 = vpop.eup %5873  ;;  %v2640_v58 = vmul.f32 1.442695, %v2562_v37  ;;  %v2746_v59 = vsel %vm2403_vm3, %v7037_v17, 0.0 }
 0x235   :  { %5525 = vmatmul.mubr.msk.bf16.vlgmr.msra.gmra.mxu1 %vm2890_vm4, %v2855_v26  ;;  %v2523_v32 = vpop.xlane.xlu1 %2522  ;;  %2747 = vadd.xlane.f32.xlu0 %v2746_v59  ;;  %v2694_v57 = vpop.xlane.xlu0 %2693  ;;  %v2816_v55 = vmul.f32 %v5874_v63, %v6817_v15 }
 0x236   :  { %5887 = vpow2.f32 %v2640_v58  ;;  %v2563_v6 = vsub.f32 %v6849_v22, %v2523_v32  ;;  %5535 = vmatpush3.bf16.msra.mxu1 %v5752_v24  ;;  %5536 = vmatprep.mubr.msk.bf16.mxu1 %vm5940_vm1, %v5939_v0  ;;  %v5758_v24 = vld [vmem:[%s7441_s3 + $0x98] sm:$0xff]  }
 0x237   :  { %v7050_v9 = vpop.eup %5875  ;;  %5889 = vrcp.f32 %v2694_v57  ;;  %v2856_v33 = vpack.c.bf16 %v2816_v55, %v2816_v55  ;;  %5546 = vmatprep.subr.bf16.mxu1 %v5939_v0  ;;  %v5759_v55 = vld [vmem:[%s7441_s3 + $0xa0] sm:$0xff]  }
 0x238   :  { %v5878_v56 = vpop.eup %5877  ;;  %v2642_v39 = vmul.f32 1.442695, %v2563_v6  ;;  %v2749_v15 = vsel %vm2403_vm3, %v7050_v9, 0.0 }
 0x239   :  { %5531 = vmatmul.mubr.msk.bf16.vlgmr.msra.gmra.mxu0 %vm2890_vm4, %v2856_v33  ;;  %2750 = vadd.xlane.f32.xlu1 %v2749_v15  ;;  %v2697_v22 = vpop.xlane.xlu1 %2696  ;;  %v2817_v62 = vmul.f32 %v5878_v56, %v6820_v28  ;;  %v5761_v15 = vld [vmem:[%s7441_s3 + $0xb0] sm:$0xff]  }
 0x23a   :  { %5891 = vpow2.f32 %v2642_v39  ;;  %5541 = vmatpush3.bf16.msra.mxu0 %v5753_v34  ;;  %5542 = vmatprep.mubr.msk.bf16.mxu0 %vm5940_vm1, %v5939_v0 }
 0x23b   :  { %v7062_v21 = vpop.eup %5879  ;;  %5893 = vrcp.f32 %v2697_v22  ;;  %v2857_v40 = vpack.c.bf16 %v2817_v62, %v2817_v62  ;;  %5552 = vmatprep.subr.bf16.mxu0 %v5939_v0 }
 0x23c   :  { %v5882_v61 = vpop.eup %5881  ;;  %v2752_v7 = vsel %vm2403_vm3, %v7062_v21, 0.0 }
 0x23d   :  { %5537 = vmatmul.mubr.msk.bf16.vlgmr.msra.gmra.mxu1 %vm2890_vm4, %v2857_v40  ;;  %2753 = vadd.xlane.f32.xlu0 %v2752_v7  ;;  %v2700_v28 = vpop.xlane.xlu0 %2699  ;;  %v2818_v25 = vmul.f32 %v5882_v61, %v6837_v10  ;;  %v5763_v7 = vld [vmem:[%s7441_s3 + $0xc0] sm:$0xff]  }
 0x23e   :  { %v2703_v20 = vpop.xlane.xlu1 %2702  ;;  %5895 = vrcp.f32 %v2700_v28  ;;  %5547 = vmatpush3.bf16.msra.mxu1 %v5754_v11  ;;  %5548 = vmatprep.mubr.msk.bf16.mxu1 %vm5940_vm1, %v5939_v0 }
 0x23f   :  { %v7074_v16 = vpop.eup %5883  ;;  %5897 = vrcp.f32 %v2703_v20  ;;  %v2858_v14 = vpack.c.bf16 %v2818_v25, %v2818_v25  ;;  %5558 = vmatprep.subr.bf16.mxu1 %v5939_v0 }
 0x240   :  { %v5886_v53 = vpop.eup %5885  ;;  %v2755_v10 = vsel %vm2403_vm3, %v7074_v16, 0.0 }
 0x241   :  { %5543 = vmatmul.mubr.msk.bf16.vlgmr.msra.gmra.mxu0 %vm2890_vm4, %v2858_v14  ;;  %2756 = vadd.xlane.f32.xlu1 %v2755_v10  ;;  %v2819_v31 = vmul.f32 %v5886_v53, %v6843_v60 }
 0x242   :  { %5553 = vmatpush3.bf16.msra.mxu0 %v5755_v18  ;;  %5554 = vmatprep.mubr.msk.bf16.mxu0 %vm5940_vm1, %v5939_v0 }
 0x243   :  { %v7086_v51 = vpop.eup %5887  ;;  %v2859_v41 = vpack.c.bf16 %v2819_v31, %v2819_v31  ;;  %5564 = vmatprep.subr.bf16.mxu0 %v5939_v0 }
 0x244   :  { %v5890_v50 = vpop.eup %5889  ;;  %v2758_v29 = vsel %vm2403_vm3, %v7086_v51, 0.0 }
 0x245   :  { %v2820_v35 = vmul.f32 %v5890_v50, %v6856_v47  ;;  %5549 = vmatmul.mubr.msk.bf16.vlgmr.msra.gmra.mxu1 %vm2890_vm4, %v2859_v41  ;;  %2759 = vadd.xlane.f32.xlu0 %v2758_v29  ;;  %v2706_v60 = vpop.xlane.xlu0 %2705 }
 0x246   :  { %v2709_v36 = vpop.xlane.xlu1 %2708  ;;  %5899 = vrcp.f32 %v2706_v60  ;;  %5559 = vmatpush3.bf16.msra.mxu1 %v5756_v49  ;;  %5560 = vmatprep.mubr.msk.bf16.mxu1 %vm5940_vm1, %v5939_v0  ;;  %v5765_v49 = vld [vmem:[%s7441_s3 + $0xd0] sm:$0xff]   ;;  %v5766_v60 = vld [vmem:[%s7441_s3 + $0xd8] sm:$0xff]  }
 0x247   :  { %v7098_v12 = vpop.eup %5891  ;;  %v2860_v23 = vpack.c.bf16 %v2820_v35, %v2820_v35  ;;  %5901 = vrcp.f32 %v2709_v36  ;;  %5570 = vmatprep.subr.bf16.mxu1 %v5939_v0 }
 0x248   :  { %v5894_v47 = vpop.eup %5893  ;;  %v2761_v54 = vsel %vm2403_vm3, %v7098_v12, 0.0 }
 0x249   :  { %v2821_v37 = vmul.f32 %v5894_v47, %v6861_v52  ;;  %5555 = vmatmul.mubr.msk.bf16.vlgmr.msra.gmra.mxu0 %vm2890_vm4, %v2860_v23  ;;  %2762 = vadd.xlane.f32.xlu1 %v2761_v54  ;;  %v5767_v23 = vld [vmem:[%s7441_s3 + $0xe0] sm:$0xff]  }
 0x24a   :  { %5565 = vmatpush3.bf16.msra.mxu0 %v5757_v27  ;;  %5566 = vmatprep.mubr.msk.bf16.mxu0 %vm5940_vm1, %v5939_v0 }
 0x24b   :  { %v5896_v26 = vpop.eup %5895  ;;  %v2861_v63 = vpack.c.bf16 %v2821_v37, %v2821_v37  ;;  %5576 = vmatprep.subr.bf16.mxu0 %v5939_v0 }
 0x24c   :  { %v5898_v58 = vpop.eup %5897  ;;  %v2822_v59 = vmul.f32 %v5896_v26, %v6866_v48  ;;  %v5760_v48 = vld [vmem:[%s7441_s3 + $0xa8] sm:$0xff]  }
 0x24d   :  { %5561 = vmatmul.mubr.msk.bf16.vlgmr.msra.gmra.mxu1 %vm2890_vm4, %v2861_v63  ;;  %v2712_v52 = vpop.xlane.xlu0 %2711  ;;  %v2823_v6 = vmul.f32 %v5898_v58, %v6869_v1 }
 0x24e   :  { %v2862_v32 = vpack.c.bf16 %v2822_v59, %v2822_v59  ;;  %v2715_v57 = vpop.xlane.xlu1 %2714  ;;  %5903 = vrcp.f32 %v2712_v52  ;;  %5571 = vmatpush3.bf16.msra.mxu1 %v5758_v24  ;;  %5572 = vmatprep.mubr.msk.bf16.mxu1 %vm5940_vm1, %v5939_v0  ;;  %v5768_v24 = vld [vmem:[%s7441_s3 + $0xe8] sm:$0xff]   ;;  %v5769_v59 = vld [vmem:[%s7441_s3 + $0xf0] sm:$0xff]  }
 0x24f   :  { %5905 = vrcp.f32 %v2715_v57  ;;  %5582 = vmatprep.subr.bf16.mxu1 %v5939_v0  ;;  %v2863_v33 = vpack.c.bf16 %v2823_v6, %v2823_v6 }
 0x251   :  { %5567 = vmatmul.mubr.msk.bf16.vlgmr.msra.gmra.mxu0 %vm2890_vm4, %v2862_v32 }
 0x252   :  { %5577 = vmatpush3.bf16.msra.mxu0 %v5759_v55  ;;  %5578 = vmatprep.mubr.msk.bf16.mxu0 %vm5940_vm1, %v5939_v0  ;;  %v5770_v55 = vld [vmem:[%s7441_s3 + $0xf8] sm:$0xff]  }
 0x253   :  { %v5900_v34 = vpop.eup %5899  ;;  %5588 = vmatprep.subr.bf16.mxu0 %v5939_v0 }
 0x254   :  { %v5902_v56 = vpop.eup %5901  ;;  %v2824_v1 = vmul.f32 %v5900_v34, %v6875_v38  ;;  %v5762_v38 = vld [vmem:[%s7441_s3 + $0xb8] sm:$0xff]  }
 0x255   :  { %5573 = vmatmul.mubr.msk.bf16.vlgmr.msra.gmra.mxu1 %vm2890_vm4, %v2863_v33  ;;  %v2825_v22 = vmul.f32 %v5902_v56, %v6877_v5  ;;  %v5771_v33 = vld [vmem:[%s7441_s3 + $0x100] sm:$0xff]  }
 0x256   :  { %v2864_v39 = vpack.c.bf16 %v2824_v1, %v2824_v1  ;;  %5583 = vmatpush3.bf16.msra.mxu1 %v5760_v48  ;;  %5584 = vmatprep.mubr.msk.bf16.mxu1 %vm5940_vm1, %v5939_v0 }
 0x257   :  { %5594 = vmatprep.subr.bf16.mxu1 %v5939_v0  ;;  %v2865_v11 = vpack.c.bf16 %v2825_v22, %v2825_v22 }
 0x259   :  { %5579 = vmatmul.mubr.msk.bf16.vlgmr.msra.gmra.mxu0 %vm2890_vm4, %v2864_v39 }
 0x25a   :  { %5589 = vmatpush3.bf16.msra.mxu0 %v5761_v15  ;;  %5590 = vmatprep.mubr.msk.bf16.mxu0 %vm5940_vm1, %v5939_v0  ;;  %v5772_v15 = vld [vmem:[%s7441_s3 + $0x108] sm:$0xff]  }
 0x25b   :  { %v5904_v62 = vpop.eup %5903  ;;  %5600 = vmatprep.subr.bf16.mxu0 %v5939_v0 }
 0x25c   :  { %v5906_v40 = vpop.eup %5905  ;;  %v2826_v61 = vmul.f32 %v5904_v62, %v6883_v3  ;;  %v5764_v3 = vld [vmem:[%s7441_s3 + $0xc8] sm:$0xff]  }
 0x25d   :  { %5585 = vmatmul.mubr.msk.bf16.vlgmr.msra.gmra.mxu1 %vm2890_vm4, %v2865_v11  ;;  %v2827_v28 = vmul.f32 %v5906_v40, %v6885_v46  ;;  %v5773_v11 = vld [vmem:[%s7441_s3 + $0x110] sm:$0xff]  }
 0x25e   :  { %v2866_v5 = vpack.c.bf16 %v2826_v61, %v2826_v61  ;;  %5595 = vmatpush3.bf16.msra.mxu1 %v5762_v38  ;;  %5596 = vmatprep.mubr.msk.bf16.mxu1 %vm5940_vm1, %v5939_v0 }
 0x25f   :  { %5606 = vmatprep.subr.bf16.mxu1 %v5939_v0  ;;  %v2867_v25 = vpack.c.bf16 %v2827_v28, %v2827_v28 }
 0x261   :  { %5591 = vmatmul.mubr.msk.bf16.vlgmr.msra.gmra.mxu0 %vm2890_vm4, %v2866_v5 }
 0x262   :  { %5601 = vmatpush3.bf16.msra.mxu0 %v5763_v7  ;;  %5602 = vmatprep.mubr.msk.bf16.mxu0 %vm5940_vm1, %v5939_v0 }
 0x263   :  { %5612 = vmatprep.subr.bf16.mxu0 %v5939_v0 }
 0x265   :  { %5597 = vmatmul.mubr.msk.bf16.vlgmr.msra.gmra.mxu1 %vm2890_vm4, %v2867_v25 }
 0x266   :  { %5607 = vmatpush3.bf16.msra.mxu1 %v5764_v3  ;;  %5608 = vmatprep.mubr.msk.bf16.mxu1 %vm5940_vm1, %v5939_v0  ;;  %v5774_v3 = vld [vmem:[%s7441_s3 + $0x118] sm:$0xff]  }
 0x267   :  { %5618 = vmatprep.subr.bf16.mxu1 %v5939_v0 }
 0x296   :  { %v2718_v46 = vpop.xlane.xlu0 %2717 }
 0x297   :  { %5907 = vrcp.f32 %v2718_v46 }
 0x29a   :  { %v2721_v20 = vpop.xlane.xlu1 %2720 }
 0x29b   :  { %5909 = vrcp.f32 %v2721_v20 }
 0x29e   :  { %v2724_v18 = vpop.xlane.xlu0 %2723 }
 0x29f   :  { %5911 = vrcp.f32 %v2724_v18 }
 0x2a2   :  { %v2727_v14 = vpop.xlane.xlu1 %2726 }
 0x2a3   :  { %5913 = vrcp.f32 %v2727_v14 }
 0x2a4   :  { %v5908_v53 = vpop.eup %5907 }
 0x2a5   :  { %v2828_v10 = vmul.f32 %v5908_v53, %v6908_v2 }
 0x2a6   :  { %v2730_v31 = vpop.xlane.xlu0 %2729 }
 0x2a7   :  { %v2868_v41 = vpack.c.bf16 %v2828_v10, %v2828_v10  ;;  %5915 = vrcp.f32 %v2730_v31  ;;  %v5775_v10 = vld [vmem:[%s7441_s3 + $0x120] sm:$0xff]  }
 0x2a8   :  { %v5910_v50 = vpop.eup %5909 }
 0x2a9   :  { %v2829_v29 = vmul.f32 %v5910_v50, %v6921_v42  ;;  %5603 = vmatmul.mubr.msk.bf16.vlgmr.msra.gmra.mxu0 %vm2890_vm4, %v2868_v41 }
 0x2aa   :  { %v2733_v35 = vpop.xlane.xlu1 %2732  ;;  %5613 = vmatpush3.bf16.msra.mxu0 %v5765_v49  ;;  %5614 = vmatprep.mubr.msk.bf16.mxu0 %vm5940_vm1, %v5939_v0 }
 0x2ab   :  { %v2869_v2 = vpack.c.bf16 %v2829_v29, %v2829_v29  ;;  %5917 = vrcp.f32 %v2733_v35  ;;  %5624 = vmatprep.subr.bf16.mxu0 %v5939_v0 }
 0x2ac   :  { %v5912_v36 = vpop.eup %5911 }
 0x2ad   :  { %v2830_v27 = vmul.f32 %v5912_v36, %v6933_v4  ;;  %5609 = vmatmul.mubr.msk.bf16.vlgmr.msra.gmra.mxu1 %vm2890_vm4, %v2869_v2  ;;  %v5776_v2 = vld [vmem:[%s7441_s3 + $0x128] sm:$0xff]  }
 0x2ae   :  { %5619 = vmatpush3.bf16.msra.mxu1 %v5766_v60  ;;  %v2736_v42 = vpop.xlane.xlu0 %2735  ;;  %5620 = vmatprep.mubr.msk.bf16.mxu1 %vm5940_vm1, %v5939_v0 }
 0x2af   :  { %v2870_v47 = vpack.c.bf16 %v2830_v27, %v2830_v27  ;;  %5919 = vrcp.f32 %v2736_v42  ;;  %5630 = vmatprep.subr.bf16.mxu1 %v5939_v0 }
 0x2b0   :  { %v5914_v54 = vpop.eup %5913 }
 0x2b1   :  { %v2831_v37 = vmul.f32 %v5914_v54, %v6946_v13  ;;  %5615 = vmatmul.mubr.msk.bf16.vlgmr.msra.gmra.mxu0 %vm2890_vm4, %v2870_v47  ;;  %v5777_v54 = vld [vmem:[%s7441_s3 + $0x130] sm:$0xff]  }
 0x2b2   :  { %v2739_v4 = vpop.xlane.xlu1 %2738  ;;  %5625 = vmatpush3.bf16.msra.mxu0 %v5767_v23  ;;  %5626 = vmatprep.mubr.msk.bf16.mxu0 %vm5940_vm1, %v5939_v0 }
 0x2b3   :  { %v2871_v26 = vpack.c.bf16 %v2831_v37, %v2831_v37  ;;  %5921 = vrcp.f32 %v2739_v4  ;;  %5636 = vmatprep.subr.bf16.mxu0 %v5939_v0 }
 0x2b4   :  { %v5916_v63 = vpop.eup %5915 }
 0x2b5   :  { %v2832_v58 = vmul.f32 %v5916_v63, %v6959_v43  ;;  %5621 = vmatmul.mubr.msk.bf16.vlgmr.msra.gmra.mxu1 %vm2890_vm4, %v2871_v26 }
 0x2b6   :  { %5631 = vmatpush3.bf16.msra.mxu1 %v5768_v24  ;;  %v2742_v13 = vpop.xlane.xlu0 %2741  ;;  %5632 = vmatprep.mubr.msk.bf16.mxu1 %vm5940_vm1, %v5939_v0 }
 0x2b7   :  { %v2872_v52 = vpack.c.bf16 %v2832_v58, %v2832_v58  ;;  %5923 = vrcp.f32 %v2742_v13  ;;  %5642 = vmatprep.subr.bf16.mxu1 %v5939_v0  ;;  %v5778_v13 = vld [vmem:[%s7441_s3 + $0x138] sm:$0xff]  }
 0x2b8   :  { %v5918_v32 = vpop.eup %5917 }
 0x2b9   :  { %v2833_v57 = vmul.f32 %v5918_v32, %v6972_v30  ;;  %5627 = vmatmul.mubr.msk.bf16.vlgmr.msra.gmra.mxu0 %vm2890_vm4, %v2872_v52 }
 0x2ba   :  { %v2745_v43 = vpop.xlane.xlu1 %2744  ;;  %5637 = vmatpush3.bf16.msra.mxu0 %v5769_v59  ;;  %5638 = vmatprep.mubr.msk.bf16.mxu0 %vm5940_vm1, %v5939_v0 }
 0x2bb   :  { %v2873_v6 = vpack.c.bf16 %v2833_v57, %v2833_v57  ;;  %5925 = vrcp.f32 %v2745_v43  ;;  %5648 = vmatprep.subr.bf16.mxu0 %v5939_v0 }
 0x2bc   :  { %v5920_v48 = vpop.eup %5919 }
 0x2bd   :  { %v2834_v34 = vmul.f32 %v5920_v48, %v6985_v19  ;;  %5633 = vmatmul.mubr.msk.bf16.vlgmr.msra.gmra.mxu1 %vm2890_vm4, %v2873_v6 }
 0x2be   :  { %5643 = vmatpush3.bf16.msra.mxu1 %v5770_v55  ;;  %v2748_v30 = vpop.xlane.xlu0 %2747  ;;  %5644 = vmatprep.mubr.msk.bf16.mxu1 %vm5940_vm1, %v5939_v0 }
 0x2bf   :  { %v2874_v56 = vpack.c.bf16 %v2834_v34, %v2834_v34  ;;  %5927 = vrcp.f32 %v2748_v30  ;;  %5654 = vmatprep.subr.bf16.mxu1 %v5939_v0 }
 0x2c0   :  { %v5922_v1 = vpop.eup %5921 }
 0x2c1   :  { %v2835_v39 = vmul.f32 %v5922_v1, %v6998_v8  ;;  %5639 = vmatmul.mubr.msk.bf16.vlgmr.msra.gmra.mxu0 %vm2890_vm4, %v2874_v56 }
 0x2c2   :  { %v2751_v19 = vpop.xlane.xlu1 %2750  ;;  %5649 = vmatpush3.bf16.msra.mxu0 %v5771_v33  ;;  %5650 = vmatprep.mubr.msk.bf16.mxu0 %vm5940_vm1, %v5939_v0 }
 0x2c3   :  { %v2875_v22 = vpack.c.bf16 %v2835_v39, %v2835_v39  ;;  %5929 = vrcp.f32 %v2751_v19  ;;  %5660 = vmatprep.subr.bf16.mxu0 %v5939_v0 }
 0x2c4   :  { %v5924_v38 = vpop.eup %5923 }
 0x2c5   :  { %v2836_v62 = vmul.f32 %v5924_v38, %v7011_v45  ;;  %5645 = vmatmul.mubr.msk.bf16.vlgmr.msra.gmra.mxu1 %vm2890_vm4, %v2875_v22 }
 0x2c6   :  { %5655 = vmatpush3.bf16.msra.mxu1 %v5772_v15  ;;  %v2754_v8 = vpop.xlane.xlu0 %2753  ;;  %5656 = vmatprep.mubr.msk.bf16.mxu1 %vm5940_vm1, %v5939_v0 }
 0x2c7   :  { %v2876_v40 = vpack.c.bf16 %v2836_v62, %v2836_v62  ;;  %5931 = vrcp.f32 %v2754_v8  ;;  %5666 = vmatprep.subr.bf16.mxu1 %v5939_v0 }
 0x2c8   :  { %v5926_v61 = vpop.eup %5925  ;;  %v2928_v5 = vpop.f32.mrf.mxu0 }
 0x2c9   :  { %v2837_v45 = vmul.f32 %v5926_v61, %v7024_v44  ;;  %4846 = vst.msk [vmem:[%s7442_s5] sm:$0x1] %vm4845_vm5, %v2928_v5  ;;  %5651 = vmatmul.mubr.msk.bf16.vlgmr.msra.gmra.mxu0 %vm2890_vm4, %v2876_v40 }
 0x2ca   :  { %v2757_v7 = vpop.xlane.xlu1 %2756  ;;  %v5460_v28 = vpop.f32.mrf.mxu0  ;;  %5661 = vmatpush3.bf16.msra.mxu0 %v5773_v11  ;;  %5662 = vmatprep.mubr.msk.bf16.mxu0 %vm5940_vm1, %v5939_v0 }
 0x2cb   :  { %v2877_v25 = vpack.c.bf16 %v2837_v45, %v2837_v45  ;;  %5933 = vrcp.f32 %v2757_v7  ;;  %5672 = vmatprep.subr.bf16.mxu0 %v5939_v0 }
 0x2cc   :  { %v5928_v44 = vpop.eup %5927  ;;  %v2931_v46 = vpop.f32.mrf.mxu0 }
 0x2cd   :  { %v2977_v20 = vpop.f32.mrf.mxu1  ;;  %v2838_v18 = vmul.f32 %v5928_v44, %v7037_v17  ;;  %5657 = vmatmul.mubr.msk.bf16.vlgmr.msra.gmra.mxu1 %vm2890_vm4, %v2877_v25 }
 0x2ce   :  { %4847 = vst.msk [vmem:[%s7442_s5 + $0x1] sm:$0x1] %vm4845_vm5, %v2977_v20  ;;  %v5461_v14 = vpop.f32.mrf.mxu0  ;;  %5667 = vmatpush3.bf16.msra.mxu1 %v5774_v3  ;;  %5668 = vmatprep.mubr.msk.bf16.mxu1 %vm5940_vm1, %v5939_v0  ;;  %v2760_v49 = vpop.xlane.xlu0 %2759 }
 0x2cf   :  { %v5466_v53 = vpop.f32.mrf.mxu1  ;;  %v2878_v31 = vpack.c.bf16 %v2838_v18, %v2838_v18  ;;  %5678 = vmatprep.subr.bf16.mxu1 %v5939_v0  ;;  %5935 = vrcp.f32 %v2760_v49 }
 0x2d0   :  { %v5930_v17 = vpop.eup %5929 }
 0x2d1   :  { %v2980_v41 = vpop.f32.mrf.mxu1  ;;  %v2839_v50 = vmul.f32 %v5930_v17, %v7050_v9  ;;  %v3026_v29 = vpop.f32.mrf.mxu0  ;;  %5663 = vmatmul.mubr.msk.bf16.vlgmr.msra.gmra.mxu0 %vm2890_vm4, %v2878_v31 }
 0x2d2   :  { %4848 = vst.msk [vmem:[%s7442_s5 + $0x2] sm:$0x1] %vm4845_vm5, %v3026_v29  ;;  %v2763_v60 = vpop.xlane.xlu1 %2762  ;;  %5673 = vmatpush3.bf16.msra.mxu0 %v5775_v10  ;;  %5674 = vmatprep.mubr.msk.bf16.mxu0 %vm5940_vm1, %v5939_v0 }
 0x2d3   :  { %v5467_v35 = vpop.f32.mrf.mxu1  ;;  %v2879_v36 = vpack.c.bf16 %v2839_v50, %v2839_v50  ;;  %5937 = vrcp.f32 %v2763_v60  ;;  %v5472_v9 = vpop.f32.mrf.mxu0  ;;  %5684 = vmatprep.subr.bf16.mxu0 %v5939_v0 }
 0x2d4   :  { %v5932_v27 = vpop.eup %5931 }
 0x2d5   :  { %v2840_v42 = vmul.f32 %v5932_v27, %v7062_v21  ;;  %v3029_v23 = vpop.f32.mrf.mxu0  ;;  %v3075_v47 = vpop.f32.mrf.mxu1  ;;  %5669 = vmatmul.mubr.msk.bf16.vlgmr.msra.gmra.mxu1 %vm2890_vm4, %v2879_v36 }
 0x2d6   :  { %4849 = vst.msk [vmem:[%s7442_s5 + $0x3] sm:$0x1] %vm4845_vm5, %v3075_v47  ;;  %5679 = vmatpush3.bf16.msra.mxu1 %v5776_v2  ;;  %5680 = vmatprep.mubr.msk.bf16.mxu1 %vm5940_vm1, %v5939_v0 }
 0x2d7   :  { %v2880_v37 = vpack.c.bf16 %v2840_v42, %v2840_v42  ;;  %v5473_v4 = vpop.f32.mrf.mxu0  ;;  %v5478_v21 = vpop.f32.mrf.mxu1  ;;  %5690 = vmatprep.subr.bf16.mxu1 %v5939_v0 }
 0x2d8   :  { %v5934_v24 = vpop.eup %5933 }
 0x2d9   :  { %v2841_v26 = vmul.f32 %v5934_v24, %v7074_v16  ;;  %v3078_v63 = vpop.f32.mrf.mxu1  ;;  %v3124_v58 = vpop.f32.mrf.mxu0  ;;  %5675 = vmatmul.mubr.msk.bf16.vlgmr.msra.gmra.mxu0 %vm2890_vm4, %v2880_v37 }
 0x2da   :  { %4850 = vst.msk [vmem:[%s7442_s5 + $0x4] sm:$0x1] %vm4845_vm5, %v3124_v58  ;;  %5685 = vmatpush3.bf16.msra.mxu0 %v5777_v54  ;;  %5686 = vmatprep.mubr.msk.bf16.mxu0 %vm5940_vm1, %v5939_v0 }
 0x2db   :  { %v2881_v59 = vpack.c.bf16 %v2841_v26, %v2841_v26  ;;  %v5479_v52 = vpop.f32.mrf.mxu1  ;;  %v5484_v16 = vpop.f32.mrf.mxu0 }
 0x2dc   :  { %v5936_v32 = vpop.eup %5935 }
 0x2dd   :  { %v3127_v57 = vpop.f32.mrf.mxu0  ;;  %v3173_v43 = vpop.f32.mrf.mxu1  ;;  %5681 = vmatmul.mubr.msk.bf16.vlgmr.msra.gmra.mxu1 %vm2890_vm4, %v2881_v59  ;;  %v2842_v55 = vmul.f32 %v5936_v32, %v7086_v51 }
 0x2de   :  { %4851 = vst.msk [vmem:[%s7442_s5 + $0x5] sm:$0x1] %vm4845_vm5, %v3173_v43  ;;  %5691 = vmatpush3.bf16.msra.mxu1 %v5778_v13  ;;  %5692 = vmatprep.mubr.msk.bf16.mxu1 %vm5940_vm1, %v5939_v0 }
 0x2df   :  { %v5485_v6 = vpop.f32.mrf.mxu0  ;;  %v5490_v48 = vpop.f32.mrf.mxu1  ;;  %v2882_v30 = vpack.c.bf16 %v2842_v55, %v2842_v55 }
 0x2e0   :  { %v5938_v34 = vpop.eup %5937 }
 0x2e1   :  { %v2843_v33 = vmul.f32 %v5938_v34, %v7098_v12  ;;  %v3176_v56 = vpop.f32.mrf.mxu1  ;;  %v3222_v1 = vpop.f32.mrf.mxu0  ;;  %5687 = vmatmul.mubr.msk.bf16.vlgmr.msra.gmra.mxu0 %vm2890_vm4, %v2882_v30 }
 0x2e2   :  { %4852 = vst.msk [vmem:[%s7442_s5 + $0x6] sm:$0x1] %vm4845_vm5, %v3222_v1 }
 0x2e3   :  { %v2883_v51 = vpack.c.bf16 %v2843_v33, %v2843_v33  ;;  %v5491_v39 = vpop.f32.mrf.mxu1  ;;  %v5496_v19 = vpop.f32.mrf.mxu0 }
 0x2e5   :  { %v3225_v15 = vpop.f32.mrf.mxu0  ;;  %v3271_v0 = vpop.f32.mrf.mxu1  ;;  %5693 = vmatmul.mubr.msk.bf16.vlgmr.msra.gmra.mxu1 %vm2890_vm4, %v2883_v51 }
 0x2e6   :  { %4853 = vst.msk [vmem:[%s7442_s5 + $0x7] sm:$0x1] %vm4845_vm5, %v3271_v0 }
 0x2e7   :  { %v5497_v12 = vpop.f32.mrf.mxu0  ;;  %v5502_v22 = vpop.f32.mrf.mxu1 }
 0x2e9   :  { %v3274_v38 = vpop.f32.mrf.mxu1  ;;  %v3320_v62 = vpop.f32.mrf.mxu0 }
 0x2ea   :  { %4854 = vst.msk [vmem:[%s7442_s5 + $0x8] sm:$0x1] %vm4845_vm5, %v3320_v62 }
 0x2eb   :  { %v5503_v8 = vpop.f32.mrf.mxu1  ;;  %v5508_v11 = vpop.f32.mrf.mxu0 }
 0x2ed   :  { %v3323_v40 = vpop.f32.mrf.mxu0  ;;  %v3369_v61 = vpop.f32.mrf.mxu1 }
 0x2ee   :  { %4855 = vst.msk [vmem:[%s7442_s5 + $0x9] sm:$0x1] %vm4845_vm5, %v3369_v61 }
 0x2ef   :  { %v5509_v5 = vpop.f32.mrf.mxu0  ;;  %v5514_v45 = vpop.f32.mrf.mxu1 }
 0x2f1   :  { %v3372_v7 = vpop.f32.mrf.mxu1  ;;  %v3418_v28 = vpop.f32.mrf.mxu0 }
 0x2f2   :  { %4856 = vst.msk [vmem:[%s7442_s5 + $0xa] sm:$0x1] %vm4845_vm5, %v3418_v28 }
 0x2f3   :  { %v5515_v3 = vpop.f32.mrf.mxu1  ;;  %v5520_v25 = vpop.f32.mrf.mxu0 }
 0x2f5   :  { %v3421_v44 = vpop.f32.mrf.mxu0  ;;  %v3467_v46 = vpop.f32.mrf.mxu1 }
 0x2f6   :  { %4857 = vst.msk [vmem:[%s7442_s5 + $0xb] sm:$0x1] %vm4845_vm5, %v3467_v46 }
 0x2f7   :  { %v5521_v20 = vpop.f32.mrf.mxu0  ;;  %v5526_v18 = vpop.f32.mrf.mxu1 }
 0x2f9   :  { %v3470_v14 = vpop.f32.mrf.mxu1  ;;  %v3516_v53 = vpop.f32.mrf.mxu0 }
 0x2fa   :  { %4858 = vst.msk [vmem:[%s7442_s5 + $0xc] sm:$0x1] %vm4845_vm5, %v3516_v53 }
 0x2fb   :  { %v5527_v10 = vpop.f32.mrf.mxu1  ;;  %v5532_v31 = vpop.f32.mrf.mxu0 }
 0x2fd   :  { %v3519_v49 = vpop.f32.mrf.mxu0  ;;  %v3565_v17 = vpop.f32.mrf.mxu1 }
 0x2fe   :  { %4859 = vst.msk [vmem:[%s7442_s5 + $0xd] sm:$0x1] %vm4845_vm5, %v3565_v17 }
 0x2ff   :  { %v5533_v41 = vpop.f32.mrf.mxu0  ;;  %v5538_v50 = vpop.f32.mrf.mxu1 }
 0x301   :  { %v3568_v29 = vpop.f32.mrf.mxu1  ;;  %v3614_v35 = vpop.f32.mrf.mxu0 }
 0x302   :  { %4860 = vst.msk [vmem:[%s7442_s5 + $0xe] sm:$0x1] %vm4845_vm5, %v3614_v35 }
 0x303   :  { %v5539_v60 = vpop.f32.mrf.mxu1  ;;  %v5544_v2 = vpop.f32.mrf.mxu0 }
 0x305   :  { %v3617_v36 = vpop.f32.mrf.mxu0  ;;  %v3663_v9 = vpop.f32.mrf.mxu1 }
 0x306   :  { %4861 = vst.msk [vmem:[%s7442_s5 + $0xf] sm:$0x1] %vm4845_vm5, %v3663_v9 }
 0x307   :  { %v5545_v27 = vpop.f32.mrf.mxu0  ;;  %v5550_v42 = vpop.f32.mrf.mxu1 }
 0x309   :  { %v3666_v23 = vpop.f32.mrf.mxu1  ;;  %v3712_v47 = vpop.f32.mrf.mxu0 }
 0x30a   :  { %4862 = vst.msk [vmem:[%s7442_s5 + $0x10] sm:$0x1] %vm4845_vm5, %v3712_v47 }
 0x30b   :  { %v5551_v54 = vpop.f32.mrf.mxu1  ;;  %v5556_v37 = vpop.f32.mrf.mxu0 }
 0x30d   :  { %v3715_v4 = vpop.f32.mrf.mxu0  ;;  %v3761_v21 = vpop.f32.mrf.mxu1 }
 0x30e   :  { %4863 = vst.msk [vmem:[%s7442_s5 + $0x11] sm:$0x1] %vm4845_vm5, %v3761_v21 }
 0x30f   :  { %v5557_v24 = vpop.f32.mrf.mxu0  ;;  %v5562_v26 = vpop.f32.mrf.mxu1 }
 0x311   :  { %v3764_v63 = vpop.f32.mrf.mxu1  ;;  %v3810_v58 = vpop.f32.mrf.mxu0 }
 0x312   :  { %4864 = vst.msk [vmem:[%s7442_s5 + $0x12] sm:$0x1] %vm4845_vm5, %v3810_v58 }
 0x313   :  { %v5563_v13 = vpop.f32.mrf.mxu1  ;;  %v5568_v59 = vpop.f32.mrf.mxu0 }
 0x315   :  { %v3813_v52 = vpop.f32.mrf.mxu0  ;;  %v3859_v16 = vpop.f32.mrf.mxu1 }
 0x316   :  { %4865 = vst.msk [vmem:[%s7442_s5 + $0x13] sm:$0x1] %vm4845_vm5, %v3859_v16 }
 0x317   :  { %v5569_v32 = vpop.f32.mrf.mxu0  ;;  %v5574_v57 = vpop.f32.mrf.mxu1 }
 0x319   :  { %v3862_v43 = vpop.f32.mrf.mxu1  ;;  %v3908_v55 = vpop.f32.mrf.mxu0 }
 0x31a   :  { %4866 = vst.msk [vmem:[%s7442_s5 + $0x14] sm:$0x1] %vm4845_vm5, %v3908_v55 }
 0x31b   :  { %v5575_v6 = vpop.f32.mrf.mxu1  ;;  %v5580_v48 = vpop.f32.mrf.mxu0 }
 0x31d   :  { %v3911_v34 = vpop.f32.mrf.mxu0  ;;  %v3957_v30 = vpop.f32.mrf.mxu1 }
 0x31e   :  { %4867 = vst.msk [vmem:[%s7442_s5 + $0x15] sm:$0x1] %vm4845_vm5, %v3957_v30 }
 0x31f   :  { %v5581_v33 = vpop.f32.mrf.mxu0  ;;  %v5586_v56 = vpop.f32.mrf.mxu1 }
 0x321   :  { %v3960_v1 = vpop.f32.mrf.mxu1  ;;  %v4006_v51 = vpop.f32.mrf.mxu0 }
 0x322   :  { %4868 = vst.msk [vmem:[%s7442_s5 + $0x16] sm:$0x1] %vm4845_vm5, %v4006_v51 }
 0x323   :  { %v5587_v39 = vpop.f32.mrf.mxu1  ;;  %v5592_v19 = vpop.f32.mrf.mxu0 }
 0x325   :  { %v4009_v15 = vpop.f32.mrf.mxu0  ;;  %v4055_v0 = vpop.f32.mrf.mxu1 }
 0x326   :  { %4869 = vst.msk [vmem:[%s7442_s5 + $0x17] sm:$0x1] %vm4845_vm5, %v4055_v0 }
 0x327   :  { %v5593_v12 = vpop.f32.mrf.mxu0  ;;  %v5598_v22 = vpop.f32.mrf.mxu1 }
 0x329   :  { %v4058_v38 = vpop.f32.mrf.mxu1 }
 0x32b   :  { %v5599_v62 = vpop.f32.mrf.mxu1 }
 0x369   :  { %v4104_v8 = vpop.f32.mrf.mxu0 }
 0x36a   :  { %4870 = vst.msk [vmem:[%s7442_s5 + $0x18] sm:$0x1] %vm4845_vm5, %v4104_v8 }
 0x36b   :  { %v5604_v11 = vpop.f32.mrf.mxu0 }
 0x36d   :  { %v4107_v40 = vpop.f32.mrf.mxu0  ;;  %v4153_v61 = vpop.f32.mrf.mxu1 }
 0x36e   :  { %4871 = vst.msk [vmem:[%s7442_s5 + $0x19] sm:$0x1] %vm4845_vm5, %v4153_v61 }
 0x36f   :  { %v5605_v5 = vpop.f32.mrf.mxu0  ;;  %v5610_v45 = vpop.f32.mrf.mxu1 }
 0x371   :  { %v4156_v7 = vpop.f32.mrf.mxu1  ;;  %v4202_v28 = vpop.f32.mrf.mxu0 }
 0x372   :  { %4872 = vst.msk [vmem:[%s7442_s5 + $0x1a] sm:$0x1] %vm4845_vm5, %v4202_v28 }
 0x373   :  { %v5611_v3 = vpop.f32.mrf.mxu1  ;;  %v5616_v25 = vpop.f32.mrf.mxu0 }
 0x375   :  { %v4205_v44 = vpop.f32.mrf.mxu0  ;;  %v4251_v46 = vpop.f32.mrf.mxu1 }
 0x376   :  { %4873 = vst.msk [vmem:[%s7442_s5 + $0x1b] sm:$0x1] %vm4845_vm5, %v4251_v46 }
 0x377   :  { %v5617_v20 = vpop.f32.mrf.mxu0  ;;  %v5622_v18 = vpop.f32.mrf.mxu1 }
 0x379   :  { %v4254_v14 = vpop.f32.mrf.mxu1  ;;  %v4300_v53 = vpop.f32.mrf.mxu0 }
 0x37a   :  { %4874 = vst.msk [vmem:[%s7442_s5 + $0x1c] sm:$0x1] %vm4845_vm5, %v4300_v53 }
 0x37b   :  { %v5623_v10 = vpop.f32.mrf.mxu1  ;;  %v5628_v31 = vpop.f32.mrf.mxu0 }
 0x37d   :  { %v4303_v49 = vpop.f32.mrf.mxu0  ;;  %v4349_v17 = vpop.f32.mrf.mxu1 }
 0x37e   :  { %4875 = vst.msk [vmem:[%s7442_s5 + $0x1d] sm:$0x1] %vm4845_vm5, %v4349_v17 }
 0x37f   :  { %v5629_v41 = vpop.f32.mrf.mxu0  ;;  %v5634_v50 = vpop.f32.mrf.mxu1 }
 0x381   :  { %v4352_v29 = vpop.f32.mrf.mxu1  ;;  %v4398_v35 = vpop.f32.mrf.mxu0 }
 0x382   :  { %4876 = vst.msk [vmem:[%s7442_s5 + $0x1e] sm:$0x1] %vm4845_vm5, %v4398_v35 }
 0x383   :  { %v5635_v60 = vpop.f32.mrf.mxu1  ;;  %v5640_v2 = vpop.f32.mrf.mxu0 }
 0x385   :  { %v4401_v36 = vpop.f32.mrf.mxu0  ;;  %v4447_v9 = vpop.f32.mrf.mxu1 }
 0x386   :  { %4877 = vst.msk [vmem:[%s7442_s5 + $0x1f] sm:$0x1] %vm4845_vm5, %v4447_v9 }
 0x387   :  { %v5641_v27 = vpop.f32.mrf.mxu0  ;;  %v5646_v42 = vpop.f32.mrf.mxu1 }
 0x389   :  { %v4450_v23 = vpop.f32.mrf.mxu1  ;;  %v4496_v47 = vpop.f32.mrf.mxu0 }
 0x38a   :  { %4878 = vst.msk [vmem:[%s7442_s5 + $0x20] sm:$0x1] %vm4845_vm5, %v4496_v47 }
 0x38b   :  { %v5647_v54 = vpop.f32.mrf.mxu1  ;;  %v5652_v37 = vpop.f32.mrf.mxu0 }
 0x38d   :  { %v4499_v4 = vpop.f32.mrf.mxu0  ;;  %v4545_v21 = vpop.f32.mrf.mxu1 }
 0x38e   :  { %4879 = vst.msk [vmem:[%s7442_s5 + $0x21] sm:$0x1] %vm4845_vm5, %v4545_v21 }
 0x38f   :  { %v5653_v24 = vpop.f32.mrf.mxu0  ;;  %v5658_v26 = vpop.f32.mrf.mxu1 }
 0x391   :  { %v4548_v63 = vpop.f32.mrf.mxu1  ;;  %v4594_v58 = vpop.f32.mrf.mxu0 }
 0x392   :  { %4880 = vst.msk [vmem:[%s7442_s5 + $0x22] sm:$0x1] %vm4845_vm5, %v4594_v58 }
 0x393   :  { %v5659_v13 = vpop.f32.mrf.mxu1  ;;  %v5664_v59 = vpop.f32.mrf.mxu0 }
 0x395   :  { %v4597_v52 = vpop.f32.mrf.mxu0  ;;  %v4643_v16 = vpop.f32.mrf.mxu1 }
 0x396   :  { %4881 = vst.msk [vmem:[%s7442_s5 + $0x23] sm:$0x1] %vm4845_vm5, %v4643_v16 }
 0x397   :  { %v5665_v32 = vpop.f32.mrf.mxu0  ;;  %v5670_v57 = vpop.f32.mrf.mxu1 }
 0x399   :  { %v4646_v43 = vpop.f32.mrf.mxu1  ;;  %v4692_v55 = vpop.f32.mrf.mxu0 }
 0x39a   :  { %4882 = vst.msk [vmem:[%s7442_s5 + $0x24] sm:$0x1] %vm4845_vm5, %v4692_v55 }
 0x39b   :  { %v5671_v6 = vpop.f32.mrf.mxu1  ;;  %v5676_v48 = vpop.f32.mrf.mxu0 }
 0x39d   :  { %v4695_v34 = vpop.f32.mrf.mxu0  ;;  %v4741_v30 = vpop.f32.mrf.mxu1 }
 0x39e   :  { %4883 = vst.msk [vmem:[%s7442_s5 + $0x25] sm:$0x1] %vm4845_vm5, %v4741_v30 }
 0x39f   :  { %v5677_v33 = vpop.f32.mrf.mxu0  ;;  %v5682_v56 = vpop.f32.mrf.mxu1 }
 0x3a1   :  { %v4744_v1 = vpop.f32.mrf.mxu1  ;;  %v4790_v51 = vpop.f32.mrf.mxu0 }
 0x3a2   :  { %4884 = vst.msk [vmem:[%s7442_s5 + $0x26] sm:$0x1] %vm4845_vm5, %v4790_v51 }
 0x3a3   :  { %v5683_v39 = vpop.f32.mrf.mxu1  ;;  %v5688_v19 = vpop.f32.mrf.mxu0 }
 0x3a5   :  { %v4839_v15 = vpop.f32.mrf.mxu1  ;;  %v4793_v0 = vpop.f32.mrf.mxu0 }
 0x3a6   :  { %4885 = vst.msk [vmem:[%s7442_s5 + $0x27] sm:$0x1] %vm4845_vm5, %v4839_v15 }
 0x3a7   :  { %v5694_v12 = vpop.f32.mrf.mxu1  ;;  %v5689_v22 = vpop.f32.mrf.mxu0 }
 0x3a9   :  { %v4842_v38 = vpop.f32.mrf.mxu1 }
 0x3ab   :  { %v5695_v62 = vpop.f32.mrf.mxu1 }

</bundles_post_ra>
